<compile_context>
chip_gen: v6e
topology: v6e:2x2x1
jax: 0.10.0
libtpu: 0.0.40
codegen_flags: <defaults>
</compile_context>

<pallas_src>
import math

import jax
import jax.numpy as jnp
import numpy as np
from jax.experimental import pallas as pl
from jax.experimental.pallas import tpu as pltpu


# ----------------------------------------------------------------------------
# Kernel
# ----------------------------------------------------------------------------
def make_decoder_kernel(u_steps, *, att_compute_dtype=jnp.float32,
                        use_mxu_awe=False):
    """Kernel processing `u_steps` consecutive timesteps per grid iteration.

    att_compute_dtype: f32 (v5e-safe default, closest to the PyTorch math) or
        bf16 (v6e/v7x: halves EUP load of the attention tanh).
    use_mxu_awe: use the MXU batched matvec for the attention-weighted
        encoding (only worthwhile when the number of regions N >= 128).
    """

    def lstm_update(gates, c_prev):
        # PyTorch LSTMCell gate order: i, f, g, o (elementwise math in f32).
        i, f, g, o = jnp.split(gates, 4, axis=1)
        c_new = jax.nn.sigmoid(f) * c_prev + jax.nn.sigmoid(i) * jnp.tanh(g)
        h_new = jax.nn.sigmoid(o) * jnp.tanh(c_new)
        return h_new, c_new

    def kernel(
        g1_ref,       # (U, Bb, 4D) f32   precomputed emb/img_mean/bias gate term
        img_ref,      # (Bb, N, F)  bf16  image features (sorted, padded)
        at1_ref,      # (Bb, N, A)  bf16  precomputed att1(image_features)+b_att1
        w1h2_ref,     # (D, 4D) bf16      top-down LSTM weight for h2 input
        w1hh_ref,     # (D, 4D) bf16      top-down LSTM recurrent weight
        wa2_ref,      # (D, A)  bf16
        ba2_ref,      # (1, A)  f32
        wa3_ref,      # (1, A)  f32
        ba3_ref,      # (1, 1)  f32
        w2awe_ref,    # (F, 4D) bf16      language LSTM weight for awe input
        w2h1_ref,     # (D, 4D) bf16      language LSTM weight for h1 input
        w2hh_ref,     # (D, 4D) bf16      language LSTM recurrent weight
        b2_ref,       # (1, 4D) f32
        h2_out_ref,   # (U, Bb, D) bf16 out: language-LSTM hidden states
        h1_s, c1_s, h2_s, c2_s,   # VMEM scratch (Bb, D) f32; persist over time
    ):
        # Zero the recurrent state at the first time block of each batch block.
        @pl.when(pl.program_id(1) == 0)
        def _init():
            h1_s[...] = jnp.zeros_like(h1_s)
            c1_s[...] = jnp.zeros_like(c1_s)
            h2_s[...] = jnp.zeros_like(h2_s)
            c2_s[...] = jnp.zeros_like(c2_s)

        def step(u, carry):
            h1, c1, h2, c2 = carry

            # ---- top-down attention LSTM ---------------------------------
            # gates = (emb@W_emb + mean@W_mean + b1)  [precomputed, streamed]
            #         + h2@W_h2 + h1@W_hh             [separate dots, no concat]
            gates1 = g1_ref[u]
            gates1 = gates1 + jnp.dot(h2.astype(jnp.bfloat16), w1h2_ref[...],
                                      preferred_element_type=jnp.float32)
            gates1 = gates1 + jnp.dot(h1.astype(jnp.bfloat16), w1hh_ref[...],
                                      preferred_element_type=jnp.float32)
            h1, c1 = lstm_update(gates1, c1)

            # ---- soft attention over the N image regions -----------------
            at2 = jnp.dot(h1.astype(jnp.bfloat16), wa2_ref[...],
                          preferred_element_type=jnp.float32) + ba2_ref[...]
            if att_compute_dtype == jnp.bfloat16:
                att = jnp.tanh(at1_ref[...] + at2[:, None, :].astype(jnp.bfloat16))
            else:
                att = jnp.tanh(at1_ref[...].astype(jnp.float32) + at2[:, None, :])
            at3 = jnp.sum(att.astype(jnp.float32) * wa3_ref[...], axis=2) \
                + ba3_ref[...]                                    # (Bb, N)
            m = jnp.max(at3, axis=1, keepdims=True)
            e = jnp.exp(at3 - m)
            alpha = e / jnp.sum(e, axis=1, keepdims=True)         # exact softmax

            if use_mxu_awe:
                awe = jnp.einsum(
                    "bqn,bnf->bqf", alpha[:, None, :].astype(jnp.bfloat16),
                    img_ref[...], preferred_element_type=jnp.float32)[:, 0, :]
            else:
                # small N: VPU multiply + sublane reduce (MXU stays free for gates)
                awe = jnp.sum(alpha[:, :, None] * img_ref[...].astype(jnp.float32),
                              axis=1)                             # (Bb, F)

            # ---- language LSTM: concat-free gate accumulation ------------
            gates2 = jnp.dot(awe.astype(jnp.bfloat16), w2awe_ref[...],
                             preferred_element_type=jnp.float32) + b2_ref[...]
            gates2 = gates2 + jnp.dot(h1.astype(jnp.bfloat16), w2h1_ref[...],
                                      preferred_element_type=jnp.float32)
            gates2 = gates2 + jnp.dot(h2.astype(jnp.bfloat16), w2hh_ref[...],
                                      preferred_element_type=jnp.float32)
            h2, c2 = lstm_update(gates2, c2)

            h2_out_ref[u] = h2.astype(h2_out_ref.dtype)           # bf16 writeback
            return (h1, c1, h2, c2)

        carry0 = (h1_s[...], c1_s[...], h2_s[...], c2_s[...])
        h1, c1, h2, c2 = jax.lax.fori_loop(0, u_steps, step, carry0, unroll=True)

        # carry LSTM state to the next grid step
        h1_s[...] = h1
        c1_s[...] = c1
        h2_s[...] = h2
        c2_s[...] = c2

    return kernel


# ----------------------------------------------------------------------------
# Wrapper
# ----------------------------------------------------------------------------
def _round_up(x, m):
    return ((x + m - 1) // m) * m


def prepare_decoder_params(params):
    """One-time weight prep (bf16 casts) done outside the per-call path."""
    prep = dict(params)
    for name in ("w1_h2", "w1_hh", "w_att2", "w2_awe", "w2_h1", "w2_hh", "w_word"):
        prep[name + "_bf16"] = params[name].astype(jnp.bfloat16)
    return prep


def decoder_forward(params, image_features, encoded_captions, caption_lengths,
                    *, unroll=8, batch_blocks=1,
                    att_compute_dtype=jnp.float32):
    """Mirrors Decoder.forward (eval-mode: dropout = identity).

    image_features:   (B, N, F) float32
    encoded_captions: (B, T)    int32
    caption_lengths:  (B, 1)    int32
    returns (predictions (B, T_max, V), sorted captions, decode_lengths, sort_ind)
    """
    B, N, F = image_features.shape
    T = encoded_captions.shape[1]
    E = params["embedding"].shape[1]
    D = params["w1_hh"].shape[0]
    G = 4 * D
    V = params["w_word"].shape[1]
    A = params["w_att1"].shape[1]

    def bf16(name):  # prefer cached bf16 copies from prepare_decoder_params
        return params.get(name + "_bf16", params[name].astype(jnp.bfloat16))

    # ---- plain-JAX glue: sort (descending length), gather ----------------
    cap_len = caption_lengths[:, 0]
    sort_ind = jnp.argsort(-cap_len)                    # descending
    cap_len_sorted = cap_len[sort_ind]
    image_features = image_features[sort_ind]
    encoded_captions = encoded_captions[sort_ind]
    decode_lengths = cap_len_sorted - 1

    # TODO(synk): host sync for T_max mirrors PyTorch max(decode_lengths);
    # T_pad bucketing below bounds recompiles to ~T/unroll distinct variants.
    T_max = int(np.asarray(jax.device_get(jnp.max(decode_lengths))))

    U = max(1, int(unroll))                 # timesteps unrolled per grid step
    T_pad = _round_up(max(T_max, 1), U)     # bucketed time extent
    n_steps = T_pad // U

    # ---- batch padding / alignment (sublane >= 8; padded rows masked off) --
    B_pad = _round_up(max(B, 8), 8)
    if batch_blocks > 1 and B_pad % (batch_blocks * 16) == 0:
        n_b = batch_blocks                  # e.g. 2 on v7x to use both TCs
    else:
        n_b = 1
    Bb = B_pad // n_b

    pad_b = B_pad - B
    img_p = jnp.pad(image_features, ((0, pad_b), (0, 0), (0, 0)))
    caps_p = jnp.pad(encoded_captions, ((0, pad_b), (0, 0)))
    img_mean_p = jnp.mean(img_p, axis=1)                              # (B_pad, F)

    # ---- hoisted time-invariant precompute (outside the recurrence) -------
    # attention image projection (bf16 to halve VMEM residency)
    at1_pre = (jnp.einsum("bnf,fa->bna", img_p, params["w_att1"])
               + params["b_att1"]).astype(jnp.bfloat16)               # (B_pad,N,A)

    # input-side gate term of the top-down LSTM: emb@W_emb + mean@W_mean + b1,
    # computed as one large matmul over the whole (padded) sequence.
    emb_p = params["embedding"][caps_p]                               # (B_pad,T,E)
    emb_seq = jnp.transpose(emb_p, (1, 0, 2))                         # (T,B_pad,E)
    if T_pad <= T:
        emb_seq = emb_seq[:T_pad]
    else:
        emb_seq = jnp.pad(emb_seq, ((0, T_pad - T), (0, 0), (0, 0)))
    g1_bias = img_mean_p @ params["w1_mean"] + params["b1"]           # (B_pad, 4D)
    g1_pre = (jnp.einsum("tbe,eg->tbg", emb_seq, params["w1_emb"])
              + g1_bias[None]).astype(jnp.float32)                    # (T_pad,B_pad,4D)

    img_bf16 = img_p.astype(jnp.bfloat16)

    kernel_inputs = (
        g1_pre, img_bf16, at1_pre,
        bf16("w1_h2"), bf16("w1_hh"),
        bf16("w_att2"), params["b_att2"], params["w_att3"], params["b_att3"],
        bf16("w2_awe"), bf16("w2_h1"), bf16("w2_hh"), params["b2"],
    )

    def _const_spec(x):
        # Time-invariant operand, resident in VMEM for the whole grid.
        # NOTE(v7x): add pipeline_mode=pl.Buffered(1) here to single-buffer
        # these operands when the 64 MiB VMEM budget is tight.
        nd = x.ndim
        return pl.BlockSpec(x.shape, lambda b, s, _nd=nd: (0,) * _nd)

    in_specs = (
        [pl.BlockSpec((U, Bb, G), lambda b, s: (s, b, 0)),     # streamed g1_pre
         pl.BlockSpec((Bb, N, F), lambda b, s: (b, 0, 0)),     # per-batch-block img
         pl.BlockSpec((Bb, N, A), lambda b, s: (b, 0, 0))]     # per-batch-block at1
        + [_const_spec(x) for x in kernel_inputs[3:]]
    )
    out_spec = pl.BlockSpec((U, Bb, D), lambda b, s: (s, b, 0))

    # Explicit VMEM budget (pipeline double-buffers operands by default).
    const_bytes = sum(int(np.prod(x.shape)) * x.dtype.itemsize
                      for x in kernel_inputs[1:])
    block_bytes = U * Bb * G * 4 + U * Bb * D * 2
    scratch_bytes = 4 * Bb * D * 4
    vmem_est = 2 * (const_bytes + block_bytes) + scratch_bytes
    vmem_limit = int(min(max(2 * vmem_est + (4 << 20), 32 << 20), 128 << 20))

    h2_seq = pl.pallas_call(
        make_decoder_kernel(U, att_compute_dtype=att_compute_dtype,
                            use_mxu_awe=(N >= 128)),
        out_shape=jax.ShapeDtypeStruct((T_pad, B_pad, D), jnp.bfloat16),
        grid_spec=pltpu.PrefetchScalarGridSpec(
            num_scalar_prefetch=0,
            grid=(n_b, n_steps),
            in_specs=in_specs,
            out_specs=out_spec,
            scratch_shapes=[pltpu.VMEM((Bb, D), jnp.float32)] * 4,
        ),
        compiler_params=pltpu.CompilerParams(
            dimension_semantics=("parallel", "arbitrary"),  # batch || , time seq
            vmem_limit_bytes=vmem_limit,
        ),
    )(*kernel_inputs)

    # ---- vocab head: one big bf16 (T*B, D) x (D, V) matmul, then mask -----
    logits = jnp.dot(h2_seq.reshape(T_pad * B_pad, D), bf16("w_word"),
                     preferred_element_type=jnp.float32) + params["b_word"]
    logits = logits.reshape(T_pad, B_pad, V)
    preds = jnp.transpose(logits, (1, 0, 2))[:B, :T_max]              # (B, T_max, V)
    valid = jnp.arange(T_max)[None, :] < decode_lengths[:, None]      # (B, T_max)
    predictions = jnp.where(valid[:, :, None], preds, 0.0).astype(jnp.float32)

    return predictions, encoded_captions, decode_lengths, sort_ind


# ----------------------------------------------------------------------------
# Deterministic parameter init (synthetic; no checkpoint loading)
# ----------------------------------------------------------------------------
def init_params(key, attention_dim, embed_dim, decoder_dim, vocab_size, features_dim):
    A, E, D, V, F = attention_dim, embed_dim, decoder_dim, vocab_size, features_dim
    keys = iter(jax.random.split(key, 32))

    def u(shape, scale):
        return jax.random.uniform(next(keys), shape, jnp.float32, -scale, scale)

    s_lstm = 1.0 / math.sqrt(D)
    p = {}
    p["embedding"] = u((V, E), 0.1)
    # top-down attention LSTM; input = cat([h2(D), img_mean(F), emb(E)])
    p["w1_h2"] = u((D, 4 * D), s_lstm)
    p["w1_mean"] = u((F, 4 * D), s_lstm)
    p["w1_emb"] = u((E, 4 * D), s_lstm)
    p["w1_hh"] = u((D, 4 * D), s_lstm)
    p["b1"] = u((1, 4 * D), s_lstm)            # b_ih + b_hh folded together
    # attention MLP
    p["w_att1"] = u((F, A), 1.0 / math.sqrt(F))
    p["b_att1"] = u((1, A), 1.0 / math.sqrt(F))
    p["w_att2"] = u((D, A), 1.0 / math.sqrt(D))
    p["b_att2"] = u((1, A), 1.0 / math.sqrt(D))
    p["w_att3"] = u((1, A), 1.0 / math.sqrt(A))   # att3 weight, shape (out=1, in=A)
    p["b_att3"] = u((1, 1), 1.0 / math.sqrt(A))
    # language LSTM; input = cat([awe(F), h1(D)])
    p["w2_awe"] = u((F, 4 * D), s_lstm)
    p["w2_h1"] = u((D, 4 * D), s_lstm)
    p["w2_hh"] = u((D, 4 * D), s_lstm)
    p["b2"] = u((1, 4 * D), s_lstm)
    # word head (init_weights: uniform(-0.1, 0.1), bias = 0)
    p["w_word"] = u((D, V), 0.1)
    p["b_word"] = jnp.zeros((1, V), jnp.float32)
    return p


# ----------------------------------------------------------------------------
# Main
# ----------------------------------------------------------------------------
if __name__ == "__main__":
    # small shapes consistent with the forward pass
    B, N, FEAT = 2, 8, 64          # batch, num_pixels, features_dim
    ATT, EMB, DEC, VOCAB = 32, 16, 32, 64
    T = 8                          # max caption length

    root = jax.random.PRNGKey(0)
    k_img, k_cap, k_par = jax.random.split(root, 3)

    image_features = jax.random.normal(k_img, (B, N, FEAT), jnp.float32)
    encoded_captions = jax.random.randint(k_cap, (B, T), 0, VOCAB, jnp.int32)
    caption_lengths = jnp.array([[T], [T - 2]], dtype=jnp.int32)

    params = prepare_decoder_params(
        init_params(k_par, ATT, EMB, DEC, VOCAB, FEAT))

    preds, caps_sorted, dec_lens, sort_ind = decoder_forward(
        params, image_features, encoded_captions, caption_lengths, unroll=8)
    jax.block_until_ready(preds)

    # sanity checks
    preds_np = np.asarray(preds)
    dec_lens_np = np.asarray(dec_lens)
    assert preds_np.shape == (B, int(dec_lens_np.max()), VOCAB)
    assert np.all(np.isfinite(preds_np))
    for b in range(B):
        assert np.all(preds_np[b, dec_lens_np[b]:, :] == 0.0)

    print("KERNEL_OK")
</pallas_src>

<mosaic_0001>
module attributes {stable_mosaic.version = 11 : i64} {
  func.func @kernel(%arg0: i32, %arg1: i32, %arg2: memref<8x8x128xf32, #tpu.memory_space<vmem>>, %arg3: memref<8x8x64xbf16, #tpu.memory_space<vmem>>, %arg4: memref<8x8x32xbf16, #tpu.memory_space<vmem>>, %arg5: memref<32x128xbf16, #tpu.memory_space<vmem>>, %arg6: memref<32x128xbf16, #tpu.memory_space<vmem>>, %arg7: memref<32x32xbf16, #tpu.memory_space<vmem>>, %arg8: memref<1x32xf32, #tpu.memory_space<vmem>>, %arg9: memref<1x32xf32, #tpu.memory_space<vmem>>, %arg10: memref<1x1xf32, #tpu.memory_space<vmem>>, %arg11: memref<64x128xbf16, #tpu.memory_space<vmem>>, %arg12: memref<32x128xbf16, #tpu.memory_space<vmem>>, %arg13: memref<32x128xbf16, #tpu.memory_space<vmem>>, %arg14: memref<1x128xf32, #tpu.memory_space<vmem>>, %arg15: memref<8x8x32xbf16, #tpu.memory_space<vmem>>, %arg16: memref<8x32xf32, #tpu.memory_space<vmem>>, %arg17: memref<8x32xf32, #tpu.memory_space<vmem>>, %arg18: memref<8x32xf32, #tpu.memory_space<vmem>>, %arg19: memref<8x32xf32, #tpu.memory_space<vmem>>) attributes {dimension_semantics = [#tpu.dimension_semantics<parallel>, #tpu.dimension_semantics<arbitrary>], iteration_bounds = array<i64: 1, 1>, scalar_prefetch = 0 : i64, scratch_operands = 4 : i64, tpu.core_type = #tpu.core_type<tc>, window_params = [{transform_indices = @transform_0, window_bounds = array<i64: 8, 8, 128>}, {transform_indices = @transform_1, window_bounds = array<i64: 8, 8, 64>}, {transform_indices = @transform_2, window_bounds = array<i64: 8, 8, 32>}, {pipeline_mode = #tpu.pipeline_mode<synchronous>, transform_indices = @transform_3, window_bounds = array<i64: 32, 128>}, {pipeline_mode = #tpu.pipeline_mode<synchronous>, transform_indices = @transform_4, window_bounds = array<i64: 32, 128>}, {pipeline_mode = #tpu.pipeline_mode<synchronous>, transform_indices = @transform_5, window_bounds = array<i64: 32, 32>}, {pipeline_mode = #tpu.pipeline_mode<synchronous>, transform_indices = @transform_6, window_bounds = array<i64: 1, 32>}, {pipeline_mode = #tpu.pipeline_mode<synchronous>, transform_indices = @transform_7, window_bounds = array<i64: 1, 32>}, {pipeline_mode = #tpu.pipeline_mode<synchronous>, transform_indices = @transform_8, window_bounds = array<i64: 1, 1>}, {pipeline_mode = #tpu.pipeline_mode<synchronous>, transform_indices = @transform_9, window_bounds = array<i64: 64, 128>}, {pipeline_mode = #tpu.pipeline_mode<synchronous>, transform_indices = @transform_10, window_bounds = array<i64: 32, 128>}, {pipeline_mode = #tpu.pipeline_mode<synchronous>, transform_indices = @transform_11, window_bounds = array<i64: 32, 128>}, {pipeline_mode = #tpu.pipeline_mode<synchronous>, transform_indices = @transform_12, window_bounds = array<i64: 1, 128>}, {transform_indices = @transform_13, window_bounds = array<i64: 8, 8, 32>}]} {
    %c0_i32 = arith.constant 0 : i32
    %0 = arith.cmpi eq, %arg1, %c0_i32 : i32
    %1 = arith.extui %0 : i1 to i32
    %c0_i32_0 = arith.constant 0 : i32
    %2 = arith.cmpi ne, %1, %c0_i32_0 : i32
    scf.if %2 {
      %cst_384 = arith.constant 0.000000e+00 : f32
      %931 = vector.broadcast %cst_384 : f32 to vector<8x32xf32>
      %c0_385 = arith.constant 0 : index
      %c0_386 = arith.constant 0 : index
      %932 = vector.load %arg16[%c0_385, %c0_386] : memref<8x32xf32, #tpu.memory_space<vmem>>, vector<8x32xf32>
      tpu.vector_store %arg16[%c0_385, %c0_386], %931 {strides = array<i32>} : memref<8x32xf32, #tpu.memory_space<vmem>>, vector<8x32xf32>,
      %cst_387 = arith.constant 0.000000e+00 : f32
      %933 = vector.broadcast %cst_387 : f32 to vector<8x32xf32>
      %c0_388 = arith.constant 0 : index
      %c0_389 = arith.constant 0 : index
      %934 = vector.load %arg17[%c0_388, %c0_389] : memref<8x32xf32, #tpu.memory_space<vmem>>, vector<8x32xf32>
      tpu.vector_store %arg17[%c0_388, %c0_389], %933 {strides = array<i32>} : memref<8x32xf32, #tpu.memory_space<vmem>>, vector<8x32xf32>,
      %cst_390 = arith.constant 0.000000e+00 : f32
      %935 = vector.broadcast %cst_390 : f32 to vector<8x32xf32>
      %c0_391 = arith.constant 0 : index
      %c0_392 = arith.constant 0 : index
      %936 = vector.load %arg18[%c0_391, %c0_392] : memref<8x32xf32, #tpu.memory_space<vmem>>, vector<8x32xf32>
      tpu.vector_store %arg18[%c0_391, %c0_392], %935 {strides = array<i32>} : memref<8x32xf32, #tpu.memory_space<vmem>>, vector<8x32xf32>,
      %cst_393 = arith.constant 0.000000e+00 : f32
      %937 = vector.broadcast %cst_393 : f32 to vector<8x32xf32>
      %c0_394 = arith.constant 0 : index
      %c0_395 = arith.constant 0 : index
      %938 = vector.load %arg19[%c0_394, %c0_395] : memref<8x32xf32, #tpu.memory_space<vmem>>, vector<8x32xf32>
      tpu.vector_store %arg19[%c0_394, %c0_395], %937 {strides = array<i32>} : memref<8x32xf32, #tpu.memory_space<vmem>>, vector<8x32xf32>,
    } else {
    }
    %c0 = arith.constant 0 : index
    %c0_1 = arith.constant 0 : index
    %3 = vector.load %arg16[%c0, %c0_1] : memref<8x32xf32, #tpu.memory_space<vmem>>, vector<8x32xf32>
    %c0_2 = arith.constant 0 : index
    %c0_3 = arith.constant 0 : index
    %4 = vector.load %arg17[%c0_2, %c0_3] : memref<8x32xf32, #tpu.memory_space<vmem>>, vector<8x32xf32>
    %c0_4 = arith.constant 0 : index
    %c0_5 = arith.constant 0 : index
    %5 = vector.load %arg18[%c0_4, %c0_5] : memref<8x32xf32, #tpu.memory_space<vmem>>, vector<8x32xf32>
    %c0_6 = arith.constant 0 : index
    %c0_7 = arith.constant 0 : index
    %6 = vector.load %arg19[%c0_6, %c0_7] : memref<8x32xf32, #tpu.memory_space<vmem>>, vector<8x32xf32>
    %c0_i32_8 = arith.constant 0 : i32
    %7 = arith.index_cast %c0_i32_8 : i32 to index
    %c0_9 = arith.constant 0 : index
    %c0_10 = arith.constant 0 : index
    %8 = vector.load %arg2[%7, %c0_9, %c0_10] : memref<8x8x128xf32, #tpu.memory_space<vmem>>, vector<1x8x128xf32>
    %9 = vector.shape_cast %8 : vector<1x8x128xf32> to vector<8x128xf32>
    %10 = arith.truncf %5 : vector<8x32xf32> to vector<8x32xbf16>
    %c0_11 = arith.constant 0 : index
    %c0_12 = arith.constant 0 : index
    %11 = vector.load %arg5[%c0_11, %c0_12] : memref<32x128xbf16, #tpu.memory_space<vmem>>, vector<32x128xbf16>
    %cst = arith.constant dense<0.000000e+00> : vector<8x128xf32>
    %12 = tpu.matmul %10, %11, %cst {dimension_numbers = #tpu.dot_dimension_numbers<[1], [0], [0], [1], [0, 0, 1, 1], [], []>} : vector<8x32xbf16>, vector<32x128xbf16>, vector<8x128xf32> -> vector<8x128xf32>
    %13 = arith.addf %9, %12 : vector<8x128xf32>
    %14 = arith.truncf %3 : vector<8x32xf32> to vector<8x32xbf16>
    %c0_13 = arith.constant 0 : index
    %c0_14 = arith.constant 0 : index
    %15 = vector.load %arg6[%c0_13, %c0_14] : memref<32x128xbf16, #tpu.memory_space<vmem>>, vector<32x128xbf16>
    %cst_15 = arith.constant dense<0.000000e+00> : vector<8x128xf32>
    %16 = tpu.matmul %14, %15, %cst_15 {dimension_numbers = #tpu.dot_dimension_numbers<[1], [0], [0], [1], [0, 0, 1, 1], [], []>} : vector<8x32xbf16>, vector<32x128xbf16>, vector<8x128xf32> -> vector<8x128xf32>
    %17 = arith.addf %13, %16 : vector<8x128xf32>
    %18 = vector.extract_strided_slice %17 {offsets = [0, 0], sizes = [8, 32], strides = [1, 1]} : vector<8x128xf32> to vector<8x32xf32>
    %19 = vector.extract_strided_slice %17 {offsets = [0, 32], sizes = [8, 32], strides = [1, 1]} : vector<8x128xf32> to vector<8x32xf32>
    %20 = vector.extract_strided_slice %17 {offsets = [0, 64], sizes = [8, 32], strides = [1, 1]} : vector<8x128xf32> to vector<8x32xf32>
    %21 = vector.extract_strided_slice %17 {offsets = [0, 96], sizes = [8, 32], strides = [1, 1]} : vector<8x128xf32> to vector<8x32xf32>
    %22 = arith.negf %19 : vector<8x32xf32>
    %23 = math.exp %22 : vector<8x32xf32>
    %cst_16 = arith.constant 1.000000e+00 : f32
    %24 = vector.broadcast %cst_16 : f32 to vector<8x32xf32>
    %25 = arith.addf %24, %23 : vector<8x32xf32>
    %26 = arith.divf %24, %25 : vector<8x32xf32>
    %27 = arith.mulf %26, %4 : vector<8x32xf32>
    %28 = arith.negf %18 : vector<8x32xf32>
    %29 = math.exp %28 : vector<8x32xf32>
    %cst_17 = arith.constant 1.000000e+00 : f32
    %30 = vector.broadcast %cst_17 : f32 to vector<8x32xf32>
    %31 = arith.addf %30, %29 : vector<8x32xf32>
    %32 = arith.divf %30, %31 : vector<8x32xf32>
    %33 = math.tanh %20 : vector<8x32xf32>
    %34 = arith.mulf %32, %33 : vector<8x32xf32>
    %35 = arith.addf %27, %34 : vector<8x32xf32>
    %36 = arith.negf %21 : vector<8x32xf32>
    %37 = math.exp %36 : vector<8x32xf32>
    %cst_18 = arith.constant 1.000000e+00 : f32
    %38 = vector.broadcast %cst_18 : f32 to vector<8x32xf32>
    %39 = arith.addf %38, %37 : vector<8x32xf32>
    %40 = arith.divf %38, %39 : vector<8x32xf32>
    %41 = math.tanh %35 : vector<8x32xf32>
    %42 = arith.mulf %40, %41 : vector<8x32xf32>
    %43 = arith.truncf %42 : vector<8x32xf32> to vector<8x32xbf16>
    %c0_19 = arith.constant 0 : index
    %c0_20 = arith.constant 0 : index
    %44 = vector.load %arg7[%c0_19, %c0_20] : memref<32x32xbf16, #tpu.memory_space<vmem>>, vector<32x32xbf16>
    %cst_21 = arith.constant dense<0.000000e+00> : vector<8x32xf32>
    %45 = tpu.matmul %43, %44, %cst_21 {dimension_numbers = #tpu.dot_dimension_numbers<[1], [0], [0], [1], [0, 0, 1, 1], [], []>} : vector<8x32xbf16>, vector<32x32xbf16>, vector<8x32xf32> -> vector<8x32xf32>
    %c0_22 = arith.constant 0 : index
    %c0_23 = arith.constant 0 : index
    %46 = vector.load %arg8[%c0_22, %c0_23] : memref<1x32xf32, #tpu.memory_space<vmem>>, vector<1x32xf32>
    %47 = vector.broadcast %46 : vector<1x32xf32> to vector<8x32xf32>
    %48 = arith.addf %45, %47 : vector<8x32xf32>
    %c0_24 = arith.constant 0 : index
    %c0_25 = arith.constant 0 : index
    %c0_26 = arith.constant 0 : index
    %49 = vector.load %arg4[%c0_24, %c0_25, %c0_26] : memref<8x8x32xbf16, #tpu.memory_space<vmem>>, vector<8x8x32xbf16>
    %50 = arith.extf %49 : vector<8x8x32xbf16> to vector<8x8x32xf32>
    %51 = vector.shape_cast %48 : vector<8x32xf32> to vector<8x1x32xf32>
    %52 = vector.broadcast %51 : vector<8x1x32xf32> to vector<8x8x32xf32>
    %53 = arith.addf %50, %52 : vector<8x8x32xf32>
    %54 = math.tanh %53 : vector<8x8x32xf32>
    %c0_27 = arith.constant 0 : index
    %c0_28 = arith.constant 0 : index
    %55 = vector.load %arg9[%c0_27, %c0_28] : memref<1x32xf32, #tpu.memory_space<vmem>>, vector<1x32xf32>
    %56 = vector.shape_cast %55 : vector<1x32xf32> to vector<1x1x32xf32>
    %57 = vector.broadcast %56 : vector<1x1x32xf32> to vector<8x8x32xf32>
    %58 = arith.mulf %54, %57 : vector<8x8x32xf32>
    %cst_29 = arith.constant dense<0.000000e+00> : vector<8x8xf32>
    %59 = vector.multi_reduction <add>, %58, %cst_29 [2] : vector<8x8x32xf32> to vector<8x8xf32>
    %c0_30 = arith.constant 0 : index
    %c0_31 = arith.constant 0 : index
    %60 = vector.load %arg10[%c0_30, %c0_31] : memref<1x1xf32, #tpu.memory_space<vmem>>, vector<1x1xf32>
    %61 = vector.broadcast %60 : vector<1x1xf32> to vector<8x8xf32>
    %62 = arith.addf %59, %61 : vector<8x8xf32>
    %cst_32 = arith.constant dense<0xFF800000> : vector<8xf32>
    %63 = vector.multi_reduction <maximumf>, %62, %cst_32 [1] : vector<8x8xf32> to vector<8xf32>
    %64 = vector.shape_cast %63 : vector<8xf32> to vector<8x1xf32>
    %65 = vector.broadcast %64 : vector<8x1xf32> to vector<8x8xf32>
    %66 = arith.subf %62, %65 : vector<8x8xf32>
    %67 = math.exp %66 : vector<8x8xf32>
    %cst_33 = arith.constant dense<0.000000e+00> : vector<8xf32>
    %68 = vector.multi_reduction <add>, %67, %cst_33 [1] : vector<8x8xf32> to vector<8xf32>
    %69 = vector.shape_cast %68 : vector<8xf32> to vector<8x1xf32>
    %70 = vector.broadcast %69 : vector<8x1xf32> to vector<8x8xf32>
    %71 = arith.divf %67, %70 : vector<8x8xf32>
    %72 = vector.shape_cast %71 : vector<8x8xf32> to vector<8x8x1xf32>
    %c0_34 = arith.constant 0 : index
    %c0_35 = arith.constant 0 : index
    %c0_36 = arith.constant 0 : index
    %73 = vector.load %arg3[%c0_34, %c0_35, %c0_36] : memref<8x8x64xbf16, #tpu.memory_space<vmem>>, vector<8x8x64xbf16>
    %74 = arith.extf %73 : vector<8x8x64xbf16> to vector<8x8x64xf32>
    %75 = vector.broadcast %72 : vector<8x8x1xf32> to vector<8x8x64xf32>
    %76 = arith.mulf %75, %74 : vector<8x8x64xf32>
    %cst_37 = arith.constant dense<0.000000e+00> : vector<8x64xf32>
    %77 = vector.multi_reduction <add>, %76, %cst_37 [1] : vector<8x8x64xf32> to vector<8x64xf32>
    %78 = arith.truncf %77 : vector<8x64xf32> to vector<8x64xbf16>
    %c0_38 = arith.constant 0 : index
    %c0_39 = arith.constant 0 : index
    %79 = vector.load %arg11[%c0_38, %c0_39] : memref<64x128xbf16, #tpu.memory_space<vmem>>, vector<64x128xbf16>
    %cst_40 = arith.constant dense<0.000000e+00> : vector<8x128xf32>
    %80 = tpu.matmul %78, %79, %cst_40 {dimension_numbers = #tpu.dot_dimension_numbers<[1], [0], [0], [1], [0, 0, 1, 1], [], []>} : vector<8x64xbf16>, vector<64x128xbf16>, vector<8x128xf32> -> vector<8x128xf32>
    %c0_41 = arith.constant 0 : index
    %c0_42 = arith.constant 0 : index
    %81 = vector.load %arg14[%c0_41, %c0_42] : memref<1x128xf32, #tpu.memory_space<vmem>>, vector<1x128xf32>
    %82 = vector.broadcast %81 : vector<1x128xf32> to vector<8x128xf32>
    %83 = arith.addf %80, %82 : vector<8x128xf32>
    %84 = arith.truncf %42 : vector<8x32xf32> to vector<8x32xbf16>
    %c0_43 = arith.constant 0 : index
    %c0_44 = arith.constant 0 : index
    %85 = vector.load %arg12[%c0_43, %c0_44] : memref<32x128xbf16, #tpu.memory_space<vmem>>, vector<32x128xbf16>
    %cst_45 = arith.constant dense<0.000000e+00> : vector<8x128xf32>
    %86 = tpu.matmul %84, %85, %cst_45 {dimension_numbers = #tpu.dot_dimension_numbers<[1], [0], [0], [1], [0, 0, 1, 1], [], []>} : vector<8x32xbf16>, vector<32x128xbf16>, vector<8x128xf32> -> vector<8x128xf32>
    %87 = arith.addf %83, %86 : vector<8x128xf32>
    %88 = arith.truncf %5 : vector<8x32xf32> to vector<8x32xbf16>
    %c0_46 = arith.constant 0 : index
    %c0_47 = arith.constant 0 : index
    %89 = vector.load %arg13[%c0_46, %c0_47] : memref<32x128xbf16, #tpu.memory_space<vmem>>, vector<32x128xbf16>
    %cst_48 = arith.constant dense<0.000000e+00> : vector<8x128xf32>
    %90 = tpu.matmul %88, %89, %cst_48 {dimension_numbers = #tpu.dot_dimension_numbers<[1], [0], [0], [1], [0, 0, 1, 1], [], []>} : vector<8x32xbf16>, vector<32x128xbf16>, vector<8x128xf32> -> vector<8x128xf32>
    %91 = arith.addf %87, %90 : vector<8x128xf32>
    %92 = vector.extract_strided_slice %91 {offsets = [0, 0], sizes = [8, 32], strides = [1, 1]} : vector<8x128xf32> to vector<8x32xf32>
    %93 = vector.extract_strided_slice %91 {offsets = [0, 32], sizes = [8, 32], strides = [1, 1]} : vector<8x128xf32> to vector<8x32xf32>
    %94 = vector.extract_strided_slice %91 {offsets = [0, 64], sizes = [8, 32], strides = [1, 1]} : vector<8x128xf32> to vector<8x32xf32>
    %95 = vector.extract_strided_slice %91 {offsets = [0, 96], sizes = [8, 32], strides = [1, 1]} : vector<8x128xf32> to vector<8x32xf32>
    %96 = arith.negf %93 : vector<8x32xf32>
    %97 = math.exp %96 : vector<8x32xf32>
    %cst_49 = arith.constant 1.000000e+00 : f32
    %98 = vector.broadcast %cst_49 : f32 to vector<8x32xf32>
    %99 = arith.addf %98, %97 : vector<8x32xf32>
    %100 = arith.divf %98, %99 : vector<8x32xf32>
    %101 = arith.mulf %100, %6 : vector<8x32xf32>
    %102 = arith.negf %92 : vector<8x32xf32>
    %103 = math.exp %102 : vector<8x32xf32>
    %cst_50 = arith.constant 1.000000e+00 : f32
    %104 = vector.broadcast %cst_50 : f32 to vector<8x32xf32>
    %105 = arith.addf %104, %103 : vector<8x32xf32>
    %106 = arith.divf %104, %105 : vector<8x32xf32>
    %107 = math.tanh %94 : vector<8x32xf32>
    %108 = arith.mulf %106, %107 : vector<8x32xf32>
    %109 = arith.addf %101, %108 : vector<8x32xf32>
    %110 = arith.negf %95 : vector<8x32xf32>
    %111 = math.exp %110 : vector<8x32xf32>
    %cst_51 = arith.constant 1.000000e+00 : f32
    %112 = vector.broadcast %cst_51 : f32 to vector<8x32xf32>
    %113 = arith.addf %112, %111 : vector<8x32xf32>
    %114 = arith.divf %112, %113 : vector<8x32xf32>
    %115 = math.tanh %109 : vector<8x32xf32>
    %116 = arith.mulf %114, %115 : vector<8x32xf32>
    %117 = arith.truncf %116 : vector<8x32xf32> to vector<8x32xbf16>
    %118 = arith.index_cast %c0_i32_8 : i32 to index
    %c0_52 = arith.constant 0 : index
    %c0_53 = arith.constant 0 : index
    %119 = vector.load %arg15[%118, %c0_52, %c0_53] : memref<8x8x32xbf16, #tpu.memory_space<vmem>>, vector<1x8x32xbf16>
    %120 = vector.shape_cast %119 : vector<1x8x32xbf16> to vector<8x32xbf16>
    %121 = vector.shape_cast %117 : vector<8x32xbf16> to vector<1x8x32xbf16>
    tpu.vector_store %arg15[%118, %c0_52, %c0_53], %121 {strides = array<i32>} : memref<8x8x32xbf16, #tpu.memory_space<vmem>>, vector<1x8x32xbf16>,
    %c1_i32 = arith.constant 1 : i32
    %122 = arith.index_cast %c1_i32 : i32 to index
    %c0_54 = arith.constant 0 : index
    %c0_55 = arith.constant 0 : index
    %123 = vector.load %arg2[%122, %c0_54, %c0_55] : memref<8x8x128xf32, #tpu.memory_space<vmem>>, vector<1x8x128xf32>
    %124 = vector.shape_cast %123 : vector<1x8x128xf32> to vector<8x128xf32>
    %125 = arith.truncf %116 : vector<8x32xf32> to vector<8x32xbf16>
    %c0_56 = arith.constant 0 : index
    %c0_57 = arith.constant 0 : index
    %126 = vector.load %arg5[%c0_56, %c0_57] : memref<32x128xbf16, #tpu.memory_space<vmem>>, vector<32x128xbf16>
    %cst_58 = arith.constant dense<0.000000e+00> : vector<8x128xf32>
    %127 = tpu.matmul %125, %126, %cst_58 {dimension_numbers = #tpu.dot_dimension_numbers<[1], [0], [0], [1], [0, 0, 1, 1], [], []>} : vector<8x32xbf16>, vector<32x128xbf16>, vector<8x128xf32> -> vector<8x128xf32>
    %128 = arith.addf %124, %127 : vector<8x128xf32>
    %129 = arith.truncf %42 : vector<8x32xf32> to vector<8x32xbf16>
    %c0_59 = arith.constant 0 : index
    %c0_60 = arith.constant 0 : index
    %130 = vector.load %arg6[%c0_59, %c0_60] : memref<32x128xbf16, #tpu.memory_space<vmem>>, vector<32x128xbf16>
    %cst_61 = arith.constant dense<0.000000e+00> : vector<8x128xf32>
    %131 = tpu.matmul %129, %130, %cst_61 {dimension_numbers = #tpu.dot_dimension_numbers<[1], [0], [0], [1], [0, 0, 1, 1], [], []>} : vector<8x32xbf16>, vector<32x128xbf16>, vector<8x128xf32> -> vector<8x128xf32>
    %132 = arith.addf %128, %131 : vector<8x128xf32>
    %133 = vector.extract_strided_slice %132 {offsets = [0, 0], sizes = [8, 32], strides = [1, 1]} : vector<8x128xf32> to vector<8x32xf32>
    %134 = vector.extract_strided_slice %132 {offsets = [0, 32], sizes = [8, 32], strides = [1, 1]} : vector<8x128xf32> to vector<8x32xf32>
    %135 = vector.extract_strided_slice %132 {offsets = [0, 64], sizes = [8, 32], strides = [1, 1]} : vector<8x128xf32> to vector<8x32xf32>
    %136 = vector.extract_strided_slice %132 {offsets = [0, 96], sizes = [8, 32], strides = [1, 1]} : vector<8x128xf32> to vector<8x32xf32>
    %137 = arith.negf %134 : vector<8x32xf32>
    %138 = math.exp %137 : vector<8x32xf32>
    %cst_62 = arith.constant 1.000000e+00 : f32
    %139 = vector.broadcast %cst_62 : f32 to vector<8x32xf32>
    %140 = arith.addf %139, %138 : vector<8x32xf32>
    %141 = arith.divf %139, %140 : vector<8x32xf32>
    %142 = arith.mulf %141, %35 : vector<8x32xf32>
    %143 = arith.negf %133 : vector<8x32xf32>
    %144 = math.exp %143 : vector<8x32xf32>
    %cst_63 = arith.constant 1.000000e+00 : f32
    %145 = vector.broadcast %cst_63 : f32 to vector<8x32xf32>
    %146 = arith.addf %145, %144 : vector<8x32xf32>
    %147 = arith.divf %145, %146 : vector<8x32xf32>
    %148 = math.tanh %135 : vector<8x32xf32>
    %149 = arith.mulf %147, %148 : vector<8x32xf32>
    %150 = arith.addf %142, %149 : vector<8x32xf32>
    %151 = arith.negf %136 : vector<8x32xf32>
    %152 = math.exp %151 : vector<8x32xf32>
    %cst_64 = arith.constant 1.000000e+00 : f32
    %153 = vector.broadcast %cst_64 : f32 to vector<8x32xf32>
    %154 = arith.addf %153, %152 : vector<8x32xf32>
    %155 = arith.divf %153, %154 : vector<8x32xf32>
    %156 = math.tanh %150 : vector<8x32xf32>
    %157 = arith.mulf %155, %156 : vector<8x32xf32>
    %158 = arith.truncf %157 : vector<8x32xf32> to vector<8x32xbf16>
    %c0_65 = arith.constant 0 : index
    %c0_66 = arith.constant 0 : index
    %159 = vector.load %arg7[%c0_65, %c0_66] : memref<32x32xbf16, #tpu.memory_space<vmem>>, vector<32x32xbf16>
    %cst_67 = arith.constant dense<0.000000e+00> : vector<8x32xf32>
    %160 = tpu.matmul %158, %159, %cst_67 {dimension_numbers = #tpu.dot_dimension_numbers<[1], [0], [0], [1], [0, 0, 1, 1], [], []>} : vector<8x32xbf16>, vector<32x32xbf16>, vector<8x32xf32> -> vector<8x32xf32>
    %c0_68 = arith.constant 0 : index
    %c0_69 = arith.constant 0 : index
    %161 = vector.load %arg8[%c0_68, %c0_69] : memref<1x32xf32, #tpu.memory_space<vmem>>, vector<1x32xf32>
    %162 = vector.broadcast %161 : vector<1x32xf32> to vector<8x32xf32>
    %163 = arith.addf %160, %162 : vector<8x32xf32>
    %c0_70 = arith.constant 0 : index
    %c0_71 = arith.constant 0 : index
    %c0_72 = arith.constant 0 : index
    %164 = vector.load %arg4[%c0_70, %c0_71, %c0_72] : memref<8x8x32xbf16, #tpu.memory_space<vmem>>, vector<8x8x32xbf16>
    %165 = arith.extf %164 : vector<8x8x32xbf16> to vector<8x8x32xf32>
    %166 = vector.shape_cast %163 : vector<8x32xf32> to vector<8x1x32xf32>
    %167 = vector.broadcast %166 : vector<8x1x32xf32> to vector<8x8x32xf32>
    %168 = arith.addf %165, %167 : vector<8x8x32xf32>
    %169 = math.tanh %168 : vector<8x8x32xf32>
    %c0_73 = arith.constant 0 : index
    %c0_74 = arith.constant 0 : index
    %170 = vector.load %arg9[%c0_73, %c0_74] : memref<1x32xf32, #tpu.memory_space<vmem>>, vector<1x32xf32>
    %171 = vector.shape_cast %170 : vector<1x32xf32> to vector<1x1x32xf32>
    %172 = vector.broadcast %171 : vector<1x1x32xf32> to vector<8x8x32xf32>
    %173 = arith.mulf %169, %172 : vector<8x8x32xf32>
    %cst_75 = arith.constant dense<0.000000e+00> : vector<8x8xf32>
    %174 = vector.multi_reduction <add>, %173, %cst_75 [2] : vector<8x8x32xf32> to vector<8x8xf32>
    %c0_76 = arith.constant 0 : index
    %c0_77 = arith.constant 0 : index
    %175 = vector.load %arg10[%c0_76, %c0_77] : memref<1x1xf32, #tpu.memory_space<vmem>>, vector<1x1xf32>
    %176 = vector.broadcast %175 : vector<1x1xf32> to vector<8x8xf32>
    %177 = arith.addf %174, %176 : vector<8x8xf32>
    %cst_78 = arith.constant dense<0xFF800000> : vector<8xf32>
    %178 = vector.multi_reduction <maximumf>, %177, %cst_78 [1] : vector<8x8xf32> to vector<8xf32>
    %179 = vector.shape_cast %178 : vector<8xf32> to vector<8x1xf32>
    %180 = vector.broadcast %179 : vector<8x1xf32> to vector<8x8xf32>
    %181 = arith.subf %177, %180 : vector<8x8xf32>
    %182 = math.exp %181 : vector<8x8xf32>
    %cst_79 = arith.constant dense<0.000000e+00> : vector<8xf32>
    %183 = vector.multi_reduction <add>, %182, %cst_79 [1] : vector<8x8xf32> to vector<8xf32>
    %184 = vector.shape_cast %183 : vector<8xf32> to vector<8x1xf32>
    %185 = vector.broadcast %184 : vector<8x1xf32> to vector<8x8xf32>
    %186 = arith.divf %182, %185 : vector<8x8xf32>
    %187 = vector.shape_cast %186 : vector<8x8xf32> to vector<8x8x1xf32>
    %c0_80 = arith.constant 0 : index
    %c0_81 = arith.constant 0 : index
    %c0_82 = arith.constant 0 : index
    %188 = vector.load %arg3[%c0_80, %c0_81, %c0_82] : memref<8x8x64xbf16, #tpu.memory_space<vmem>>, vector<8x8x64xbf16>
    %189 = arith.extf %188 : vector<8x8x64xbf16> to vector<8x8x64xf32>
    %190 = vector.broadcast %187 : vector<8x8x1xf32> to vector<8x8x64xf32>
    %191 = arith.mulf %190, %189 : vector<8x8x64xf32>
    %cst_83 = arith.constant dense<0.000000e+00> : vector<8x64xf32>
    %192 = vector.multi_reduction <add>, %191, %cst_83 [1] : vector<8x8x64xf32> to vector<8x64xf32>
    %193 = arith.truncf %192 : vector<8x64xf32> to vector<8x64xbf16>
    %c0_84 = arith.constant 0 : index
    %c0_85 = arith.constant 0 : index
    %194 = vector.load %arg11[%c0_84, %c0_85] : memref<64x128xbf16, #tpu.memory_space<vmem>>, vector<64x128xbf16>
    %cst_86 = arith.constant dense<0.000000e+00> : vector<8x128xf32>
    %195 = tpu.matmul %193, %194, %cst_86 {dimension_numbers = #tpu.dot_dimension_numbers<[1], [0], [0], [1], [0, 0, 1, 1], [], []>} : vector<8x64xbf16>, vector<64x128xbf16>, vector<8x128xf32> -> vector<8x128xf32>
    %c0_87 = arith.constant 0 : index
    %c0_88 = arith.constant 0 : index
    %196 = vector.load %arg14[%c0_87, %c0_88] : memref<1x128xf32, #tpu.memory_space<vmem>>, vector<1x128xf32>
    %197 = vector.broadcast %196 : vector<1x128xf32> to vector<8x128xf32>
    %198 = arith.addf %195, %197 : vector<8x128xf32>
    %199 = arith.truncf %157 : vector<8x32xf32> to vector<8x32xbf16>
    %c0_89 = arith.constant 0 : index
    %c0_90 = arith.constant 0 : index
    %200 = vector.load %arg12[%c0_89, %c0_90] : memref<32x128xbf16, #tpu.memory_space<vmem>>, vector<32x128xbf16>
    %cst_91 = arith.constant dense<0.000000e+00> : vector<8x128xf32>
    %201 = tpu.matmul %199, %200, %cst_91 {dimension_numbers = #tpu.dot_dimension_numbers<[1], [0], [0], [1], [0, 0, 1, 1], [], []>} : vector<8x32xbf16>, vector<32x128xbf16>, vector<8x128xf32> -> vector<8x128xf32>
    %202 = arith.addf %198, %201 : vector<8x128xf32>
    %203 = arith.truncf %116 : vector<8x32xf32> to vector<8x32xbf16>
    %c0_92 = arith.constant 0 : index
    %c0_93 = arith.constant 0 : index
    %204 = vector.load %arg13[%c0_92, %c0_93] : memref<32x128xbf16, #tpu.memory_space<vmem>>, vector<32x128xbf16>
    %cst_94 = arith.constant dense<0.000000e+00> : vector<8x128xf32>
    %205 = tpu.matmul %203, %204, %cst_94 {dimension_numbers = #tpu.dot_dimension_numbers<[1], [0], [0], [1], [0, 0, 1, 1], [], []>} : vector<8x32xbf16>, vector<32x128xbf16>, vector<8x128xf32> -> vector<8x128xf32>
    %206 = arith.addf %202, %205 : vector<8x128xf32>
    %207 = vector.extract_strided_slice %206 {offsets = [0, 0], sizes = [8, 32], strides = [1, 1]} : vector<8x128xf32> to vector<8x32xf32>
    %208 = vector.extract_strided_slice %206 {offsets = [0, 32], sizes = [8, 32], strides = [1, 1]} : vector<8x128xf32> to vector<8x32xf32>
    %209 = vector.extract_strided_slice %206 {offsets = [0, 64], sizes = [8, 32], strides = [1, 1]} : vector<8x128xf32> to vector<8x32xf32>
    %210 = vector.extract_strided_slice %206 {offsets = [0, 96], sizes = [8, 32], strides = [1, 1]} : vector<8x128xf32> to vector<8x32xf32>
    %211 = arith.negf %208 : vector<8x32xf32>
    %212 = math.exp %211 : vector<8x32xf32>
    %cst_95 = arith.constant 1.000000e+00 : f32
    %213 = vector.broadcast %cst_95 : f32 to vector<8x32xf32>
    %214 = arith.addf %213, %212 : vector<8x32xf32>
    %215 = arith.divf %213, %214 : vector<8x32xf32>
    %216 = arith.mulf %215, %109 : vector<8x32xf32>
    %217 = arith.negf %207 : vector<8x32xf32>
    %218 = math.exp %217 : vector<8x32xf32>
    %cst_96 = arith.constant 1.000000e+00 : f32
    %219 = vector.broadcast %cst_96 : f32 to vector<8x32xf32>
    %220 = arith.addf %219, %218 : vector<8x32xf32>
    %221 = arith.divf %219, %220 : vector<8x32xf32>
    %222 = math.tanh %209 : vector<8x32xf32>
    %223 = arith.mulf %221, %222 : vector<8x32xf32>
    %224 = arith.addf %216, %223 : vector<8x32xf32>
    %225 = arith.negf %210 : vector<8x32xf32>
    %226 = math.exp %225 : vector<8x32xf32>
    %cst_97 = arith.constant 1.000000e+00 : f32
    %227 = vector.broadcast %cst_97 : f32 to vector<8x32xf32>
    %228 = arith.addf %227, %226 : vector<8x32xf32>
    %229 = arith.divf %227, %228 : vector<8x32xf32>
    %230 = math.tanh %224 : vector<8x32xf32>
    %231 = arith.mulf %229, %230 : vector<8x32xf32>
    %232 = arith.truncf %231 : vector<8x32xf32> to vector<8x32xbf16>
    %233 = arith.index_cast %c1_i32 : i32 to index
    %c0_98 = arith.constant 0 : index
    %c0_99 = arith.constant 0 : index
    %234 = vector.load %arg15[%233, %c0_98, %c0_99] : memref<8x8x32xbf16, #tpu.memory_space<vmem>>, vector<1x8x32xbf16>
    %235 = vector.shape_cast %234 : vector<1x8x32xbf16> to vector<8x32xbf16>
    %236 = vector.shape_cast %232 : vector<8x32xbf16> to vector<1x8x32xbf16>
    tpu.vector_store %arg15[%233, %c0_98, %c0_99], %236 {strides = array<i32>} : memref<8x8x32xbf16, #tpu.memory_space<vmem>>, vector<1x8x32xbf16>,
    %c2_i32 = arith.constant 2 : i32
    %237 = arith.index_cast %c2_i32 : i32 to index
    %c0_100 = arith.constant 0 : index
    %c0_101 = arith.constant 0 : index
    %238 = vector.load %arg2[%237, %c0_100, %c0_101] : memref<8x8x128xf32, #tpu.memory_space<vmem>>, vector<1x8x128xf32>
    %239 = vector.shape_cast %238 : vector<1x8x128xf32> to vector<8x128xf32>
    %240 = arith.truncf %231 : vector<8x32xf32> to vector<8x32xbf16>
    %c0_102 = arith.constant 0 : index
    %c0_103 = arith.constant 0 : index
    %241 = vector.load %arg5[%c0_102, %c0_103] : memref<32x128xbf16, #tpu.memory_space<vmem>>, vector<32x128xbf16>
    %cst_104 = arith.constant dense<0.000000e+00> : vector<8x128xf32>
    %242 = tpu.matmul %240, %241, %cst_104 {dimension_numbers = #tpu.dot_dimension_numbers<[1], [0], [0], [1], [0, 0, 1, 1], [], []>} : vector<8x32xbf16>, vector<32x128xbf16>, vector<8x128xf32> -> vector<8x128xf32>
    %243 = arith.addf %239, %242 : vector<8x128xf32>
    %244 = arith.truncf %157 : vector<8x32xf32> to vector<8x32xbf16>
    %c0_105 = arith.constant 0 : index
    %c0_106 = arith.constant 0 : index
    %245 = vector.load %arg6[%c0_105, %c0_106] : memref<32x128xbf16, #tpu.memory_space<vmem>>, vector<32x128xbf16>
    %cst_107 = arith.constant dense<0.000000e+00> : vector<8x128xf32>
    %246 = tpu.matmul %244, %245, %cst_107 {dimension_numbers = #tpu.dot_dimension_numbers<[1], [0], [0], [1], [0, 0, 1, 1], [], []>} : vector<8x32xbf16>, vector<32x128xbf16>, vector<8x128xf32> -> vector<8x128xf32>
    %247 = arith.addf %243, %246 : vector<8x128xf32>
    %248 = vector.extract_strided_slice %247 {offsets = [0, 0], sizes = [8, 32], strides = [1, 1]} : vector<8x128xf32> to vector<8x32xf32>
    %249 = vector.extract_strided_slice %247 {offsets = [0, 32], sizes = [8, 32], strides = [1, 1]} : vector<8x128xf32> to vector<8x32xf32>
    %250 = vector.extract_strided_slice %247 {offsets = [0, 64], sizes = [8, 32], strides = [1, 1]} : vector<8x128xf32> to vector<8x32xf32>
    %251 = vector.extract_strided_slice %247 {offsets = [0, 96], sizes = [8, 32], strides = [1, 1]} : vector<8x128xf32> to vector<8x32xf32>
    %252 = arith.negf %249 : vector<8x32xf32>
    %253 = math.exp %252 : vector<8x32xf32>
    %cst_108 = arith.constant 1.000000e+00 : f32
    %254 = vector.broadcast %cst_108 : f32 to vector<8x32xf32>
    %255 = arith.addf %254, %253 : vector<8x32xf32>
    %256 = arith.divf %254, %255 : vector<8x32xf32>
    %257 = arith.mulf %256, %150 : vector<8x32xf32>
    %258 = arith.negf %248 : vector<8x32xf32>
    %259 = math.exp %258 : vector<8x32xf32>
    %cst_109 = arith.constant 1.000000e+00 : f32
    %260 = vector.broadcast %cst_109 : f32 to vector<8x32xf32>
    %261 = arith.addf %260, %259 : vector<8x32xf32>
    %262 = arith.divf %260, %261 : vector<8x32xf32>
    %263 = math.tanh %250 : vector<8x32xf32>
    %264 = arith.mulf %262, %263 : vector<8x32xf32>
    %265 = arith.addf %257, %264 : vector<8x32xf32>
    %266 = arith.negf %251 : vector<8x32xf32>
    %267 = math.exp %266 : vector<8x32xf32>
    %cst_110 = arith.constant 1.000000e+00 : f32
    %268 = vector.broadcast %cst_110 : f32 to vector<8x32xf32>
    %269 = arith.addf %268, %267 : vector<8x32xf32>
    %270 = arith.divf %268, %269 : vector<8x32xf32>
    %271 = math.tanh %265 : vector<8x32xf32>
    %272 = arith.mulf %270, %271 : vector<8x32xf32>
    %273 = arith.truncf %272 : vector<8x32xf32> to vector<8x32xbf16>
    %c0_111 = arith.constant 0 : index
    %c0_112 = arith.constant 0 : index
    %274 = vector.load %arg7[%c0_111, %c0_112] : memref<32x32xbf16, #tpu.memory_space<vmem>>, vector<32x32xbf16>
    %cst_113 = arith.constant dense<0.000000e+00> : vector<8x32xf32>
    %275 = tpu.matmul %273, %274, %cst_113 {dimension_numbers = #tpu.dot_dimension_numbers<[1], [0], [0], [1], [0, 0, 1, 1], [], []>} : vector<8x32xbf16>, vector<32x32xbf16>, vector<8x32xf32> -> vector<8x32xf32>
    %c0_114 = arith.constant 0 : index
    %c0_115 = arith.constant 0 : index
    %276 = vector.load %arg8[%c0_114, %c0_115] : memref<1x32xf32, #tpu.memory_space<vmem>>, vector<1x32xf32>
    %277 = vector.broadcast %276 : vector<1x32xf32> to vector<8x32xf32>
    %278 = arith.addf %275, %277 : vector<8x32xf32>
    %c0_116 = arith.constant 0 : index
    %c0_117 = arith.constant 0 : index
    %c0_118 = arith.constant 0 : index
    %279 = vector.load %arg4[%c0_116, %c0_117, %c0_118] : memref<8x8x32xbf16, #tpu.memory_space<vmem>>, vector<8x8x32xbf16>
    %280 = arith.extf %279 : vector<8x8x32xbf16> to vector<8x8x32xf32>
    %281 = vector.shape_cast %278 : vector<8x32xf32> to vector<8x1x32xf32>
    %282 = vector.broadcast %281 : vector<8x1x32xf32> to vector<8x8x32xf32>
    %283 = arith.addf %280, %282 : vector<8x8x32xf32>
    %284 = math.tanh %283 : vector<8x8x32xf32>
    %c0_119 = arith.constant 0 : index
    %c0_120 = arith.constant 0 : index
    %285 = vector.load %arg9[%c0_119, %c0_120] : memref<1x32xf32, #tpu.memory_space<vmem>>, vector<1x32xf32>
    %286 = vector.shape_cast %285 : vector<1x32xf32> to vector<1x1x32xf32>
    %287 = vector.broadcast %286 : vector<1x1x32xf32> to vector<8x8x32xf32>
    %288 = arith.mulf %284, %287 : vector<8x8x32xf32>
    %cst_121 = arith.constant dense<0.000000e+00> : vector<8x8xf32>
    %289 = vector.multi_reduction <add>, %288, %cst_121 [2] : vector<8x8x32xf32> to vector<8x8xf32>
    %c0_122 = arith.constant 0 : index
    %c0_123 = arith.constant 0 : index
    %290 = vector.load %arg10[%c0_122, %c0_123] : memref<1x1xf32, #tpu.memory_space<vmem>>, vector<1x1xf32>
    %291 = vector.broadcast %290 : vector<1x1xf32> to vector<8x8xf32>
    %292 = arith.addf %289, %291 : vector<8x8xf32>
    %cst_124 = arith.constant dense<0xFF800000> : vector<8xf32>
    %293 = vector.multi_reduction <maximumf>, %292, %cst_124 [1] : vector<8x8xf32> to vector<8xf32>
    %294 = vector.shape_cast %293 : vector<8xf32> to vector<8x1xf32>
    %295 = vector.broadcast %294 : vector<8x1xf32> to vector<8x8xf32>
    %296 = arith.subf %292, %295 : vector<8x8xf32>
    %297 = math.exp %296 : vector<8x8xf32>
    %cst_125 = arith.constant dense<0.000000e+00> : vector<8xf32>
    %298 = vector.multi_reduction <add>, %297, %cst_125 [1] : vector<8x8xf32> to vector<8xf32>
    %299 = vector.shape_cast %298 : vector<8xf32> to vector<8x1xf32>
    %300 = vector.broadcast %299 : vector<8x1xf32> to vector<8x8xf32>
    %301 = arith.divf %297, %300 : vector<8x8xf32>
    %302 = vector.shape_cast %301 : vector<8x8xf32> to vector<8x8x1xf32>
    %c0_126 = arith.constant 0 : index
    %c0_127 = arith.constant 0 : index
    %c0_128 = arith.constant 0 : index
    %303 = vector.load %arg3[%c0_126, %c0_127, %c0_128] : memref<8x8x64xbf16, #tpu.memory_space<vmem>>, vector<8x8x64xbf16>
    %304 = arith.extf %303 : vector<8x8x64xbf16> to vector<8x8x64xf32>
    %305 = vector.broadcast %302 : vector<8x8x1xf32> to vector<8x8x64xf32>
    %306 = arith.mulf %305, %304 : vector<8x8x64xf32>
    %cst_129 = arith.constant dense<0.000000e+00> : vector<8x64xf32>
    %307 = vector.multi_reduction <add>, %306, %cst_129 [1] : vector<8x8x64xf32> to vector<8x64xf32>
    %308 = arith.truncf %307 : vector<8x64xf32> to vector<8x64xbf16>
    %c0_130 = arith.constant 0 : index
    %c0_131 = arith.constant 0 : index
    %309 = vector.load %arg11[%c0_130, %c0_131] : memref<64x128xbf16, #tpu.memory_space<vmem>>, vector<64x128xbf16>
    %cst_132 = arith.constant dense<0.000000e+00> : vector<8x128xf32>
    %310 = tpu.matmul %308, %309, %cst_132 {dimension_numbers = #tpu.dot_dimension_numbers<[1], [0], [0], [1], [0, 0, 1, 1], [], []>} : vector<8x64xbf16>, vector<64x128xbf16>, vector<8x128xf32> -> vector<8x128xf32>
    %c0_133 = arith.constant 0 : index
    %c0_134 = arith.constant 0 : index
    %311 = vector.load %arg14[%c0_133, %c0_134] : memref<1x128xf32, #tpu.memory_space<vmem>>, vector<1x128xf32>
    %312 = vector.broadcast %311 : vector<1x128xf32> to vector<8x128xf32>
    %313 = arith.addf %310, %312 : vector<8x128xf32>
    %314 = arith.truncf %272 : vector<8x32xf32> to vector<8x32xbf16>
    %c0_135 = arith.constant 0 : index
    %c0_136 = arith.constant 0 : index
    %315 = vector.load %arg12[%c0_135, %c0_136] : memref<32x128xbf16, #tpu.memory_space<vmem>>, vector<32x128xbf16>
    %cst_137 = arith.constant dense<0.000000e+00> : vector<8x128xf32>
    %316 = tpu.matmul %314, %315, %cst_137 {dimension_numbers = #tpu.dot_dimension_numbers<[1], [0], [0], [1], [0, 0, 1, 1], [], []>} : vector<8x32xbf16>, vector<32x128xbf16>, vector<8x128xf32> -> vector<8x128xf32>
    %317 = arith.addf %313, %316 : vector<8x128xf32>
    %318 = arith.truncf %231 : vector<8x32xf32> to vector<8x32xbf16>
    %c0_138 = arith.constant 0 : index
    %c0_139 = arith.constant 0 : index
    %319 = vector.load %arg13[%c0_138, %c0_139] : memref<32x128xbf16, #tpu.memory_space<vmem>>, vector<32x128xbf16>
    %cst_140 = arith.constant dense<0.000000e+00> : vector<8x128xf32>
    %320 = tpu.matmul %318, %319, %cst_140 {dimension_numbers = #tpu.dot_dimension_numbers<[1], [0], [0], [1], [0, 0, 1, 1], [], []>} : vector<8x32xbf16>, vector<32x128xbf16>, vector<8x128xf32> -> vector<8x128xf32>
    %321 = arith.addf %317, %320 : vector<8x128xf32>
    %322 = vector.extract_strided_slice %321 {offsets = [0, 0], sizes = [8, 32], strides = [1, 1]} : vector<8x128xf32> to vector<8x32xf32>
    %323 = vector.extract_strided_slice %321 {offsets = [0, 32], sizes = [8, 32], strides = [1, 1]} : vector<8x128xf32> to vector<8x32xf32>
    %324 = vector.extract_strided_slice %321 {offsets = [0, 64], sizes = [8, 32], strides = [1, 1]} : vector<8x128xf32> to vector<8x32xf32>
    %325 = vector.extract_strided_slice %321 {offsets = [0, 96], sizes = [8, 32], strides = [1, 1]} : vector<8x128xf32> to vector<8x32xf32>
    %326 = arith.negf %323 : vector<8x32xf32>
    %327 = math.exp %326 : vector<8x32xf32>
    %cst_141 = arith.constant 1.000000e+00 : f32
    %328 = vector.broadcast %cst_141 : f32 to vector<8x32xf32>
    %329 = arith.addf %328, %327 : vector<8x32xf32>
    %330 = arith.divf %328, %329 : vector<8x32xf32>
    %331 = arith.mulf %330, %224 : vector<8x32xf32>
    %332 = arith.negf %322 : vector<8x32xf32>
    %333 = math.exp %332 : vector<8x32xf32>
    %cst_142 = arith.constant 1.000000e+00 : f32
    %334 = vector.broadcast %cst_142 : f32 to vector<8x32xf32>
    %335 = arith.addf %334, %333 : vector<8x32xf32>
    %336 = arith.divf %334, %335 : vector<8x32xf32>
    %337 = math.tanh %324 : vector<8x32xf32>
    %338 = arith.mulf %336, %337 : vector<8x32xf32>
    %339 = arith.addf %331, %338 : vector<8x32xf32>
    %340 = arith.negf %325 : vector<8x32xf32>
    %341 = math.exp %340 : vector<8x32xf32>
    %cst_143 = arith.constant 1.000000e+00 : f32
    %342 = vector.broadcast %cst_143 : f32 to vector<8x32xf32>
    %343 = arith.addf %342, %341 : vector<8x32xf32>
    %344 = arith.divf %342, %343 : vector<8x32xf32>
    %345 = math.tanh %339 : vector<8x32xf32>
    %346 = arith.mulf %344, %345 : vector<8x32xf32>
    %347 = arith.truncf %346 : vector<8x32xf32> to vector<8x32xbf16>
    %348 = arith.index_cast %c2_i32 : i32 to index
    %c0_144 = arith.constant 0 : index
    %c0_145 = arith.constant 0 : index
    %349 = vector.load %arg15[%348, %c0_144, %c0_145] : memref<8x8x32xbf16, #tpu.memory_space<vmem>>, vector<1x8x32xbf16>
    %350 = vector.shape_cast %349 : vector<1x8x32xbf16> to vector<8x32xbf16>
    %351 = vector.shape_cast %347 : vector<8x32xbf16> to vector<1x8x32xbf16>
    tpu.vector_store %arg15[%348, %c0_144, %c0_145], %351 {strides = array<i32>} : memref<8x8x32xbf16, #tpu.memory_space<vmem>>, vector<1x8x32xbf16>,
    %c3_i32 = arith.constant 3 : i32
    %352 = arith.index_cast %c3_i32 : i32 to index
    %c0_146 = arith.constant 0 : index
    %c0_147 = arith.constant 0 : index
    %353 = vector.load %arg2[%352, %c0_146, %c0_147] : memref<8x8x128xf32, #tpu.memory_space<vmem>>, vector<1x8x128xf32>
    %354 = vector.shape_cast %353 : vector<1x8x128xf32> to vector<8x128xf32>
    %355 = arith.truncf %346 : vector<8x32xf32> to vector<8x32xbf16>
    %c0_148 = arith.constant 0 : index
    %c0_149 = arith.constant 0 : index
    %356 = vector.load %arg5[%c0_148, %c0_149] : memref<32x128xbf16, #tpu.memory_space<vmem>>, vector<32x128xbf16>
    %cst_150 = arith.constant dense<0.000000e+00> : vector<8x128xf32>
    %357 = tpu.matmul %355, %356, %cst_150 {dimension_numbers = #tpu.dot_dimension_numbers<[1], [0], [0], [1], [0, 0, 1, 1], [], []>} : vector<8x32xbf16>, vector<32x128xbf16>, vector<8x128xf32> -> vector<8x128xf32>
    %358 = arith.addf %354, %357 : vector<8x128xf32>
    %359 = arith.truncf %272 : vector<8x32xf32> to vector<8x32xbf16>
    %c0_151 = arith.constant 0 : index
    %c0_152 = arith.constant 0 : index
    %360 = vector.load %arg6[%c0_151, %c0_152] : memref<32x128xbf16, #tpu.memory_space<vmem>>, vector<32x128xbf16>
    %cst_153 = arith.constant dense<0.000000e+00> : vector<8x128xf32>
    %361 = tpu.matmul %359, %360, %cst_153 {dimension_numbers = #tpu.dot_dimension_numbers<[1], [0], [0], [1], [0, 0, 1, 1], [], []>} : vector<8x32xbf16>, vector<32x128xbf16>, vector<8x128xf32> -> vector<8x128xf32>
    %362 = arith.addf %358, %361 : vector<8x128xf32>
    %363 = vector.extract_strided_slice %362 {offsets = [0, 0], sizes = [8, 32], strides = [1, 1]} : vector<8x128xf32> to vector<8x32xf32>
    %364 = vector.extract_strided_slice %362 {offsets = [0, 32], sizes = [8, 32], strides = [1, 1]} : vector<8x128xf32> to vector<8x32xf32>
    %365 = vector.extract_strided_slice %362 {offsets = [0, 64], sizes = [8, 32], strides = [1, 1]} : vector<8x128xf32> to vector<8x32xf32>
    %366 = vector.extract_strided_slice %362 {offsets = [0, 96], sizes = [8, 32], strides = [1, 1]} : vector<8x128xf32> to vector<8x32xf32>
    %367 = arith.negf %364 : vector<8x32xf32>
    %368 = math.exp %367 : vector<8x32xf32>
    %cst_154 = arith.constant 1.000000e+00 : f32
    %369 = vector.broadcast %cst_154 : f32 to vector<8x32xf32>
    %370 = arith.addf %369, %368 : vector<8x32xf32>
    %371 = arith.divf %369, %370 : vector<8x32xf32>
    %372 = arith.mulf %371, %265 : vector<8x32xf32>
    %373 = arith.negf %363 : vector<8x32xf32>
    %374 = math.exp %373 : vector<8x32xf32>
    %cst_155 = arith.constant 1.000000e+00 : f32
    %375 = vector.broadcast %cst_155 : f32 to vector<8x32xf32>
    %376 = arith.addf %375, %374 : vector<8x32xf32>
    %377 = arith.divf %375, %376 : vector<8x32xf32>
    %378 = math.tanh %365 : vector<8x32xf32>
    %379 = arith.mulf %377, %378 : vector<8x32xf32>
    %380 = arith.addf %372, %379 : vector<8x32xf32>
    %381 = arith.negf %366 : vector<8x32xf32>
    %382 = math.exp %381 : vector<8x32xf32>
    %cst_156 = arith.constant 1.000000e+00 : f32
    %383 = vector.broadcast %cst_156 : f32 to vector<8x32xf32>
    %384 = arith.addf %383, %382 : vector<8x32xf32>
    %385 = arith.divf %383, %384 : vector<8x32xf32>
    %386 = math.tanh %380 : vector<8x32xf32>
    %387 = arith.mulf %385, %386 : vector<8x32xf32>
    %388 = arith.truncf %387 : vector<8x32xf32> to vector<8x32xbf16>
    %c0_157 = arith.constant 0 : index
    %c0_158 = arith.constant 0 : index
    %389 = vector.load %arg7[%c0_157, %c0_158] : memref<32x32xbf16, #tpu.memory_space<vmem>>, vector<32x32xbf16>
    %cst_159 = arith.constant dense<0.000000e+00> : vector<8x32xf32>
    %390 = tpu.matmul %388, %389, %cst_159 {dimension_numbers = #tpu.dot_dimension_numbers<[1], [0], [0], [1], [0, 0, 1, 1], [], []>} : vector<8x32xbf16>, vector<32x32xbf16>, vector<8x32xf32> -> vector<8x32xf32>
    %c0_160 = arith.constant 0 : index
    %c0_161 = arith.constant 0 : index
    %391 = vector.load %arg8[%c0_160, %c0_161] : memref<1x32xf32, #tpu.memory_space<vmem>>, vector<1x32xf32>
    %392 = vector.broadcast %391 : vector<1x32xf32> to vector<8x32xf32>
    %393 = arith.addf %390, %392 : vector<8x32xf32>
    %c0_162 = arith.constant 0 : index
    %c0_163 = arith.constant 0 : index
    %c0_164 = arith.constant 0 : index
    %394 = vector.load %arg4[%c0_162, %c0_163, %c0_164] : memref<8x8x32xbf16, #tpu.memory_space<vmem>>, vector<8x8x32xbf16>
    %395 = arith.extf %394 : vector<8x8x32xbf16> to vector<8x8x32xf32>
    %396 = vector.shape_cast %393 : vector<8x32xf32> to vector<8x1x32xf32>
    %397 = vector.broadcast %396 : vector<8x1x32xf32> to vector<8x8x32xf32>
    %398 = arith.addf %395, %397 : vector<8x8x32xf32>
    %399 = math.tanh %398 : vector<8x8x32xf32>
    %c0_165 = arith.constant 0 : index
    %c0_166 = arith.constant 0 : index
    %400 = vector.load %arg9[%c0_165, %c0_166] : memref<1x32xf32, #tpu.memory_space<vmem>>, vector<1x32xf32>
    %401 = vector.shape_cast %400 : vector<1x32xf32> to vector<1x1x32xf32>
    %402 = vector.broadcast %401 : vector<1x1x32xf32> to vector<8x8x32xf32>
    %403 = arith.mulf %399, %402 : vector<8x8x32xf32>
    %cst_167 = arith.constant dense<0.000000e+00> : vector<8x8xf32>
    %404 = vector.multi_reduction <add>, %403, %cst_167 [2] : vector<8x8x32xf32> to vector<8x8xf32>
    %c0_168 = arith.constant 0 : index
    %c0_169 = arith.constant 0 : index
    %405 = vector.load %arg10[%c0_168, %c0_169] : memref<1x1xf32, #tpu.memory_space<vmem>>, vector<1x1xf32>
    %406 = vector.broadcast %405 : vector<1x1xf32> to vector<8x8xf32>
    %407 = arith.addf %404, %406 : vector<8x8xf32>
    %cst_170 = arith.constant dense<0xFF800000> : vector<8xf32>
    %408 = vector.multi_reduction <maximumf>, %407, %cst_170 [1] : vector<8x8xf32> to vector<8xf32>
    %409 = vector.shape_cast %408 : vector<8xf32> to vector<8x1xf32>
    %410 = vector.broadcast %409 : vector<8x1xf32> to vector<8x8xf32>
    %411 = arith.subf %407, %410 : vector<8x8xf32>
    %412 = math.exp %411 : vector<8x8xf32>
    %cst_171 = arith.constant dense<0.000000e+00> : vector<8xf32>
    %413 = vector.multi_reduction <add>, %412, %cst_171 [1] : vector<8x8xf32> to vector<8xf32>
    %414 = vector.shape_cast %413 : vector<8xf32> to vector<8x1xf32>
    %415 = vector.broadcast %414 : vector<8x1xf32> to vector<8x8xf32>
    %416 = arith.divf %412, %415 : vector<8x8xf32>
    %417 = vector.shape_cast %416 : vector<8x8xf32> to vector<8x8x1xf32>
    %c0_172 = arith.constant 0 : index
    %c0_173 = arith.constant 0 : index
    %c0_174 = arith.constant 0 : index
    %418 = vector.load %arg3[%c0_172, %c0_173, %c0_174] : memref<8x8x64xbf16, #tpu.memory_space<vmem>>, vector<8x8x64xbf16>
    %419 = arith.extf %418 : vector<8x8x64xbf16> to vector<8x8x64xf32>
    %420 = vector.broadcast %417 : vector<8x8x1xf32> to vector<8x8x64xf32>
    %421 = arith.mulf %420, %419 : vector<8x8x64xf32>
    %cst_175 = arith.constant dense<0.000000e+00> : vector<8x64xf32>
    %422 = vector.multi_reduction <add>, %421, %cst_175 [1] : vector<8x8x64xf32> to vector<8x64xf32>
    %423 = arith.truncf %422 : vector<8x64xf32> to vector<8x64xbf16>
    %c0_176 = arith.constant 0 : index
    %c0_177 = arith.constant 0 : index
    %424 = vector.load %arg11[%c0_176, %c0_177] : memref<64x128xbf16, #tpu.memory_space<vmem>>, vector<64x128xbf16>
    %cst_178 = arith.constant dense<0.000000e+00> : vector<8x128xf32>
    %425 = tpu.matmul %423, %424, %cst_178 {dimension_numbers = #tpu.dot_dimension_numbers<[1], [0], [0], [1], [0, 0, 1, 1], [], []>} : vector<8x64xbf16>, vector<64x128xbf16>, vector<8x128xf32> -> vector<8x128xf32>
    %c0_179 = arith.constant 0 : index
    %c0_180 = arith.constant 0 : index
    %426 = vector.load %arg14[%c0_179, %c0_180] : memref<1x128xf32, #tpu.memory_space<vmem>>, vector<1x128xf32>
    %427 = vector.broadcast %426 : vector<1x128xf32> to vector<8x128xf32>
    %428 = arith.addf %425, %427 : vector<8x128xf32>
    %429 = arith.truncf %387 : vector<8x32xf32> to vector<8x32xbf16>
    %c0_181 = arith.constant 0 : index
    %c0_182 = arith.constant 0 : index
    %430 = vector.load %arg12[%c0_181, %c0_182] : memref<32x128xbf16, #tpu.memory_space<vmem>>, vector<32x128xbf16>
    %cst_183 = arith.constant dense<0.000000e+00> : vector<8x128xf32>
    %431 = tpu.matmul %429, %430, %cst_183 {dimension_numbers = #tpu.dot_dimension_numbers<[1], [0], [0], [1], [0, 0, 1, 1], [], []>} : vector<8x32xbf16>, vector<32x128xbf16>, vector<8x128xf32> -> vector<8x128xf32>
    %432 = arith.addf %428, %431 : vector<8x128xf32>
    %433 = arith.truncf %346 : vector<8x32xf32> to vector<8x32xbf16>
    %c0_184 = arith.constant 0 : index
    %c0_185 = arith.constant 0 : index
    %434 = vector.load %arg13[%c0_184, %c0_185] : memref<32x128xbf16, #tpu.memory_space<vmem>>, vector<32x128xbf16>
    %cst_186 = arith.constant dense<0.000000e+00> : vector<8x128xf32>
    %435 = tpu.matmul %433, %434, %cst_186 {dimension_numbers = #tpu.dot_dimension_numbers<[1], [0], [0], [1], [0, 0, 1, 1], [], []>} : vector<8x32xbf16>, vector<32x128xbf16>, vector<8x128xf32> -> vector<8x128xf32>
    %436 = arith.addf %432, %435 : vector<8x128xf32>
    %437 = vector.extract_strided_slice %436 {offsets = [0, 0], sizes = [8, 32], strides = [1, 1]} : vector<8x128xf32> to vector<8x32xf32>
    %438 = vector.extract_strided_slice %436 {offsets = [0, 32], sizes = [8, 32], strides = [1, 1]} : vector<8x128xf32> to vector<8x32xf32>
    %439 = vector.extract_strided_slice %436 {offsets = [0, 64], sizes = [8, 32], strides = [1, 1]} : vector<8x128xf32> to vector<8x32xf32>
    %440 = vector.extract_strided_slice %436 {offsets = [0, 96], sizes = [8, 32], strides = [1, 1]} : vector<8x128xf32> to vector<8x32xf32>
    %441 = arith.negf %438 : vector<8x32xf32>
    %442 = math.exp %441 : vector<8x32xf32>
    %cst_187 = arith.constant 1.000000e+00 : f32
    %443 = vector.broadcast %cst_187 : f32 to vector<8x32xf32>
    %444 = arith.addf %443, %442 : vector<8x32xf32>
    %445 = arith.divf %443, %444 : vector<8x32xf32>
    %446 = arith.mulf %445, %339 : vector<8x32xf32>
    %447 = arith.negf %437 : vector<8x32xf32>
    %448 = math.exp %447 : vector<8x32xf32>
    %cst_188 = arith.constant 1.000000e+00 : f32
    %449 = vector.broadcast %cst_188 : f32 to vector<8x32xf32>
    %450 = arith.addf %449, %448 : vector<8x32xf32>
    %451 = arith.divf %449, %450 : vector<8x32xf32>
    %452 = math.tanh %439 : vector<8x32xf32>
    %453 = arith.mulf %451, %452 : vector<8x32xf32>
    %454 = arith.addf %446, %453 : vector<8x32xf32>
    %455 = arith.negf %440 : vector<8x32xf32>
    %456 = math.exp %455 : vector<8x32xf32>
    %cst_189 = arith.constant 1.000000e+00 : f32
    %457 = vector.broadcast %cst_189 : f32 to vector<8x32xf32>
    %458 = arith.addf %457, %456 : vector<8x32xf32>
    %459 = arith.divf %457, %458 : vector<8x32xf32>
    %460 = math.tanh %454 : vector<8x32xf32>
    %461 = arith.mulf %459, %460 : vector<8x32xf32>
    %462 = arith.truncf %461 : vector<8x32xf32> to vector<8x32xbf16>
    %463 = arith.index_cast %c3_i32 : i32 to index
    %c0_190 = arith.constant 0 : index
    %c0_191 = arith.constant 0 : index
    %464 = vector.load %arg15[%463, %c0_190, %c0_191] : memref<8x8x32xbf16, #tpu.memory_space<vmem>>, vector<1x8x32xbf16>
    %465 = vector.shape_cast %464 : vector<1x8x32xbf16> to vector<8x32xbf16>
    %466 = vector.shape_cast %462 : vector<8x32xbf16> to vector<1x8x32xbf16>
    tpu.vector_store %arg15[%463, %c0_190, %c0_191], %466 {strides = array<i32>} : memref<8x8x32xbf16, #tpu.memory_space<vmem>>, vector<1x8x32xbf16>,
    %c4_i32 = arith.constant 4 : i32
    %467 = arith.index_cast %c4_i32 : i32 to index
    %c0_192 = arith.constant 0 : index
    %c0_193 = arith.constant 0 : index
    %468 = vector.load %arg2[%467, %c0_192, %c0_193] : memref<8x8x128xf32, #tpu.memory_space<vmem>>, vector<1x8x128xf32>
    %469 = vector.shape_cast %468 : vector<1x8x128xf32> to vector<8x128xf32>
    %470 = arith.truncf %461 : vector<8x32xf32> to vector<8x32xbf16>
    %c0_194 = arith.constant 0 : index
    %c0_195 = arith.constant 0 : index
    %471 = vector.load %arg5[%c0_194, %c0_195] : memref<32x128xbf16, #tpu.memory_space<vmem>>, vector<32x128xbf16>
    %cst_196 = arith.constant dense<0.000000e+00> : vector<8x128xf32>
    %472 = tpu.matmul %470, %471, %cst_196 {dimension_numbers = #tpu.dot_dimension_numbers<[1], [0], [0], [1], [0, 0, 1, 1], [], []>} : vector<8x32xbf16>, vector<32x128xbf16>, vector<8x128xf32> -> vector<8x128xf32>
    %473 = arith.addf %469, %472 : vector<8x128xf32>
    %474 = arith.truncf %387 : vector<8x32xf32> to vector<8x32xbf16>
    %c0_197 = arith.constant 0 : index
    %c0_198 = arith.constant 0 : index
    %475 = vector.load %arg6[%c0_197, %c0_198] : memref<32x128xbf16, #tpu.memory_space<vmem>>, vector<32x128xbf16>
    %cst_199 = arith.constant dense<0.000000e+00> : vector<8x128xf32>
    %476 = tpu.matmul %474, %475, %cst_199 {dimension_numbers = #tpu.dot_dimension_numbers<[1], [0], [0], [1], [0, 0, 1, 1], [], []>} : vector<8x32xbf16>, vector<32x128xbf16>, vector<8x128xf32> -> vector<8x128xf32>
    %477 = arith.addf %473, %476 : vector<8x128xf32>
    %478 = vector.extract_strided_slice %477 {offsets = [0, 0], sizes = [8, 32], strides = [1, 1]} : vector<8x128xf32> to vector<8x32xf32>
    %479 = vector.extract_strided_slice %477 {offsets = [0, 32], sizes = [8, 32], strides = [1, 1]} : vector<8x128xf32> to vector<8x32xf32>
    %480 = vector.extract_strided_slice %477 {offsets = [0, 64], sizes = [8, 32], strides = [1, 1]} : vector<8x128xf32> to vector<8x32xf32>
    %481 = vector.extract_strided_slice %477 {offsets = [0, 96], sizes = [8, 32], strides = [1, 1]} : vector<8x128xf32> to vector<8x32xf32>
    %482 = arith.negf %479 : vector<8x32xf32>
    %483 = math.exp %482 : vector<8x32xf32>
    %cst_200 = arith.constant 1.000000e+00 : f32
    %484 = vector.broadcast %cst_200 : f32 to vector<8x32xf32>
    %485 = arith.addf %484, %483 : vector<8x32xf32>
    %486 = arith.divf %484, %485 : vector<8x32xf32>
    %487 = arith.mulf %486, %380 : vector<8x32xf32>
    %488 = arith.negf %478 : vector<8x32xf32>
    %489 = math.exp %488 : vector<8x32xf32>
    %cst_201 = arith.constant 1.000000e+00 : f32
    %490 = vector.broadcast %cst_201 : f32 to vector<8x32xf32>
    %491 = arith.addf %490, %489 : vector<8x32xf32>
    %492 = arith.divf %490, %491 : vector<8x32xf32>
    %493 = math.tanh %480 : vector<8x32xf32>
    %494 = arith.mulf %492, %493 : vector<8x32xf32>
    %495 = arith.addf %487, %494 : vector<8x32xf32>
    %496 = arith.negf %481 : vector<8x32xf32>
    %497 = math.exp %496 : vector<8x32xf32>
    %cst_202 = arith.constant 1.000000e+00 : f32
    %498 = vector.broadcast %cst_202 : f32 to vector<8x32xf32>
    %499 = arith.addf %498, %497 : vector<8x32xf32>
    %500 = arith.divf %498, %499 : vector<8x32xf32>
    %501 = math.tanh %495 : vector<8x32xf32>
    %502 = arith.mulf %500, %501 : vector<8x32xf32>
    %503 = arith.truncf %502 : vector<8x32xf32> to vector<8x32xbf16>
    %c0_203 = arith.constant 0 : index
    %c0_204 = arith.constant 0 : index
    %504 = vector.load %arg7[%c0_203, %c0_204] : memref<32x32xbf16, #tpu.memory_space<vmem>>, vector<32x32xbf16>
    %cst_205 = arith.constant dense<0.000000e+00> : vector<8x32xf32>
    %505 = tpu.matmul %503, %504, %cst_205 {dimension_numbers = #tpu.dot_dimension_numbers<[1], [0], [0], [1], [0, 0, 1, 1], [], []>} : vector<8x32xbf16>, vector<32x32xbf16>, vector<8x32xf32> -> vector<8x32xf32>
    %c0_206 = arith.constant 0 : index
    %c0_207 = arith.constant 0 : index
    %506 = vector.load %arg8[%c0_206, %c0_207] : memref<1x32xf32, #tpu.memory_space<vmem>>, vector<1x32xf32>
    %507 = vector.broadcast %506 : vector<1x32xf32> to vector<8x32xf32>
    %508 = arith.addf %505, %507 : vector<8x32xf32>
    %c0_208 = arith.constant 0 : index
    %c0_209 = arith.constant 0 : index
    %c0_210 = arith.constant 0 : index
    %509 = vector.load %arg4[%c0_208, %c0_209, %c0_210] : memref<8x8x32xbf16, #tpu.memory_space<vmem>>, vector<8x8x32xbf16>
    %510 = arith.extf %509 : vector<8x8x32xbf16> to vector<8x8x32xf32>
    %511 = vector.shape_cast %508 : vector<8x32xf32> to vector<8x1x32xf32>
    %512 = vector.broadcast %511 : vector<8x1x32xf32> to vector<8x8x32xf32>
    %513 = arith.addf %510, %512 : vector<8x8x32xf32>
    %514 = math.tanh %513 : vector<8x8x32xf32>
    %c0_211 = arith.constant 0 : index
    %c0_212 = arith.constant 0 : index
    %515 = vector.load %arg9[%c0_211, %c0_212] : memref<1x32xf32, #tpu.memory_space<vmem>>, vector<1x32xf32>
    %516 = vector.shape_cast %515 : vector<1x32xf32> to vector<1x1x32xf32>
    %517 = vector.broadcast %516 : vector<1x1x32xf32> to vector<8x8x32xf32>
    %518 = arith.mulf %514, %517 : vector<8x8x32xf32>
    %cst_213 = arith.constant dense<0.000000e+00> : vector<8x8xf32>
    %519 = vector.multi_reduction <add>, %518, %cst_213 [2] : vector<8x8x32xf32> to vector<8x8xf32>
    %c0_214 = arith.constant 0 : index
    %c0_215 = arith.constant 0 : index
    %520 = vector.load %arg10[%c0_214, %c0_215] : memref<1x1xf32, #tpu.memory_space<vmem>>, vector<1x1xf32>
    %521 = vector.broadcast %520 : vector<1x1xf32> to vector<8x8xf32>
    %522 = arith.addf %519, %521 : vector<8x8xf32>
    %cst_216 = arith.constant dense<0xFF800000> : vector<8xf32>
    %523 = vector.multi_reduction <maximumf>, %522, %cst_216 [1] : vector<8x8xf32> to vector<8xf32>
    %524 = vector.shape_cast %523 : vector<8xf32> to vector<8x1xf32>
    %525 = vector.broadcast %524 : vector<8x1xf32> to vector<8x8xf32>
    %526 = arith.subf %522, %525 : vector<8x8xf32>
    %527 = math.exp %526 : vector<8x8xf32>
    %cst_217 = arith.constant dense<0.000000e+00> : vector<8xf32>
    %528 = vector.multi_reduction <add>, %527, %cst_217 [1] : vector<8x8xf32> to vector<8xf32>
    %529 = vector.shape_cast %528 : vector<8xf32> to vector<8x1xf32>
    %530 = vector.broadcast %529 : vector<8x1xf32> to vector<8x8xf32>
    %531 = arith.divf %527, %530 : vector<8x8xf32>
    %532 = vector.shape_cast %531 : vector<8x8xf32> to vector<8x8x1xf32>
    %c0_218 = arith.constant 0 : index
    %c0_219 = arith.constant 0 : index
    %c0_220 = arith.constant 0 : index
    %533 = vector.load %arg3[%c0_218, %c0_219, %c0_220] : memref<8x8x64xbf16, #tpu.memory_space<vmem>>, vector<8x8x64xbf16>
    %534 = arith.extf %533 : vector<8x8x64xbf16> to vector<8x8x64xf32>
    %535 = vector.broadcast %532 : vector<8x8x1xf32> to vector<8x8x64xf32>
    %536 = arith.mulf %535, %534 : vector<8x8x64xf32>
    %cst_221 = arith.constant dense<0.000000e+00> : vector<8x64xf32>
    %537 = vector.multi_reduction <add>, %536, %cst_221 [1] : vector<8x8x64xf32> to vector<8x64xf32>
    %538 = arith.truncf %537 : vector<8x64xf32> to vector<8x64xbf16>
    %c0_222 = arith.constant 0 : index
    %c0_223 = arith.constant 0 : index
    %539 = vector.load %arg11[%c0_222, %c0_223] : memref<64x128xbf16, #tpu.memory_space<vmem>>, vector<64x128xbf16>
    %cst_224 = arith.constant dense<0.000000e+00> : vector<8x128xf32>
    %540 = tpu.matmul %538, %539, %cst_224 {dimension_numbers = #tpu.dot_dimension_numbers<[1], [0], [0], [1], [0, 0, 1, 1], [], []>} : vector<8x64xbf16>, vector<64x128xbf16>, vector<8x128xf32> -> vector<8x128xf32>
    %c0_225 = arith.constant 0 : index
    %c0_226 = arith.constant 0 : index
    %541 = vector.load %arg14[%c0_225, %c0_226] : memref<1x128xf32, #tpu.memory_space<vmem>>, vector<1x128xf32>
    %542 = vector.broadcast %541 : vector<1x128xf32> to vector<8x128xf32>
    %543 = arith.addf %540, %542 : vector<8x128xf32>
    %544 = arith.truncf %502 : vector<8x32xf32> to vector<8x32xbf16>
    %c0_227 = arith.constant 0 : index
    %c0_228 = arith.constant 0 : index
    %545 = vector.load %arg12[%c0_227, %c0_228] : memref<32x128xbf16, #tpu.memory_space<vmem>>, vector<32x128xbf16>
    %cst_229 = arith.constant dense<0.000000e+00> : vector<8x128xf32>
    %546 = tpu.matmul %544, %545, %cst_229 {dimension_numbers = #tpu.dot_dimension_numbers<[1], [0], [0], [1], [0, 0, 1, 1], [], []>} : vector<8x32xbf16>, vector<32x128xbf16>, vector<8x128xf32> -> vector<8x128xf32>
    %547 = arith.addf %543, %546 : vector<8x128xf32>
    %548 = arith.truncf %461 : vector<8x32xf32> to vector<8x32xbf16>
    %c0_230 = arith.constant 0 : index
    %c0_231 = arith.constant 0 : index
    %549 = vector.load %arg13[%c0_230, %c0_231] : memref<32x128xbf16, #tpu.memory_space<vmem>>, vector<32x128xbf16>
    %cst_232 = arith.constant dense<0.000000e+00> : vector<8x128xf32>
    %550 = tpu.matmul %548, %549, %cst_232 {dimension_numbers = #tpu.dot_dimension_numbers<[1], [0], [0], [1], [0, 0, 1, 1], [], []>} : vector<8x32xbf16>, vector<32x128xbf16>, vector<8x128xf32> -> vector<8x128xf32>
    %551 = arith.addf %547, %550 : vector<8x128xf32>
    %552 = vector.extract_strided_slice %551 {offsets = [0, 0], sizes = [8, 32], strides = [1, 1]} : vector<8x128xf32> to vector<8x32xf32>
    %553 = vector.extract_strided_slice %551 {offsets = [0, 32], sizes = [8, 32], strides = [1, 1]} : vector<8x128xf32> to vector<8x32xf32>
    %554 = vector.extract_strided_slice %551 {offsets = [0, 64], sizes = [8, 32], strides = [1, 1]} : vector<8x128xf32> to vector<8x32xf32>
    %555 = vector.extract_strided_slice %551 {offsets = [0, 96], sizes = [8, 32], strides = [1, 1]} : vector<8x128xf32> to vector<8x32xf32>
    %556 = arith.negf %553 : vector<8x32xf32>
    %557 = math.exp %556 : vector<8x32xf32>
    %cst_233 = arith.constant 1.000000e+00 : f32
    %558 = vector.broadcast %cst_233 : f32 to vector<8x32xf32>
    %559 = arith.addf %558, %557 : vector<8x32xf32>
    %560 = arith.divf %558, %559 : vector<8x32xf32>
    %561 = arith.mulf %560, %454 : vector<8x32xf32>
    %562 = arith.negf %552 : vector<8x32xf32>
    %563 = math.exp %562 : vector<8x32xf32>
    %cst_234 = arith.constant 1.000000e+00 : f32
    %564 = vector.broadcast %cst_234 : f32 to vector<8x32xf32>
    %565 = arith.addf %564, %563 : vector<8x32xf32>
    %566 = arith.divf %564, %565 : vector<8x32xf32>
    %567 = math.tanh %554 : vector<8x32xf32>
    %568 = arith.mulf %566, %567 : vector<8x32xf32>
    %569 = arith.addf %561, %568 : vector<8x32xf32>
    %570 = arith.negf %555 : vector<8x32xf32>
    %571 = math.exp %570 : vector<8x32xf32>
    %cst_235 = arith.constant 1.000000e+00 : f32
    %572 = vector.broadcast %cst_235 : f32 to vector<8x32xf32>
    %573 = arith.addf %572, %571 : vector<8x32xf32>
    %574 = arith.divf %572, %573 : vector<8x32xf32>
    %575 = math.tanh %569 : vector<8x32xf32>
    %576 = arith.mulf %574, %575 : vector<8x32xf32>
    %577 = arith.truncf %576 : vector<8x32xf32> to vector<8x32xbf16>
    %578 = arith.index_cast %c4_i32 : i32 to index
    %c0_236 = arith.constant 0 : index
    %c0_237 = arith.constant 0 : index
    %579 = vector.load %arg15[%578, %c0_236, %c0_237] : memref<8x8x32xbf16, #tpu.memory_space<vmem>>, vector<1x8x32xbf16>
    %580 = vector.shape_cast %579 : vector<1x8x32xbf16> to vector<8x32xbf16>
    %581 = vector.shape_cast %577 : vector<8x32xbf16> to vector<1x8x32xbf16>
    tpu.vector_store %arg15[%578, %c0_236, %c0_237], %581 {strides = array<i32>} : memref<8x8x32xbf16, #tpu.memory_space<vmem>>, vector<1x8x32xbf16>,
    %c5_i32 = arith.constant 5 : i32
    %582 = arith.index_cast %c5_i32 : i32 to index
    %c0_238 = arith.constant 0 : index
    %c0_239 = arith.constant 0 : index
    %583 = vector.load %arg2[%582, %c0_238, %c0_239] : memref<8x8x128xf32, #tpu.memory_space<vmem>>, vector<1x8x128xf32>
    %584 = vector.shape_cast %583 : vector<1x8x128xf32> to vector<8x128xf32>
    %585 = arith.truncf %576 : vector<8x32xf32> to vector<8x32xbf16>
    %c0_240 = arith.constant 0 : index
    %c0_241 = arith.constant 0 : index
    %586 = vector.load %arg5[%c0_240, %c0_241] : memref<32x128xbf16, #tpu.memory_space<vmem>>, vector<32x128xbf16>
    %cst_242 = arith.constant dense<0.000000e+00> : vector<8x128xf32>
    %587 = tpu.matmul %585, %586, %cst_242 {dimension_numbers = #tpu.dot_dimension_numbers<[1], [0], [0], [1], [0, 0, 1, 1], [], []>} : vector<8x32xbf16>, vector<32x128xbf16>, vector<8x128xf32> -> vector<8x128xf32>
    %588 = arith.addf %584, %587 : vector<8x128xf32>
    %589 = arith.truncf %502 : vector<8x32xf32> to vector<8x32xbf16>
    %c0_243 = arith.constant 0 : index
    %c0_244 = arith.constant 0 : index
    %590 = vector.load %arg6[%c0_243, %c0_244] : memref<32x128xbf16, #tpu.memory_space<vmem>>, vector<32x128xbf16>
    %cst_245 = arith.constant dense<0.000000e+00> : vector<8x128xf32>
    %591 = tpu.matmul %589, %590, %cst_245 {dimension_numbers = #tpu.dot_dimension_numbers<[1], [0], [0], [1], [0, 0, 1, 1], [], []>} : vector<8x32xbf16>, vector<32x128xbf16>, vector<8x128xf32> -> vector<8x128xf32>
    %592 = arith.addf %588, %591 : vector<8x128xf32>
    %593 = vector.extract_strided_slice %592 {offsets = [0, 0], sizes = [8, 32], strides = [1, 1]} : vector<8x128xf32> to vector<8x32xf32>
    %594 = vector.extract_strided_slice %592 {offsets = [0, 32], sizes = [8, 32], strides = [1, 1]} : vector<8x128xf32> to vector<8x32xf32>
    %595 = vector.extract_strided_slice %592 {offsets = [0, 64], sizes = [8, 32], strides = [1, 1]} : vector<8x128xf32> to vector<8x32xf32>
    %596 = vector.extract_strided_slice %592 {offsets = [0, 96], sizes = [8, 32], strides = [1, 1]} : vector<8x128xf32> to vector<8x32xf32>
    %597 = arith.negf %594 : vector<8x32xf32>
    %598 = math.exp %597 : vector<8x32xf32>
    %cst_246 = arith.constant 1.000000e+00 : f32
    %599 = vector.broadcast %cst_246 : f32 to vector<8x32xf32>
    %600 = arith.addf %599, %598 : vector<8x32xf32>
    %601 = arith.divf %599, %600 : vector<8x32xf32>
    %602 = arith.mulf %601, %495 : vector<8x32xf32>
    %603 = arith.negf %593 : vector<8x32xf32>
    %604 = math.exp %603 : vector<8x32xf32>
    %cst_247 = arith.constant 1.000000e+00 : f32
    %605 = vector.broadcast %cst_247 : f32 to vector<8x32xf32>
    %606 = arith.addf %605, %604 : vector<8x32xf32>
    %607 = arith.divf %605, %606 : vector<8x32xf32>
    %608 = math.tanh %595 : vector<8x32xf32>
    %609 = arith.mulf %607, %608 : vector<8x32xf32>
    %610 = arith.addf %602, %609 : vector<8x32xf32>
    %611 = arith.negf %596 : vector<8x32xf32>
    %612 = math.exp %611 : vector<8x32xf32>
    %cst_248 = arith.constant 1.000000e+00 : f32
    %613 = vector.broadcast %cst_248 : f32 to vector<8x32xf32>
    %614 = arith.addf %613, %612 : vector<8x32xf32>
    %615 = arith.divf %613, %614 : vector<8x32xf32>
    %616 = math.tanh %610 : vector<8x32xf32>
    %617 = arith.mulf %615, %616 : vector<8x32xf32>
    %618 = arith.truncf %617 : vector<8x32xf32> to vector<8x32xbf16>
    %c0_249 = arith.constant 0 : index
    %c0_250 = arith.constant 0 : index
    %619 = vector.load %arg7[%c0_249, %c0_250] : memref<32x32xbf16, #tpu.memory_space<vmem>>, vector<32x32xbf16>
    %cst_251 = arith.constant dense<0.000000e+00> : vector<8x32xf32>
    %620 = tpu.matmul %618, %619, %cst_251 {dimension_numbers = #tpu.dot_dimension_numbers<[1], [0], [0], [1], [0, 0, 1, 1], [], []>} : vector<8x32xbf16>, vector<32x32xbf16>, vector<8x32xf32> -> vector<8x32xf32>
    %c0_252 = arith.constant 0 : index
    %c0_253 = arith.constant 0 : index
    %621 = vector.load %arg8[%c0_252, %c0_253] : memref<1x32xf32, #tpu.memory_space<vmem>>, vector<1x32xf32>
    %622 = vector.broadcast %621 : vector<1x32xf32> to vector<8x32xf32>
    %623 = arith.addf %620, %622 : vector<8x32xf32>
    %c0_254 = arith.constant 0 : index
    %c0_255 = arith.constant 0 : index
    %c0_256 = arith.constant 0 : index
    %624 = vector.load %arg4[%c0_254, %c0_255, %c0_256] : memref<8x8x32xbf16, #tpu.memory_space<vmem>>, vector<8x8x32xbf16>
    %625 = arith.extf %624 : vector<8x8x32xbf16> to vector<8x8x32xf32>
    %626 = vector.shape_cast %623 : vector<8x32xf32> to vector<8x1x32xf32>
    %627 = vector.broadcast %626 : vector<8x1x32xf32> to vector<8x8x32xf32>
    %628 = arith.addf %625, %627 : vector<8x8x32xf32>
    %629 = math.tanh %628 : vector<8x8x32xf32>
    %c0_257 = arith.constant 0 : index
    %c0_258 = arith.constant 0 : index
    %630 = vector.load %arg9[%c0_257, %c0_258] : memref<1x32xf32, #tpu.memory_space<vmem>>, vector<1x32xf32>
    %631 = vector.shape_cast %630 : vector<1x32xf32> to vector<1x1x32xf32>
    %632 = vector.broadcast %631 : vector<1x1x32xf32> to vector<8x8x32xf32>
    %633 = arith.mulf %629, %632 : vector<8x8x32xf32>
    %cst_259 = arith.constant dense<0.000000e+00> : vector<8x8xf32>
    %634 = vector.multi_reduction <add>, %633, %cst_259 [2] : vector<8x8x32xf32> to vector<8x8xf32>
    %c0_260 = arith.constant 0 : index
    %c0_261 = arith.constant 0 : index
    %635 = vector.load %arg10[%c0_260, %c0_261] : memref<1x1xf32, #tpu.memory_space<vmem>>, vector<1x1xf32>
    %636 = vector.broadcast %635 : vector<1x1xf32> to vector<8x8xf32>
    %637 = arith.addf %634, %636 : vector<8x8xf32>
    %cst_262 = arith.constant dense<0xFF800000> : vector<8xf32>
    %638 = vector.multi_reduction <maximumf>, %637, %cst_262 [1] : vector<8x8xf32> to vector<8xf32>
    %639 = vector.shape_cast %638 : vector<8xf32> to vector<8x1xf32>
    %640 = vector.broadcast %639 : vector<8x1xf32> to vector<8x8xf32>
    %641 = arith.subf %637, %640 : vector<8x8xf32>
    %642 = math.exp %641 : vector<8x8xf32>
    %cst_263 = arith.constant dense<0.000000e+00> : vector<8xf32>
    %643 = vector.multi_reduction <add>, %642, %cst_263 [1] : vector<8x8xf32> to vector<8xf32>
    %644 = vector.shape_cast %643 : vector<8xf32> to vector<8x1xf32>
    %645 = vector.broadcast %644 : vector<8x1xf32> to vector<8x8xf32>
    %646 = arith.divf %642, %645 : vector<8x8xf32>
    %647 = vector.shape_cast %646 : vector<8x8xf32> to vector<8x8x1xf32>
    %c0_264 = arith.constant 0 : index
    %c0_265 = arith.constant 0 : index
    %c0_266 = arith.constant 0 : index
    %648 = vector.load %arg3[%c0_264, %c0_265, %c0_266] : memref<8x8x64xbf16, #tpu.memory_space<vmem>>, vector<8x8x64xbf16>
    %649 = arith.extf %648 : vector<8x8x64xbf16> to vector<8x8x64xf32>
    %650 = vector.broadcast %647 : vector<8x8x1xf32> to vector<8x8x64xf32>
    %651 = arith.mulf %650, %649 : vector<8x8x64xf32>
    %cst_267 = arith.constant dense<0.000000e+00> : vector<8x64xf32>
    %652 = vector.multi_reduction <add>, %651, %cst_267 [1] : vector<8x8x64xf32> to vector<8x64xf32>
    %653 = arith.truncf %652 : vector<8x64xf32> to vector<8x64xbf16>
    %c0_268 = arith.constant 0 : index
    %c0_269 = arith.constant 0 : index
    %654 = vector.load %arg11[%c0_268, %c0_269] : memref<64x128xbf16, #tpu.memory_space<vmem>>, vector<64x128xbf16>
    %cst_270 = arith.constant dense<0.000000e+00> : vector<8x128xf32>
    %655 = tpu.matmul %653, %654, %cst_270 {dimension_numbers = #tpu.dot_dimension_numbers<[1], [0], [0], [1], [0, 0, 1, 1], [], []>} : vector<8x64xbf16>, vector<64x128xbf16>, vector<8x128xf32> -> vector<8x128xf32>
    %c0_271 = arith.constant 0 : index
    %c0_272 = arith.constant 0 : index
    %656 = vector.load %arg14[%c0_271, %c0_272] : memref<1x128xf32, #tpu.memory_space<vmem>>, vector<1x128xf32>
    %657 = vector.broadcast %656 : vector<1x128xf32> to vector<8x128xf32>
    %658 = arith.addf %655, %657 : vector<8x128xf32>
    %659 = arith.truncf %617 : vector<8x32xf32> to vector<8x32xbf16>
    %c0_273 = arith.constant 0 : index
    %c0_274 = arith.constant 0 : index
    %660 = vector.load %arg12[%c0_273, %c0_274] : memref<32x128xbf16, #tpu.memory_space<vmem>>, vector<32x128xbf16>
    %cst_275 = arith.constant dense<0.000000e+00> : vector<8x128xf32>
    %661 = tpu.matmul %659, %660, %cst_275 {dimension_numbers = #tpu.dot_dimension_numbers<[1], [0], [0], [1], [0, 0, 1, 1], [], []>} : vector<8x32xbf16>, vector<32x128xbf16>, vector<8x128xf32> -> vector<8x128xf32>
    %662 = arith.addf %658, %661 : vector<8x128xf32>
    %663 = arith.truncf %576 : vector<8x32xf32> to vector<8x32xbf16>
    %c0_276 = arith.constant 0 : index
    %c0_277 = arith.constant 0 : index
    %664 = vector.load %arg13[%c0_276, %c0_277] : memref<32x128xbf16, #tpu.memory_space<vmem>>, vector<32x128xbf16>
    %cst_278 = arith.constant dense<0.000000e+00> : vector<8x128xf32>
    %665 = tpu.matmul %663, %664, %cst_278 {dimension_numbers = #tpu.dot_dimension_numbers<[1], [0], [0], [1], [0, 0, 1, 1], [], []>} : vector<8x32xbf16>, vector<32x128xbf16>, vector<8x128xf32> -> vector<8x128xf32>
    %666 = arith.addf %662, %665 : vector<8x128xf32>
    %667 = vector.extract_strided_slice %666 {offsets = [0, 0], sizes = [8, 32], strides = [1, 1]} : vector<8x128xf32> to vector<8x32xf32>
    %668 = vector.extract_strided_slice %666 {offsets = [0, 32], sizes = [8, 32], strides = [1, 1]} : vector<8x128xf32> to vector<8x32xf32>
    %669 = vector.extract_strided_slice %666 {offsets = [0, 64], sizes = [8, 32], strides = [1, 1]} : vector<8x128xf32> to vector<8x32xf32>
    %670 = vector.extract_strided_slice %666 {offsets = [0, 96], sizes = [8, 32], strides = [1, 1]} : vector<8x128xf32> to vector<8x32xf32>
    %671 = arith.negf %668 : vector<8x32xf32>
    %672 = math.exp %671 : vector<8x32xf32>
    %cst_279 = arith.constant 1.000000e+00 : f32
    %673 = vector.broadcast %cst_279 : f32 to vector<8x32xf32>
    %674 = arith.addf %673, %672 : vector<8x32xf32>
    %675 = arith.divf %673, %674 : vector<8x32xf32>
    %676 = arith.mulf %675, %569 : vector<8x32xf32>
    %677 = arith.negf %667 : vector<8x32xf32>
    %678 = math.exp %677 : vector<8x32xf32>
    %cst_280 = arith.constant 1.000000e+00 : f32
    %679 = vector.broadcast %cst_280 : f32 to vector<8x32xf32>
    %680 = arith.addf %679, %678 : vector<8x32xf32>
    %681 = arith.divf %679, %680 : vector<8x32xf32>
    %682 = math.tanh %669 : vector<8x32xf32>
    %683 = arith.mulf %681, %682 : vector<8x32xf32>
    %684 = arith.addf %676, %683 : vector<8x32xf32>
    %685 = arith.negf %670 : vector<8x32xf32>
    %686 = math.exp %685 : vector<8x32xf32>
    %cst_281 = arith.constant 1.000000e+00 : f32
    %687 = vector.broadcast %cst_281 : f32 to vector<8x32xf32>
    %688 = arith.addf %687, %686 : vector<8x32xf32>
    %689 = arith.divf %687, %688 : vector<8x32xf32>
    %690 = math.tanh %684 : vector<8x32xf32>
    %691 = arith.mulf %689, %690 : vector<8x32xf32>
    %692 = arith.truncf %691 : vector<8x32xf32> to vector<8x32xbf16>
    %693 = arith.index_cast %c5_i32 : i32 to index
    %c0_282 = arith.constant 0 : index
    %c0_283 = arith.constant 0 : index
    %694 = vector.load %arg15[%693, %c0_282, %c0_283] : memref<8x8x32xbf16, #tpu.memory_space<vmem>>, vector<1x8x32xbf16>
    %695 = vector.shape_cast %694 : vector<1x8x32xbf16> to vector<8x32xbf16>
    %696 = vector.shape_cast %692 : vector<8x32xbf16> to vector<1x8x32xbf16>
    tpu.vector_store %arg15[%693, %c0_282, %c0_283], %696 {strides = array<i32>} : memref<8x8x32xbf16, #tpu.memory_space<vmem>>, vector<1x8x32xbf16>,
    %c6_i32 = arith.constant 6 : i32
    %697 = arith.index_cast %c6_i32 : i32 to index
    %c0_284 = arith.constant 0 : index
    %c0_285 = arith.constant 0 : index
    %698 = vector.load %arg2[%697, %c0_284, %c0_285] : memref<8x8x128xf32, #tpu.memory_space<vmem>>, vector<1x8x128xf32>
    %699 = vector.shape_cast %698 : vector<1x8x128xf32> to vector<8x128xf32>
    %700 = arith.truncf %691 : vector<8x32xf32> to vector<8x32xbf16>
    %c0_286 = arith.constant 0 : index
    %c0_287 = arith.constant 0 : index
    %701 = vector.load %arg5[%c0_286, %c0_287] : memref<32x128xbf16, #tpu.memory_space<vmem>>, vector<32x128xbf16>
    %cst_288 = arith.constant dense<0.000000e+00> : vector<8x128xf32>
    %702 = tpu.matmul %700, %701, %cst_288 {dimension_numbers = #tpu.dot_dimension_numbers<[1], [0], [0], [1], [0, 0, 1, 1], [], []>} : vector<8x32xbf16>, vector<32x128xbf16>, vector<8x128xf32> -> vector<8x128xf32>
    %703 = arith.addf %699, %702 : vector<8x128xf32>
    %704 = arith.truncf %617 : vector<8x32xf32> to vector<8x32xbf16>
    %c0_289 = arith.constant 0 : index
    %c0_290 = arith.constant 0 : index
    %705 = vector.load %arg6[%c0_289, %c0_290] : memref<32x128xbf16, #tpu.memory_space<vmem>>, vector<32x128xbf16>
    %cst_291 = arith.constant dense<0.000000e+00> : vector<8x128xf32>
    %706 = tpu.matmul %704, %705, %cst_291 {dimension_numbers = #tpu.dot_dimension_numbers<[1], [0], [0], [1], [0, 0, 1, 1], [], []>} : vector<8x32xbf16>, vector<32x128xbf16>, vector<8x128xf32> -> vector<8x128xf32>
    %707 = arith.addf %703, %706 : vector<8x128xf32>
    %708 = vector.extract_strided_slice %707 {offsets = [0, 0], sizes = [8, 32], strides = [1, 1]} : vector<8x128xf32> to vector<8x32xf32>
    %709 = vector.extract_strided_slice %707 {offsets = [0, 32], sizes = [8, 32], strides = [1, 1]} : vector<8x128xf32> to vector<8x32xf32>
    %710 = vector.extract_strided_slice %707 {offsets = [0, 64], sizes = [8, 32], strides = [1, 1]} : vector<8x128xf32> to vector<8x32xf32>
    %711 = vector.extract_strided_slice %707 {offsets = [0, 96], sizes = [8, 32], strides = [1, 1]} : vector<8x128xf32> to vector<8x32xf32>
    %712 = arith.negf %709 : vector<8x32xf32>
    %713 = math.exp %712 : vector<8x32xf32>
    %cst_292 = arith.constant 1.000000e+00 : f32
    %714 = vector.broadcast %cst_292 : f32 to vector<8x32xf32>
    %715 = arith.addf %714, %713 : vector<8x32xf32>
    %716 = arith.divf %714, %715 : vector<8x32xf32>
    %717 = arith.mulf %716, %610 : vector<8x32xf32>
    %718 = arith.negf %708 : vector<8x32xf32>
    %719 = math.exp %718 : vector<8x32xf32>
    %cst_293 = arith.constant 1.000000e+00 : f32
    %720 = vector.broadcast %cst_293 : f32 to vector<8x32xf32>
    %721 = arith.addf %720, %719 : vector<8x32xf32>
    %722 = arith.divf %720, %721 : vector<8x32xf32>
    %723 = math.tanh %710 : vector<8x32xf32>
    %724 = arith.mulf %722, %723 : vector<8x32xf32>
    %725 = arith.addf %717, %724 : vector<8x32xf32>
    %726 = arith.negf %711 : vector<8x32xf32>
    %727 = math.exp %726 : vector<8x32xf32>
    %cst_294 = arith.constant 1.000000e+00 : f32
    %728 = vector.broadcast %cst_294 : f32 to vector<8x32xf32>
    %729 = arith.addf %728, %727 : vector<8x32xf32>
    %730 = arith.divf %728, %729 : vector<8x32xf32>
    %731 = math.tanh %725 : vector<8x32xf32>
    %732 = arith.mulf %730, %731 : vector<8x32xf32>
    %733 = arith.truncf %732 : vector<8x32xf32> to vector<8x32xbf16>
    %c0_295 = arith.constant 0 : index
    %c0_296 = arith.constant 0 : index
    %734 = vector.load %arg7[%c0_295, %c0_296] : memref<32x32xbf16, #tpu.memory_space<vmem>>, vector<32x32xbf16>
    %cst_297 = arith.constant dense<0.000000e+00> : vector<8x32xf32>
    %735 = tpu.matmul %733, %734, %cst_297 {dimension_numbers = #tpu.dot_dimension_numbers<[1], [0], [0], [1], [0, 0, 1, 1], [], []>} : vector<8x32xbf16>, vector<32x32xbf16>, vector<8x32xf32> -> vector<8x32xf32>
    %c0_298 = arith.constant 0 : index
    %c0_299 = arith.constant 0 : index
    %736 = vector.load %arg8[%c0_298, %c0_299] : memref<1x32xf32, #tpu.memory_space<vmem>>, vector<1x32xf32>
    %737 = vector.broadcast %736 : vector<1x32xf32> to vector<8x32xf32>
    %738 = arith.addf %735, %737 : vector<8x32xf32>
    %c0_300 = arith.constant 0 : index
    %c0_301 = arith.constant 0 : index
    %c0_302 = arith.constant 0 : index
    %739 = vector.load %arg4[%c0_300, %c0_301, %c0_302] : memref<8x8x32xbf16, #tpu.memory_space<vmem>>, vector<8x8x32xbf16>
    %740 = arith.extf %739 : vector<8x8x32xbf16> to vector<8x8x32xf32>
    %741 = vector.shape_cast %738 : vector<8x32xf32> to vector<8x1x32xf32>
    %742 = vector.broadcast %741 : vector<8x1x32xf32> to vector<8x8x32xf32>
    %743 = arith.addf %740, %742 : vector<8x8x32xf32>
    %744 = math.tanh %743 : vector<8x8x32xf32>
    %c0_303 = arith.constant 0 : index
    %c0_304 = arith.constant 0 : index
    %745 = vector.load %arg9[%c0_303, %c0_304] : memref<1x32xf32, #tpu.memory_space<vmem>>, vector<1x32xf32>
    %746 = vector.shape_cast %745 : vector<1x32xf32> to vector<1x1x32xf32>
    %747 = vector.broadcast %746 : vector<1x1x32xf32> to vector<8x8x32xf32>
    %748 = arith.mulf %744, %747 : vector<8x8x32xf32>
    %cst_305 = arith.constant dense<0.000000e+00> : vector<8x8xf32>
    %749 = vector.multi_reduction <add>, %748, %cst_305 [2] : vector<8x8x32xf32> to vector<8x8xf32>
    %c0_306 = arith.constant 0 : index
    %c0_307 = arith.constant 0 : index
    %750 = vector.load %arg10[%c0_306, %c0_307] : memref<1x1xf32, #tpu.memory_space<vmem>>, vector<1x1xf32>
    %751 = vector.broadcast %750 : vector<1x1xf32> to vector<8x8xf32>
    %752 = arith.addf %749, %751 : vector<8x8xf32>
    %cst_308 = arith.constant dense<0xFF800000> : vector<8xf32>
    %753 = vector.multi_reduction <maximumf>, %752, %cst_308 [1] : vector<8x8xf32> to vector<8xf32>
    %754 = vector.shape_cast %753 : vector<8xf32> to vector<8x1xf32>
    %755 = vector.broadcast %754 : vector<8x1xf32> to vector<8x8xf32>
    %756 = arith.subf %752, %755 : vector<8x8xf32>
    %757 = math.exp %756 : vector<8x8xf32>
    %cst_309 = arith.constant dense<0.000000e+00> : vector<8xf32>
    %758 = vector.multi_reduction <add>, %757, %cst_309 [1] : vector<8x8xf32> to vector<8xf32>
    %759 = vector.shape_cast %758 : vector<8xf32> to vector<8x1xf32>
    %760 = vector.broadcast %759 : vector<8x1xf32> to vector<8x8xf32>
    %761 = arith.divf %757, %760 : vector<8x8xf32>
    %762 = vector.shape_cast %761 : vector<8x8xf32> to vector<8x8x1xf32>
    %c0_310 = arith.constant 0 : index
    %c0_311 = arith.constant 0 : index
    %c0_312 = arith.constant 0 : index
    %763 = vector.load %arg3[%c0_310, %c0_311, %c0_312] : memref<8x8x64xbf16, #tpu.memory_space<vmem>>, vector<8x8x64xbf16>
    %764 = arith.extf %763 : vector<8x8x64xbf16> to vector<8x8x64xf32>
    %765 = vector.broadcast %762 : vector<8x8x1xf32> to vector<8x8x64xf32>
    %766 = arith.mulf %765, %764 : vector<8x8x64xf32>
    %cst_313 = arith.constant dense<0.000000e+00> : vector<8x64xf32>
    %767 = vector.multi_reduction <add>, %766, %cst_313 [1] : vector<8x8x64xf32> to vector<8x64xf32>
    %768 = arith.truncf %767 : vector<8x64xf32> to vector<8x64xbf16>
    %c0_314 = arith.constant 0 : index
    %c0_315 = arith.constant 0 : index
    %769 = vector.load %arg11[%c0_314, %c0_315] : memref<64x128xbf16, #tpu.memory_space<vmem>>, vector<64x128xbf16>
    %cst_316 = arith.constant dense<0.000000e+00> : vector<8x128xf32>
    %770 = tpu.matmul %768, %769, %cst_316 {dimension_numbers = #tpu.dot_dimension_numbers<[1], [0], [0], [1], [0, 0, 1, 1], [], []>} : vector<8x64xbf16>, vector<64x128xbf16>, vector<8x128xf32> -> vector<8x128xf32>
    %c0_317 = arith.constant 0 : index
    %c0_318 = arith.constant 0 : index
    %771 = vector.load %arg14[%c0_317, %c0_318] : memref<1x128xf32, #tpu.memory_space<vmem>>, vector<1x128xf32>
    %772 = vector.broadcast %771 : vector<1x128xf32> to vector<8x128xf32>
    %773 = arith.addf %770, %772 : vector<8x128xf32>
    %774 = arith.truncf %732 : vector<8x32xf32> to vector<8x32xbf16>
    %c0_319 = arith.constant 0 : index
    %c0_320 = arith.constant 0 : index
    %775 = vector.load %arg12[%c0_319, %c0_320] : memref<32x128xbf16, #tpu.memory_space<vmem>>, vector<32x128xbf16>
    %cst_321 = arith.constant dense<0.000000e+00> : vector<8x128xf32>
    %776 = tpu.matmul %774, %775, %cst_321 {dimension_numbers = #tpu.dot_dimension_numbers<[1], [0], [0], [1], [0, 0, 1, 1], [], []>} : vector<8x32xbf16>, vector<32x128xbf16>, vector<8x128xf32> -> vector<8x128xf32>
    %777 = arith.addf %773, %776 : vector<8x128xf32>
    %778 = arith.truncf %691 : vector<8x32xf32> to vector<8x32xbf16>
    %c0_322 = arith.constant 0 : index
    %c0_323 = arith.constant 0 : index
    %779 = vector.load %arg13[%c0_322, %c0_323] : memref<32x128xbf16, #tpu.memory_space<vmem>>, vector<32x128xbf16>
    %cst_324 = arith.constant dense<0.000000e+00> : vector<8x128xf32>
    %780 = tpu.matmul %778, %779, %cst_324 {dimension_numbers = #tpu.dot_dimension_numbers<[1], [0], [0], [1], [0, 0, 1, 1], [], []>} : vector<8x32xbf16>, vector<32x128xbf16>, vector<8x128xf32> -> vector<8x128xf32>
    %781 = arith.addf %777, %780 : vector<8x128xf32>
    %782 = vector.extract_strided_slice %781 {offsets = [0, 0], sizes = [8, 32], strides = [1, 1]} : vector<8x128xf32> to vector<8x32xf32>
    %783 = vector.extract_strided_slice %781 {offsets = [0, 32], sizes = [8, 32], strides = [1, 1]} : vector<8x128xf32> to vector<8x32xf32>
    %784 = vector.extract_strided_slice %781 {offsets = [0, 64], sizes = [8, 32], strides = [1, 1]} : vector<8x128xf32> to vector<8x32xf32>
    %785 = vector.extract_strided_slice %781 {offsets = [0, 96], sizes = [8, 32], strides = [1, 1]} : vector<8x128xf32> to vector<8x32xf32>
    %786 = arith.negf %783 : vector<8x32xf32>
    %787 = math.exp %786 : vector<8x32xf32>
    %cst_325 = arith.constant 1.000000e+00 : f32
    %788 = vector.broadcast %cst_325 : f32 to vector<8x32xf32>
    %789 = arith.addf %788, %787 : vector<8x32xf32>
    %790 = arith.divf %788, %789 : vector<8x32xf32>
    %791 = arith.mulf %790, %684 : vector<8x32xf32>
    %792 = arith.negf %782 : vector<8x32xf32>
    %793 = math.exp %792 : vector<8x32xf32>
    %cst_326 = arith.constant 1.000000e+00 : f32
    %794 = vector.broadcast %cst_326 : f32 to vector<8x32xf32>
    %795 = arith.addf %794, %793 : vector<8x32xf32>
    %796 = arith.divf %794, %795 : vector<8x32xf32>
    %797 = math.tanh %784 : vector<8x32xf32>
    %798 = arith.mulf %796, %797 : vector<8x32xf32>
    %799 = arith.addf %791, %798 : vector<8x32xf32>
    %800 = arith.negf %785 : vector<8x32xf32>
    %801 = math.exp %800 : vector<8x32xf32>
    %cst_327 = arith.constant 1.000000e+00 : f32
    %802 = vector.broadcast %cst_327 : f32 to vector<8x32xf32>
    %803 = arith.addf %802, %801 : vector<8x32xf32>
    %804 = arith.divf %802, %803 : vector<8x32xf32>
    %805 = math.tanh %799 : vector<8x32xf32>
    %806 = arith.mulf %804, %805 : vector<8x32xf32>
    %807 = arith.truncf %806 : vector<8x32xf32> to vector<8x32xbf16>
    %808 = arith.index_cast %c6_i32 : i32 to index
    %c0_328 = arith.constant 0 : index
    %c0_329 = arith.constant 0 : index
    %809 = vector.load %arg15[%808, %c0_328, %c0_329] : memref<8x8x32xbf16, #tpu.memory_space<vmem>>, vector<1x8x32xbf16>
    %810 = vector.shape_cast %809 : vector<1x8x32xbf16> to vector<8x32xbf16>
    %811 = vector.shape_cast %807 : vector<8x32xbf16> to vector<1x8x32xbf16>
    tpu.vector_store %arg15[%808, %c0_328, %c0_329], %811 {strides = array<i32>} : memref<8x8x32xbf16, #tpu.memory_space<vmem>>, vector<1x8x32xbf16>,
    %c7_i32 = arith.constant 7 : i32
    %812 = arith.index_cast %c7_i32 : i32 to index
    %c0_330 = arith.constant 0 : index
    %c0_331 = arith.constant 0 : index
    %813 = vector.load %arg2[%812, %c0_330, %c0_331] : memref<8x8x128xf32, #tpu.memory_space<vmem>>, vector<1x8x128xf32>
    %814 = vector.shape_cast %813 : vector<1x8x128xf32> to vector<8x128xf32>
    %815 = arith.truncf %806 : vector<8x32xf32> to vector<8x32xbf16>
    %c0_332 = arith.constant 0 : index
    %c0_333 = arith.constant 0 : index
    %816 = vector.load %arg5[%c0_332, %c0_333] : memref<32x128xbf16, #tpu.memory_space<vmem>>, vector<32x128xbf16>
    %cst_334 = arith.constant dense<0.000000e+00> : vector<8x128xf32>
    %817 = tpu.matmul %815, %816, %cst_334 {dimension_numbers = #tpu.dot_dimension_numbers<[1], [0], [0], [1], [0, 0, 1, 1], [], []>} : vector<8x32xbf16>, vector<32x128xbf16>, vector<8x128xf32> -> vector<8x128xf32>
    %818 = arith.addf %814, %817 : vector<8x128xf32>
    %819 = arith.truncf %732 : vector<8x32xf32> to vector<8x32xbf16>
    %c0_335 = arith.constant 0 : index
    %c0_336 = arith.constant 0 : index
    %820 = vector.load %arg6[%c0_335, %c0_336] : memref<32x128xbf16, #tpu.memory_space<vmem>>, vector<32x128xbf16>
    %cst_337 = arith.constant dense<0.000000e+00> : vector<8x128xf32>
    %821 = tpu.matmul %819, %820, %cst_337 {dimension_numbers = #tpu.dot_dimension_numbers<[1], [0], [0], [1], [0, 0, 1, 1], [], []>} : vector<8x32xbf16>, vector<32x128xbf16>, vector<8x128xf32> -> vector<8x128xf32>
    %822 = arith.addf %818, %821 : vector<8x128xf32>
    %823 = vector.extract_strided_slice %822 {offsets = [0, 0], sizes = [8, 32], strides = [1, 1]} : vector<8x128xf32> to vector<8x32xf32>
    %824 = vector.extract_strided_slice %822 {offsets = [0, 32], sizes = [8, 32], strides = [1, 1]} : vector<8x128xf32> to vector<8x32xf32>
    %825 = vector.extract_strided_slice %822 {offsets = [0, 64], sizes = [8, 32], strides = [1, 1]} : vector<8x128xf32> to vector<8x32xf32>
    %826 = vector.extract_strided_slice %822 {offsets = [0, 96], sizes = [8, 32], strides = [1, 1]} : vector<8x128xf32> to vector<8x32xf32>
    %827 = arith.negf %824 : vector<8x32xf32>
    %828 = math.exp %827 : vector<8x32xf32>
    %cst_338 = arith.constant 1.000000e+00 : f32
    %829 = vector.broadcast %cst_338 : f32 to vector<8x32xf32>
    %830 = arith.addf %829, %828 : vector<8x32xf32>
    %831 = arith.divf %829, %830 : vector<8x32xf32>
    %832 = arith.mulf %831, %725 : vector<8x32xf32>
    %833 = arith.negf %823 : vector<8x32xf32>
    %834 = math.exp %833 : vector<8x32xf32>
    %cst_339 = arith.constant 1.000000e+00 : f32
    %835 = vector.broadcast %cst_339 : f32 to vector<8x32xf32>
    %836 = arith.addf %835, %834 : vector<8x32xf32>
    %837 = arith.divf %835, %836 : vector<8x32xf32>
    %838 = math.tanh %825 : vector<8x32xf32>
    %839 = arith.mulf %837, %838 : vector<8x32xf32>
    %840 = arith.addf %832, %839 : vector<8x32xf32>
    %841 = arith.negf %826 : vector<8x32xf32>
    %842 = math.exp %841 : vector<8x32xf32>
    %cst_340 = arith.constant 1.000000e+00 : f32
    %843 = vector.broadcast %cst_340 : f32 to vector<8x32xf32>
    %844 = arith.addf %843, %842 : vector<8x32xf32>
    %845 = arith.divf %843, %844 : vector<8x32xf32>
    %846 = math.tanh %840 : vector<8x32xf32>
    %847 = arith.mulf %845, %846 : vector<8x32xf32>
    %848 = arith.truncf %847 : vector<8x32xf32> to vector<8x32xbf16>
    %c0_341 = arith.constant 0 : index
    %c0_342 = arith.constant 0 : index
    %849 = vector.load %arg7[%c0_341, %c0_342] : memref<32x32xbf16, #tpu.memory_space<vmem>>, vector<32x32xbf16>
    %cst_343 = arith.constant dense<0.000000e+00> : vector<8x32xf32>
    %850 = tpu.matmul %848, %849, %cst_343 {dimension_numbers = #tpu.dot_dimension_numbers<[1], [0], [0], [1], [0, 0, 1, 1], [], []>} : vector<8x32xbf16>, vector<32x32xbf16>, vector<8x32xf32> -> vector<8x32xf32>
    %c0_344 = arith.constant 0 : index
    %c0_345 = arith.constant 0 : index
    %851 = vector.load %arg8[%c0_344, %c0_345] : memref<1x32xf32, #tpu.memory_space<vmem>>, vector<1x32xf32>
    %852 = vector.broadcast %851 : vector<1x32xf32> to vector<8x32xf32>
    %853 = arith.addf %850, %852 : vector<8x32xf32>
    %c0_346 = arith.constant 0 : index
    %c0_347 = arith.constant 0 : index
    %c0_348 = arith.constant 0 : index
    %854 = vector.load %arg4[%c0_346, %c0_347, %c0_348] : memref<8x8x32xbf16, #tpu.memory_space<vmem>>, vector<8x8x32xbf16>
    %855 = arith.extf %854 : vector<8x8x32xbf16> to vector<8x8x32xf32>
    %856 = vector.shape_cast %853 : vector<8x32xf32> to vector<8x1x32xf32>
    %857 = vector.broadcast %856 : vector<8x1x32xf32> to vector<8x8x32xf32>
    %858 = arith.addf %855, %857 : vector<8x8x32xf32>
    %859 = math.tanh %858 : vector<8x8x32xf32>
    %c0_349 = arith.constant 0 : index
    %c0_350 = arith.constant 0 : index
    %860 = vector.load %arg9[%c0_349, %c0_350] : memref<1x32xf32, #tpu.memory_space<vmem>>, vector<1x32xf32>
    %861 = vector.shape_cast %860 : vector<1x32xf32> to vector<1x1x32xf32>
    %862 = vector.broadcast %861 : vector<1x1x32xf32> to vector<8x8x32xf32>
    %863 = arith.mulf %859, %862 : vector<8x8x32xf32>
    %cst_351 = arith.constant dense<0.000000e+00> : vector<8x8xf32>
    %864 = vector.multi_reduction <add>, %863, %cst_351 [2] : vector<8x8x32xf32> to vector<8x8xf32>
    %c0_352 = arith.constant 0 : index
    %c0_353 = arith.constant 0 : index
    %865 = vector.load %arg10[%c0_352, %c0_353] : memref<1x1xf32, #tpu.memory_space<vmem>>, vector<1x1xf32>
    %866 = vector.broadcast %865 : vector<1x1xf32> to vector<8x8xf32>
    %867 = arith.addf %864, %866 : vector<8x8xf32>
    %cst_354 = arith.constant dense<0xFF800000> : vector<8xf32>
    %868 = vector.multi_reduction <maximumf>, %867, %cst_354 [1] : vector<8x8xf32> to vector<8xf32>
    %869 = vector.shape_cast %868 : vector<8xf32> to vector<8x1xf32>
    %870 = vector.broadcast %869 : vector<8x1xf32> to vector<8x8xf32>
    %871 = arith.subf %867, %870 : vector<8x8xf32>
    %872 = math.exp %871 : vector<8x8xf32>
    %cst_355 = arith.constant dense<0.000000e+00> : vector<8xf32>
    %873 = vector.multi_reduction <add>, %872, %cst_355 [1] : vector<8x8xf32> to vector<8xf32>
    %874 = vector.shape_cast %873 : vector<8xf32> to vector<8x1xf32>
    %875 = vector.broadcast %874 : vector<8x1xf32> to vector<8x8xf32>
    %876 = arith.divf %872, %875 : vector<8x8xf32>
    %877 = vector.shape_cast %876 : vector<8x8xf32> to vector<8x8x1xf32>
    %c0_356 = arith.constant 0 : index
    %c0_357 = arith.constant 0 : index
    %c0_358 = arith.constant 0 : index
    %878 = vector.load %arg3[%c0_356, %c0_357, %c0_358] : memref<8x8x64xbf16, #tpu.memory_space<vmem>>, vector<8x8x64xbf16>
    %879 = arith.extf %878 : vector<8x8x64xbf16> to vector<8x8x64xf32>
    %880 = vector.broadcast %877 : vector<8x8x1xf32> to vector<8x8x64xf32>
    %881 = arith.mulf %880, %879 : vector<8x8x64xf32>
    %cst_359 = arith.constant dense<0.000000e+00> : vector<8x64xf32>
    %882 = vector.multi_reduction <add>, %881, %cst_359 [1] : vector<8x8x64xf32> to vector<8x64xf32>
    %883 = arith.truncf %882 : vector<8x64xf32> to vector<8x64xbf16>
    %c0_360 = arith.constant 0 : index
    %c0_361 = arith.constant 0 : index
    %884 = vector.load %arg11[%c0_360, %c0_361] : memref<64x128xbf16, #tpu.memory_space<vmem>>, vector<64x128xbf16>
    %cst_362 = arith.constant dense<0.000000e+00> : vector<8x128xf32>
    %885 = tpu.matmul %883, %884, %cst_362 {dimension_numbers = #tpu.dot_dimension_numbers<[1], [0], [0], [1], [0, 0, 1, 1], [], []>} : vector<8x64xbf16>, vector<64x128xbf16>, vector<8x128xf32> -> vector<8x128xf32>
    %c0_363 = arith.constant 0 : index
    %c0_364 = arith.constant 0 : index
    %886 = vector.load %arg14[%c0_363, %c0_364] : memref<1x128xf32, #tpu.memory_space<vmem>>, vector<1x128xf32>
    %887 = vector.broadcast %886 : vector<1x128xf32> to vector<8x128xf32>
    %888 = arith.addf %885, %887 : vector<8x128xf32>
    %889 = arith.truncf %847 : vector<8x32xf32> to vector<8x32xbf16>
    %c0_365 = arith.constant 0 : index
    %c0_366 = arith.constant 0 : index
    %890 = vector.load %arg12[%c0_365, %c0_366] : memref<32x128xbf16, #tpu.memory_space<vmem>>, vector<32x128xbf16>
    %cst_367 = arith.constant dense<0.000000e+00> : vector<8x128xf32>
    %891 = tpu.matmul %889, %890, %cst_367 {dimension_numbers = #tpu.dot_dimension_numbers<[1], [0], [0], [1], [0, 0, 1, 1], [], []>} : vector<8x32xbf16>, vector<32x128xbf16>, vector<8x128xf32> -> vector<8x128xf32>
    %892 = arith.addf %888, %891 : vector<8x128xf32>
    %893 = arith.truncf %806 : vector<8x32xf32> to vector<8x32xbf16>
    %c0_368 = arith.constant 0 : index
    %c0_369 = arith.constant 0 : index
    %894 = vector.load %arg13[%c0_368, %c0_369] : memref<32x128xbf16, #tpu.memory_space<vmem>>, vector<32x128xbf16>
    %cst_370 = arith.constant dense<0.000000e+00> : vector<8x128xf32>
    %895 = tpu.matmul %893, %894, %cst_370 {dimension_numbers = #tpu.dot_dimension_numbers<[1], [0], [0], [1], [0, 0, 1, 1], [], []>} : vector<8x32xbf16>, vector<32x128xbf16>, vector<8x128xf32> -> vector<8x128xf32>
    %896 = arith.addf %892, %895 : vector<8x128xf32>
    %897 = vector.extract_strided_slice %896 {offsets = [0, 0], sizes = [8, 32], strides = [1, 1]} : vector<8x128xf32> to vector<8x32xf32>
    %898 = vector.extract_strided_slice %896 {offsets = [0, 32], sizes = [8, 32], strides = [1, 1]} : vector<8x128xf32> to vector<8x32xf32>
    %899 = vector.extract_strided_slice %896 {offsets = [0, 64], sizes = [8, 32], strides = [1, 1]} : vector<8x128xf32> to vector<8x32xf32>
    %900 = vector.extract_strided_slice %896 {offsets = [0, 96], sizes = [8, 32], strides = [1, 1]} : vector<8x128xf32> to vector<8x32xf32>
    %901 = arith.negf %898 : vector<8x32xf32>
    %902 = math.exp %901 : vector<8x32xf32>
    %cst_371 = arith.constant 1.000000e+00 : f32
    %903 = vector.broadcast %cst_371 : f32 to vector<8x32xf32>
    %904 = arith.addf %903, %902 : vector<8x32xf32>
    %905 = arith.divf %903, %904 : vector<8x32xf32>
    %906 = arith.mulf %905, %799 : vector<8x32xf32>
    %907 = arith.negf %897 : vector<8x32xf32>
    %908 = math.exp %907 : vector<8x32xf32>
    %cst_372 = arith.constant 1.000000e+00 : f32
    %909 = vector.broadcast %cst_372 : f32 to vector<8x32xf32>
    %910 = arith.addf %909, %908 : vector<8x32xf32>
    %911 = arith.divf %909, %910 : vector<8x32xf32>
    %912 = math.tanh %899 : vector<8x32xf32>
    %913 = arith.mulf %911, %912 : vector<8x32xf32>
    %914 = arith.addf %906, %913 : vector<8x32xf32>
    %915 = arith.negf %900 : vector<8x32xf32>
    %916 = math.exp %915 : vector<8x32xf32>
    %cst_373 = arith.constant 1.000000e+00 : f32
    %917 = vector.broadcast %cst_373 : f32 to vector<8x32xf32>
    %918 = arith.addf %917, %916 : vector<8x32xf32>
    %919 = arith.divf %917, %918 : vector<8x32xf32>
    %920 = math.tanh %914 : vector<8x32xf32>
    %921 = arith.mulf %919, %920 : vector<8x32xf32>
    %922 = arith.truncf %921 : vector<8x32xf32> to vector<8x32xbf16>
    %923 = arith.index_cast %c7_i32 : i32 to index
    %c0_374 = arith.constant 0 : index
    %c0_375 = arith.constant 0 : index
    %924 = vector.load %arg15[%923, %c0_374, %c0_375] : memref<8x8x32xbf16, #tpu.memory_space<vmem>>, vector<1x8x32xbf16>
    %925 = vector.shape_cast %924 : vector<1x8x32xbf16> to vector<8x32xbf16>
    %926 = vector.shape_cast %922 : vector<8x32xbf16> to vector<1x8x32xbf16>
    tpu.vector_store %arg15[%923, %c0_374, %c0_375], %926 {strides = array<i32>} : memref<8x8x32xbf16, #tpu.memory_space<vmem>>, vector<1x8x32xbf16>,
    %c8_i32 = arith.constant 8 : i32
    %c0_376 = arith.constant 0 : index
    %c0_377 = arith.constant 0 : index
    %927 = vector.load %arg16[%c0_376, %c0_377] : memref<8x32xf32, #tpu.memory_space<vmem>>, vector<8x32xf32>
    tpu.vector_store %arg16[%c0_376, %c0_377], %847 {strides = array<i32>} : memref<8x32xf32, #tpu.memory_space<vmem>>, vector<8x32xf32>,
    %c0_378 = arith.constant 0 : index
    %c0_379 = arith.constant 0 : index
    %928 = vector.load %arg17[%c0_378, %c0_379] : memref<8x32xf32, #tpu.memory_space<vmem>>, vector<8x32xf32>
    tpu.vector_store %arg17[%c0_378, %c0_379], %840 {strides = array<i32>} : memref<8x32xf32, #tpu.memory_space<vmem>>, vector<8x32xf32>,
    %c0_380 = arith.constant 0 : index
    %c0_381 = arith.constant 0 : index
    %929 = vector.load %arg18[%c0_380, %c0_381] : memref<8x32xf32, #tpu.memory_space<vmem>>, vector<8x32xf32>
    tpu.vector_store %arg18[%c0_380, %c0_381], %921 {strides = array<i32>} : memref<8x32xf32, #tpu.memory_space<vmem>>, vector<8x32xf32>,
    %c0_382 = arith.constant 0 : index
    %c0_383 = arith.constant 0 : index
    %930 = vector.load %arg19[%c0_382, %c0_383] : memref<8x32xf32, #tpu.memory_space<vmem>>, vector<8x32xf32>
    tpu.vector_store %arg19[%c0_382, %c0_383], %914 {strides = array<i32>} : memref<8x32xf32, #tpu.memory_space<vmem>>, vector<8x32xf32>,
    return
  }
  func.func @transform_0(%arg0: i32, %arg1: i32) -> (i32, i32, i32) {
    %c0_i32 = arith.constant 0 : i32
    %c0_i32_0 = arith.constant 0 : i32
    return %arg1, %arg0, %c0_i32 : i32, i32, i32
  }
  func.func @transform_1(%arg0: i32, %arg1: i32) -> (i32, i32, i32) {
    %c0_i32 = arith.constant 0 : i32
    %c0_i32_0 = arith.constant 0 : i32
    %c0_i32_1 = arith.constant 0 : i32
    return %arg0, %c0_i32, %c0_i32_0 : i32, i32, i32
  }
  func.func @transform_2(%arg0: i32, %arg1: i32) -> (i32, i32, i32) {
    %c0_i32 = arith.constant 0 : i32
    %c0_i32_0 = arith.constant 0 : i32
    %c0_i32_1 = arith.constant 0 : i32
    return %arg0, %c0_i32, %c0_i32_0 : i32, i32, i32
  }
  func.func @transform_3(%arg0: i32, %arg1: i32) -> (i32, i32) {
    %c0_i32 = arith.constant 0 : i32
    %c0_i32_0 = arith.constant 0 : i32
    %c0_i32_1 = arith.constant 0 : i32
    return %c0_i32, %c0_i32_0 : i32, i32
  }
  func.func @transform_4(%arg0: i32, %arg1: i32) -> (i32, i32) {
    %c0_i32 = arith.constant 0 : i32
    %c0_i32_0 = arith.constant 0 : i32
    %c0_i32_1 = arith.constant 0 : i32
    return %c0_i32, %c0_i32_0 : i32, i32
  }
  func.func @transform_5(%arg0: i32, %arg1: i32) -> (i32, i32) {
    %c0_i32 = arith.constant 0 : i32
    %c0_i32_0 = arith.constant 0 : i32
    %c0_i32_1 = arith.constant 0 : i32
    return %c0_i32, %c0_i32_0 : i32, i32
  }
  func.func @transform_6(%arg0: i32, %arg1: i32) -> (i32, i32) {
    %c0_i32 = arith.constant 0 : i32
    %c0_i32_0 = arith.constant 0 : i32
    %c0_i32_1 = arith.constant 0 : i32
    return %c0_i32, %c0_i32_0 : i32, i32
  }
  func.func @transform_7(%arg0: i32, %arg1: i32) -> (i32, i32) {
    %c0_i32 = arith.constant 0 : i32
    %c0_i32_0 = arith.constant 0 : i32
    %c0_i32_1 = arith.constant 0 : i32
    return %c0_i32, %c0_i32_0 : i32, i32
  }
  func.func @transform_8(%arg0: i32, %arg1: i32) -> (i32, i32) {
    %c0_i32 = arith.constant 0 : i32
    %c0_i32_0 = arith.constant 0 : i32
    %c0_i32_1 = arith.constant 0 : i32
    return %c0_i32, %c0_i32_0 : i32, i32
  }
  func.func @transform_9(%arg0: i32, %arg1: i32) -> (i32, i32) {
    %c0_i32 = arith.constant 0 : i32
    %c0_i32_0 = arith.constant 0 : i32
    %c0_i32_1 = arith.constant 0 : i32
    return %c0_i32, %c0_i32_0 : i32, i32
  }
  func.func @transform_10(%arg0: i32, %arg1: i32) -> (i32, i32) {
    %c0_i32 = arith.constant 0 : i32
    %c0_i32_0 = arith.constant 0 : i32
    %c0_i32_1 = arith.constant 0 : i32
    return %c0_i32, %c0_i32_0 : i32, i32
  }
  func.func @transform_11(%arg0: i32, %arg1: i32) -> (i32, i32) {
    %c0_i32 = arith.constant 0 : i32
    %c0_i32_0 = arith.constant 0 : i32
    %c0_i32_1 = arith.constant 0 : i32
    return %c0_i32, %c0_i32_0 : i32, i32
  }
  func.func @transform_12(%arg0: i32, %arg1: i32) -> (i32, i32) {
    %c0_i32 = arith.constant 0 : i32
    %c0_i32_0 = arith.constant 0 : i32
    %c0_i32_1 = arith.constant 0 : i32
    return %c0_i32, %c0_i32_0 : i32, i32
  }
  func.func @transform_13(%arg0: i32, %arg1: i32) -> (i32, i32, i32) {
    %c0_i32 = arith.constant 0 : i32
    %c0_i32_0 = arith.constant 0 : i32
    return %arg1, %arg0, %c0_i32 : i32, i32, i32
  }
}

</mosaic_0001>

<bundles_post_ra>
// kernel: tpu_custom_call.1
= control target key start
LH: loop header
LB: loop body
LE: loop exit
PB: predicated region body
PF: predicated region fallthrough
CT: control target
= control target key end

     0   :  { %s12423_s0 = inlined_call_operand.hbm [shape: f32[8,8,128], index: 0, kind: input, shape index: {}]   ;;  %s12424_s1 = inlined_call_operand.hbm [shape: bf16[8,8,64], index: 1, kind: input, shape index: {}]   ;;  %s12425_s2 = inlined_call_operand.hbm [shape: bf16[8,8,32], index: 2, kind: input, shape index: {}]   ;;  %s12426_s3 = inlined_call_operand.hbm [shape: bf16[32,128], index: 3, kind: input, shape index: {}]   ;;  %s12427_s4 = inlined_call_operand.hbm [shape: bf16[32,128], index: 4, kind: input, shape index: {}]   ;;  %s12428_s5 = inlined_call_operand.hbm [shape: bf16[32,32], index: 5, kind: input, shape index: {}]   ;;  %s12429_s6 = inlined_call_operand.vmem [shape: f32[1,32], index: 6, kind: input, shape index: {}]   ;;  %s12430_s7 = inlined_call_operand.vmem [shape: f32[1,32], index: 7, kind: input, shape index: {}]   ;;  %s12431_s8 = inlined_call_operand.<no memory space> [shape: f32[1,1], index: 8, kind: input, shape index: {}]   ;;  %s12432_s9 = inlined_call_operand.hbm [shape: bf16[64,128], index: 9, kind: input, shape index: {}]   ;;  %s12433_s10 = inlined_call_operand.vmem [shape: bf16[32,128], index: 10, kind: input, shape index: {}]   ;;  %s12434_s11 = inlined_call_operand.hbm [shape: bf16[32,128], index: 11, kind: input, shape index: {}]   ;;  %s12435_s12 = inlined_call_operand.vmem [shape: f32[1,128], index: 12, kind: input, shape index: {}]   ;;  %s12436_s13 = inlined_call_operand.hbm [shape: bf16[8,8,32], index: 13, kind: output, shape index: {}]  }
   0x1   :  { %v18_v0 = vstv %s12431_s8 }
   0x2   :  { %19 = vst [vmem:[#allocation6] sm:$0x1] %v18_v0 }
   0x3   :  { %20 = vsyncpa [#allocation8], 0 }
   0x4   :  { %21 = vsyncpa [#allocation11], 0 }
   0x5   :  { %22 = vsyncpa [#allocation14], 0 }
   0x6   :  { %23 = vsyncpa [#allocation17], 0 }
   0x7   :  { %24 = vsyncpa [#allocation20], 0 }
   0x8   :  { %25 = vsyncpa [#allocation9], 0  ;;  %s10359_s27 = smov [#allocation10]  }
   0x9   :  { %s43_s28 = sshll.u32 %s10359_s27, 4  ;;  %s44_s28 = int_to_ptr.vmem [resolvable:$true] %s43_s28 }
   0xa   :  { %s10175_s29 = scalar_lea.vmem %s44_s28, 512  ;;  %p10180_p1 = scmp.lt.s32.totalorder %s44_s28, %s44_s28 }
   0xb   :  { %p10176_p0 = scmp.ne.s32.totalorder %s44_s28, %s10175_s29  ;;  %p10181_p2 = scmp.lt.s32.totalorder %s10175_s29, %s10175_s29 }
   0xd   :  { %p10182_p3 = por %p10181_p2, %p10180_p1 }
   0xf   :  { %p10183_p4 = pnand %p10182_p3, %p10176_p0 }
  0x11   :  { %10186 = shalt.err (!%p10183_p4)
}
  0x12   :  { %s10360_s30 = smov 64   ;;  %s10361_s14 = smov 4  }
  0x13   :  { %49 = dma.hbm_to_vmem [thread:$0]  %s12424_s1, 512, %s44_s28, [#allocation11], %s10360_s30, %s10360_s30, %s10361_s14  }
  0x14   :  { %s10362_s16 = smov [#allocation13]   ;;  %s10363_s18 = smov [#allocation16]  }
  0x15   :  { %s67_s17 = sshll.u32 %s10362_s16, 4  ;;  %s91_s19 = sshll.u32 %s10363_s18, 4  ;;  %s68_s17 = int_to_ptr.vmem [resolvable:$true] %s67_s17  ;;  %s92_s19 = int_to_ptr.vmem [resolvable:$true] %s91_s19 }
  0x16   :  { %s10195_s20 = scalar_lea.vmem %s68_s17, 256  ;;  %p10200_p6 = scmp.lt.s32.totalorder %s68_s17, %s68_s17 }
  0x17   :  { %p10196_p5 = scmp.ne.s32.totalorder %s68_s17, %s10195_s20  ;;  %p10201_p7 = scmp.lt.s32.totalorder %s10195_s20, %s10195_s20 }
  0x19   :  { %p10202_p8 = por %p10201_p7, %p10200_p6 }
  0x1b   :  { %p10203_p9 = pnand %p10202_p8, %p10196_p5 }
  0x1d   :  { %10206 = shalt.err (!%p10203_p9)
}
  0x1e   :  { %73 = dma.hbm_to_vmem [thread:$0]  %s12426_s3, 256, %s68_s17, [#allocation14], %s10360_s30, %s10360_s30, %s10361_s14  }
  0x1f   :  { %s10215_s1 = scalar_lea.vmem %s92_s19, 256  ;;  %p10220_p11 = scmp.lt.s32.totalorder %s92_s19, %s92_s19 }
  0x20   :  { %p10216_p10 = scmp.ne.s32.totalorder %s92_s19, %s10215_s1  ;;  %p10221_p12 = scmp.lt.s32.totalorder %s10215_s1, %s10215_s1 }
  0x22   :  { %p10222_p13 = por %p10221_p12, %p10220_p11 }
  0x24   :  { %p10223_p0 = pnand %p10222_p13, %p10216_p10 }
  0x26   :  { %10226 = shalt.err (!%p10223_p0)
}
  0x27   :  { %97 = dma.hbm_to_vmem [thread:$0]  %s12428_s5, 256, %s92_s19, [#allocation17], %s10360_s30, %s10360_s30, %s10361_s14  }
  0x28   :  { %s10364_s25 = smov [#allocation7]  }
  0x29   :  { %s31_s26 = sshll.u32 %s10364_s25, 4  ;;  %s32_s26 = int_to_ptr.vmem [resolvable:$true] %s31_s26 }
  0x2a   :  { %s10235_s27 = scalar_lea.vmem %s32_s26, 1024  ;;  %p10240_p2 = scmp.lt.s32.totalorder %s32_s26, %s32_s26 }
  0x2b   :  { %p10236_p1 = scmp.ne.s32.totalorder %s32_s26, %s10235_s27  ;;  %p10241_p3 = scmp.lt.s32.totalorder %s10235_s27, %s10235_s27 }
  0x2d   :  { %p10242_p4 = por %p10241_p3, %p10240_p2 }
  0x2f   :  { %p10243_p5 = pnand %p10242_p4, %p10236_p1 }
  0x31   :  { %10246 = shalt.err (!%p10243_p5)
}
  0x32   :  { %s10365_s3 = smov 128   ;;  %s10366_s28 = smov 8  }
  0x33   :  { %37 = dma.hbm_to_vmem [thread:$0]  %s12423_s0, 1024, %s32_s26, [#allocation8], %s10365_s3, %s10365_s3, %s10366_s28  }
  0x34   :  { %s10367_s15 = smov [#allocation12]   ;;  %s10368_s17 = smov [#allocation15]  }
  0x35   :  { %s55_s16 = sshll.u32 %s10367_s15, 4  ;;  %s79_s5 = sshll.u32 %s10368_s17, 4  ;;  %s56_s16 = int_to_ptr.vmem [resolvable:$true] %s55_s16  ;;  %s80_s5 = int_to_ptr.vmem [resolvable:$true] %s79_s5 }
  0x36   :  { %s10255_s18 = scalar_lea.vmem %s56_s16, 512  ;;  %p10260_p7 = scmp.lt.s32.totalorder %s56_s16, %s56_s16 }
  0x37   :  { %p10256_p6 = scmp.ne.s32.totalorder %s56_s16, %s10255_s18  ;;  %p10261_p8 = scmp.lt.s32.totalorder %s10255_s18, %s10255_s18 }
  0x39   :  { %p10262_p9 = por %p10261_p8, %p10260_p7 }
  0x3b   :  { %p10263_p10 = pnand %p10262_p9, %p10256_p6 }
  0x3d   :  { %10266 = shalt.err (!%p10263_p10)
}
  0x3e   :  { %61 = dma.hbm_to_vmem [thread:$0]  %s12425_s2, 512, %s56_s16, [#allocation11], %s10360_s30, %s10360_s30, %s10361_s14  }
  0x3f   :  { %s10275_s0 = scalar_lea.vmem %s80_s5, 256  ;;  %p10280_p12 = scmp.lt.s32.totalorder %s80_s5, %s80_s5 }
  0x40   :  { %p10276_p11 = scmp.ne.s32.totalorder %s80_s5, %s10275_s0  ;;  %p10281_p13 = scmp.lt.s32.totalorder %s10275_s0, %s10275_s0 }
  0x42   :  { %p10282_p0 = por %p10281_p13, %p10280_p12 }
  0x44   :  { %p10283_p1 = pnand %p10282_p0, %p10276_p11 }
  0x46   :  { %10286 = shalt.err (!%p10283_p1)
}
  0x47   :  { %85 = dma.hbm_to_vmem [thread:$0]  %s12427_s4, 256, %s80_s5, [#allocation14], %s10360_s30, %s10360_s30, %s10361_s14  }
  0x48   :  { %s10369_s1 = smov [#allocation18]   ;;  %s10370_s24 = smov [#allocation19]  }
  0x49   :  { %s109_s23 = sshll.u32 %s10369_s1, 4  ;;  %s123_s25 = sshll.u32 %s10370_s24, 4  ;;  %s110_s23 = int_to_ptr.vmem [resolvable:$true] %s109_s23  ;;  %s124_s25 = int_to_ptr.vmem [resolvable:$true] %s123_s25 }
  0x4a   :  { %s10295_s2 = scalar_lea.vmem %s110_s23, 512  ;;  %p10300_p3 = scmp.lt.s32.totalorder %s110_s23, %s110_s23 }
  0x4b   :  { %p10296_p2 = scmp.ne.s32.totalorder %s110_s23, %s10295_s2  ;;  %p10301_p4 = scmp.lt.s32.totalorder %s10295_s2, %s10295_s2 }
  0x4d   :  { %p10302_p5 = por %p10301_p4, %p10300_p3 }
  0x4f   :  { %p10303_p6 = pnand %p10302_p5, %p10296_p2 }
  0x51   :  { %10306 = shalt.err (!%p10303_p6)
}
  0x52   :  { %115 = dma.hbm_to_vmem [thread:$0]  %s12432_s9, 512, %s110_s23, [#allocation17], %s10360_s30, %s10360_s30, %s10361_s14  }
  0x53   :  { %s10315_s4 = scalar_lea.vmem %s124_s25, 256  ;;  %p10320_p8 = scmp.lt.s32.totalorder %s124_s25, %s124_s25 }
  0x54   :  { %p10316_p7 = scmp.ne.s32.totalorder %s124_s25, %s10315_s4  ;;  %p10321_p9 = scmp.lt.s32.totalorder %s10315_s4, %s10315_s4 }
  0x56   :  { %p10322_p10 = por %p10321_p9, %p10320_p8 }
  0x58   :  { %p10323_p11 = pnand %p10322_p10, %p10316_p7 }
  0x5a   :  { %10326 = shalt.err (!%p10323_p11)
}
  0x5b   :  { %129 = dma.hbm_to_vmem [thread:$0]  %s12434_s11, 256, %s124_s25, [#allocation20], %s10360_s30, %s10360_s30, %s10361_s14  }
  0x5c   :  { %10347 = dma.done.wait [#allocation8], 1024  }
  0x5d   :  { %10348 = vsyncadd [#allocation8], 4294966272 }
  0x5e   :  { %10349 = dma.done.wait [#allocation11], 1024  }
  0x5f   :  { %10350 = vsyncadd [#allocation11], 4294966272 }
  0x60   :  { %10351 = dma.done.wait [#allocation14], 512  }
  0x61   :  { %10352 = vsyncadd [#allocation14], 4294966784 }
  0x62   :  { %10353 = dma.done.wait [#allocation17], 768  }
  0x63   :  { %10354 = vsyncadd [#allocation17], 4294966528 }
  0x64   :  { %10355 = dma.done.wait [#allocation20], 256  }
  0x65   :  { %10356 = vsyncadd [#allocation20], 4294967040  ;;  %vm161_vm0 = vcmask 261120   ;;  %v12479_v1 = vmov 0.0   ;;  %vm10372_vm1 = vmmov 0   ;;  %v9542_v2 = vld [vmem:[#allocation13 + $0x8] sm:$0xff]   ;;  %v413_v49 = vlaneseq }
  0x66   :  { %9105 = vmatprep.subr.bf16.mxu0 %v12479_v1  ;;  %9113 = vmatprep.subr.bf16.mxu1 %v12479_v1  ;;  %164 = vst.msk [vmem:[#allocation4] sm:$0xff] %vm161_vm0, %v12479_v1  ;;  %162 = vst.msk [vmem:[#allocation2] sm:$0xff] %vm161_vm0, %v12479_v1  ;;  %v9543_v3 = vld [vmem:[#allocation15 + $0x8] sm:$0xff]   ;;  %v9544_v4 = vld [vmem:[#allocation13] sm:$0xff]   ;;  %s10373_s9 = smov 32   ;;  %v10374_v46 = vmov 0  }
  0x67   :  { %163 = vst.msk [vmem:[#allocation3] sm:$0xff] %vm161_vm0, %v12479_v1  ;;  %165 = vst.msk [vmem:[#allocation5] sm:$0xff] %vm161_vm0, %v12479_v1  ;;  %9109 = vmatprep.mubr.msk.bf16.mxu0 %vm10372_vm1, %v12479_v1  ;;  %9117 = vmatprep.mubr.msk.bf16.mxu1 %vm10372_vm1, %v12479_v1  ;;  %v9545_v5 = vld [vmem:[#allocation15] sm:$0xff]   ;;  %v170_v10 = vld [vmem:[#allocation7] sm:$0xff]  ;;  %v10375_v47 = vmov 1966171168  }
  0x68   :  { %9106 = vmatpush3.bf16.msra.mxu0 %v9542_v2  ;;  %9114 = vmatpush3.bf16.msra.mxu1 %v9543_v3  ;;  %v9546_v33 = vld [vmem:[#allocation16 + $0x8] sm:$0xff]   ;;  %v9547_v34 = vld [vmem:[#allocation16] sm:$0xff]   ;;  %v9550_v42 = vld [vmem:[#allocation19 + $0x8] sm:$0xff]   ;;  %v411_v48 = vunpack.c.l.s4 %v10375_v47  ;;  %v10559_v51 = vshrl.u32 %v413_v49, 7  ;;  %vm613_vm2 = vcmask 1041409   ;;  %vm615_vm3 = vcmask 1042434  }
  0x69   :  { %9107 = vmatprep.subr.bf16.mxu0 %v12479_v1  ;;  %9115 = vmatprep.subr.bf16.mxu1 %v12479_v1  ;;  %v9548_v39 = vld [vmem:[%s12433_s10 + $0x8] sm:$0xff]   ;;  %v9549_v41 = vld [vmem:[%s12433_s10] sm:$0xff]   ;;  %v9551_v43 = vld [vmem:[#allocation19] sm:$0xff]   ;;  %vm617_vm4 = vcmask 1043459   ;;  %vm619_vm5 = vcmask 1044484   ;;  %vm621_vm6 = vcmask 1045509  }
  0x6a   :  { %v9552_v44 = vld [vmem:[#allocation15 + $0x8] sm:$0xff]   ;;  %v9553_v45 = vld [vmem:[#allocation15] sm:$0xff]   ;;  %9540 = vset.pattern.permute.xlu0 %v10374_v46  ;;  %9541 = vset.pattern.permute.xlu1 %v10374_v46  ;;  %v412_v50 = vunpack.c.0.s8 %v411_v48  ;;  %v10570_v57 = vld [vmem:[#allocation12] sm:$0xff]   ;;  %v10574_v60 = vsub.s32 0, %v10559_v51  ;;  %vm623_vm7 = vcmask 1046534   ;;  %vm625_vm8 = vcmask 1047559  }
  0x6b   :  { %v10564_v52 = vld [vmem:[%s12429_s6] ss:$0 sm:$0xff]  ;;  %v10576_v62 = vld [vmem:[#allocation12 + $0x8] sm:$0xff]   ;;  %v10578_v63 = vld [vmem:[#allocation12 + $0x10] sm:$0xff]   ;;  %vm628_vm9 = vcmask 64512   ;;  %vm893_vm10 = vcmask 523264  }
  0x6c   :  { %9108 = vmatpush3.bf16.msra.mxu0 %v9544_v4  ;;  %9116 = vmatpush3.bf16.msra.mxu1 %v9545_v5  ;;  %v10567_v53 = vsub.s32 %v412_v50, %v10559_v51  ;;  %v8643_v4 = vunpack.c.l.bf16 %v10570_v57  ;;  %v8644_v5 = vunpack.c.h.bf16 %v10570_v57  ;;  %v10626_v47 = vld [vmem:[%s12430_s7] ss:$0 sm:$0xff]  ;;  %vm1213_vm11 = vcmask 257024   ;;  %s10377_s20 = smov [#allocation21]  }
  0x6d   :  { %v168_v6 = vld [vmem:[#allocation4] sm:$0xff]  ;;  %v166_v7 = vld [vmem:[#allocation2] sm:$0xff]  ;;  %9121 = vmatprep.subr.bf16.mxu0 %v12479_v1  ;;  %9129 = vmatprep.subr.bf16.mxu1 %v12479_v1  ;;  %s8401_s0 = sshll.u32 %s10377_s20, 4  ;;  %s8402_s0 = int_to_ptr.vmem [resolvable:$true] %s8401_s0 }
  0x6e   :  { %v10512_v8 = vpack.c.bf16 %v168_v6, %v168_v6  ;;  %v233_v9 = vpack.c.bf16 %v166_v7, %v166_v7  ;;  %v167_v22 = vld [vmem:[#allocation3] sm:$0xff]  ;;  %p10332_p13 = scmp.lt.s32.totalorder %s8402_s0, %s8402_s0 }
  0x70   :  { %9110 = vmatmul.mubr.msk.bf16.vlgmr.msra.gmra.mxu0 %vm161_vm0, %v10512_v8  ;;  %9118 = vmatmul.mubr.msk.bf16.vlgmr.msra.gmra.mxu1 %vm161_vm0, %v233_v9 }
  0x71   :  { %9125 = vmatprep.mubr.msk.bf16.mxu0 %vm10372_vm1, %v12479_v1  ;;  %9137 = vmatprep.mubr.msk.bf16.mxu1 %vm10372_vm1, %v12479_v1 }
  0x72   :  { %9122 = vmatpush3.bf16.msra.mxu0 %v9546_v33 }
  0x73   :  { %9123 = vmatprep.subr.bf16.mxu0 %v12479_v1 }
  0x76   :  { %9124 = vmatpush3.bf16.msra.mxu0 %v9547_v34 }
  0x77   :  { %9141 = vmatprep.subr.bf16.mxu0 %v12479_v1 }
 0x130   :  { %v226_v11 = vpop.f32.mrf.mxu0  ;;  %v287_v13 = vpop.f32.mrf.mxu1 }
 0x131   :  { %v232_v12 = vadd.f32 %v226_v11, %v170_v10  ;;  %v8647_v11 = vunpack.c.l.bf16 %v10576_v62 }
 0x132   :  { %v9111_v14 = vpop.f32.mrf.mxu0  ;;  %v9119_v16 = vpop.f32.mrf.mxu1 }
 0x133   :  { %v293_v15 = vadd.f32 %v287_v13, %v232_v12  ;;  %v12446_v12 = vunpack.c.h.bf16 %v10576_v62  ;;  %v12448_v13 = vunpack.c.l.bf16 %v10578_v63  ;;  %v12447_v16 = vunpack.c.h.bf16 %v10578_v63 }
 0x134   :  { %v229_v17 = vpop.f32.mrf.mxu0  ;;  %v290_v18 = vpop.f32.mrf.mxu1 }
 0x135   :  { %9654 = vtanh.f32 %v293_v15  ;;  %v8423_v23 = vmul.f32 -1.442695, %v293_v15 }
 0x136   :  { %v9112_v19 = vpop.f32.mrf.mxu0  ;;  %v9120_v20 = vpop.f32.mrf.mxu1 }
 0x137   :  { %9656 = vpow2.f32 %v8423_v23 }
 0x142   :  { %v9655_v21 = vpop.eup %9654 }
 0x143   :  { %307 = vrot.lane.b32.xlu0 %v9655_v21, %s10360_s30 }
 0x144   :  { %v9657_v24 = vpop.eup %9656 }
 0x145   :  { %v297_v25 = vadd.f32 1.0, %v9657_v24 }
 0x147   :  { %301 = vrot.lane.b32.xlu0 %v167_v22, %s10373_s9  ;;  %9658 = vrcp.f32 %v297_v25  ;;  %v10599_v25 = vld [vmem:[#allocation12 + $0x18] sm:$0xff]  }
 0x154   :  { %v9659_v26 = vpop.eup %9658 }
 0x1b5   :  { %v308_v27 = vpop.permute.xlu0 %307 }
 0x1b6   :  { %v310_v28 = vmul.f32 %v9659_v26, %v308_v27 }
 0x1b8   :  { %312 = vrot.lane.b32.xlu1 %v310_v28, %s10373_s9 }
 0x1b9   :  { %v302_v29 = vpop.permute.xlu0 %301 }
 0x1ba   :  { %v304_v30 = vmul.f32 %v9659_v26, %v302_v29  ;;  %v12445_v29 = vunpack.c.h.bf16 %v10599_v25 }
 0x22a   :  { %v313_v31 = vpop.permute.xlu1 %312 }
 0x22b   :  { %v10526_v32 = vadd.f32 %v313_v31, %v304_v30 }
 0x22d   :  { %9660 = vtanh.f32 %v10526_v32 }
 0x23a   :  { %v9661_v35 = vpop.eup %9660 }
 0x23b   :  { %318 = vrot.lane.b32.xlu1 %v9661_v35, %s10360_s30 }
 0x2ad   :  { %v319_v36 = vpop.permute.xlu1 %318 }
 0x2ae   :  { %v321_v37 = vmul.f32 %v9659_v26, %v319_v36 }
 0x2b0   :  { %v322_v38 = vpack.c.bf16 %v321_v37, %v321_v37  ;;  %v12444_v37 = vunpack.c.l.bf16 %v10599_v25 }
 0x2b2   :  { %335 = vrot.lane.b32.xlu0 %v322_v38, %s10373_s9 }
 0x324   :  { %v336_v40 = vpop.permute.xlu0 %335 }
 0x325   :  { %9126 = vmatmul.mubr.msk.bf16.vlgmr.msra.gmra.mxu0 %vm161_vm0, %v336_v40 }
 0x326   :  { %9142 = vmatpush3.bf16.msra.mxu0 %v9548_v39  ;;  %9145 = vmatprep.mubr.msk.bf16.mxu0 %vm10372_vm1, %v12479_v1 }
 0x327   :  { %9143 = vmatprep.subr.bf16.mxu0 %v12479_v1 }
 0x32a   :  { %9144 = vmatpush3.bf16.msra.mxu0 %v9549_v41 }
 0x32b   :  { %9149 = vmatprep.subr.bf16.mxu0 %v12479_v1 }
 0x32d   :  { %9146 = vmatmul.mubr.msk.bf16.vlgmr.msra.gmra.mxu0 %vm161_vm0, %v336_v40 }
 0x32e   :  { %9150 = vmatpush3.bf16.msra.mxu0 %v9550_v42  ;;  %9153 = vmatprep.mubr.msk.bf16.mxu0 %vm10372_vm1, %v12479_v1 }
 0x32f   :  { %9151 = vmatprep.subr.bf16.mxu0 %v12479_v1 }
 0x332   :  { %9152 = vmatpush3.bf16.msra.mxu0 %v9551_v43 }
 0x333   :  { %9165 = vmatprep.subr.bf16.mxu0 %v12479_v1 }
 0x335   :  { %9154 = vmatmul.mubr.msk.bf16.vlgmr.msra.gmra.mxu0 %vm161_vm0, %v10512_v8 }
 0x336   :  { %9166 = vmatpush3.bf16.msra.mxu0 %v9552_v44  ;;  %9169 = vmatprep.mubr.msk.bf16.mxu0 %vm10372_vm1, %v12479_v1 }
 0x337   :  { %9167 = vmatprep.subr.bf16.mxu0 %v12479_v1 }
 0x33a   :  { %9168 = vmatpush3.bf16.msra.mxu0 %v9553_v45 }
 0x33b   :  { %9181 = vmatprep.subr.bf16.mxu0 %v12479_v1 }
 0x33d   :  { %9170 = vmatmul.mubr.msk.bf16.vlgmr.msra.gmra.mxu0 %vm161_vm0, %v336_v40 }
 0x33e   :  { %9189 = vmatprep.mubr.msk.bf16.mxu0 %vm10372_vm1, %v12479_v1 }
 0x3e5   :  { %v386_v54 = vpop.f32.mrf.mxu0 }
 0x3e6   :  { %v387_v55 = vadd.f32 %v10564_v52, %v386_v54 }
 0x3e7   :  { %v9127_v56 = vpop.f32.mrf.mxu0 }
 0x3e8   :  { %v409_v58 = vcombine.high %v387_v55, %v387_v55  ;;  %v416_v59 = vrot.slane %v387_v55, %v10567_v53 }
 0x3e9   :  { %v389_v61 = vpop.f32.mrf.mxu0 }
 0x3ea   :  { %v423_v0 = vrot.slane %v409_v58, %v10567_v53  ;;  %v424_v2 = vcombine.high %v416_v59, %v416_v59  ;;  %v432_v3 = vrot.slane %v416_v59, %v10567_v53 }
 0x3eb   :  { %v9128_v6 = vpop.f32.mrf.mxu0 }
 0x3ec   :  { %v425_v7 = vcombine.high %v423_v0, %v423_v0  ;;  %v439_v8 = vrot.slane %v423_v0, %v10567_v53  ;;  %v446_v9 = vrot.slane %v424_v2, %v10567_v53  ;;  %v454_v10 = vcombine.high %v432_v3, %v432_v3 }
 0x3ed   :  { %v461_v14 = vrot.slane %v432_v3, %v10574_v60  ;;  %v10590_v15 = vpop.f32.mrf.mxu0 }
 0x3ee   :  { %v453_v17 = vrot.slane %v425_v7, %v10567_v53  ;;  %v456_v18 = vcombine.high %v446_v9, %v446_v9  ;;  %v465_v19 = vrot.slane %v446_v9, %v10574_v60  ;;  %v455_v20 = vcombine.high %v439_v8, %v439_v8 }
 0x3ef   :  { %v469_v21 = vrot.slane %v454_v10, %v10574_v60  ;;  %v477_v22 = vrot.slane %v439_v8, %v10574_v60  ;;  %v498_v23 = vadd.f32 %v8643_v4, %v461_v14  ;;  %v9147_v24 = vpop.f32.mrf.mxu0 }
 0x3f0   :  { %v457_v26 = vcombine.high %v453_v17, %v453_v17  ;;  %v473_v27 = vrot.slane %v456_v18, %v10574_v60  ;;  %v481_v28 = vrot.slane %v453_v17, %v10574_v60  ;;  %v499_v30 = vadd.f32 %v8644_v5, %v465_v19 }
 0x3f1   :  { %v500_v31 = vadd.f32 %v8647_v11, %v469_v21  ;;  %9662 = vtanh.f32 %v498_v23  ;;  %v1117_v33 = vpop.f32.mrf.mxu0  ;;  %v502_v36 = vadd.f32 %v12448_v13, %v477_v22  ;;  %v485_v38 = vrot.slane %v455_v20, %v10574_v60 }
 0x3f2   :  { %v489_v34 = vrot.slane %v457_v26, %v10574_v60  ;;  %v501_v35 = vadd.f32 %v12446_v12, %v473_v27  ;;  %v503_v39 = vadd.f32 %v12447_v16, %v481_v28  ;;  %9664 = vtanh.f32 %v499_v30  ;;  %v10646_v30 = vld [vmem:[#allocation6] ss:$0 sm:$0xff] }
 0x3f3   :  { %v9148_v40 = vpop.f32.mrf.mxu0  ;;  %9666 = vtanh.f32 %v500_v31  ;;  %v504_v43 = vadd.f32 %v12444_v37, %v485_v38  ;;  %v580_v38 = vand.u32 127, %v413_v49 }
 0x3f4   :  { %v505_v41 = vadd.f32 %v12445_v29, %v489_v34  ;;  %9668 = vtanh.f32 %v501_v35 }
 0x3f5   :  { %v10619_v42 = vpop.f32.mrf.mxu0  ;;  %9670 = vtanh.f32 %v502_v36 }
 0x3f6   :  { %9672 = vtanh.f32 %v503_v39 }
 0x3f7   :  { %v9155_v44 = vpop.f32.mrf.mxu0  ;;  %9674 = vtanh.f32 %v505_v41  ;;  %v10651_v41 = vsub.s32 %v580_v38, %v10559_v51 }
 0x3f8   :  { %9676 = vtanh.f32 %v504_v43 }
 0x3f9   :  { %v1174_v45 = vpop.f32.mrf.mxu0 }
 0x3fb   :  { %v9156_v46 = vpop.f32.mrf.mxu0 }
 0x3fd   :  { %v10628_v48 = vpop.f32.mrf.mxu0 }
 0x3fe   :  { %v9663_v50 = vpop.eup %9662 }
 0x3ff   :  { %v9171_v54 = vpop.f32.mrf.mxu0  ;;  %v521_v55 = vmul.f32 %v9663_v50, %v10626_v47  ;;  %v9665_v56 = vpop.eup %9664 }
 0x400   :  { %v9667_v58 = vpop.eup %9666  ;;  %v522_v0 = vmul.f32 %v9665_v56, %v10626_v47 }
 0x401   :  { %v529_v59 = vsel %vm161_vm0, %v521_v55, 0.0  ;;  %v1332_v61 = vpop.f32.mrf.mxu0  ;;  %v9669_v2 = vpop.eup %9668  ;;  %v523_v9 = vmul.f32 %v9667_v58, %v10626_v47 }
 0x402   :  { %530 = vadd.xlane.f32.xlu1 %v529_v59  ;;  %v9671_v3 = vpop.eup %9670  ;;  %v532_v6 = vsel %vm161_vm0, %v522_v0, 0.0  ;;  %v524_v8 = vmul.f32 %v9669_v2, %v10626_v47 }
 0x403   :  { %v9172_v7 = vpop.f32.mrf.mxu0  ;;  %v9673_v10 = vpop.eup %9672  ;;  %533 = vadd.xlane.f32.xlu0 %v532_v6  ;;  %v535_v19 = vsel %vm161_vm0, %v523_v9, 0.0  ;;  %v525_v20 = vmul.f32 %v9671_v3, %v10626_v47 }
 0x404   :  { %v538_v14 = vsel %vm161_vm0, %v524_v8, 0.0  ;;  %v526_v17 = vmul.f32 %v9673_v10, %v10626_v47  ;;  %v9675_v18 = vpop.eup %9674 }
 0x405   :  { %v9677_v21 = vpop.eup %9676  ;;  %v528_v23 = vmul.f32 %v9675_v18, %v10626_v47  ;;  %v541_v24 = vsel %vm161_vm0, %v525_v20, 0.0 }
 0x406   :  { %539 = vadd.xlane.f32.xlu1 %v538_v14  ;;  %v544_v22 = vsel %vm161_vm0, %v526_v17, 0.0  ;;  %v527_v26 = vmul.f32 %v9677_v21, %v10626_v47 }
 0x407   :  { %536 = vadd.xlane.f32.xlu0 %v535_v19  ;;  %v550_v27 = vsel %vm161_vm0, %v528_v23, 0.0  ;;  %v10673_v23 = vsub.s32 7, %v10559_v51 }
 0x408   :  { %v547_v28 = vsel %vm161_vm0, %v527_v26, 0.0 }
 0x40a   :  { %545 = vadd.xlane.f32.xlu1 %v544_v22  ;;  %v10670_v22 = vsub.s32 1, %v10559_v51 }
 0x40b   :  { %542 = vadd.xlane.f32.xlu0 %v541_v24  ;;  %v10676_v24 = vsub.s32 2, %v10559_v51 }
 0x40e   :  { %551 = vadd.xlane.f32.xlu1 %v550_v27 }
 0x40f   :  { %548 = vadd.xlane.f32.xlu0 %v547_v28 }
 0x425   :  { %560 = vperm.xlu0 %9540, %v10646_v30  }
 0x48b   :  { %v531_v34 = vpop.xlane.xlu1 %530 }
 0x48c   :  { %v534_v31 = vpop.xlane.xlu0 %533 }
 0x48f   :  { %v540_v36 = vpop.xlane.xlu1 %539 }
 0x490   :  { %v537_v33 = vpop.xlane.xlu0 %536 }
 0x493   :  { %v546_v40 = vpop.xlane.xlu1 %545 }
 0x494   :  { %v543_v35 = vpop.xlane.xlu0 %542 }
 0x497   :  { %v552_v59 = vpop.xlane.xlu1 %551 }
 0x498   :  { %v549_v39 = vpop.xlane.xlu0 %548 }
 0x4a0   :  { %v561_v43 = vpop.permute.xlu0 %560 }
 0x4a1   :  { %v563_v44 = vadd.f32 %v561_v43, %v531_v34  ;;  %v564_v45 = vadd.f32 %v561_v43, %v534_v31  ;;  %v565_v46 = vadd.f32 %v561_v43, %v537_v33  ;;  %v566_v50 = vadd.f32 %v561_v43, %v540_v36 }
 0x4a2   :  { %v567_v54 = vadd.f32 %v561_v43, %v543_v35  ;;  %v568_v55 = vadd.f32 %v561_v43, %v546_v40  ;;  %v569_v61 = vadd.f32 %v561_v43, %v549_v39  ;;  %v570_v0 = vadd.f32 %v561_v43, %v552_v59 }
 0x4a3   :  { %v584_v56 = vrot.slane %v563_v44, %v10651_v41  ;;  %v588_v58 = vrot.slane %v564_v45, %v10651_v41  ;;  %v592_v49 = vrot.slane %v565_v46, %v10651_v41  ;;  %v596_v2 = vrot.slane %v566_v50, %v10651_v41 }
 0x4a4   :  { %v600_v6 = vrot.slane %v567_v54, %v10651_v41  ;;  %v604_v8 = vrot.slane %v568_v55, %v10651_v41  ;;  %v608_v10 = vrot.slane %v569_v61, %v10651_v41  ;;  %v612_v17 = vrot.slane %v570_v0, %v10651_v41 }
 0x4a5   :  { %v614_v3 = vsel %vm613_vm2, %v588_v58, %v584_v56  ;;  %v10682_v33 = vsub.s32 3, %v10559_v51  ;;  %v10686_v39 = vsub.s32 4, %v10559_v51 }
 0x4a6   :  { %v616_v7 = vsel %vm615_vm3, %v592_v49, %v614_v3  ;;  %v10690_v49 = vsub.s32 5, %v10559_v51 }
 0x4a7   :  { %v618_v9 = vsel %vm617_vm4, %v596_v2, %v616_v7 }
 0x4a8   :  { %v620_v14 = vsel %vm619_vm5, %v600_v6, %v618_v9 }
 0x4a9   :  { %v622_v18 = vsel %vm621_vm6, %v604_v8, %v620_v14 }
 0x4aa   :  { %v624_v19 = vsel %vm623_vm7, %v608_v10, %v622_v18 }
 0x4ab   :  { %v626_v20 = vsel %vm625_vm8, %v612_v17, %v624_v19 }
 0x4ac   :  { %v629_v21 = vsel %vm628_vm9, %v626_v20, -inf }
 0x4ad   :  { %630 = vmax.xlane.f32.xlu1 %v629_v21 }
 0x536   :  { %v631_v26 = vpop.xlane.xlu1 %630 }
 0x537   :  { %v636_v27 = vrot.slane %v631_v26, %v10574_v60  ;;  %v640_v28 = vrot.slane %v631_v26, %v10670_v22  ;;  %v664_v31 = vrot.slane %v631_v26, %v10673_v23  ;;  %v644_v34 = vrot.slane %v631_v26, %v10676_v24 }
 0x538   :  { %v648_v43 = vrot.slane %v631_v26, %v10682_v33  ;;  %v652_v2 = vrot.slane %v631_v26, %v10686_v39 }
 0x539   :  { %v673_v35 = vsub.f32 %v563_v44, %v636_v27  ;;  %v674_v36 = vsub.f32 %v564_v45, %v640_v28  ;;  %v680_v40 = vsub.f32 %v570_v0, %v664_v31  ;;  %v675_v56 = vsub.f32 %v565_v46, %v644_v34 }
 0x53a   :  { %v676_v3 = vsub.f32 %v566_v50, %v648_v43  ;;  %v10694_v45 = vsub.s32 6, %v10559_v51  ;;  %v656_v0 = vrot.slane %v631_v26, %v10690_v49  ;;  %v677_v6 = vsub.f32 %v567_v54, %v652_v2 }
 0x53b   :  { %v681_v38 = vmul.f32 1.442695, %v673_v35  ;;  %v683_v58 = vmul.f32 1.442695, %v674_v36  ;;  %v695_v59 = vmul.f32 1.442695, %v680_v40 }
 0x53c   :  { %v685_v44 = vmul.f32 1.442695, %v675_v56  ;;  %v687_v46 = vmul.f32 1.442695, %v676_v3  ;;  %v660_v7 = vrot.slane %v631_v26, %v10694_v45  ;;  %v678_v8 = vsub.f32 %v568_v55, %v656_v0 }
 0x53d   :  { %9678 = vpow2.f32 %v681_v38  ;;  %v689_v9 = vmul.f32 1.442695, %v677_v6 }
 0x53e   :  { %9680 = vpow2.f32 %v683_v58  ;;  %v679_v14 = vsub.f32 %v569_v61, %v660_v7  ;;  %v691_v50 = vmul.f32 1.442695, %v678_v8 }
 0x53f   :  { %9682 = vpow2.f32 %v695_v59 }
 0x540   :  { %9684 = vpow2.f32 %v685_v44  ;;  %v693_v18 = vmul.f32 1.442695, %v679_v14 }
 0x541   :  { %9686 = vpow2.f32 %v687_v46 }
 0x542   :  { %9688 = vpow2.f32 %v689_v9 }
 0x543   :  { %9690 = vpow2.f32 %v691_v50 }
 0x544   :  { %9692 = vpow2.f32 %v693_v18 }
 0x54a   :  { %v9679_v10 = vpop.eup %9678 }
 0x54b   :  { %706 = vperm.xlu1 %9541, %v9679_v10   ;;  %v9681_v17 = vpop.eup %9680 }
 0x54c   :  { %v10698_v51 = vpop.eup %9682 }
 0x54d   :  { %v9685_v19 = vpop.eup %9684  ;;  %727 = vperm.xlu0 %9540, %v10698_v51  }
 0x54e   :  { %v9687_v54 = vpop.eup %9686 }
 0x54f   :  { %709 = vperm.xlu1 %9541, %v9681_v17   ;;  %v9689_v55 = vpop.eup %9688 }
 0x550   :  { %v9691_v20 = vpop.eup %9690 }
 0x551   :  { %v10701_v61 = vpop.eup %9692 }
 0x553   :  { %712 = vperm.xlu1 %9541, %v9685_v19  }
 0x557   :  { %715 = vperm.xlu1 %9541, %v9687_v54  }
 0x55b   :  { %718 = vperm.xlu1 %9541, %v9689_v55  }
 0x55f   :  { %721 = vperm.xlu1 %9541, %v9691_v20  }
 0x563   :  { %724 = vperm.xlu1 %9541, %v10701_v61  }
 0x5c6   :  { %v707_v21 = vpop.permute.xlu1 %706 }
 0x5c7   :  { %v732_v36 = vrot.slane %v707_v21, %v10651_v41 }
 0x5c8   :  { %v728_v59 = vpop.permute.xlu0 %727 }
 0x5c9   :  { %v760_v46 = vrot.slane %v728_v59, %v10651_v41 }
 0x5ca   :  { %v710_v26 = vpop.permute.xlu1 %709 }
 0x5cb   :  { %v736_v34 = vrot.slane %v710_v26, %v10651_v41 }
 0x5cd   :  { %v761_v56 = vsel %vm613_vm2, %v736_v34, %v732_v36 }
 0x5ce   :  { %v713_v27 = vpop.permute.xlu1 %712 }
 0x5cf   :  { %v740_v35 = vrot.slane %v713_v27, %v10651_v41 }
 0x5d1   :  { %v762_v2 = vsel %vm615_vm3, %v740_v35, %v761_v56 }
 0x5d2   :  { %v716_v28 = vpop.permute.xlu1 %715 }
 0x5d3   :  { %v744_v38 = vrot.slane %v716_v28, %v10651_v41 }
 0x5d5   :  { %v763_v3 = vsel %vm617_vm4, %v744_v38, %v762_v2 }
 0x5d6   :  { %v719_v31 = vpop.permute.xlu1 %718 }
 0x5d7   :  { %v748_v43 = vrot.slane %v719_v31, %v10651_v41 }
 0x5d9   :  { %v764_v0 = vsel %vm619_vm5, %v748_v43, %v763_v3 }
 0x5da   :  { %v722_v40 = vpop.permute.xlu1 %721 }
 0x5db   :  { %v752_v58 = vrot.slane %v722_v40, %v10651_v41 }
 0x5dd   :  { %v765_v7 = vsel %vm621_vm6, %v752_v58, %v764_v0 }
 0x5de   :  { %v725_v44 = vpop.permute.xlu1 %724 }
 0x5df   :  { %v756_v6 = vrot.slane %v725_v44, %v10651_v41 }
 0x5e1   :  { %v766_v8 = vsel %vm623_vm7, %v756_v6, %v765_v7  ;;  %v9554_v7 = vld [vmem:[#allocation18 + $0x18] sm:$0xff]  }
 0x5e2   :  { %v767_v9 = vsel %vm625_vm8, %v760_v46, %v766_v8  ;;  %9130 = vmatpush3.bf16.msra.mxu1 %v9554_v7  ;;  %v9556_v8 = vld [vmem:[#allocation18 + $0x8] sm:$0xff]  }
 0x5e3   :  { %v769_v14 = vsel %vm628_vm9, %v767_v9, 0.0  ;;  %9131 = vmatprep.subr.bf16.mxu1 %v12479_v1 }
 0x5e4   :  { %770 = vadd.xlane.f32.xlu1 %v769_v14 }
 0x66d   :  { %v771_v50 = vpop.xlane.xlu1 %770 }
 0x66e   :  { %v776_v18 = vrot.slane %v771_v50, %v10574_v60  ;;  %v780_v21 = vrot.slane %v771_v50, %v10670_v22  ;;  %v784_v26 = vrot.slane %v771_v50, %v10676_v24  ;;  %v788_v27 = vrot.slane %v771_v50, %v10682_v33 }
 0x66f   :  { %v792_v28 = vrot.slane %v771_v50, %v10686_v39  ;;  %v796_v35 = vrot.slane %v771_v50, %v10690_v49  ;;  %v800_v40 = vrot.slane %v771_v50, %v10694_v45  ;;  %v804_v58 = vrot.slane %v771_v50, %v10673_v23  ;;  %v10739_v50 = vld [vmem:[#allocation10 + $0x8] sm:$0xff]  }
 0x670   :  { %9694 = vrcp.f32 %v776_v18 }
 0x671   :  { %9696 = vrcp.f32 %v780_v21 }
 0x672   :  { %9698 = vrcp.f32 %v784_v26 }
 0x673   :  { %9700 = vrcp.f32 %v788_v27  ;;  %v12441_v27 = vunpack.c.l.bf16 %v10739_v50 }
 0x674   :  { %9702 = vrcp.f32 %v792_v28 }
 0x675   :  { %9704 = vrcp.f32 %v796_v35 }
 0x676   :  { %9706 = vrcp.f32 %v800_v40  ;;  %v10751_v40 = vld [vmem:[#allocation10 + $0x10] sm:$0xff]  }
 0x677   :  { %9708 = vrcp.f32 %v804_v58  ;;  %v12439_v7 = vunpack.c.h.bf16 %v10751_v40 }
 0x67d   :  { %v9695_v31 = vpop.eup %9694 }
 0x67e   :  { %v814_v34 = vmul.f32 %v9695_v31, %v9679_v10  ;;  %v9697_v36 = vpop.eup %9696 }
 0x67f   :  { %v816_v38 = vmul.f32 %v9697_v36, %v9681_v17  ;;  %v9699_v43 = vpop.eup %9698  ;;  %v12438_v36 = vunpack.c.h.bf16 %v10739_v50 }
 0x680   :  { %847 = vperm.xlu0 %9540, %v814_v34   ;;  %v818_v56 = vmul.f32 %v9699_v43, %v9685_v19  ;;  %v9701_v59 = vpop.eup %9700 }
 0x681   :  { %v820_v2 = vmul.f32 %v9701_v59, %v9687_v54  ;;  %v9703_v10 = vpop.eup %9702  ;;  %v9555_v54 = vld [vmem:[#allocation18 + $0x10] sm:$0xff]  }
 0x682   :  { %v822_v3 = vmul.f32 %v9703_v10, %v9689_v55  ;;  %v9705_v44 = vpop.eup %9704  ;;  %9132 = vmatpush3.bf16.msra.mxu1 %v9555_v54  ;;  %v9557_v55 = vld [vmem:[#allocation18] sm:$0xff]   ;;  %v12437_v10 = vunpack.c.l.bf16 %v10751_v40 }
 0x683   :  { %v824_v0 = vmul.f32 %v9705_v44, %v9691_v20  ;;  %v9707_v17 = vpop.eup %9706  ;;  %9133 = vmatprep.subr.bf16.mxu1 %v12479_v1  ;;  %v169_v20 = vld [vmem:[#allocation5] sm:$0xff] }
 0x684   :  { %852 = vperm.xlu0 %9540, %v816_v38   ;;  %v826_v6 = vmul.f32 %v9707_v17, %v10701_v61  ;;  %v9709_v46 = vpop.eup %9708  ;;  %1185 = vrot.lane.b32.xlu1 %v169_v20, %s10373_s9 }
 0x685   :  { %v828_v19 = vmul.f32 %v9709_v46, %v10698_v51  ;;  %v10735_v51 = vld [vmem:[#allocation10] sm:$0xff]  }
 0x686   :  { %9134 = vmatpush3.bf16.msra.mxu1 %v9556_v8  ;;  %v12443_v9 = vunpack.c.l.bf16 %v10735_v51  ;;  %v12442_v14 = vunpack.c.h.bf16 %v10735_v51 }
 0x687   :  { %9135 = vmatprep.subr.bf16.mxu1 %v12479_v1 }
 0x688   :  { %857 = vperm.xlu0 %9540, %v818_v56  }
 0x68a   :  { %9136 = vmatpush3.bf16.msra.mxu1 %v9557_v55  ;;  %v10761_v55 = vld [vmem:[#allocation10 + $0x18] sm:$0xff]  }
 0x68b   :  { %9157 = vmatprep.subr.bf16.mxu1 %v12479_v1 }
 0x68c   :  { %862 = vperm.xlu0 %9540, %v820_v2  }
 0x690   :  { %867 = vperm.xlu0 %9540, %v822_v3  }
 0x694   :  { %872 = vperm.xlu0 %9540, %v824_v0  }
 0x698   :  { %877 = vperm.xlu0 %9540, %v826_v6  }
 0x69c   :  { %882 = vperm.xlu0 %9540, %v828_v19  }
 0x6fb   :  { %v848_v61 = vpop.permute.xlu0 %847 }
 0x6fc   :  { %v885_v21 = vmul.f32 %v12443_v9, %v848_v61 }
 0x6fe   :  { %v894_v34 = vsel %vm893_vm10, %v885_v21, 0.0 }
 0x6ff   :  { %v853_v18 = vpop.permute.xlu0 %852  ;;  %v895_v56 = vrot.slane %v894_v34, 4 }
 0x700   :  { %v886_v26 = vmul.f32 %v12442_v14, %v853_v18 }
 0x701   :  { %v896_v17 = vadd.f32 %v895_v56, %v894_v34  ;;  %v12440_v34 = vunpack.c.l.bf16 %v10761_v55 }
 0x702   :  { %v901_v28 = vsel %vm893_vm10, %v886_v26, 0.0 }
 0x703   :  { %v858_v31 = vpop.permute.xlu0 %857  ;;  %v902_v38 = vrot.slane %v901_v28, 4  ;;  %v897_v18 = vrot.slane %v896_v17, 2 }
 0x704   :  { %v887_v35 = vmul.f32 %v12441_v27, %v858_v31 }
 0x705   :  { %v903_v3 = vadd.f32 %v902_v38, %v901_v28 }
 0x706   :  { %v908_v43 = vsel %vm893_vm10, %v887_v35, 0.0 }
 0x707   :  { %v909_v58 = vrot.slane %v908_v43, 4  ;;  %v863_v59 = vpop.permute.xlu0 %862  ;;  %v904_v54 = vrot.slane %v903_v3, 2 }
 0x708   :  { %v888_v2 = vmul.f32 %v12438_v36, %v863_v59 }
 0x709   :  { %v910_v44 = vadd.f32 %v909_v58, %v908_v43  ;;  %v905_v35 = vadd.f32 %v904_v54, %v903_v3  ;;  %v898_v58 = vadd.f32 %v897_v18, %v896_v17 }
 0x70a   :  { %v915_v0 = vsel %vm893_vm10, %v888_v2, 0.0 }
 0x70b   :  { %v916_v6 = vrot.slane %v915_v0, 4  ;;  %v868_v46 = vpop.permute.xlu0 %867  ;;  %v911_v20 = vrot.slane %v910_v44, 2  ;;  %v899_v54 = vrot.slane %v898_v58, 1 }
 0x70c   :  { %v889_v19 = vmul.f32 %v12437_v10, %v868_v46  ;;  %v906_v10 = vrot.slane %v905_v35, 1 }
 0x70d   :  { %v917_v8 = vadd.f32 %v916_v6, %v915_v0  ;;  %v912_v43 = vadd.f32 %v911_v20, %v910_v44 }
 0x70e   :  { %v922_v61 = vsel %vm893_vm10, %v889_v19, 0.0  ;;  %v8672_v19 = vunpack.c.h.bf16 %v10761_v55 }
 0x70f   :  { %v918_v21 = vrot.slane %v917_v8, 2  ;;  %v923_v26 = vrot.slane %v922_v61, 4  ;;  %v873_v28 = vpop.permute.xlu0 %872 }
 0x710   :  { %v890_v31 = vmul.f32 %v12439_v7, %v873_v28  ;;  %v913_v28 = vrot.slane %v912_v43, 1 }
 0x711   :  { %v924_v38 = vadd.f32 %v923_v26, %v922_v61  ;;  %v919_v59 = vadd.f32 %v918_v21, %v917_v8  ;;  %v907_v21 = vadd.f32 %v906_v10, %v905_v35 }
 0x712   :  { %v929_v56 = vsel %vm893_vm10, %v890_v31, 0.0  ;;  %v914_v31 = vadd.f32 %v913_v28, %v912_v43 }
 0x713   :  { %v925_v2 = vrot.slane %v924_v38, 2  ;;  %v878_v0 = vpop.permute.xlu0 %877  ;;  %v930_v6 = vrot.slane %v929_v56, 4  ;;  %v920_v44 = vrot.slane %v919_v59, 1  ;;  %v951_v14 = vpack.c.bf16 %v907_v21, %v907_v21 }
 0x714   :  { %v891_v46 = vmul.f32 %v12440_v34, %v878_v0  ;;  %v952_v29 = vpack.c.bf16 %v914_v31, %v914_v31 }
 0x715   :  { %v926_v36 = vadd.f32 %v925_v2, %v924_v38  ;;  %v931_v7 = vadd.f32 %v930_v6, %v929_v56  ;;  %v900_v38 = vadd.f32 %v899_v54, %v898_v58  ;;  %v921_v2 = vadd.f32 %v920_v44, %v919_v59 }
 0x716   :  { %v936_v3 = vsel %vm893_vm10, %v891_v46, 0.0  ;;  %v982_v43 = vunpack.c.l.b16 %v951_v14  ;;  %v983_v58 = vunpack.c.l.b16 %v952_v29  ;;  %v10788_v14 = vld [vmem:[%s12435_s12] ss:$0 sm:$0xff] }
 0x717   :  { %v937_v20 = vrot.slane %v936_v3, 4  ;;  %v883_v61 = vpop.permute.xlu0 %882  ;;  %v927_v17 = vrot.slane %v926_v36, 1  ;;  %v932_v8 = vrot.slane %v931_v7, 2  ;;  %v950_v16 = vpack.c.bf16 %v900_v38, %v900_v38 }
 0x718   :  { %v892_v18 = vmul.f32 %v8672_v19, %v883_v61  ;;  %v953_v13 = vpack.c.bf16 %v921_v2, %v921_v2 }
 0x719   :  { %v938_v26 = vadd.f32 %v937_v20, %v936_v3  ;;  %v933_v0 = vadd.f32 %v932_v8, %v931_v7  ;;  %v928_v46 = vadd.f32 %v927_v17, %v926_v36  ;;  %v981_v59 = vunpack.c.l.b16 %v950_v16 }
 0x71a   :  { %v943_v34 = vsel %vm893_vm10, %v892_v18, 0.0  ;;  %v984_v54 = vunpack.c.l.b16 %v953_v13 }
 0x71b   :  { %v939_v56 = vrot.slane %v938_v26, 2  ;;  %v944_v6 = vrot.slane %v943_v34, 4  ;;  %v934_v27 = vrot.slane %v933_v0, 1  ;;  %v954_v35 = vpack.c.bf16 %v928_v46, %v928_v46 }
 0x71c   :  { %v989_v17 = vsel %vm613_vm2, %v982_v43, %v981_v59 }
 0x71d   :  { %v940_v9 = vadd.f32 %v939_v56, %v938_v26  ;;  %v945_v37 = vadd.f32 %v944_v6, %v943_v34  ;;  %v935_v12 = vadd.f32 %v934_v27, %v933_v0  ;;  %v985_v20 = vunpack.c.l.b16 %v954_v35 }
 0x71e   :  { %v990_v27 = vsel %vm615_vm3, %v983_v58, %v989_v17  ;;  %v1186_v58 = vpop.permute.xlu1 %1185 }
 0x71f   :  { %v941_v61 = vrot.slane %v940_v9, 1  ;;  %v946_v10 = vrot.slane %v945_v37, 2  ;;  %v955_v7 = vpack.c.bf16 %v935_v12, %v935_v12  ;;  %v991_v21 = vsel %vm617_vm4, %v984_v54, %v990_v27  ;;  %v1216_v27 = vld [vmem:[#allocation7 + $0x8] sm:$0xff] }
 0x720   :  { %v992_v12 = vsel %vm619_vm5, %v985_v20, %v991_v21 }
 0x721   :  { %v942_v28 = vadd.f32 %v941_v61, %v940_v9  ;;  %v947_v3 = vadd.f32 %v946_v10, %v945_v37  ;;  %v986_v34 = vunpack.c.l.b16 %v955_v7 }
 0x723   :  { %v956_v44 = vpack.c.bf16 %v942_v28, %v942_v28  ;;  %v948_v36 = vrot.slane %v947_v3, 1  ;;  %v993_v37 = vsel %vm621_vm6, %v986_v34, %v992_v12 }
 0x725   :  { %v949_v8 = vadd.f32 %v948_v36, %v947_v3  ;;  %v987_v18 = vunpack.c.l.b16 %v956_v44  ;;  %v9559_v44 = vld [vmem:[#allocation13] sm:$0xff]  }
 0x727   :  { %v957_v26 = vpack.c.bf16 %v949_v8, %v949_v8  ;;  %v994_v13 = vsel %vm623_vm7, %v987_v18, %v993_v37 }
 0x729   :  { %v988_v29 = vunpack.c.l.b16 %v957_v26 }
 0x72b   :  { %v995_v16 = vsel %vm625_vm8, %v988_v29, %v994_v13 }
 0x72c   :  { %v996_v9 = vpack.c.b16 %v995_v16, %v995_v16 }
 0x72e   :  { %9138 = vmatmul.mubr.msk.bf16.vlgmr.msra.gmra.mxu1 %vm893_vm10, %v996_v9 }
 0x72f   :  { %9161 = vmatprep.mubr.msk.bf16.mxu1 %vm10372_vm1, %v12479_v1 }
 0x7ee   :  { %v1058_v31 = vpop.f32.mrf.mxu1 }
 0x7ef   :  { %v1059_v0 = vadd.f32 %v10788_v14, %v1058_v31 }
 0x7f0   :  { %v9139_v38 = vpop.f32.mrf.mxu1 }
 0x7f1   :  { %v1120_v2 = vadd.f32 %v10590_v15, %v1059_v0 }
 0x7f2   :  { %v1061_v56 = vpop.f32.mrf.mxu1 }
 0x7f3   :  { %v1177_v6 = vadd.f32 %v10619_v42, %v1120_v2  ;;  %v9558_v42 = vld [vmem:[#allocation13 + $0x8] sm:$0xff]  }
 0x7f4   :  { %v9140_v46 = vpop.f32.mrf.mxu1  ;;  %9158 = vmatpush3.bf16.msra.mxu1 %v9558_v42  ;;  %v9567_v42 = vld [vmem:[#allocation15] sm:$0xff]  }
 0x7f5   :  { %9710 = vtanh.f32 %v1177_v6  ;;  %v8442_v10 = vmul.f32 -1.442695, %v1177_v6  ;;  %9159 = vmatprep.subr.bf16.mxu1 %v12479_v1  ;;  %v9560_v46 = vld [vmem:[#allocation16 + $0x8] sm:$0xff]  }
 0x7f7   :  { %9712 = vpow2.f32 %v8442_v10 }
 0x7f8   :  { %9160 = vmatpush3.bf16.msra.mxu1 %v9559_v44 }
 0x7f9   :  { %9173 = vmatprep.subr.bf16.mxu1 %v12479_v1 }
 0x802   :  { %v9711_v61 = vpop.eup %9710 }
 0x803   :  { %1191 = vrot.lane.b32.xlu0 %v9711_v61, %s10360_s30  ;;  %v9561_v61 = vld [vmem:[#allocation16] sm:$0xff]  }
 0x804   :  { %v9713_v35 = vpop.eup %9712 }
 0x805   :  { %v1181_v43 = vadd.f32 1.0, %v9713_v35 }
 0x807   :  { %9714 = vrcp.f32 %v1181_v43 }
 0x814   :  { %v9715_v7 = vpop.eup %9714 }
 0x815   :  { %v1188_v15 = vmul.f32 %v9715_v7, %v1186_v58  ;;  %v9564_v58 = vld [vmem:[#allocation19 + $0x8] sm:$0xff]  }
 0x875   :  { %v1192_v28 = vpop.permute.xlu0 %1191 }
 0x876   :  { %v1194_v3 = vmul.f32 %v9715_v7, %v1192_v28 }
 0x878   :  { %1196 = vrot.lane.b32.xlu0 %v1194_v3, %s10373_s9  ;;  %v9563_v3 = vld [vmem:[%s12433_s10] sm:$0xff]  }
 0x8ea   :  { %v1197_v59 = vpop.permute.xlu0 %1196 }
 0x8eb   :  { %v10795_v54 = vadd.f32 %v1197_v59, %v1188_v15  ;;  %v9565_v15 = vld [vmem:[#allocation19] sm:$0xff]   ;;  %v9566_v59 = vld [vmem:[#allocation15 + $0x8] sm:$0xff]  }
 0x8ed   :  { %9716 = vtanh.f32 %v10795_v54 }
 0x8fa   :  { %v9717_v36 = vpop.eup %9716 }
 0x8fb   :  { %1202 = vrot.lane.b32.xlu0 %v9717_v36, %s10360_s30 }
 0x96d   :  { %v1203_v20 = vpop.permute.xlu0 %1202 }
 0x96e   :  { %v1205_v17 = vmul.f32 %v9715_v7, %v1203_v20 }
 0x970   :  { %v10801_v34 = vpack.c.bf16 %v1205_v17, %v1205_v17 }
 0x972   :  { %1221 = vrot.lane.b32.xlu0 %v10801_v34, %s10373_s9 }
 0x9e4   :  { %v1222_v8 = vpop.permute.xlu0 %1221 }
 0x9e5   :  { %9162 = vmatmul.mubr.msk.bf16.vlgmr.msra.gmra.mxu1 %vm161_vm0, %v1222_v8 }
 0x9e6   :  { %9177 = vmatprep.mubr.msk.bf16.mxu1 %vm10372_vm1, %v12479_v1  ;;  %9174 = vmatpush3.bf16.msra.mxu1 %v9560_v46 }
 0x9e7   :  { %9175 = vmatprep.subr.bf16.mxu1 %v12479_v1 }
 0x9ea   :  { %9176 = vmatpush3.bf16.msra.mxu1 %v9561_v61 }
 0x9eb   :  { %9193 = vmatprep.subr.bf16.mxu1 %v12479_v1 }
 0xaa5   :  { %v1272_v18 = vpop.f32.mrf.mxu1 }
 0xaa6   :  { %v1278_v21 = vadd.f32 %v1272_v18, %v1216_v27 }
 0xaa7   :  { %v9163_v26 = vpop.f32.mrf.mxu1 }
 0xaa8   :  { %v1335_v12 = vadd.f32 %v10628_v48, %v1278_v21 }
 0xaa9   :  { %v1275_v37 = vpop.f32.mrf.mxu1 }
 0xaaa   :  { %9718 = vtanh.f32 %v1335_v12  ;;  %v8450_v16 = vmul.f32 -1.442695, %v1335_v12 }
 0xaab   :  { %v9164_v29 = vpop.f32.mrf.mxu1 }
 0xaac   :  { %9720 = vpow2.f32 %v8450_v16 }
 0xab7   :  { %v9719_v13 = vpop.eup %9718 }
 0xab8   :  { %1345 = vrot.lane.b32.xlu0 %v9719_v13, %s10360_s30 }
 0xab9   :  { %v9721_v9 = vpop.eup %9720 }
 0xaba   :  { %v1339_v31 = vadd.f32 1.0, %v9721_v9 }
 0xabc   :  { %9722 = vrcp.f32 %v1339_v31 }
 0xac9   :  { %v9723_v0 = vpop.eup %9722 }
 0xaca   :  { %v1342_v56 = vmul.f32 %v9723_v0, %v10526_v32  ;;  %v9562_v32 = vld [vmem:[%s12433_s10 + $0x8] sm:$0xff]  }
 0xb2a   :  { %v1346_v38 = vpop.permute.xlu0 %1345 }
 0xb2b   :  { %v1348_v2 = vmul.f32 %v9723_v0, %v1346_v38 }
 0xb2d   :  { %1350 = vrot.lane.b32.xlu1 %v1348_v2, %s10373_s9 }
 0xb9f   :  { %v1351_v6 = vpop.permute.xlu1 %1350 }
 0xba0   :  { %v10812_v48 = vadd.f32 %v1351_v6, %v1342_v56 }
 0xba2   :  { %9724 = vtanh.f32 %v10812_v48 }
 0xbaf   :  { %v9725_v10 = vpop.eup %9724 }
 0xbb0   :  { %1356 = vrot.lane.b32.xlu0 %v9725_v10, %s10360_s30 }
 0xc22   :  { %v1357_v35 = vpop.permute.xlu0 %1356 }
 0xc23   :  { %v1359_v43 = vmul.f32 %v9723_v0, %v1357_v35 }
 0xc25   :  { %v1360_v7 = vpack.c.bf16 %v1359_v43, %v1359_v43 }
 0xc27   :  { %1373 = vrot.lane.b32.xlu1 %v1360_v7, %s10373_s9 }
 0xc99   :  { %v1374_v28 = vpop.permute.xlu1 %1373 }
 0xc9a   :  { %9178 = vmatmul.mubr.msk.bf16.vlgmr.msra.gmra.mxu1 %vm161_vm0, %v1374_v28 }
 0xc9b   :  { %9194 = vmatpush3.bf16.msra.mxu1 %v9562_v32  ;;  %9197 = vmatprep.mubr.msk.bf16.mxu1 %vm10372_vm1, %v12479_v1 }
 0xc9c   :  { %9195 = vmatprep.subr.bf16.mxu1 %v12479_v1 }
 0xc9f   :  { %9196 = vmatpush3.bf16.msra.mxu1 %v9563_v3 }
 0xca0   :  { %9201 = vmatprep.subr.bf16.mxu1 %v12479_v1 }
 0xca2   :  { %9198 = vmatmul.mubr.msk.bf16.vlgmr.msra.gmra.mxu1 %vm161_vm0, %v1374_v28 }
 0xca3   :  { %9202 = vmatpush3.bf16.msra.mxu1 %v9564_v58  ;;  %9205 = vmatprep.mubr.msk.bf16.mxu1 %vm10372_vm1, %v12479_v1  ;;  %v12500_v58 = vunpack.c.l.bf16 %v10578_v63 }
 0xca4   :  { %9203 = vmatprep.subr.bf16.mxu1 %v12479_v1 }
 0xca7   :  { %9204 = vmatpush3.bf16.msra.mxu1 %v9565_v15  ;;  %v12501_v15 = vunpack.c.h.bf16 %v10578_v63  ;;  %v12504_v63 = vunpack.c.l.bf16 %v10599_v25 }
 0xca8   :  { %9217 = vmatprep.subr.bf16.mxu1 %v12479_v1 }
 0xcaa   :  { %9206 = vmatmul.mubr.msk.bf16.vlgmr.msra.gmra.mxu1 %vm161_vm0, %v1222_v8 }
 0xcab   :  { %9218 = vmatpush3.bf16.msra.mxu1 %v9566_v59  ;;  %9221 = vmatprep.mubr.msk.bf16.mxu1 %vm10372_vm1, %v12479_v1 }
 0xcac   :  { %9219 = vmatprep.subr.bf16.mxu1 %v12479_v1 }
 0xcaf   :  { %9220 = vmatpush3.bf16.msra.mxu1 %v9567_v42 }
 0xcb0   :  { %9233 = vmatprep.subr.bf16.mxu1 %v12479_v1 }
 0xcb2   :  { %9222 = vmatmul.mubr.msk.bf16.vlgmr.msra.gmra.mxu1 %vm161_vm0, %v1374_v28 }
 0xcb3   :  { %9241 = vmatprep.mubr.msk.bf16.mxu1 %vm10372_vm1, %v12479_v1 }
 0xd5a   :  { %v1424_v44 = vpop.f32.mrf.mxu1 }
 0xd5b   :  { %v1425_v36 = vadd.f32 %v10564_v52, %v1424_v44  ;;  %v12502_v44 = vunpack.c.h.bf16 %v10576_v62 }
 0xd5c   :  { %v9179_v20 = vpop.f32.mrf.mxu1 }
 0xd5d   :  { %v1447_v17 = vcombine.high %v1425_v36, %v1425_v36  ;;  %v1454_v8 = vrot.slane %v1425_v36, %v10567_v53 }
 0xd5e   :  { %v1427_v27 = vpop.f32.mrf.mxu1 }
 0xd5f   :  { %v1461_v18 = vrot.slane %v1447_v17, %v10567_v53  ;;  %v1462_v21 = vcombine.high %v1454_v8, %v1454_v8  ;;  %v1470_v26 = vrot.slane %v1454_v8, %v10567_v53 }
 0xd60   :  { %v9180_v12 = vpop.f32.mrf.mxu1 }
 0xd61   :  { %v1463_v37 = vcombine.high %v1461_v18, %v1461_v18  ;;  %v1477_v29 = vrot.slane %v1461_v18, %v10567_v53  ;;  %v1484_v13 = vrot.slane %v1462_v21, %v10567_v53  ;;  %v1492_v16 = vcombine.high %v1470_v26, %v1470_v26 }
 0xd62   :  { %v1499_v9 = vrot.slane %v1470_v26, %v10574_v60  ;;  %v10850_v52 = vpop.f32.mrf.mxu1 }
 0xd63   :  { %v1491_v31 = vrot.slane %v1463_v37, %v10567_v53  ;;  %v1494_v0 = vcombine.high %v1484_v13, %v1484_v13  ;;  %v1503_v38 = vrot.slane %v1484_v13, %v10574_v60  ;;  %v1507_v2 = vrot.slane %v1492_v16, %v10574_v60 }
 0xd64   :  { %v1515_v56 = vrot.slane %v1477_v29, %v10574_v60  ;;  %v1536_v6 = vadd.f32 %v8643_v4, %v1499_v9  ;;  %v9199_v46 = vpop.f32.mrf.mxu1  ;;  %v1493_v43 = vcombine.high %v1477_v29, %v1477_v29 }
 0xd65   :  { %v1495_v61 = vcombine.high %v1491_v31, %v1491_v31  ;;  %v1511_v10 = vrot.slane %v1494_v0, %v10574_v60  ;;  %v1519_v35 = vrot.slane %v1491_v31, %v10574_v60  ;;  %v1537_v7 = vadd.f32 %v8644_v5, %v1503_v38 }
 0xd66   :  { %v1538_v32 = vadd.f32 %v8647_v11, %v1507_v2  ;;  %9726 = vtanh.f32 %v1536_v6  ;;  %v2144_v28 = vpop.f32.mrf.mxu1  ;;  %v1540_v4 = vadd.f32 %v12500_v58, %v1515_v56  ;;  %v1523_v57 = vrot.slane %v1493_v43, %v10574_v60 }
 0xd67   :  { %v1527_v3 = vrot.slane %v1495_v61, %v10574_v60  ;;  %v1541_v59 = vadd.f32 %v12501_v15, %v1519_v35  ;;  %9728 = vtanh.f32 %v1537_v7  ;;  %v1539_v36 = vadd.f32 %v12502_v44, %v1511_v10 }
 0xd68   :  { %v9200_v42 = vpop.f32.mrf.mxu1  ;;  %9730 = vtanh.f32 %v1538_v32  ;;  %v12503_v5 = vunpack.c.h.bf16 %v10599_v25  ;;  %v1542_v8 = vadd.f32 %v12504_v63, %v1523_v57 }
 0xd69   :  { %9732 = vtanh.f32 %v1540_v4  ;;  %v10166_v4 = vld [vmem:[%s12430_s7] ss:$0 sm:$0xff] }
 0xd6a   :  { %v1543_v11 = vadd.f32 %v12503_v5, %v1527_v3  ;;  %v10874_v20 = vpop.f32.mrf.mxu1  ;;  %9734 = vtanh.f32 %v1541_v59 }
 0xd6b   :  { %9736 = vtanh.f32 %v1539_v36 }
 0xd6c   :  { %v9207_v17 = vpop.f32.mrf.mxu1  ;;  %9738 = vtanh.f32 %v1543_v11 }
 0xd6d   :  { %9740 = vtanh.f32 %v1542_v8 }
 0xd6e   :  { %v2201_v27 = vpop.f32.mrf.mxu1 }
 0xd70   :  { %v9208_v18 = vpop.f32.mrf.mxu1 }
 0xd72   :  { %v10878_v62 = vpop.f32.mrf.mxu1 }
 0xd73   :  { %v9727_v21 = vpop.eup %9726 }
 0xd74   :  { %v9223_v26 = vpop.f32.mrf.mxu1  ;;  %v1559_v12 = vmul.f32 %v9727_v21, %v10626_v47  ;;  %v9729_v37 = vpop.eup %9728 }
 0xd75   :  { %v9731_v29 = vpop.eup %9730  ;;  %v1560_v9 = vmul.f32 %v9729_v37, %v10626_v47 }
 0xd76   :  { %v1567_v13 = vsel %vm161_vm0, %v1559_v12, 0.0  ;;  %v2355_v16 = vpop.f32.mrf.mxu1  ;;  %v1561_v25 = vmul.f32 %v9731_v29, %v10626_v47  ;;  %v9733_v31 = vpop.eup %9732 }
 0xd77   :  { %1568 = vadd.xlane.f32.xlu0 %v1567_v13  ;;  %v1570_v0 = vsel %vm161_vm0, %v1560_v9, 0.0  ;;  %v9735_v2 = vpop.eup %9734  ;;  %v1563_v61 = vmul.f32 %v9733_v31, %v10626_v47 }
 0xd78   :  { %v9224_v38 = vpop.f32.mrf.mxu1  ;;  %1571 = vadd.xlane.f32.xlu1 %v1570_v0  ;;  %v9737_v56 = vpop.eup %9736  ;;  %v1573_v6 = vsel %vm161_vm0, %v1561_v25, 0.0  ;;  %v1564_v46 = vmul.f32 %v9735_v2, %v10626_v47 }
 0xd79   :  { %v9739_v10 = vpop.eup %9738  ;;  %v1579_v7 = vsel %vm161_vm0, %v1563_v61, 0.0  ;;  %v1562_v32 = vmul.f32 %v9737_v56, %v10626_v47 }
 0xd7a   :  { %v1582_v35 = vsel %vm161_vm0, %v1564_v46, 0.0  ;;  %v1566_v43 = vmul.f32 %v9739_v10, %v10626_v47  ;;  %v9741_v28 = vpop.eup %9740 }
 0xd7b   :  { %1574 = vadd.xlane.f32.xlu0 %v1573_v6  ;;  %v1576_v58 = vsel %vm161_vm0, %v1562_v32, 0.0  ;;  %v1565_v15 = vmul.f32 %v10166_v4, %v9741_v28 }
 0xd7c   :  { %1583 = vadd.xlane.f32.xlu1 %v1582_v35  ;;  %v1588_v3 = vsel %vm161_vm0, %v1566_v43, 0.0 }
 0xd7d   :  { %v1585_v59 = vsel %vm161_vm0, %v1565_v15, 0.0 }
 0xd7f   :  { %1580 = vadd.xlane.f32.xlu0 %v1579_v7 }
 0xd80   :  { %1589 = vadd.xlane.f32.xlu1 %v1588_v3 }
 0xd83   :  { %1577 = vadd.xlane.f32.xlu0 %v1576_v58 }
 0xd87   :  { %1586 = vadd.xlane.f32.xlu0 %v1585_v59 }
 0xd9d   :  { %1598 = vperm.xlu0 %9540, %v10646_v30  }
 0xe00   :  { %v1569_v42 = vpop.xlane.xlu0 %1568 }
 0xe01   :  { %v1572_v57 = vpop.xlane.xlu1 %1571 }
 0xe04   :  { %v1575_v47 = vpop.xlane.xlu0 %1574 }
 0xe05   :  { %v1584_v11 = vpop.xlane.xlu1 %1583 }
 0xe08   :  { %v1581_v44 = vpop.xlane.xlu0 %1580 }
 0xe09   :  { %v1590_v29 = vpop.xlane.xlu1 %1589 }
 0xe0c   :  { %v1578_v36 = vpop.xlane.xlu0 %1577 }
 0xe10   :  { %v1587_v5 = vpop.xlane.xlu0 %1586 }
 0xe18   :  { %v1599_v17 = vpop.permute.xlu0 %1598 }
 0xe19   :  { %v1601_v63 = vadd.f32 %v1599_v17, %v1569_v42  ;;  %v1602_v8 = vadd.f32 %v1599_v17, %v1572_v57  ;;  %v1603_v27 = vadd.f32 %v1599_v17, %v1575_v47  ;;  %v1604_v18 = vadd.f32 %v1599_v17, %v1578_v36 }
 0xe1a   :  { %v1605_v21 = vadd.f32 %v1599_v17, %v1581_v44  ;;  %v1606_v26 = vadd.f32 %v1599_v17, %v1584_v11  ;;  %v1607_v13 = vadd.f32 %v1599_v17, %v1587_v5  ;;  %v1608_v16 = vadd.f32 %v1599_v17, %v1590_v29 }
 0xe1b   :  { %v1620_v12 = vrot.slane %v1601_v63, %v10651_v41  ;;  %v1624_v37 = vrot.slane %v1602_v8, %v10651_v41  ;;  %v1628_v30 = vrot.slane %v1603_v27, %v10651_v41  ;;  %v1632_v9 = vrot.slane %v1604_v18, %v10651_v41 }
 0xe1c   :  { %v1636_v31 = vrot.slane %v1605_v21, %v10651_v41  ;;  %v1640_v38 = vrot.slane %v1606_v26, %v10651_v41  ;;  %v1644_v56 = vrot.slane %v1607_v13, %v10651_v41  ;;  %v1648_v46 = vrot.slane %v1608_v16, %v10651_v41 }
 0xe1d   :  { %v1649_v25 = vsel %vm613_vm2, %v1624_v37, %v1620_v12 }
 0xe1e   :  { %v1650_v0 = vsel %vm615_vm3, %v1628_v30, %v1649_v25 }
 0xe1f   :  { %v1651_v2 = vsel %vm617_vm4, %v1632_v9, %v1650_v0 }
 0xe20   :  { %v1652_v6 = vsel %vm619_vm5, %v1636_v31, %v1651_v2 }
 0xe21   :  { %v1653_v61 = vsel %vm621_vm6, %v1640_v38, %v1652_v6 }
 0xe22   :  { %v1654_v10 = vsel %vm623_vm7, %v1644_v56, %v1653_v61 }
 0xe23   :  { %v1655_v35 = vsel %vm625_vm8, %v1648_v46, %v1654_v10 }
 0xe24   :  { %v1657_v43 = vsel %vm628_vm9, %v1655_v35, -inf }
 0xe25   :  { %1658 = vmax.xlane.f32.xlu1 %v1657_v43 }
 0xeae   :  { %v1659_v7 = vpop.xlane.xlu1 %1658 }
 0xeaf   :  { %v1664_v32 = vrot.slane %v1659_v7, %v10574_v60  ;;  %v1668_v28 = vrot.slane %v1659_v7, %v10670_v22  ;;  %v1672_v3 = vrot.slane %v1659_v7, %v10676_v24  ;;  %v1680_v58 = vrot.slane %v1659_v7, %v10686_v39 }
 0xeb0   :  { %v1676_v4 = vrot.slane %v1659_v7, %v10682_v33  ;;  %v1688_v47 = vrot.slane %v1659_v7, %v10694_v45  ;;  %v1684_v5 = vrot.slane %v1659_v7, %v10690_v49  ;;  %v1692_v30 = vrot.slane %v1659_v7, %v10673_v23 }
 0xeb1   :  { %v1701_v15 = vsub.f32 %v1601_v63, %v1664_v32  ;;  %v1702_v59 = vsub.f32 %v1602_v8, %v1668_v28  ;;  %v1703_v42 = vsub.f32 %v1603_v27, %v1672_v3  ;;  %v1705_v44 = vsub.f32 %v1605_v21, %v1680_v58 }
 0xeb2   :  { %v1704_v11 = vsub.f32 %v1604_v18, %v1676_v4  ;;  %v1707_v12 = vsub.f32 %v1607_v13, %v1688_v47  ;;  %v1706_v29 = vsub.f32 %v1606_v26, %v1684_v5  ;;  %v1708_v27 = vsub.f32 %v1608_v16, %v1692_v30 }
 0xeb3   :  { %v1709_v36 = vmul.f32 1.442695, %v1701_v15  ;;  %v1713_v57 = vmul.f32 1.442695, %v1703_v42  ;;  %v1711_v17 = vmul.f32 1.442695, %v1702_v59 }
 0xeb4   :  { %v1717_v37 = vmul.f32 1.442695, %v1705_v44  ;;  %v1715_v63 = vmul.f32 1.442695, %v1704_v11  ;;  %v1721_v8 = vmul.f32 1.442695, %v1707_v12 }
 0xeb5   :  { %9742 = vpow2.f32 %v1709_v36  ;;  %v1719_v21 = vmul.f32 1.442695, %v1706_v29  ;;  %v1723_v9 = vmul.f32 1.442695, %v1708_v27 }
 0xeb6   :  { %9744 = vpow2.f32 %v1713_v57 }
 0xeb7   :  { %9746 = vpow2.f32 %v1711_v17 }
 0xeb8   :  { %9748 = vpow2.f32 %v1717_v37 }
 0xeb9   :  { %9750 = vpow2.f32 %v1715_v63 }
 0xeba   :  { %9752 = vpow2.f32 %v1721_v8 }
 0xebb   :  { %9754 = vpow2.f32 %v1719_v21 }
 0xebc   :  { %9756 = vpow2.f32 %v1723_v9 }
 0xec2   :  { %v9743_v25 = vpop.eup %9742 }
 0xec3   :  { %1734 = vperm.xlu1 %9541, %v9743_v25   ;;  %v10923_v18 = vpop.eup %9744 }
 0xec4   :  { %1740 = vperm.xlu0 %9540, %v10923_v18   ;;  %v9747_v13 = vpop.eup %9746 }
 0xec5   :  { %v10926_v26 = vpop.eup %9748 }
 0xec6   :  { %v10929_v31 = vpop.eup %9750 }
 0xec7   :  { %1737 = vperm.xlu1 %9541, %v9747_v13   ;;  %v10932_v16 = vpop.eup %9752 }
 0xec8   :  { %1746 = vperm.xlu0 %9540, %v10926_v26   ;;  %v10935_v0 = vpop.eup %9754 }
 0xec9   :  { %v9757_v38 = vpop.eup %9756 }
 0xecb   :  { %1743 = vperm.xlu1 %9541, %v10929_v31  }
 0xecc   :  { %1752 = vperm.xlu0 %9540, %v10932_v16  }
 0xecf   :  { %1749 = vperm.xlu1 %9541, %v10935_v0  }
 0xed3   :  { %1755 = vperm.xlu1 %9541, %v9757_v38  }
 0xf3e   :  { %v1735_v2 = vpop.permute.xlu1 %1734 }
 0xf3f   :  { %v1741_v56 = vpop.permute.xlu0 %1740  ;;  %v1760_v46 = vrot.slane %v1735_v2, %v10651_v41 }
 0xf40   :  { %v1768_v43 = vrot.slane %v1741_v56, %v10651_v41 }
 0xf42   :  { %v1738_v6 = vpop.permute.xlu1 %1737 }
 0xf43   :  { %v1764_v61 = vrot.slane %v1738_v6, %v10651_v41  ;;  %v1747_v10 = vpop.permute.xlu0 %1746 }
 0xf44   :  { %v1776_v58 = vrot.slane %v1747_v10, %v10651_v41 }
 0xf45   :  { %v1789_v35 = vsel %vm613_vm2, %v1764_v61, %v1760_v46 }
 0xf46   :  { %v1744_v7 = vpop.permute.xlu1 %1743  ;;  %v1790_v28 = vsel %vm615_vm3, %v1768_v43, %v1789_v35 }
 0xf47   :  { %v1772_v32 = vrot.slane %v1744_v7, %v10651_v41  ;;  %v1753_v15 = vpop.permute.xlu0 %1752 }
 0xf48   :  { %v1784_v44 = vrot.slane %v1753_v15, %v10651_v41 }
 0xf49   :  { %v1791_v3 = vsel %vm617_vm4, %v1772_v32, %v1790_v28 }
 0xf4a   :  { %v1750_v4 = vpop.permute.xlu1 %1749  ;;  %v1792_v42 = vsel %vm619_vm5, %v1776_v58, %v1791_v3 }
 0xf4b   :  { %v1780_v59 = vrot.slane %v1750_v4, %v10651_v41  ;;  %v9568_v4 = vld [vmem:[#allocation18 + $0x18] sm:$0xff]  }
 0xf4c   :  { %9182 = vmatpush3.bf16.msra.mxu0 %v9568_v4 }
 0xf4d   :  { %v1793_v47 = vsel %vm621_vm6, %v1780_v59, %v1792_v42  ;;  %9183 = vmatprep.subr.bf16.mxu0 %v12479_v1 }
 0xf4e   :  { %v1756_v36 = vpop.permute.xlu1 %1755  ;;  %v1794_v5 = vsel %vm623_vm7, %v1784_v44, %v1793_v47  ;;  %v12506_v47 = vunpack.c.h.bf16 %v10735_v51 }
 0xf4f   :  { %v1788_v57 = vrot.slane %v1756_v36, %v10651_v41 }
 0xf51   :  { %v1795_v11 = vsel %vm625_vm8, %v1788_v57, %v1794_v5 }
 0xf52   :  { %v1797_v17 = vsel %vm628_vm9, %v1795_v11, 0.0 }
 0xf53   :  { %1798 = vadd.xlane.f32.xlu0 %v1797_v17 }
 0xfdc   :  { %v1799_v12 = vpop.xlane.xlu0 %1798 }
 0xfdd   :  { %v1832_v37 = vrot.slane %v1799_v12, %v10673_v23  ;;  %v1804_v30 = vrot.slane %v1799_v12, %v10574_v60  ;;  %v1808_v29 = vrot.slane %v1799_v12, %v10670_v22  ;;  %v1812_v63 = vrot.slane %v1799_v12, %v10676_v24 }
 0xfde   :  { %v1816_v8 = vrot.slane %v1799_v12, %v10682_v33  ;;  %v1820_v27 = vrot.slane %v1799_v12, %v10686_v39  ;;  %v1824_v6 = vrot.slane %v1799_v12, %v10690_v49  ;;  %v1828_v10 = vrot.slane %v1799_v12, %v10694_v45 }
 0xfdf   :  { %9758 = vrcp.f32 %v1832_v37  ;;  %v12507_v37 = vunpack.c.l.bf16 %v10739_v50 }
 0xfe0   :  { %9760 = vrcp.f32 %v1804_v30 }
 0xfe1   :  { %9762 = vrcp.f32 %v1808_v29 }
 0xfe2   :  { %9764 = vrcp.f32 %v1812_v63 }
 0xfe3   :  { %9766 = vrcp.f32 %v1816_v8 }
 0xfe4   :  { %9768 = vrcp.f32 %v1820_v27 }
 0xfe5   :  { %9770 = vrcp.f32 %v1824_v6 }
 0xfe6   :  { %9772 = vrcp.f32 %v1828_v10 }
 0xfec   :  { %v9759_v21 = vpop.eup %9758 }
 0xfed   :  { %v9761_v9 = vpop.eup %9760  ;;  %v1856_v2 = vmul.f32 %v9759_v21, %v9757_v38 }
 0xfee   :  { %v1842_v56 = vmul.f32 %v9761_v9, %v9743_v25  ;;  %v9763_v46 = vpop.eup %9762  ;;  %v12508_v9 = vunpack.c.h.bf16 %v10739_v50 }
 0xfef   :  { %1910 = vperm.xlu0 %9540, %v1856_v2   ;;  %v1844_v61 = vmul.f32 %v9763_v46, %v9747_v13  ;;  %v9765_v35 = vpop.eup %9764 }
 0xff0   :  { %1875 = vperm.xlu1 %9541, %v1842_v56   ;;  %v1846_v43 = vmul.f32 %v9765_v35, %v10923_v18  ;;  %v9767_v7 = vpop.eup %9766  ;;  %v9569_v18 = vld [vmem:[#allocation18 + $0x10] sm:$0xff]  }
 0xff1   :  { %v1848_v38 = vmul.f32 %v9767_v7, %v10929_v31  ;;  %v9769_v25 = vpop.eup %9768  ;;  %9184 = vmatpush3.bf16.msra.mxu0 %v9569_v18  ;;  %v9570_v31 = vld [vmem:[#allocation18 + $0x8] sm:$0xff]   ;;  %v12509_v7 = vunpack.c.l.bf16 %v10751_v40 }
 0xff2   :  { %v1850_v32 = vmul.f32 %v9769_v25, %v10926_v26  ;;  %v9771_v28 = vpop.eup %9770  ;;  %9185 = vmatprep.subr.bf16.mxu0 %v12479_v1  ;;  %v9571_v26 = vld [vmem:[#allocation18] sm:$0xff]  }
 0xff3   :  { %v1852_v13 = vmul.f32 %v9771_v28, %v10935_v0  ;;  %v9773_v3 = vpop.eup %9772 }
 0xff4   :  { %1880 = vperm.xlu1 %9541, %v1844_v61   ;;  %v1854_v58 = vmul.f32 %v9773_v3, %v10932_v16  ;;  %v12505_v16 = vunpack.c.l.bf16 %v10735_v51 }
 0xff5   :  { %9186 = vmatpush3.bf16.msra.mxu0 %v9570_v31  ;;  %v12510_v31 = vunpack.c.h.bf16 %v10751_v40 }
 0xff6   :  { %9187 = vmatprep.subr.bf16.mxu0 %v12479_v1 }
 0xff8   :  { %1885 = vperm.xlu1 %9541, %v1846_v43  }
 0xff9   :  { %9188 = vmatpush3.bf16.msra.mxu0 %v9571_v26 }
 0xffa   :  { %9209 = vmatprep.subr.bf16.mxu0 %v12479_v1 }
 0xffc   :  { %1890 = vperm.xlu1 %9541, %v1848_v38  }
0x1000   :  { %1895 = vperm.xlu1 %9541, %v1850_v32  }
0x1004   :  { %1900 = vperm.xlu1 %9541, %v1852_v13  }
0x1008   :  { %1905 = vperm.xlu1 %9541, %v1854_v58  }
0x106a   :  { %v1911_v42 = vpop.permute.xlu0 %1910 }
0x106b   :  { %v1876_v0 = vpop.permute.xlu1 %1875  ;;  %v1920_v5 = vmul.f32 %v8672_v19, %v1911_v42 }
0x106c   :  { %v1913_v15 = vmul.f32 %v12505_v16, %v1876_v0 }
0x106d   :  { %v1970_v8 = vsel %vm893_vm10, %v1920_v5, 0.0 }
0x106e   :  { %v1921_v36 = vsel %vm893_vm10, %v1913_v15, 0.0  ;;  %v1971_v6 = vrot.slane %v1970_v8, 4 }
0x106f   :  { %v1881_v59 = vpop.permute.xlu1 %1880  ;;  %v1922_v12 = vrot.slane %v1921_v36, 4 }
0x1070   :  { %v1914_v44 = vmul.f32 %v12506_v47, %v1881_v59  ;;  %v1972_v32 = vadd.f32 %v1971_v6, %v1970_v8 }
0x1071   :  { %v1923_v21 = vadd.f32 %v1922_v12, %v1921_v36 }
0x1072   :  { %v1928_v57 = vsel %vm893_vm10, %v1914_v44, 0.0  ;;  %v1973_v15 = vrot.slane %v1972_v32, 2 }
0x1073   :  { %v1929_v11 = vrot.slane %v1928_v57, 4  ;;  %v1886_v17 = vpop.permute.xlu1 %1885  ;;  %v1924_v43 = vrot.slane %v1923_v21, 2 }
0x1074   :  { %v1915_v30 = vmul.f32 %v12507_v37, %v1886_v17  ;;  %v12511_v17 = vunpack.c.l.bf16 %v10761_v55 }
0x1075   :  { %v1930_v29 = vadd.f32 %v1929_v11, %v1928_v57  ;;  %v1925_v18 = vadd.f32 %v1924_v43, %v1923_v21 }
0x1076   :  { %v1935_v63 = vsel %vm893_vm10, %v1915_v30, 0.0  ;;  %v1974_v30 = vadd.f32 %v1973_v15, %v1972_v32 }
0x1077   :  { %v1936_v51 = vrot.slane %v1935_v63, 4  ;;  %v1891_v27 = vpop.permute.xlu1 %1890  ;;  %v1931_v19 = vrot.slane %v1930_v29, 2  ;;  %v1926_v57 = vrot.slane %v1925_v18, 1 }
0x1078   :  { %v1916_v2 = vmul.f32 %v12508_v9, %v1891_v27 }
0x1079   :  { %v1937_v56 = vadd.f32 %v1936_v51, %v1935_v63  ;;  %v1932_v28 = vadd.f32 %v1931_v19, %v1930_v29  ;;  %v1927_v21 = vadd.f32 %v1926_v57, %v1925_v18  ;;  %v1975_v19 = vrot.slane %v1974_v30, 1 }
0x107a   :  { %v1942_v46 = vsel %vm893_vm10, %v1916_v2, 0.0 }
0x107b   :  { %v1938_v61 = vrot.slane %v1937_v56, 2  ;;  %v1943_v10 = vrot.slane %v1942_v46, 4  ;;  %v1896_v35 = vpop.permute.xlu1 %1895  ;;  %v1933_v59 = vrot.slane %v1932_v28, 1  ;;  %v1976_v32 = vadd.f32 %v1975_v19, %v1974_v30 }
0x107c   :  { %v1917_v38 = vmul.f32 %v12509_v7, %v1896_v35  ;;  %v1977_v35 = vpack.c.bf16 %v1927_v21, %v1927_v21 }
0x107d   :  { %v1944_v25 = vadd.f32 %v1943_v10, %v1942_v46  ;;  %v1939_v3 = vadd.f32 %v1938_v61, %v1937_v56  ;;  %v1934_v29 = vadd.f32 %v1933_v59, %v1932_v28 }
0x107e   :  { %v1949_v13 = vsel %vm893_vm10, %v1917_v38, 0.0 }
0x107f   :  { %v1945_v50 = vrot.slane %v1944_v25, 2  ;;  %v1950_v58 = vrot.slane %v1949_v13, 4  ;;  %v1901_v4 = vpop.permute.xlu1 %1900  ;;  %v1940_v47 = vrot.slane %v1939_v3, 1  ;;  %v1978_v46 = vpack.c.bf16 %v1934_v29, %v1934_v29 }
0x1080   :  { %v1918_v26 = vmul.f32 %v12510_v31, %v1901_v4 }
0x1081   :  { %v1946_v0 = vadd.f32 %v1945_v50, %v1944_v25  ;;  %v1951_v16 = vadd.f32 %v1950_v58, %v1949_v13  ;;  %v1941_v8 = vadd.f32 %v1940_v47, %v1939_v3  ;;  %v2009_v28 = vunpack.c.l.b16 %v1978_v46 }
0x1082   :  { %v1956_v42 = vsel %vm893_vm10, %v1918_v26, 0.0  ;;  %v2008_v58 = vunpack.c.l.b16 %v1977_v35 }
0x1083   :  { %v1952_v44 = vrot.slane %v1951_v16, 2  ;;  %v1906_v36 = vpop.permute.xlu1 %1905  ;;  %v1947_v5 = vrot.slane %v1946_v0, 1  ;;  %v1957_v11 = vrot.slane %v1956_v42, 4  ;;  %v1979_v10 = vpack.c.bf16 %v1941_v8, %v1941_v8 }
0x1084   :  { %v1919_v12 = vmul.f32 %v12511_v17, %v1906_v36 }
0x1085   :  { %v1953_v37 = vadd.f32 %v1952_v44, %v1951_v16  ;;  %v1958_v40 = vadd.f32 %v1957_v11, %v1956_v42  ;;  %v1948_v9 = vadd.f32 %v1947_v5, %v1946_v0  ;;  %v2010_v3 = vunpack.c.l.b16 %v1979_v10 }
0x1086   :  { %v1963_v63 = vsel %vm893_vm10, %v1919_v12, 0.0  ;;  %v1984_v0 = vpack.c.bf16 %v1976_v32, %v1976_v32  ;;  %v2016_v16 = vsel %vm613_vm2, %v2009_v28, %v2008_v58 }
0x1087   :  { %v1954_v51 = vrot.slane %v1953_v37, 1  ;;  %v1964_v27 = vrot.slane %v1963_v63, 4  ;;  %v1959_v2 = vrot.slane %v1958_v40, 2  ;;  %v1980_v43 = vpack.c.bf16 %v1948_v9, %v1948_v9 }
0x1088   :  { %v2017_v59 = vsel %vm615_vm3, %v2010_v3, %v2016_v16  ;;  %v2015_v57 = vunpack.c.l.b16 %v1984_v0 }
0x1089   :  { %v1955_v56 = vadd.f32 %v1954_v51, %v1953_v37  ;;  %v1965_v6 = vadd.f32 %v1964_v27, %v1963_v63  ;;  %v1960_v61 = vadd.f32 %v1959_v2, %v1958_v40  ;;  %v2011_v4 = vunpack.c.l.b16 %v1980_v43 }
0x108b   :  { %v1966_v55 = vrot.slane %v1965_v6, 2  ;;  %v1961_v7 = vrot.slane %v1960_v61, 1  ;;  %v1981_v38 = vpack.c.bf16 %v1955_v56, %v1955_v56  ;;  %v2018_v47 = vsel %vm617_vm4, %v2011_v4, %v2017_v59  ;;  %v9574_v59 = vld [vmem:[#allocation16 + $0x8] sm:$0xff]  }
0x108d   :  { %v1967_v25 = vadd.f32 %v1966_v55, %v1965_v6  ;;  %v1962_v13 = vadd.f32 %v1961_v7, %v1960_v61  ;;  %v2012_v31 = vunpack.c.l.b16 %v1981_v38  ;;  %v9573_v61 = vld [vmem:[#allocation13] sm:$0xff]   ;;  %v2239_v7 = vld [vmem:[#allocation7 + $0x10] sm:$0xff] }
0x108f   :  { %v1968_v50 = vrot.slane %v1967_v25, 1  ;;  %v1982_v18 = vpack.c.bf16 %v1962_v13, %v1962_v13  ;;  %v2019_v44 = vsel %vm619_vm5, %v2012_v31, %v2018_v47 }
0x1091   :  { %v1969_v26 = vadd.f32 %v1968_v50, %v1967_v25  ;;  %v2013_v15 = vunpack.c.l.b16 %v1982_v18 }
0x1093   :  { %v1983_v42 = vpack.c.bf16 %v1969_v26, %v1969_v26  ;;  %v2020_v5 = vsel %vm621_vm6, %v2013_v15, %v2019_v44 }
0x1095   :  { %v2014_v36 = vunpack.c.l.b16 %v1983_v42  ;;  %v9575_v42 = vld [vmem:[#allocation16] sm:$0xff]  }
0x1097   :  { %v2021_v11 = vsel %vm623_vm7, %v2014_v36, %v2020_v5 }
0x1098   :  { %v2022_v17 = vsel %vm625_vm8, %v2015_v57, %v2021_v11  ;;  %v9577_v11 = vld [vmem:[%s12433_s10] sm:$0xff]  }
0x1099   :  { %v2023_v12 = vpack.c.b16 %v2022_v17, %v2022_v17  ;;  %v9578_v17 = vld [vmem:[#allocation19 + $0x8] sm:$0xff]  }
0x109b   :  { %9190 = vmatmul.mubr.msk.bf16.vlgmr.msra.gmra.mxu0 %vm893_vm10, %v2023_v12  ;;  %v9579_v12 = vld [vmem:[#allocation19] sm:$0xff]  }
0x109c   :  { %9213 = vmatprep.mubr.msk.bf16.mxu0 %vm10372_vm1, %v12479_v1 }
0x115b   :  { %v2085_v37 = vpop.f32.mrf.mxu0 }
0x115c   :  { %v2086_v30 = vadd.f32 %v10788_v14, %v2085_v37  ;;  %v9580_v37 = vld [vmem:[#allocation15 + $0x8] sm:$0xff]  }
0x115d   :  { %v9191_v29 = vpop.f32.mrf.mxu0 }
0x115e   :  { %v2147_v40 = vadd.f32 %v10850_v52, %v2086_v30  ;;  %v9581_v30 = vld [vmem:[#allocation15] sm:$0xff]   ;;  %v11062_v29 = vld [vmem:[%s12429_s6] ss:$0 sm:$0xff] }
0x115f   :  { %v2088_v63 = vpop.f32.mrf.mxu0 }
0x1160   :  { %v2204_v8 = vadd.f32 %v10874_v20, %v2147_v40  ;;  %v9572_v20 = vld [vmem:[#allocation13 + $0x8] sm:$0xff]  }
0x1161   :  { %v9192_v51 = vpop.f32.mrf.mxu0  ;;  %9210 = vmatpush3.bf16.msra.mxu0 %v9572_v20 }
0x1162   :  { %9774 = vtanh.f32 %v2204_v8  ;;  %v8469_v21 = vmul.f32 -1.442695, %v2204_v8  ;;  %9211 = vmatprep.subr.bf16.mxu0 %v12479_v1  ;;  %v11065_v51 = vld [vmem:[#allocation12] sm:$0xff]  }
0x1163   :  { %v12462_v20 = vunpack.c.h.bf16 %v11065_v51 }
0x1164   :  { %9776 = vpow2.f32 %v8469_v21 }
0x1165   :  { %9212 = vmatpush3.bf16.msra.mxu0 %v9573_v61 }
0x1166   :  { %9225 = vmatprep.subr.bf16.mxu0 %v12479_v1 }
0x116f   :  { %v9775_v27 = vpop.eup %9774 }
0x1170   :  { %2214 = vrot.lane.b32.xlu1 %v9775_v27, %s10360_s30 }
0x1171   :  { %v9777_v9 = vpop.eup %9776 }
0x1172   :  { %v2208_v2 = vadd.f32 1.0, %v9777_v9 }
0x1174   :  { %9778 = vrcp.f32 %v2208_v2  ;;  %v11068_v2 = vld [vmem:[#allocation12 + $0x8] sm:$0xff]  }
0x1181   :  { %v9779_v56 = vpop.eup %9778 }
0x1182   :  { %v2211_v14 = vmul.f32 %v9779_v56, %v10795_v54 }
0x11e2   :  { %v2215_v6 = vpop.permute.xlu1 %2214 }
0x11e3   :  { %v2217_v19 = vmul.f32 %v9779_v56, %v2215_v6 }
0x11e5   :  { %2219 = vrot.lane.b32.xlu1 %v2217_v19, %s10373_s9 }
0x1257   :  { %v2220_v52 = vpop.permute.xlu1 %2219 }
0x1258   :  { %v11011_v46 = vadd.f32 %v2220_v52, %v2211_v14  ;;  %v12463_v52 = vunpack.c.l.bf16 %v11065_v51 }
0x125a   :  { %9780 = vtanh.f32 %v11011_v46 }
0x1267   :  { %v9781_v10 = vpop.eup %9780 }
0x1268   :  { %2225 = vrot.lane.b32.xlu1 %v9781_v10, %s10360_s30 }
0x12da   :  { %v2226_v55 = vpop.permute.xlu1 %2225 }
0x12db   :  { %v2228_v35 = vmul.f32 %v9779_v56, %v2226_v55  ;;  %v11070_v56 = vld [vmem:[#allocation12 + $0x10] sm:$0xff]  }
0x12dd   :  { %v11017_v43 = vpack.c.bf16 %v2228_v35, %v2228_v35 }
0x12df   :  { %12512 = vst [vmem:[#allocation28_spill] sm:$0xff] %v11017_v43  ;;  %2244 = vrot.lane.b32.xlu1 %v11017_v43, %s10373_s9 }
0x1351   :  { %v2245_v54 = vpop.permute.xlu1 %2244 }
0x1352   :  { %9214 = vmatmul.mubr.msk.bf16.vlgmr.msra.gmra.mxu0 %vm161_vm0, %v2245_v54 }
0x1353   :  { %9229 = vmatprep.mubr.msk.bf16.mxu0 %vm10372_vm1, %v12479_v1  ;;  %9226 = vmatpush3.bf16.msra.mxu0 %v9574_v59 }
0x1354   :  { %9227 = vmatprep.subr.bf16.mxu0 %v12479_v1 }
0x1357   :  { %9228 = vmatpush3.bf16.msra.mxu0 %v9575_v42 }
0x1358   :  { %9245 = vmatprep.subr.bf16.mxu0 %v12479_v1 }
0x1412   :  { %v2295_v38 = vpop.f32.mrf.mxu0 }
0x1413   :  { %v2301_v25 = vadd.f32 %v2295_v38, %v2239_v7  ;;  %v12461_v7 = vunpack.c.l.bf16 %v11068_v2  ;;  %v12460_v38 = vunpack.c.h.bf16 %v11068_v2 }
0x1414   :  { %v9215_v32 = vpop.f32.mrf.mxu0 }
0x1415   :  { %v2358_v28 = vadd.f32 %v10878_v62, %v2301_v25  ;;  %v12459_v25 = vunpack.c.l.bf16 %v11070_v56  ;;  %v11081_v32 = vld [vmem:[#allocation12 + $0x18] sm:$0xff]  }
0x1416   :  { %v2298_v13 = vpop.f32.mrf.mxu0 }
0x1417   :  { %9782 = vtanh.f32 %v2358_v28  ;;  %v8477_v58 = vmul.f32 -1.442695, %v2358_v28 }
0x1418   :  { %v9216_v3 = vpop.f32.mrf.mxu0 }
0x1419   :  { %9784 = vpow2.f32 %v8477_v58 }
0x1424   :  { %v9783_v50 = vpop.eup %9782 }
0x1425   :  { %2368 = vrot.lane.b32.xlu1 %v9783_v50, %s10360_s30 }
0x1426   :  { %v9785_v4 = vpop.eup %9784 }
0x1427   :  { %v2362_v18 = vadd.f32 1.0, %v9785_v4 }
0x1429   :  { %9786 = vrcp.f32 %v2362_v18  ;;  %v12457_v18 = vunpack.c.h.bf16 %v11070_v56 }
0x1436   :  { %v9787_v31 = vpop.eup %9786 }
0x1437   :  { %v2365_v16 = vmul.f32 %v9787_v31, %v10812_v48  ;;  %v9576_v48 = vld [vmem:[%s12433_s10 + $0x8] sm:$0xff]  }
0x1497   :  { %v2369_v26 = vpop.permute.xlu1 %2368 }
0x1498   :  { %v2371_v0 = vmul.f32 %v9787_v31, %v2369_v26 }
0x149a   :  { %2373 = vrot.lane.b32.xlu1 %v2371_v0, %s10373_s9 }
0x150c   :  { %v2374_v15 = vpop.permute.xlu1 %2373 }
0x150d   :  { %v11028_v62 = vadd.f32 %v2374_v15, %v2365_v16  ;;  %v12458_v15 = vunpack.c.l.bf16 %v11081_v32 }
0x150f   :  { %9788 = vtanh.f32 %v11028_v62 }
0x151c   :  { %v9789_v47 = vpop.eup %9788 }
0x151d   :  { %2379 = vrot.lane.b32.xlu0 %v9789_v47, %s10360_s30 }
0x158f   :  { %v2380_v44 = vpop.permute.xlu0 %2379 }
0x1590   :  { %v2382_v36 = vmul.f32 %v9787_v31, %v2380_v44 }
0x1592   :  { %v2383_v57 = vpack.c.bf16 %v2382_v36, %v2382_v36 }
0x1594   :  { %2396 = vrot.lane.b32.xlu1 %v2383_v57, %s10373_s9 }
0x1606   :  { %v2397_v5 = vpop.permute.xlu1 %2396 }
0x1607   :  { %9230 = vmatmul.mubr.msk.bf16.vlgmr.msra.gmra.mxu0 %vm161_vm0, %v2397_v5 }
0x1608   :  { %9246 = vmatpush3.bf16.msra.mxu0 %v9576_v48  ;;  %9249 = vmatprep.mubr.msk.bf16.mxu0 %vm10372_vm1, %v12479_v1 }
0x1609   :  { %9247 = vmatprep.subr.bf16.mxu0 %v12479_v1 }
0x160c   :  { %9248 = vmatpush3.bf16.msra.mxu0 %v9577_v11 }
0x160d   :  { %9253 = vmatprep.subr.bf16.mxu0 %v12479_v1 }
0x160f   :  { %9250 = vmatmul.mubr.msk.bf16.vlgmr.msra.gmra.mxu0 %vm161_vm0, %v2397_v5 }
0x1610   :  { %9254 = vmatpush3.bf16.msra.mxu0 %v9578_v17  ;;  %9257 = vmatprep.mubr.msk.bf16.mxu0 %vm10372_vm1, %v12479_v1 }
0x1611   :  { %9255 = vmatprep.subr.bf16.mxu0 %v12479_v1 }
0x1614   :  { %9256 = vmatpush3.bf16.msra.mxu0 %v9579_v12 }
0x1615   :  { %9269 = vmatprep.subr.bf16.mxu0 %v12479_v1 }
0x1617   :  { %9258 = vmatmul.mubr.msk.bf16.vlgmr.msra.gmra.mxu0 %vm161_vm0, %v2245_v54 }
0x1618   :  { %9270 = vmatpush3.bf16.msra.mxu0 %v9580_v37  ;;  %9273 = vmatprep.mubr.msk.bf16.mxu0 %vm10372_vm1, %v12479_v1  ;;  %v12456_v37 = vunpack.c.h.bf16 %v11081_v32 }
0x1619   :  { %9271 = vmatprep.subr.bf16.mxu0 %v12479_v1 }
0x161c   :  { %9272 = vmatpush3.bf16.msra.mxu0 %v9581_v30 }
0x161d   :  { %9285 = vmatprep.subr.bf16.mxu0 %v12479_v1 }
0x161f   :  { %9274 = vmatmul.mubr.msk.bf16.vlgmr.msra.gmra.mxu0 %vm161_vm0, %v2397_v5 }
0x1620   :  { %9293 = vmatprep.mubr.msk.bf16.mxu0 %vm10372_vm1, %v12479_v1 }
0x16c7   :  { %v2447_v40 = vpop.f32.mrf.mxu0 }
0x16c8   :  { %v2448_v63 = vadd.f32 %v11062_v29, %v2447_v40 }
0x16c9   :  { %v9231_v8 = vpop.f32.mrf.mxu0 }
0x16ca   :  { %v2470_v27 = vcombine.high %v2448_v63, %v2448_v63  ;;  %v2477_v21 = vrot.slane %v2448_v63, %v10567_v53 }
0x16cb   :  { %v2450_v9 = vpop.f32.mrf.mxu0 }
0x16cc   :  { %v2484_v6 = vrot.slane %v2470_v27, %v10567_v53  ;;  %v2485_v19 = vcombine.high %v2477_v21, %v2477_v21  ;;  %v2493_v14 = vrot.slane %v2477_v21, %v10567_v53 }
0x16cd   :  { %v9232_v61 = vpop.f32.mrf.mxu0 }
0x16ce   :  { %v2486_v10 = vcombine.high %v2484_v6, %v2484_v6  ;;  %v2500_v55 = vrot.slane %v2484_v6, %v10567_v53  ;;  %v2507_v35 = vrot.slane %v2485_v19, %v10567_v53  ;;  %v2515_v54 = vcombine.high %v2493_v14, %v2493_v14  ;;  %v11118_v6 = vld [vmem:[%s12430_s7] ss:$0 sm:$0xff] }
0x16cf   :  { %v2522_v28 = vrot.slane %v2493_v14, %v10574_v60  ;;  %v11084_v13 = vpop.f32.mrf.mxu0 }
0x16d0   :  { %v2514_v3 = vrot.slane %v2486_v10, %v10567_v53  ;;  %v2516_v50 = vcombine.high %v2500_v55, %v2500_v55  ;;  %v2517_v58 = vcombine.high %v2507_v35, %v2507_v35  ;;  %v2526_v4 = vrot.slane %v2507_v35, %v10574_v60 }
0x16d1   :  { %v2530_v31 = vrot.slane %v2515_v54, %v10574_v60  ;;  %v2538_v26 = vrot.slane %v2500_v55, %v10574_v60  ;;  %v2559_v0 = vadd.f32 %v12463_v52, %v2522_v28  ;;  %v9251_v16 = vpop.f32.mrf.mxu0 }
0x16d2   :  { %v2518_v59 = vcombine.high %v2514_v3, %v2514_v3  ;;  %v2534_v42 = vrot.slane %v2517_v58, %v10574_v60  ;;  %v2546_v47 = vrot.slane %v2516_v50, %v10574_v60  ;;  %v2542_v44 = vrot.slane %v2514_v3, %v10574_v60 }
0x16d3   :  { %v2560_v36 = vadd.f32 %v12462_v20, %v2526_v4  ;;  %v2561_v57 = vadd.f32 %v12461_v7, %v2530_v31  ;;  %9790 = vtanh.f32 %v2559_v0  ;;  %v3167_v48 = vpop.f32.mrf.mxu0  ;;  %v2563_v11 = vadd.f32 %v12459_v25, %v2538_v26 }
0x16d4   :  { %v2562_v5 = vadd.f32 %v12460_v38, %v2534_v42  ;;  %v2565_v12 = vadd.f32 %v12458_v15, %v2546_v47  ;;  %v2550_v30 = vrot.slane %v2518_v59, %v10574_v60  ;;  %v2564_v40 = vadd.f32 %v12457_v18, %v2542_v44 }
0x16d5   :  { %9792 = vtanh.f32 %v2560_v36  ;;  %v9252_v17 = vpop.f32.mrf.mxu0 }
0x16d6   :  { %9794 = vtanh.f32 %v2561_v57  ;;  %v2566_v27 = vadd.f32 %v12456_v37, %v2550_v30 }
0x16d7   :  { %9796 = vtanh.f32 %v2562_v5  ;;  %v11111_v63 = vpop.f32.mrf.mxu0 }
0x16d8   :  { %9798 = vtanh.f32 %v2563_v11 }
0x16d9   :  { %v9259_v8 = vpop.f32.mrf.mxu0  ;;  %9800 = vtanh.f32 %v2565_v12 }
0x16da   :  { %9802 = vtanh.f32 %v2564_v40  ;;  %v11138_v40 = vld [vmem:[#allocation6] ss:$0 sm:$0xff] }
0x16db   :  { %v3224_v21 = vpop.f32.mrf.mxu0  ;;  %9804 = vtanh.f32 %v2566_v27 }
0x16dd   :  { %v9260_v9 = vpop.f32.mrf.mxu0 }
0x16df   :  { %v11120_v19 = vpop.f32.mrf.mxu0 }
0x16e0   :  { %v9791_v14 = vpop.eup %9790 }
0x16e1   :  { %v9275_v61 = vpop.f32.mrf.mxu0  ;;  %v2582_v10 = vmul.f32 %v9791_v14, %v11118_v6 }
0x16e2   :  { %v9793_v55 = vpop.eup %9792 }
0x16e3   :  { %v9795_v35 = vpop.eup %9794  ;;  %v2590_v54 = vsel %vm161_vm0, %v2582_v10, 0.0  ;;  %v3378_v28 = vpop.f32.mrf.mxu0  ;;  %v2583_v3 = vmul.f32 %v9793_v55, %v11118_v6 }
0x16e4   :  { %v9797_v50 = vpop.eup %9796  ;;  %2591 = vadd.xlane.f32.xlu0 %v2590_v54  ;;  %v2584_v58 = vmul.f32 %v9795_v35, %v11118_v6 }
0x16e5   :  { %v9799_v4 = vpop.eup %9798  ;;  %v2593_v31 = vsel %vm161_vm0, %v2583_v3, 0.0  ;;  %v9276_v26 = vpop.f32.mrf.mxu0  ;;  %v2585_v42 = vmul.f32 %v9797_v50, %v11118_v6 }
0x16e6   :  { %2594 = vadd.xlane.f32.xlu1 %v2593_v31  ;;  %v2586_v0 = vmul.f32 %v9799_v4, %v11118_v6  ;;  %v9801_v16 = vpop.eup %9800  ;;  %v2596_v59 = vsel %vm161_vm0, %v2584_v58, 0.0 }
0x16e7   :  { %v9803_v47 = vpop.eup %9802  ;;  %v2588_v36 = vmul.f32 %v9801_v16, %v11118_v6  ;;  %v2599_v57 = vsel %vm161_vm0, %v2585_v42, 0.0 }
0x16e8   :  { %2597 = vadd.xlane.f32.xlu0 %v2596_v59  ;;  %v2602_v44 = vsel %vm161_vm0, %v2586_v0, 0.0  ;;  %v2587_v48 = vmul.f32 %v9803_v47, %v11118_v6  ;;  %v9805_v5 = vpop.eup %9804 }
0x16e9   :  { %v2608_v11 = vsel %vm161_vm0, %v2588_v36, 0.0  ;;  %v2589_v12 = vmul.f32 %v9805_v5, %v11118_v6 }
0x16ea   :  { %2603 = vadd.xlane.f32.xlu1 %v2602_v44  ;;  %v2605_v17 = vsel %vm161_vm0, %v2587_v48, 0.0 }
0x16eb   :  { %v2611_v30 = vsel %vm161_vm0, %v2589_v12, 0.0 }
0x16ec   :  { %2600 = vadd.xlane.f32.xlu0 %v2599_v57 }
0x16ee   :  { %2609 = vadd.xlane.f32.xlu1 %v2608_v11 }
0x16f0   :  { %2606 = vadd.xlane.f32.xlu0 %v2605_v17 }
0x16f4   :  { %2612 = vadd.xlane.f32.xlu0 %v2611_v30 }
0x16ff   :  { %2621 = vperm.xlu1 %9541, %v11138_v40  }
0x176d   :  { %v2592_v8 = vpop.xlane.xlu0 %2591 }
0x176f   :  { %v2595_v27 = vpop.xlane.xlu1 %2594 }
0x1771   :  { %v2598_v21 = vpop.xlane.xlu0 %2597 }
0x1773   :  { %v2604_v9 = vpop.xlane.xlu1 %2603 }
0x1775   :  { %v2601_v14 = vpop.xlane.xlu0 %2600 }
0x1777   :  { %v2610_v61 = vpop.xlane.xlu1 %2609 }
0x1779   :  { %v2607_v10 = vpop.xlane.xlu0 %2606 }
0x177b   :  { %v2622_v55 = vpop.permute.xlu1 %2621 }
0x177c   :  { %v2624_v35 = vadd.f32 %v2622_v55, %v2592_v8  ;;  %v2625_v54 = vadd.f32 %v2622_v55, %v2595_v27  ;;  %v2626_v28 = vadd.f32 %v2622_v55, %v2598_v21  ;;  %v2627_v3 = vadd.f32 %v2622_v55, %v2601_v14 }
0x177d   :  { %v2613_v50 = vpop.xlane.xlu0 %2612  ;;  %v2628_v58 = vadd.f32 %v2622_v55, %v2604_v9  ;;  %v2629_v4 = vadd.f32 %v2622_v55, %v2607_v10  ;;  %v2630_v16 = vadd.f32 %v2622_v55, %v2610_v61 }
0x177e   :  { %v2643_v31 = vrot.slane %v2624_v35, %v10651_v41  ;;  %v2647_v26 = vrot.slane %v2625_v54, %v10651_v41  ;;  %v2651_v0 = vrot.slane %v2626_v28, %v10651_v41  ;;  %v2631_v59 = vadd.f32 %v2622_v55, %v2613_v50 }
0x177f   :  { %v2655_v42 = vrot.slane %v2627_v3, %v10651_v41  ;;  %v2659_v44 = vrot.slane %v2628_v58, %v10651_v41  ;;  %v2663_v57 = vrot.slane %v2629_v4, %v10651_v41  ;;  %v2667_v5 = vrot.slane %v2630_v16, %v10651_v41 }
0x1780   :  { %v2672_v47 = vsel %vm613_vm2, %v2647_v26, %v2643_v31  ;;  %v2671_v17 = vrot.slane %v2631_v59, %v10651_v41 }
0x1781   :  { %v2673_v36 = vsel %vm615_vm3, %v2651_v0, %v2672_v47 }
0x1782   :  { %v2674_v48 = vsel %vm617_vm4, %v2655_v42, %v2673_v36 }
0x1783   :  { %v2675_v11 = vsel %vm619_vm5, %v2659_v44, %v2674_v48 }
0x1784   :  { %v2676_v12 = vsel %vm621_vm6, %v2663_v57, %v2675_v11 }
0x1785   :  { %v2677_v30 = vsel %vm623_vm7, %v2667_v5, %v2676_v12 }
0x1786   :  { %v2678_v8 = vsel %vm625_vm8, %v2671_v17, %v2677_v30 }
0x1787   :  { %v2680_v27 = vsel %vm628_vm9, %v2678_v8, -inf }
0x1788   :  { %2681 = vmax.xlane.f32.xlu0 %v2680_v27 }
0x1811   :  { %v2682_v21 = vpop.xlane.xlu0 %2681 }
0x1812   :  { %v2687_v9 = vrot.slane %v2682_v21, %v10574_v60  ;;  %v2691_v14 = vrot.slane %v2682_v21, %v10670_v22  ;;  %v2695_v61 = vrot.slane %v2682_v21, %v10676_v24  ;;  %v2703_v10 = vrot.slane %v2682_v21, %v10686_v39 }
0x1813   :  { %v2711_v55 = vrot.slane %v2682_v21, %v10694_v45  ;;  %v2699_v26 = vrot.slane %v2682_v21, %v10682_v33  ;;  %v2707_v48 = vrot.slane %v2682_v21, %v10690_v49  ;;  %v2715_v12 = vrot.slane %v2682_v21, %v10673_v23 }
0x1814   :  { %v2724_v50 = vsub.f32 %v2624_v35, %v2687_v9  ;;  %v2725_v31 = vsub.f32 %v2625_v54, %v2691_v14  ;;  %v2726_v0 = vsub.f32 %v2626_v28, %v2695_v61  ;;  %v2728_v42 = vsub.f32 %v2628_v58, %v2703_v10 }
0x1815   :  { %v2730_v36 = vsub.f32 %v2630_v16, %v2711_v55  ;;  %v2727_v5 = vsub.f32 %v2627_v3, %v2699_v26  ;;  %v2729_v35 = vsub.f32 %v2629_v4, %v2707_v48  ;;  %v2731_v28 = vsub.f32 %v2631_v59, %v2715_v12 }
0x1816   :  { %v2732_v47 = vmul.f32 1.442695, %v2724_v50  ;;  %v2734_v44 = vmul.f32 1.442695, %v2725_v31  ;;  %v2740_v57 = vmul.f32 1.442695, %v2728_v42 }
0x1817   :  { %v2736_v11 = vmul.f32 1.442695, %v2726_v0  ;;  %v2744_v17 = vmul.f32 1.442695, %v2730_v36  ;;  %v2738_v54 = vmul.f32 1.442695, %v2727_v5 }
0x1818   :  { %9806 = vpow2.f32 %v2732_v47  ;;  %v2742_v58 = vmul.f32 1.442695, %v2729_v35  ;;  %v2746_v16 = vmul.f32 1.442695, %v2731_v28 }
0x1819   :  { %9808 = vpow2.f32 %v2734_v44 }
0x181a   :  { %9810 = vpow2.f32 %v2740_v57 }
0x181b   :  { %9812 = vpow2.f32 %v2736_v11 }
0x181c   :  { %9814 = vpow2.f32 %v2744_v17 }
0x181d   :  { %9816 = vpow2.f32 %v2738_v54 }
0x181e   :  { %9818 = vpow2.f32 %v2742_v58 }
0x181f   :  { %9820 = vpow2.f32 %v2746_v16 }
0x1825   :  { %v9807_v30 = vpop.eup %9806 }
0x1826   :  { %v9809_v8 = vpop.eup %9808  ;;  %2757 = vperm.xlu0 %9540, %v9807_v30  }
0x1827   :  { %2760 = vperm.xlu1 %9541, %v9809_v8   ;;  %v11165_v3 = vpop.eup %9810 }
0x1828   :  { %v9813_v27 = vpop.eup %9812 }
0x1829   :  { %v11168_v4 = vpop.eup %9814 }
0x182a   :  { %2769 = vperm.xlu0 %9540, %v11165_v3   ;;  %v9817_v21 = vpop.eup %9816 }
0x182b   :  { %2763 = vperm.xlu1 %9541, %v9813_v27   ;;  %v9819_v59 = vpop.eup %9818 }
0x182c   :  { %v11171_v9 = vpop.eup %9820 }
0x182e   :  { %2775 = vperm.xlu0 %9540, %v11168_v4  }
0x182f   :  { %2766 = vperm.xlu1 %9541, %v9817_v21  }
0x1833   :  { %2772 = vperm.xlu1 %9541, %v9819_v59  }
0x1837   :  { %2778 = vperm.xlu1 %9541, %v11171_v9  }
0x18a1   :  { %v2758_v61 = vpop.permute.xlu0 %2757 }
0x18a2   :  { %v2761_v14 = vpop.permute.xlu1 %2760  ;;  %v2783_v50 = vrot.slane %v2758_v61, %v10651_v41 }
0x18a3   :  { %v2787_v55 = vrot.slane %v2761_v14, %v10651_v41 }
0x18a5   :  { %v2770_v26 = vpop.permute.xlu0 %2769  ;;  %v2812_v42 = vsel %vm613_vm2, %v2787_v55, %v2783_v50 }
0x18a6   :  { %v2764_v10 = vpop.permute.xlu1 %2763  ;;  %v2799_v57 = vrot.slane %v2770_v26, %v10651_v41 }
0x18a7   :  { %v2791_v31 = vrot.slane %v2764_v10, %v10651_v41 }
0x18a9   :  { %v2813_v44 = vsel %vm615_vm3, %v2791_v31, %v2812_v42  ;;  %v2776_v5 = vpop.permute.xlu0 %2775 }
0x18aa   :  { %v2767_v0 = vpop.permute.xlu1 %2766  ;;  %v2807_v35 = vrot.slane %v2776_v5, %v10651_v41 }
0x18ab   :  { %v2795_v47 = vrot.slane %v2767_v0, %v10651_v41 }
0x18ad   :  { %v2814_v36 = vsel %vm617_vm4, %v2795_v47, %v2813_v44 }
0x18ae   :  { %v2773_v48 = vpop.permute.xlu1 %2772  ;;  %v2815_v17 = vsel %vm619_vm5, %v2799_v57, %v2814_v36 }
0x18af   :  { %v2803_v11 = vrot.slane %v2773_v48, %v10651_v41 }
0x18b1   :  { %v2816_v12 = vsel %vm621_vm6, %v2803_v11, %v2815_v17 }
0x18b2   :  { %v2779_v54 = vpop.permute.xlu1 %2778  ;;  %v2817_v58 = vsel %vm623_vm7, %v2807_v35, %v2816_v12 }
0x18b3   :  { %v2811_v28 = vrot.slane %v2779_v54, %v10651_v41 }
0x18b5   :  { %v2818_v16 = vsel %vm625_vm8, %v2811_v28, %v2817_v58 }
0x18b6   :  { %v2820_v14 = vsel %vm628_vm9, %v2818_v16, 0.0 }
0x18b7   :  { %2821 = vadd.xlane.f32.xlu0 %v2820_v14  ;;  %v9582_v14 = vld [vmem:[#allocation18 + $0x18] sm:$0xff]  }
0x18b8   :  { %9234 = vmatpush3.bf16.msra.mxu1 %v9582_v14 }
0x18b9   :  { %9235 = vmatprep.subr.bf16.mxu1 %v12479_v1 }
0x1940   :  { %v2822_v61 = vpop.xlane.xlu0 %2821 }
0x1941   :  { %v2827_v10 = vrot.slane %v2822_v61, %v10574_v60  ;;  %v2831_v55 = vrot.slane %v2822_v61, %v10670_v22  ;;  %v2835_v50 = vrot.slane %v2822_v61, %v10676_v24  ;;  %v2839_v31 = vrot.slane %v2822_v61, %v10682_v33 }
0x1942   :  { %v2843_v26 = vrot.slane %v2822_v61, %v10686_v39  ;;  %v2847_v47 = vrot.slane %v2822_v61, %v10690_v49  ;;  %v2851_v57 = vrot.slane %v2822_v61, %v10694_v45  ;;  %v2855_v11 = vrot.slane %v2822_v61, %v10673_v23  ;;  %v9584_v61 = vld [vmem:[#allocation18 + $0x8] sm:$0xff]  }
0x1943   :  { %9822 = vrcp.f32 %v2827_v10 }
0x1944   :  { %9824 = vrcp.f32 %v2831_v55  ;;  %v11209_v55 = vld [vmem:[#allocation10 + $0x8] sm:$0xff]  }
0x1945   :  { %9826 = vrcp.f32 %v2835_v50 }
0x1946   :  { %9828 = vrcp.f32 %v2839_v31 }
0x1947   :  { %9830 = vrcp.f32 %v2843_v26 }
0x1948   :  { %9832 = vrcp.f32 %v2847_v47 }
0x1949   :  { %9834 = vrcp.f32 %v2851_v57  ;;  %v12450_v57 = vunpack.c.h.bf16 %v11209_v55 }
0x194a   :  { %9836 = vrcp.f32 %v2855_v11 }
0x1950   :  { %v9823_v0 = vpop.eup %9822 }
0x1951   :  { %v2865_v42 = vmul.f32 %v9823_v0, %v9807_v30  ;;  %v9825_v44 = vpop.eup %9824  ;;  %v12451_v0 = vunpack.c.l.bf16 %v11209_v55 }
0x1952   :  { %v2867_v36 = vmul.f32 %v9825_v44, %v9809_v8  ;;  %v9827_v48 = vpop.eup %9826 }
0x1953   :  { %2898 = vperm.xlu1 %9541, %v2865_v42   ;;  %v2869_v5 = vmul.f32 %v9827_v48, %v9813_v27  ;;  %v9829_v17 = vpop.eup %9828 }
0x1954   :  { %v2871_v12 = vmul.f32 %v9829_v17, %v9817_v21  ;;  %v9831_v30 = vpop.eup %9830  ;;  %v9583_v21 = vld [vmem:[#allocation18 + $0x10] sm:$0xff]  }
0x1955   :  { %v2873_v35 = vmul.f32 %v9831_v30, %v11165_v3  ;;  %v9833_v54 = vpop.eup %9832  ;;  %9236 = vmatpush3.bf16.msra.mxu1 %v9583_v21  ;;  %v9585_v3 = vld [vmem:[#allocation18] sm:$0xff]  }
0x1956   :  { %v2875_v8 = vmul.f32 %v9833_v54, %v9819_v59  ;;  %v9835_v28 = vpop.eup %9834  ;;  %9237 = vmatprep.subr.bf16.mxu1 %v12479_v1 }
0x1957   :  { %2903 = vperm.xlu1 %9541, %v2867_v36   ;;  %v2877_v58 = vmul.f32 %v9835_v28, %v11168_v4  ;;  %v9837_v16 = vpop.eup %9836  ;;  %v11205_v4 = vld [vmem:[#allocation10] sm:$0xff]  }
0x1958   :  { %v2879_v27 = vmul.f32 %v9837_v16, %v11171_v9  ;;  %v12453_v9 = vunpack.c.l.bf16 %v11205_v4  ;;  %v12452_v10 = vunpack.c.h.bf16 %v11205_v4 }
0x1959   :  { %9238 = vmatpush3.bf16.msra.mxu1 %v9584_v61 }
0x195a   :  { %9239 = vmatprep.subr.bf16.mxu1 %v12479_v1 }
0x195b   :  { %2908 = vperm.xlu1 %9541, %v2869_v5   ;;  %v11221_v5 = vld [vmem:[#allocation10 + $0x10] sm:$0xff]  }
0x195c   :  { %v12449_v54 = vunpack.c.l.bf16 %v11221_v5  ;;  %v12454_v61 = vunpack.c.h.bf16 %v11221_v5 }
0x195d   :  { %9240 = vmatpush3.bf16.msra.mxu1 %v9585_v3 }
0x195e   :  { %9261 = vmatprep.subr.bf16.mxu1 %v12479_v1 }
0x195f   :  { %2913 = vperm.xlu1 %9541, %v2871_v12  }
0x1963   :  { %2918 = vperm.xlu1 %9541, %v2873_v35  }
0x1967   :  { %2923 = vperm.xlu1 %9541, %v2875_v8  }
0x196b   :  { %2928 = vperm.xlu1 %9541, %v2877_v58  }
0x196f   :  { %2933 = vperm.xlu1 %9541, %v2879_v27  }
0x19ce   :  { %v2899_v59 = vpop.permute.xlu1 %2898 }
0x19cf   :  { %v2936_v31 = vmul.f32 %v12453_v9, %v2899_v59 }
0x19d1   :  { %v2944_v44 = vsel %vm893_vm10, %v2936_v31, 0.0 }
0x19d2   :  { %v2904_v50 = vpop.permute.xlu1 %2903  ;;  %v2945_v17 = vrot.slane %v2944_v44, 4 }
0x19d3   :  { %v2937_v26 = vmul.f32 %v12452_v10, %v2904_v50  ;;  %v11231_v50 = vld [vmem:[#allocation10 + $0x18] sm:$0xff]  }
0x19d4   :  { %v2946_v16 = vadd.f32 %v2945_v17, %v2944_v44 }
0x19d5   :  { %v2951_v42 = vsel %vm893_vm10, %v2937_v26, 0.0 }
0x19d6   :  { %v2909_v47 = vpop.permute.xlu1 %2908  ;;  %v2952_v48 = vrot.slane %v2951_v42, 4 }
0x19d7   :  { %v2938_v36 = vmul.f32 %v12451_v0, %v2909_v47  ;;  %v2947_v47 = vrot.slane %v2946_v16, 2  ;;  %v8736_v0 = vunpack.c.h.bf16 %v11231_v50 }
0x19d8   :  { %v2953_v8 = vadd.f32 %v2952_v48, %v2951_v42 }
0x19d9   :  { %v2958_v11 = vsel %vm893_vm10, %v2938_v36, 0.0 }
0x19da   :  { %v2959_v12 = vrot.slane %v2958_v11, 4  ;;  %v2914_v30 = vpop.permute.xlu1 %2913  ;;  %v2954_v3 = vrot.slane %v2953_v8, 2 }
0x19db   :  { %v2939_v35 = vmul.f32 %v12450_v57, %v2914_v30 }
0x19dc   :  { %v2960_v28 = vadd.f32 %v2959_v12, %v2958_v11  ;;  %v12455_v11 = vunpack.c.l.bf16 %v11231_v50  ;;  %v2955_v17 = vadd.f32 %v2954_v3, %v2953_v8 }
0x19dd   :  { %v2965_v58 = vsel %vm893_vm10, %v2939_v35, 0.0 }
0x19de   :  { %v2966_v27 = vrot.slane %v2965_v58, 4  ;;  %v2919_v14 = vpop.permute.xlu1 %2918  ;;  %v2961_v31 = vrot.slane %v2960_v28, 2  ;;  %v2956_v10 = vrot.slane %v2955_v17, 1 }
0x19df   :  { %v2940_v21 = vmul.f32 %v12449_v54, %v2919_v14 }
0x19e0   :  { %v2967_v59 = vadd.f32 %v2966_v27, %v2965_v58  ;;  %v2962_v30 = vadd.f32 %v2961_v31, %v2960_v28  ;;  %v2948_v58 = vadd.f32 %v2947_v47, %v2946_v16 }
0x19e1   :  { %v2972_v26 = vsel %vm893_vm10, %v2940_v21, 0.0 }
0x19e2   :  { %v2968_v42 = vrot.slane %v2967_v59, 2  ;;  %v2973_v36 = vrot.slane %v2972_v26, 4  ;;  %v2924_v48 = vpop.permute.xlu1 %2923  ;;  %v2949_v3 = vrot.slane %v2948_v58, 1 }
0x19e3   :  { %v2941_v44 = vmul.f32 %v12454_v61, %v2924_v48  ;;  %v2963_v48 = vrot.slane %v2962_v30, 1 }
0x19e4   :  { %v2974_v12 = vadd.f32 %v2973_v36, %v2972_v26  ;;  %v2969_v27 = vadd.f32 %v2968_v42, %v2967_v59  ;;  %v2957_v42 = vadd.f32 %v2956_v10, %v2955_v17 }
0x19e5   :  { %v2979_v35 = vsel %vm893_vm10, %v2941_v44, 0.0 }
0x19e6   :  { %v2975_v14 = vrot.slane %v2974_v12, 2  ;;  %v2929_v54 = vpop.permute.xlu1 %2928  ;;  %v2980_v57 = vrot.slane %v2979_v35, 4  ;;  %v2970_v28 = vrot.slane %v2969_v27, 1  ;;  %v3001_v18 = vpack.c.bf16 %v2957_v42, %v2957_v42 }
0x19e7   :  { %v2942_v21 = vmul.f32 %v12455_v11, %v2929_v54  ;;  %v2964_v54 = vadd.f32 %v2963_v48, %v2962_v30 }
0x19e8   :  { %v2976_v9 = vadd.f32 %v2975_v14, %v2974_v12  ;;  %v2981_v61 = vadd.f32 %v2980_v57, %v2979_v35  ;;  %v2950_v12 = vadd.f32 %v2949_v3, %v2948_v58  ;;  %v2971_v14 = vadd.f32 %v2970_v28, %v2969_v27 }
0x19e9   :  { %v2986_v8 = vsel %vm893_vm10, %v2942_v21, 0.0  ;;  %v3002_v38 = vpack.c.bf16 %v2964_v54, %v2964_v54  ;;  %v3032_v30 = vunpack.c.l.b16 %v3001_v18 }
0x19ea   :  { %v2987_v31 = vrot.slane %v2986_v8, 4  ;;  %v2934_v26 = vpop.permute.xlu1 %2933  ;;  %v2977_v16 = vrot.slane %v2976_v9, 1  ;;  %v2982_v59 = vrot.slane %v2981_v61, 2  ;;  %v3000_v20 = vpack.c.bf16 %v2950_v12, %v2950_v12 }
0x19eb   :  { %v2943_v47 = vmul.f32 %v8736_v0, %v2934_v26  ;;  %v3003_v52 = vpack.c.bf16 %v2971_v14, %v2971_v14  ;;  %v3033_v58 = vunpack.c.l.b16 %v3002_v38 }
0x19ec   :  { %v2988_v36 = vadd.f32 %v2987_v31, %v2986_v8  ;;  %v2983_v44 = vadd.f32 %v2982_v59, %v2981_v61  ;;  %v2978_v21 = vadd.f32 %v2977_v16, %v2976_v9  ;;  %v3031_v27 = vunpack.c.l.b16 %v3000_v20 }
0x19ed   :  { %v2993_v11 = vsel %vm893_vm10, %v2943_v47, 0.0  ;;  %v3034_v3 = vunpack.c.l.b16 %v3003_v52 }
0x19ee   :  { %v2989_v57 = vrot.slane %v2988_v36, 2  ;;  %v2994_v35 = vrot.slane %v2993_v11, 4  ;;  %v2984_v37 = vrot.slane %v2983_v44, 1  ;;  %v3004_v17 = vpack.c.bf16 %v2978_v21, %v2978_v21 }
0x19ef   :  { %v3039_v16 = vsel %vm613_vm2, %v3032_v30, %v3031_v27 }
0x19f0   :  { %v2990_v15 = vadd.f32 %v2989_v57, %v2988_v36  ;;  %v2995_v25 = vadd.f32 %v2994_v35, %v2993_v11  ;;  %v2985_v7 = vadd.f32 %v2984_v37, %v2983_v44  ;;  %v3035_v31 = vunpack.c.l.b16 %v3004_v17 }
0x19f1   :  { %v3040_v37 = vsel %vm615_vm3, %v3033_v58, %v3039_v16 }
0x19f2   :  { %v2991_v26 = vrot.slane %v2990_v15, 1  ;;  %v2996_v10 = vrot.slane %v2995_v25, 2  ;;  %v3005_v61 = vpack.c.bf16 %v2985_v7, %v2985_v7  ;;  %v3041_v42 = vsel %vm617_vm4, %v3034_v3, %v3040_v37  ;;  %v9587_v3 = vld [vmem:[#allocation13] sm:$0xff]  }
0x19f3   :  { %v3042_v7 = vsel %vm619_vm5, %v3035_v31, %v3041_v42 }
0x19f4   :  { %v2992_v48 = vadd.f32 %v2991_v26, %v2990_v15  ;;  %v2997_v8 = vadd.f32 %v2996_v10, %v2995_v25  ;;  %v3036_v11 = vunpack.c.l.b16 %v3005_v61  ;;  %v11258_v15 = vld [vmem:[%s12435_s12] ss:$0 sm:$0xff] }
0x19f6   :  { %v3006_v28 = vpack.c.bf16 %v2992_v48, %v2992_v48  ;;  %v2998_v9 = vrot.slane %v2997_v8, 1  ;;  %v3043_v25 = vsel %vm621_vm6, %v3036_v11, %v3042_v7  ;;  %v3262_v11 = vld [vmem:[#allocation7 + $0x18] sm:$0xff] }
0x19f8   :  { %v2999_v59 = vadd.f32 %v2998_v9, %v2997_v8  ;;  %v3037_v47 = vunpack.c.l.b16 %v3006_v28 }
0x19fa   :  { %v3007_v36 = vpack.c.bf16 %v2999_v59, %v2999_v59  ;;  %v3044_v52 = vsel %vm623_vm7, %v3037_v47, %v3043_v25 }
0x19fc   :  { %v3038_v38 = vunpack.c.l.b16 %v3007_v36 }
0x19fe   :  { %v3045_v20 = vsel %vm625_vm8, %v3038_v38, %v3044_v52 }
0x19ff   :  { %v3046_v18 = vpack.c.b16 %v3045_v20, %v3045_v20 }
0x1a01   :  { %9242 = vmatmul.mubr.msk.bf16.vlgmr.msra.gmra.mxu1 %vm893_vm10, %v3046_v18 }
0x1a02   :  { %9265 = vmatprep.mubr.msk.bf16.mxu1 %vm10372_vm1, %v12479_v1 }
0x1ac1   :  { %v3108_v54 = vpop.f32.mrf.mxu1 }
0x1ac2   :  { %v3109_v44 = vadd.f32 %v11258_v15, %v3108_v54 }
0x1ac3   :  { %v9243_v12 = vpop.f32.mrf.mxu1 }
0x1ac4   :  { %v3170_v14 = vadd.f32 %v11084_v13, %v3109_v44 }
0x1ac5   :  { %v3111_v57 = vpop.f32.mrf.mxu1 }
0x1ac6   :  { %v3227_v35 = vadd.f32 %v11111_v63, %v3170_v14  ;;  %v9586_v63 = vld [vmem:[#allocation13 + $0x8] sm:$0xff]  }
0x1ac7   :  { %v9244_v21 = vpop.f32.mrf.mxu1  ;;  %9262 = vmatpush3.bf16.msra.mxu1 %v9586_v63  ;;  %v9588_v57 = vld [vmem:[#allocation16 + $0x8] sm:$0xff]  }
0x1ac8   :  { %9838 = vtanh.f32 %v3227_v35  ;;  %v8496_v10 = vmul.f32 -1.442695, %v3227_v35  ;;  %9263 = vmatprep.subr.bf16.mxu1 %v12479_v1  ;;  %v9589_v35 = vld [vmem:[#allocation16] sm:$0xff]  }
0x1aca   :  { %9840 = vpow2.f32 %v8496_v10 }
0x1acb   :  { %9264 = vmatpush3.bf16.msra.mxu1 %v9587_v3 }
0x1acc   :  { %9277 = vmatprep.subr.bf16.mxu1 %v12479_v1 }
0x1ad5   :  { %v9839_v26 = vpop.eup %9838 }
0x1ad6   :  { %3237 = vrot.lane.b32.xlu0 %v9839_v26, %s10360_s30 }
0x1ad7   :  { %v9841_v17 = vpop.eup %9840 }
0x1ad8   :  { %v3231_v30 = vadd.f32 1.0, %v9841_v17 }
0x1ada   :  { %9842 = vrcp.f32 %v3231_v30 }
0x1ae7   :  { %v9843_v61 = vpop.eup %9842 }
0x1ae8   :  { %v3234_v13 = vmul.f32 %v9843_v61, %v11011_v46 }
0x1b48   :  { %v3238_v48 = vpop.permute.xlu0 %3237 }
0x1b49   :  { %v3240_v8 = vmul.f32 %v9843_v61, %v3238_v48  ;;  %v9592_v48 = vld [vmem:[#allocation19 + $0x8] sm:$0xff]  }
0x1b4b   :  { %3242 = vrot.lane.b32.xlu1 %v3240_v8, %s10373_s9  ;;  %v9593_v8 = vld [vmem:[#allocation19] sm:$0xff]  }
0x1bbd   :  { %v3243_v58 = vpop.permute.xlu1 %3242 }
0x1bbe   :  { %v11266_v27 = vadd.f32 %v3243_v58, %v3234_v13  ;;  %v9594_v13 = vld [vmem:[#allocation15 + $0x8] sm:$0xff]   ;;  %v9595_v58 = vld [vmem:[#allocation15] sm:$0xff]  }
0x1bc0   :  { %9844 = vtanh.f32 %v11266_v27 }
0x1bcd   :  { %v9845_v28 = vpop.eup %9844 }
0x1bce   :  { %3248 = vrot.lane.b32.xlu1 %v9845_v28, %s10360_s30 }
0x1c40   :  { %v3249_v9 = vpop.permute.xlu1 %3248 }
0x1c41   :  { %v3251_v31 = vmul.f32 %v9843_v61, %v3249_v9  ;;  %v9591_v61 = vld [vmem:[%s12433_s10] sm:$0xff]  }
0x1c43   :  { %v11272_v16 = vpack.c.bf16 %v3251_v31, %v3251_v31 }
0x1c45   :  { %12513 = vst [vmem:[#allocation29_spill] sm:$0xff] %v11272_v16  ;;  %3267 = vrot.lane.b32.xlu1 %v11272_v16, %s10373_s9 }
0x1cb7   :  { %v3268_v46 = vpop.permute.xlu1 %3267 }
0x1cb8   :  { %9266 = vmatmul.mubr.msk.bf16.vlgmr.msra.gmra.mxu1 %vm161_vm0, %v3268_v46 }
0x1cb9   :  { %9281 = vmatprep.mubr.msk.bf16.mxu1 %vm10372_vm1, %v12479_v1  ;;  %9278 = vmatpush3.bf16.msra.mxu1 %v9588_v57 }
0x1cba   :  { %9279 = vmatprep.subr.bf16.mxu1 %v12479_v1 }
0x1cbd   :  { %9280 = vmatpush3.bf16.msra.mxu1 %v9589_v35 }
0x1cbe   :  { %9297 = vmatprep.subr.bf16.mxu1 %v12479_v1 }
0x1d78   :  { %v3318_v59 = vpop.f32.mrf.mxu1 }
0x1d79   :  { %v3324_v37 = vadd.f32 %v3318_v59, %v3262_v11 }
0x1d7a   :  { %v9267_v47 = vpop.f32.mrf.mxu1 }
0x1d7b   :  { %v3381_v42 = vadd.f32 %v11120_v19, %v3324_v37 }
0x1d7c   :  { %v3321_v36 = vpop.f32.mrf.mxu1 }
0x1d7d   :  { %9846 = vtanh.f32 %v3381_v42  ;;  %v8504_v38 = vmul.f32 -1.442695, %v3381_v42 }
0x1d7e   :  { %v9268_v7 = vpop.f32.mrf.mxu1 }
0x1d7f   :  { %9848 = vpow2.f32 %v8504_v38 }
0x1d8a   :  { %v9847_v25 = vpop.eup %9846 }
0x1d8b   :  { %3391 = vrot.lane.b32.xlu1 %v9847_v25, %s10360_s30 }
0x1d8c   :  { %v9849_v52 = vpop.eup %9848 }
0x1d8d   :  { %v3385_v20 = vadd.f32 1.0, %v9849_v52 }
0x1d8f   :  { %9850 = vrcp.f32 %v3385_v20 }
0x1d9c   :  { %v9851_v18 = vpop.eup %9850 }
0x1d9d   :  { %v3388_v12 = vmul.f32 %v9851_v18, %v11028_v62  ;;  %v9590_v62 = vld [vmem:[%s12433_s10 + $0x8] sm:$0xff]  }
0x1dfd   :  { %v3392_v54 = vpop.permute.xlu1 %3391 }
0x1dfe   :  { %v3394_v44 = vmul.f32 %v9851_v18, %v3392_v54 }
0x1e00   :  { %3396 = vrot.lane.b32.xlu1 %v3394_v44, %s10373_s9 }
0x1e72   :  { %v3397_v14 = vpop.permute.xlu1 %3396 }
0x1e73   :  { %v11283_v19 = vadd.f32 %v3397_v14, %v3388_v12  ;;  %v12514_v14 = vunpack.c.l.bf16 %v11065_v51 }
0x1e75   :  { %9852 = vtanh.f32 %v11283_v19 }
0x1e82   :  { %v9853_v21 = vpop.eup %9852 }
0x1e83   :  { %3402 = vrot.lane.b32.xlu0 %v9853_v21, %s10360_s30 }
0x1ef5   :  { %v3403_v26 = vpop.permute.xlu0 %3402 }
0x1ef6   :  { %v3405_v10 = vmul.f32 %v9851_v18, %v3403_v26 }
0x1ef8   :  { %v3406_v17 = vpack.c.bf16 %v3405_v10, %v3405_v10 }
0x1efa   :  { %3419 = vrot.lane.b32.xlu1 %v3406_v17, %s10373_s9 }
0x1f6c   :  { %v3420_v30 = vpop.permute.xlu1 %3419 }
0x1f6d   :  { %9282 = vmatmul.mubr.msk.bf16.vlgmr.msra.gmra.mxu1 %vm161_vm0, %v3420_v30 }
0x1f6e   :  { %9298 = vmatpush3.bf16.msra.mxu1 %v9590_v62  ;;  %9301 = vmatprep.mubr.msk.bf16.mxu1 %vm10372_vm1, %v12479_v1  ;;  %v12515_v62 = vunpack.c.h.bf16 %v11065_v51 }
0x1f6f   :  { %9299 = vmatprep.subr.bf16.mxu1 %v12479_v1 }
0x1f72   :  { %9300 = vmatpush3.bf16.msra.mxu1 %v9591_v61  ;;  %v12516_v61 = vunpack.c.l.bf16 %v11068_v2 }
0x1f73   :  { %9305 = vmatprep.subr.bf16.mxu1 %v12479_v1 }
0x1f75   :  { %9302 = vmatmul.mubr.msk.bf16.vlgmr.msra.gmra.mxu1 %vm161_vm0, %v3420_v30 }
0x1f76   :  { %9306 = vmatpush3.bf16.msra.mxu1 %v9592_v48  ;;  %9309 = vmatprep.mubr.msk.bf16.mxu1 %vm10372_vm1, %v12479_v1 }
0x1f77   :  { %9307 = vmatprep.subr.bf16.mxu1 %v12479_v1 }
0x1f7a   :  { %9308 = vmatpush3.bf16.msra.mxu1 %v9593_v8 }
0x1f7b   :  { %9321 = vmatprep.subr.bf16.mxu1 %v12479_v1 }
0x1f7d   :  { %9310 = vmatmul.mubr.msk.bf16.vlgmr.msra.gmra.mxu1 %vm161_vm0, %v3268_v46 }
0x1f7e   :  { %9322 = vmatpush3.bf16.msra.mxu1 %v9594_v13  ;;  %9325 = vmatprep.mubr.msk.bf16.mxu1 %vm10372_vm1, %v12479_v1  ;;  %v12517_v13 = vunpack.c.h.bf16 %v11068_v2 }
0x1f7f   :  { %9323 = vmatprep.subr.bf16.mxu1 %v12479_v1 }
0x1f82   :  { %9324 = vmatpush3.bf16.msra.mxu1 %v9595_v58 }
0x1f83   :  { %9337 = vmatprep.subr.bf16.mxu1 %v12479_v1 }
0x1f85   :  { %9326 = vmatmul.mubr.msk.bf16.vlgmr.msra.gmra.mxu1 %vm161_vm0, %v3420_v30 }
0x1f86   :  { %9345 = vmatprep.mubr.msk.bf16.mxu1 %vm10372_vm1, %v12479_v1 }
0x202d   :  { %v3470_v63 = vpop.f32.mrf.mxu1 }
0x202e   :  { %v3471_v3 = vadd.f32 %v11062_v29, %v3470_v63  ;;  %v12518_v63 = vunpack.c.l.bf16 %v11070_v56 }
0x202f   :  { %v9283_v28 = vpop.f32.mrf.mxu1 }
0x2030   :  { %v3493_v9 = vcombine.high %v3471_v3, %v3471_v3  ;;  %v3500_v31 = vrot.slane %v3471_v3, %v10567_v53 }
0x2031   :  { %v3473_v46 = vpop.f32.mrf.mxu1 }
0x2032   :  { %v3507_v11 = vrot.slane %v3493_v9, %v10567_v53  ;;  %v3508_v59 = vcombine.high %v3500_v31, %v3500_v31  ;;  %v3516_v37 = vrot.slane %v3500_v31, %v10567_v53  ;;  %v12519_v9 = vunpack.c.l.bf16 %v11081_v32 }
0x2033   :  { %v9284_v47 = vpop.f32.mrf.mxu1  ;;  %v12520_v46 = vunpack.c.h.bf16 %v11070_v56 }
0x2034   :  { %v3509_v42 = vcombine.high %v3507_v11, %v3507_v11  ;;  %v3523_v36 = vrot.slane %v3507_v11, %v10567_v53  ;;  %v3530_v7 = vrot.slane %v3508_v59, %v10567_v53  ;;  %v3538_v25 = vcombine.high %v3516_v37, %v3516_v37 }
0x2035   :  { %v3545_v38 = vrot.slane %v3516_v37, %v10574_v60  ;;  %v11321_v29 = vpop.f32.mrf.mxu1  ;;  %v12521_v37 = vunpack.c.h.bf16 %v11081_v32 }
0x2036   :  { %v3537_v52 = vrot.slane %v3509_v42, %v10567_v53  ;;  %v3539_v20 = vcombine.high %v3523_v36, %v3523_v36  ;;  %v3540_v18 = vcombine.high %v3530_v7, %v3530_v7  ;;  %v3549_v54 = vrot.slane %v3530_v7, %v10574_v60 }
0x2037   :  { %v3553_v44 = vrot.slane %v3538_v25, %v10574_v60  ;;  %v3561_v12 = vrot.slane %v3523_v36, %v10574_v60  ;;  %v3582_v57 = vadd.f32 %v12514_v14, %v3545_v38  ;;  %v9303_v35 = vpop.f32.mrf.mxu1 }
0x2038   :  { %v3541_v21 = vcombine.high %v3537_v52, %v3537_v52  ;;  %v3557_v26 = vrot.slane %v3540_v18, %v10574_v60  ;;  %v3569_v10 = vrot.slane %v3539_v20, %v10574_v60  ;;  %v3565_v17 = vrot.slane %v3537_v52, %v10574_v60 }
0x2039   :  { %v3583_v30 = vadd.f32 %v12515_v62, %v3549_v54  ;;  %v3584_v48 = vadd.f32 %v12516_v61, %v3553_v44  ;;  %9854 = vtanh.f32 %v3582_v57  ;;  %v4190_v8 = vpop.f32.mrf.mxu1  ;;  %v3586_v3 = vadd.f32 %v12518_v63, %v3561_v12 }
0x203a   :  { %v3585_v58 = vadd.f32 %v12517_v13, %v3557_v26  ;;  %v3588_v31 = vadd.f32 %v12519_v9, %v3569_v10  ;;  %v3573_v51 = vrot.slane %v3541_v21, %v10574_v60  ;;  %v3587_v11 = vadd.f32 %v12520_v46, %v3565_v17 }
0x203b   :  { %9856 = vtanh.f32 %v3583_v30  ;;  %v9304_v28 = vpop.f32.mrf.mxu1 }
0x203c   :  { %9858 = vtanh.f32 %v3584_v48  ;;  %v3589_v47 = vadd.f32 %v12521_v37, %v3573_v51 }
0x203d   :  { %9860 = vtanh.f32 %v3585_v58  ;;  %v11345_v59 = vpop.f32.mrf.mxu1 }
0x203e   :  { %9862 = vtanh.f32 %v3586_v3 }
0x203f   :  { %v9311_v2 = vpop.f32.mrf.mxu1  ;;  %9864 = vtanh.f32 %v3588_v31 }
0x2040   :  { %9866 = vtanh.f32 %v3587_v11 }
0x2041   :  { %v4247_v42 = vpop.f32.mrf.mxu1  ;;  %9868 = vtanh.f32 %v3589_v47 }
0x2043   :  { %v9312_v36 = vpop.f32.mrf.mxu1 }
0x2045   :  { %v11349_v7 = vpop.f32.mrf.mxu1 }
0x2046   :  { %v9855_v25 = vpop.eup %9854 }
0x2047   :  { %v9327_v38 = vpop.f32.mrf.mxu1  ;;  %v3605_v56 = vmul.f32 %v9855_v25, %v11118_v6 }
0x2048   :  { %v9857_v52 = vpop.eup %9856 }
0x2049   :  { %v9859_v20 = vpop.eup %9858  ;;  %v3613_v18 = vsel %vm161_vm0, %v3605_v56, 0.0  ;;  %v4401_v54 = vpop.f32.mrf.mxu1  ;;  %v3606_v44 = vmul.f32 %v9857_v52, %v11118_v6 }
0x204a   :  { %v9861_v12 = vpop.eup %9860  ;;  %3614 = vadd.xlane.f32.xlu0 %v3613_v18  ;;  %v3607_v32 = vmul.f32 %v9859_v20, %v11118_v6 }
0x204b   :  { %v9863_v14 = vpop.eup %9862  ;;  %v3616_v57 = vsel %vm161_vm0, %v3606_v44, 0.0  ;;  %v9328_v35 = vpop.f32.mrf.mxu1  ;;  %v3608_v17 = vmul.f32 %v9861_v12, %v11118_v6 }
0x204c   :  { %3617 = vadd.xlane.f32.xlu1 %v3616_v57  ;;  %v3609_v21 = vmul.f32 %v9863_v14, %v11118_v6  ;;  %v9865_v26 = vpop.eup %9864  ;;  %v3619_v10 = vsel %vm161_vm0, %v3607_v32, 0.0 }
0x204d   :  { %v9867_v62 = vpop.eup %9866  ;;  %v3611_v61 = vmul.f32 %v9865_v26, %v11118_v6  ;;  %v3622_v48 = vsel %vm161_vm0, %v3608_v17, 0.0 }
0x204e   :  { %3620 = vadd.xlane.f32.xlu0 %v3619_v10  ;;  %v3625_v30 = vsel %vm161_vm0, %v3609_v21, 0.0  ;;  %v3610_v8 = vmul.f32 %v9867_v62, %v11118_v6  ;;  %v9869_v13 = vpop.eup %9868 }
0x204f   :  { %v3631_v58 = vsel %vm161_vm0, %v3611_v61, 0.0  ;;  %v3612_v3 = vmul.f32 %v9869_v13, %v11118_v6 }
0x2050   :  { %3626 = vadd.xlane.f32.xlu1 %v3625_v30  ;;  %v3628_v63 = vsel %vm161_vm0, %v3610_v8, 0.0 }
0x2051   :  { %v3634_v28 = vsel %vm161_vm0, %v3612_v3, 0.0 }
0x2052   :  { %3623 = vadd.xlane.f32.xlu0 %v3622_v48 }
0x2054   :  { %3632 = vadd.xlane.f32.xlu1 %v3631_v58 }
0x2056   :  { %3629 = vadd.xlane.f32.xlu0 %v3628_v63 }
0x205a   :  { %3635 = vadd.xlane.f32.xlu0 %v3634_v28 }
0x2065   :  { %3644 = vperm.xlu1 %9541, %v11138_v40  }
0x20d3   :  { %v3615_v9 = vpop.xlane.xlu0 %3614 }
0x20d5   :  { %v3618_v31 = vpop.xlane.xlu1 %3617 }
0x20d7   :  { %v3621_v51 = vpop.xlane.xlu0 %3620 }
0x20d9   :  { %v3627_v46 = vpop.xlane.xlu1 %3626 }
0x20db   :  { %v3624_v11 = vpop.xlane.xlu0 %3623 }
0x20dd   :  { %v3633_v2 = vpop.xlane.xlu1 %3632 }
0x20df   :  { %v3630_v37 = vpop.xlane.xlu0 %3629 }
0x20e1   :  { %v3645_v47 = vpop.permute.xlu1 %3644 }
0x20e2   :  { %v3647_v42 = vadd.f32 %v3645_v47, %v3615_v9  ;;  %v3648_v36 = vadd.f32 %v3645_v47, %v3618_v31  ;;  %v3649_v25 = vadd.f32 %v3645_v47, %v3621_v51  ;;  %v3650_v38 = vadd.f32 %v3645_v47, %v3624_v11 }
0x20e3   :  { %v3636_v56 = vpop.xlane.xlu0 %3635  ;;  %v3651_v6 = vadd.f32 %v3645_v47, %v3627_v46  ;;  %v3652_v52 = vadd.f32 %v3645_v47, %v3630_v37  ;;  %v3653_v54 = vadd.f32 %v3645_v47, %v3633_v2 }
0x20e4   :  { %v3666_v20 = vrot.slane %v3647_v42, %v10651_v41  ;;  %v3670_v18 = vrot.slane %v3648_v36, %v10651_v41  ;;  %v3674_v40 = vrot.slane %v3649_v25, %v10651_v41  ;;  %v3654_v44 = vadd.f32 %v3645_v47, %v3636_v56 }
0x20e5   :  { %v3678_v12 = vrot.slane %v3650_v38, %v10651_v41  ;;  %v3682_v14 = vrot.slane %v3651_v6, %v10651_v41  ;;  %v3686_v35 = vrot.slane %v3652_v52, %v10651_v41  ;;  %v3690_v26 = vrot.slane %v3653_v54, %v10651_v41 }
0x20e6   :  { %v3695_v32 = vsel %vm613_vm2, %v3670_v18, %v3666_v20  ;;  %v3694_v17 = vrot.slane %v3654_v44, %v10651_v41 }
0x20e7   :  { %v3696_v57 = vsel %vm615_vm3, %v3674_v40, %v3695_v32 }
0x20e8   :  { %v3697_v21 = vsel %vm617_vm4, %v3678_v12, %v3696_v57 }
0x20e9   :  { %v3698_v10 = vsel %vm619_vm5, %v3682_v14, %v3697_v21 }
0x20ea   :  { %v3699_v62 = vsel %vm621_vm6, %v3686_v35, %v3698_v10 }
0x20eb   :  { %v3700_v30 = vsel %vm623_vm7, %v3690_v26, %v3699_v62 }
0x20ec   :  { %v3701_v61 = vsel %vm625_vm8, %v3694_v17, %v3700_v30 }
0x20ed   :  { %v3703_v48 = vsel %vm628_vm9, %v3701_v61, -inf }
0x20ee   :  { %3704 = vmax.xlane.f32.xlu0 %v3703_v48 }
0x2177   :  { %v3705_v8 = vpop.xlane.xlu0 %3704 }
0x2178   :  { %v3710_v13 = vrot.slane %v3705_v8, %v10574_v60  ;;  %v3714_v58 = vrot.slane %v3705_v8, %v10670_v22  ;;  %v3718_v63 = vrot.slane %v3705_v8, %v10676_v24  ;;  %v3726_v3 = vrot.slane %v3705_v8, %v10686_v39 }
0x2179   :  { %v3734_v28 = vrot.slane %v3705_v8, %v10694_v45  ;;  %v3722_v51 = vrot.slane %v3705_v8, %v10682_v33  ;;  %v3730_v20 = vrot.slane %v3705_v8, %v10690_v49  ;;  %v3738_v32 = vrot.slane %v3705_v8, %v10673_v23 }
0x217a   :  { %v3747_v9 = vsub.f32 %v3647_v42, %v3710_v13  ;;  %v3748_v31 = vsub.f32 %v3648_v36, %v3714_v58  ;;  %v3749_v46 = vsub.f32 %v3649_v25, %v3718_v63  ;;  %v3751_v11 = vsub.f32 %v3651_v6, %v3726_v3 }
0x217b   :  { %v3753_v47 = vsub.f32 %v3653_v54, %v3734_v28  ;;  %v3750_v18 = vsub.f32 %v3650_v38, %v3722_v51  ;;  %v3752_v42 = vsub.f32 %v3652_v52, %v3730_v20  ;;  %v3754_v25 = vsub.f32 %v3654_v44, %v3738_v32 }
0x217c   :  { %v3755_v2 = vmul.f32 1.442695, %v3747_v9  ;;  %v3757_v37 = vmul.f32 1.442695, %v3748_v31  ;;  %v3763_v56 = vmul.f32 1.442695, %v3751_v11 }
0x217d   :  { %v3759_v40 = vmul.f32 1.442695, %v3749_v46  ;;  %v3767_v12 = vmul.f32 1.442695, %v3753_v47  ;;  %v3761_v36 = vmul.f32 1.442695, %v3750_v18 }
0x217e   :  { %9870 = vpow2.f32 %v3755_v2  ;;  %v3765_v6 = vmul.f32 1.442695, %v3752_v42  ;;  %v3769_v54 = vmul.f32 1.442695, %v3754_v25 }
0x217f   :  { %9872 = vpow2.f32 %v3757_v37 }
0x2180   :  { %9874 = vpow2.f32 %v3763_v56 }
0x2181   :  { %9876 = vpow2.f32 %v3759_v40 }
0x2182   :  { %9878 = vpow2.f32 %v3767_v12 }
0x2183   :  { %9880 = vpow2.f32 %v3761_v36 }
0x2184   :  { %9882 = vpow2.f32 %v3765_v6 }
0x2185   :  { %9884 = vpow2.f32 %v3769_v54 }
0x218b   :  { %v9871_v14 = vpop.eup %9870 }
0x218c   :  { %v9873_v57 = vpop.eup %9872  ;;  %3780 = vperm.xlu0 %9540, %v9871_v14  }
0x218d   :  { %3783 = vperm.xlu1 %9541, %v9873_v57   ;;  %v11392_v38 = vpop.eup %9874 }
0x218e   :  { %v9877_v35 = vpop.eup %9876 }
0x218f   :  { %v11395_v52 = vpop.eup %9878 }
0x2190   :  { %3792 = vperm.xlu0 %9540, %v11392_v38   ;;  %v9881_v21 = vpop.eup %9880 }
0x2191   :  { %3786 = vperm.xlu1 %9541, %v9877_v35   ;;  %v9883_v44 = vpop.eup %9882 }
0x2192   :  { %v11398_v26 = vpop.eup %9884 }
0x2194   :  { %3798 = vperm.xlu0 %9540, %v11395_v52  }
0x2195   :  { %3789 = vperm.xlu1 %9541, %v9881_v21  }
0x2199   :  { %3795 = vperm.xlu1 %9541, %v9883_v44  }
0x219d   :  { %3801 = vperm.xlu1 %9541, %v11398_v26  }
0x2207   :  { %v3781_v17 = vpop.permute.xlu0 %3780 }
0x2208   :  { %v3784_v10 = vpop.permute.xlu1 %3783  ;;  %v3806_v61 = vrot.slane %v3781_v17, %v10651_v41 }
0x2209   :  { %v3810_v30 = vrot.slane %v3784_v10, %v10651_v41 }
0x220b   :  { %v3793_v8 = vpop.permute.xlu0 %3792  ;;  %v3835_v58 = vsel %vm613_vm2, %v3810_v30, %v3806_v61 }
0x220c   :  { %v3787_v62 = vpop.permute.xlu1 %3786  ;;  %v3822_v9 = vrot.slane %v3793_v8, %v10651_v41 }
0x220d   :  { %v3814_v48 = vrot.slane %v3787_v62, %v10651_v41 }
0x220f   :  { %v3836_v3 = vsel %vm615_vm3, %v3814_v48, %v3835_v58  ;;  %v3799_v51 = vpop.permute.xlu0 %3798 }
0x2210   :  { %v3790_v13 = vpop.permute.xlu1 %3789  ;;  %v3830_v37 = vrot.slane %v3799_v51, %v10651_v41 }
0x2211   :  { %v3818_v63 = vrot.slane %v3790_v13, %v10651_v41 }
0x2213   :  { %v3837_v28 = vsel %vm617_vm4, %v3818_v63, %v3836_v3 }
0x2214   :  { %v3796_v31 = vpop.permute.xlu1 %3795  ;;  %v3838_v11 = vsel %vm619_vm5, %v3822_v9, %v3837_v28 }
0x2215   :  { %v3826_v46 = vrot.slane %v3796_v31, %v10651_v41 }
0x2217   :  { %v3839_v2 = vsel %vm621_vm6, %v3826_v46, %v3838_v11  ;;  %v9596_v46 = vld [vmem:[#allocation18 + $0x18] sm:$0xff]   ;;  %v9598_v11 = vld [vmem:[#allocation18 + $0x8] sm:$0xff]  }
0x2218   :  { %v3802_v47 = vpop.permute.xlu1 %3801  ;;  %v3840_v20 = vsel %vm623_vm7, %v3830_v37, %v3839_v2  ;;  %9286 = vmatpush3.bf16.msra.mxu0 %v9596_v46  ;;  %v12523_v37 = vunpack.c.h.bf16 %v11205_v4 }
0x2219   :  { %v3834_v56 = vrot.slane %v3802_v47, %v10651_v41  ;;  %9287 = vmatprep.subr.bf16.mxu0 %v12479_v1 }
0x221b   :  { %v3841_v18 = vsel %vm625_vm8, %v3834_v56, %v3840_v20 }
0x221c   :  { %v3843_v40 = vsel %vm628_vm9, %v3841_v18, 0.0 }
0x221d   :  { %3844 = vadd.xlane.f32.xlu0 %v3843_v40  ;;  %v12524_v40 = vunpack.c.l.bf16 %v11209_v55 }
0x22a6   :  { %v3845_v12 = vpop.xlane.xlu0 %3844 }
0x22a7   :  { %v3850_v32 = vrot.slane %v3845_v12, %v10574_v60  ;;  %v3854_v42 = vrot.slane %v3845_v12, %v10670_v22  ;;  %v3858_v36 = vrot.slane %v3845_v12, %v10676_v24  ;;  %v3862_v25 = vrot.slane %v3845_v12, %v10682_v33 }
0x22a8   :  { %v3866_v6 = vrot.slane %v3845_v12, %v10686_v39  ;;  %v3870_v17 = vrot.slane %v3845_v12, %v10690_v49  ;;  %v3874_v61 = vrot.slane %v3845_v12, %v10694_v45  ;;  %v3878_v13 = vrot.slane %v3845_v12, %v10673_v23 }
0x22a9   :  { %9886 = vrcp.f32 %v3850_v32 }
0x22aa   :  { %9888 = vrcp.f32 %v3854_v42 }
0x22ab   :  { %9890 = vrcp.f32 %v3858_v36 }
0x22ac   :  { %9892 = vrcp.f32 %v3862_v25 }
0x22ad   :  { %9894 = vrcp.f32 %v3866_v6 }
0x22ae   :  { %9896 = vrcp.f32 %v3870_v17 }
0x22af   :  { %9898 = vrcp.f32 %v3874_v61 }
0x22b0   :  { %9900 = vrcp.f32 %v3878_v13 }
0x22b6   :  { %v9887_v54 = vpop.eup %9886 }
0x22b7   :  { %v3888_v10 = vmul.f32 %v9887_v54, %v9871_v14  ;;  %v9889_v62 = vpop.eup %9888  ;;  %v12525_v54 = vunpack.c.h.bf16 %v11209_v55 }
0x22b8   :  { %v3890_v30 = vmul.f32 %v9889_v62, %v9873_v57  ;;  %v9891_v48 = vpop.eup %9890 }
0x22b9   :  { %3921 = vperm.xlu1 %9541, %v3888_v10   ;;  %v3892_v8 = vmul.f32 %v9891_v48, %v9877_v35  ;;  %v9893_v58 = vpop.eup %9892 }
0x22ba   :  { %v3894_v63 = vmul.f32 %v9893_v58, %v9881_v21  ;;  %v9895_v14 = vpop.eup %9894  ;;  %v9597_v21 = vld [vmem:[#allocation18 + $0x10] sm:$0xff]  }
0x22bb   :  { %v3896_v3 = vmul.f32 %v9895_v14, %v11392_v38  ;;  %v9897_v28 = vpop.eup %9896  ;;  %9288 = vmatpush3.bf16.msra.mxu0 %v9597_v21  ;;  %v9599_v38 = vld [vmem:[#allocation18] sm:$0xff]  }
0x22bc   :  { %v3898_v57 = vmul.f32 %v9897_v28, %v9883_v44  ;;  %v9899_v9 = vpop.eup %9898  ;;  %9289 = vmatprep.subr.bf16.mxu0 %v12479_v1 }
0x22bd   :  { %3926 = vperm.xlu1 %9541, %v3890_v30   ;;  %v3900_v31 = vmul.f32 %v9899_v9, %v11395_v52  ;;  %v9901_v51 = vpop.eup %9900 }
0x22be   :  { %v3902_v35 = vmul.f32 %v9901_v51, %v11398_v26  ;;  %v12522_v26 = vunpack.c.l.bf16 %v11205_v4 }
0x22bf   :  { %9290 = vmatpush3.bf16.msra.mxu0 %v9598_v11 }
0x22c0   :  { %9291 = vmatprep.subr.bf16.mxu0 %v12479_v1 }
0x22c1   :  { %3931 = vperm.xlu1 %9541, %v3892_v8   ;;  %v12526_v8 = vunpack.c.l.bf16 %v11221_v5 }
0x22c3   :  { %9292 = vmatpush3.bf16.msra.mxu0 %v9599_v38 }
0x22c4   :  { %9313 = vmatprep.subr.bf16.mxu0 %v12479_v1 }
0x22c5   :  { %3936 = vperm.xlu1 %9541, %v3894_v63  }
0x22c9   :  { %3941 = vperm.xlu1 %9541, %v3896_v3  }
0x22cd   :  { %3946 = vperm.xlu1 %9541, %v3898_v57  }
0x22d1   :  { %3951 = vperm.xlu1 %9541, %v3900_v31   ;;  %v12527_v31 = vunpack.c.h.bf16 %v11221_v5 }
0x22d5   :  { %3956 = vperm.xlu1 %9541, %v3902_v35  }
0x2334   :  { %v3922_v52 = vpop.permute.xlu1 %3921 }
0x2335   :  { %v3959_v2 = vmul.f32 %v12522_v26, %v3922_v52 }
0x2337   :  { %v3967_v18 = vsel %vm893_vm10, %v3959_v2, 0.0 }
0x2338   :  { %v3927_v44 = vpop.permute.xlu1 %3926  ;;  %v3968_v36 = vrot.slane %v3967_v18, 4 }
0x2339   :  { %v3960_v47 = vmul.f32 %v12523_v37, %v3927_v44  ;;  %v12528_v37 = vunpack.c.l.bf16 %v11231_v50 }
0x233a   :  { %v3969_v30 = vadd.f32 %v3968_v36, %v3967_v18 }
0x233b   :  { %v3974_v56 = vsel %vm893_vm10, %v3960_v47, 0.0 }
0x233c   :  { %v3932_v20 = vpop.permute.xlu1 %3931  ;;  %v3975_v32 = vrot.slane %v3974_v56, 4  ;;  %v3970_v28 = vrot.slane %v3969_v30, 2 }
0x233d   :  { %v3961_v12 = vmul.f32 %v12524_v40, %v3932_v20 }
0x233e   :  { %v3976_v17 = vadd.f32 %v3975_v32, %v3974_v56  ;;  %v3971_v38 = vadd.f32 %v3970_v28, %v3969_v30 }
0x233f   :  { %v3981_v42 = vsel %vm893_vm10, %v3961_v12, 0.0 }
0x2340   :  { %v3982_v25 = vrot.slane %v3981_v42, 4  ;;  %v3937_v6 = vpop.permute.xlu1 %3936  ;;  %v3977_v58 = vrot.slane %v3976_v17, 2  ;;  %v3972_v12 = vrot.slane %v3971_v38, 1 }
0x2341   :  { %v3962_v10 = vmul.f32 %v12525_v54, %v3937_v6 }
0x2342   :  { %v3983_v4 = vadd.f32 %v3982_v25, %v3981_v42  ;;  %v3978_v35 = vadd.f32 %v3977_v58, %v3976_v17 }
0x2343   :  { %v3988_v62 = vsel %vm893_vm10, %v3962_v10, 0.0 }
0x2344   :  { %v3989_v61 = vrot.slane %v3988_v62, 4  ;;  %v3942_v48 = vpop.permute.xlu1 %3941  ;;  %v3984_v14 = vrot.slane %v3983_v4, 2  ;;  %v3979_v56 = vrot.slane %v3978_v35, 1 }
0x2345   :  { %v3963_v13 = vmul.f32 %v12526_v8, %v3942_v48 }
0x2346   :  { %v3990_v63 = vadd.f32 %v3989_v61, %v3988_v62  ;;  %v3985_v21 = vadd.f32 %v3984_v14, %v3983_v4  ;;  %v3980_v10 = vadd.f32 %v3979_v56, %v3978_v35  ;;  %v3973_v61 = vadd.f32 %v3972_v12, %v3971_v38 }
0x2347   :  { %v3995_v3 = vsel %vm893_vm10, %v3963_v13, 0.0 }
0x2348   :  { %v3991_v57 = vrot.slane %v3990_v63, 2  ;;  %v3996_v9 = vrot.slane %v3995_v3, 4  ;;  %v3947_v55 = vpop.permute.xlu1 %3946  ;;  %v3986_v18 = vrot.slane %v3985_v21, 1  ;;  %v4024_v14 = vpack.c.bf16 %v3980_v10, %v3980_v10 }
0x2349   :  { %v3964_v51 = vmul.f32 %v12527_v31, %v3947_v55  ;;  %v4023_v55 = vpack.c.bf16 %v3973_v61, %v3973_v61 }
0x234a   :  { %v3997_v46 = vadd.f32 %v3996_v9, %v3995_v3  ;;  %v3992_v52 = vadd.f32 %v3991_v57, %v3990_v63  ;;  %v3987_v4 = vadd.f32 %v3986_v18, %v3985_v21  ;;  %v4055_v35 = vunpack.c.l.b16 %v4024_v14 }
0x234b   :  { %v4002_v11 = vsel %vm893_vm10, %v3964_v51, 0.0 }
0x234c   :  { %v3998_v44 = vrot.slane %v3997_v46, 2  ;;  %v3952_v26 = vpop.permute.xlu1 %3951  ;;  %v4003_v2 = vrot.slane %v4002_v11, 4  ;;  %v3993_v32 = vrot.slane %v3992_v52, 1  ;;  %v4025_v57 = vpack.c.bf16 %v3987_v4, %v3987_v4 }
0x234d   :  { %v3965_v47 = vmul.f32 %v12528_v37, %v3952_v26 }
0x234e   :  { %v3999_v20 = vadd.f32 %v3998_v44, %v3997_v46  ;;  %v4004_v40 = vadd.f32 %v4003_v2, %v4002_v11  ;;  %v3994_v48 = vadd.f32 %v3993_v32, %v3992_v52  ;;  %v4056_v38 = vunpack.c.l.b16 %v4025_v57 }
0x234f   :  { %v4009_v5 = vsel %vm893_vm10, %v3965_v47, 0.0  ;;  %v4054_v52 = vunpack.c.l.b16 %v4023_v55 }
0x2350   :  { %v4010_v42 = vrot.slane %v4009_v5, 4  ;;  %v3957_v36 = vpop.permute.xlu1 %3956  ;;  %v4000_v25 = vrot.slane %v3999_v20, 1  ;;  %v4005_v6 = vrot.slane %v4004_v40, 2  ;;  %v4026_v50 = vpack.c.bf16 %v3994_v48, %v3994_v48 }
0x2351   :  { %v3966_v54 = vmul.f32 %v8736_v0, %v3957_v36  ;;  %v4062_v47 = vsel %vm613_vm2, %v4055_v35, %v4054_v52 }
0x2352   :  { %v4011_v17 = vadd.f32 %v4010_v42, %v4009_v5  ;;  %v4006_v62 = vadd.f32 %v4005_v6, %v4004_v40  ;;  %v4001_v58 = vadd.f32 %v4000_v25, %v3999_v20  ;;  %v4057_v44 = vunpack.c.l.b16 %v4026_v50 }
0x2353   :  { %v4016_v30 = vsel %vm893_vm10, %v3966_v54, 0.0  ;;  %v4063_v18 = vsel %vm615_vm3, %v4056_v38, %v4062_v47 }
0x2354   :  { %v4012_v8 = vrot.slane %v4011_v17, 2  ;;  %v4017_v13 = vrot.slane %v4016_v30, 4  ;;  %v4007_v63 = vrot.slane %v4006_v62, 1  ;;  %v4027_v51 = vpack.c.bf16 %v4001_v58, %v4001_v58 }
0x2355   :  { %v4064_v5 = vsel %vm617_vm4, %v4057_v44, %v4063_v18 }
0x2356   :  { %v4013_v3 = vadd.f32 %v4012_v8, %v4011_v17  ;;  %v4018_v28 = vadd.f32 %v4017_v13, %v4016_v30  ;;  %v4008_v9 = vadd.f32 %v4007_v63, %v4006_v62  ;;  %v4058_v37 = vunpack.c.l.b16 %v4027_v51  ;;  %v4285_v51 = vld [vmem:[#allocation7 + $0x20] sm:$0xff] }
0x2358   :  { %v4014_v0 = vrot.slane %v4013_v3, 1  ;;  %v4019_v31 = vrot.slane %v4018_v28, 2  ;;  %v4028_v46 = vpack.c.bf16 %v4008_v9, %v4008_v9  ;;  %v4065_v32 = vsel %vm619_vm5, %v4058_v37, %v4064_v5  ;;  %v9601_v9 = vld [vmem:[#allocation13] sm:$0xff]   ;;  %v9602_v5 = vld [vmem:[#allocation16 + $0x8] sm:$0xff]  }
0x235a   :  { %v4015_v21 = vadd.f32 %v4014_v0, %v4013_v3  ;;  %v4020_v11 = vadd.f32 %v4019_v31, %v4018_v28  ;;  %v4059_v56 = vunpack.c.l.b16 %v4028_v46 }
0x235c   :  { %v4029_v26 = vpack.c.bf16 %v4015_v21, %v4015_v21  ;;  %v4021_v2 = vrot.slane %v4020_v11, 1  ;;  %v4066_v42 = vsel %vm621_vm6, %v4059_v56, %v4065_v32 }
0x235e   :  { %v4022_v20 = vadd.f32 %v4021_v2, %v4020_v11  ;;  %v4060_v40 = vunpack.c.l.b16 %v4029_v26 }
0x2360   :  { %v4030_v12 = vpack.c.bf16 %v4022_v20, %v4022_v20  ;;  %v4067_v25 = vsel %vm623_vm7, %v4060_v40, %v4066_v42 }
0x2362   :  { %v4061_v36 = vunpack.c.l.b16 %v4030_v12  ;;  %v9603_v12 = vld [vmem:[#allocation16] sm:$0xff]  }
0x2364   :  { %v4068_v6 = vsel %vm625_vm8, %v4061_v36, %v4067_v25 }
0x2365   :  { %v4069_v54 = vpack.c.b16 %v4068_v6, %v4068_v6 }
0x2367   :  { %9294 = vmatmul.mubr.msk.bf16.vlgmr.msra.gmra.mxu0 %vm893_vm10, %v4069_v54  ;;  %v9605_v54 = vld [vmem:[%s12433_s10] sm:$0xff]  }
0x2368   :  { %9317 = vmatprep.mubr.msk.bf16.mxu0 %vm10372_vm1, %v12479_v1 }
0x2427   :  { %v4131_v10 = vpop.f32.mrf.mxu0 }
0x2428   :  { %v4132_v17 = vadd.f32 %v11258_v15, %v4131_v10  ;;  %v9606_v10 = vld [vmem:[#allocation19 + $0x8] sm:$0xff]  }
0x2429   :  { %v9295_v4 = vpop.f32.mrf.mxu0 }
0x242a   :  { %v4193_v62 = vadd.f32 %v11321_v29, %v4132_v17  ;;  %v9607_v17 = vld [vmem:[#allocation19] sm:$0xff]   ;;  %v9608_v4 = vld [vmem:[#allocation15 + $0x8] sm:$0xff]  }
0x242b   :  { %v4134_v30 = vpop.f32.mrf.mxu0 }
0x242c   :  { %v4250_v61 = vadd.f32 %v11345_v59, %v4193_v62  ;;  %v9600_v59 = vld [vmem:[#allocation13 + $0x8] sm:$0xff]   ;;  %v9609_v62 = vld [vmem:[#allocation15] sm:$0xff]   ;;  %v11523_v30 = vld [vmem:[%s12429_s6] ss:$0 sm:$0xff] }
0x242d   :  { %v9296_v48 = vpop.f32.mrf.mxu0  ;;  %9314 = vmatpush3.bf16.msra.mxu0 %v9600_v59 }
0x242e   :  { %9902 = vtanh.f32 %v4250_v61  ;;  %v8523_v13 = vmul.f32 -1.442695, %v4250_v61  ;;  %9315 = vmatprep.subr.bf16.mxu0 %v12479_v1 }
0x2430   :  { %9904 = vpow2.f32 %v8523_v13  ;;  %v11526_v13 = vld [vmem:[#allocation12] sm:$0xff]  }
0x2431   :  { %9316 = vmatpush3.bf16.msra.mxu0 %v9601_v9  ;;  %v12478_v9 = vunpack.c.l.bf16 %v11526_v13 }
0x2432   :  { %9329 = vmatprep.subr.bf16.mxu0 %v12479_v1 }
0x243b   :  { %v9903_v8 = vpop.eup %9902 }
0x243c   :  { %4260 = vrot.lane.b32.xlu0 %v9903_v8, %s10360_s30 }
0x243d   :  { %v9905_v58 = vpop.eup %9904 }
0x243e   :  { %v4254_v63 = vadd.f32 1.0, %v9905_v58 }
0x2440   :  { %9906 = vrcp.f32 %v4254_v63 }
0x244d   :  { %v9907_v14 = vpop.eup %9906 }
0x244e   :  { %v4257_v15 = vmul.f32 %v9907_v14, %v11266_v27 }
0x24ae   :  { %v4261_v3 = vpop.permute.xlu0 %4260 }
0x24af   :  { %v4263_v28 = vmul.f32 %v9907_v14, %v4261_v3  ;;  %v11529_v3 = vld [vmem:[#allocation12 + $0x8] sm:$0xff]  }
0x24b1   :  { %4265 = vrot.lane.b32.xlu1 %v4263_v28, %s10373_s9  ;;  %v11531_v28 = vld [vmem:[#allocation12 + $0x10] sm:$0xff]  }
0x2523   :  { %v4266_v29 = vpop.permute.xlu1 %4265 }
0x2524   :  { %v11472_v57 = vadd.f32 %v4266_v29, %v4257_v15 }
0x2526   :  { %9908 = vtanh.f32 %v11472_v57 }
0x2533   :  { %v9909_v55 = vpop.eup %9908 }
0x2534   :  { %4271 = vrot.lane.b32.xlu1 %v9909_v55, %s10360_s30  ;;  %v12477_v55 = vunpack.c.h.bf16 %v11526_v13 }
0x25a6   :  { %v4272_v50 = vpop.permute.xlu1 %4271 }
0x25a7   :  { %v4274_v0 = vmul.f32 %v9907_v14, %v4272_v50 }
0x25a9   :  { %v11478_v31 = vpack.c.bf16 %v4274_v0, %v4274_v0 }
0x25ab   :  { %12529 = vst [vmem:[#allocation30_spill] sm:$0xff] %v11478_v31  ;;  %4290 = vrot.lane.b32.xlu1 %v11478_v31, %s10373_s9 }
0x261d   :  { %v4291_v27 = vpop.permute.xlu1 %4290 }
0x261e   :  { %9318 = vmatmul.mubr.msk.bf16.vlgmr.msra.gmra.mxu0 %vm161_vm0, %v4291_v27 }
0x261f   :  { %9333 = vmatprep.mubr.msk.bf16.mxu0 %vm10372_vm1, %v12479_v1  ;;  %9330 = vmatpush3.bf16.msra.mxu0 %v9602_v5 }
0x2620   :  { %9331 = vmatprep.subr.bf16.mxu0 %v12479_v1 }
0x2623   :  { %9332 = vmatpush3.bf16.msra.mxu0 %v9603_v12 }
0x2624   :  { %9349 = vmatprep.subr.bf16.mxu0 %v12479_v1 }
0x26de   :  { %v4341_v35 = vpop.f32.mrf.mxu0 }
0x26df   :  { %v4347_v46 = vadd.f32 %v4341_v35, %v4285_v51 }
0x26e0   :  { %v9319_v21 = vpop.f32.mrf.mxu0 }
0x26e1   :  { %v4404_v11 = vadd.f32 %v11349_v7, %v4347_v46  ;;  %v12476_v46 = vunpack.c.l.bf16 %v11529_v3  ;;  %v12474_v21 = vunpack.c.h.bf16 %v11529_v3 }
0x26e2   :  { %v4344_v38 = vpop.f32.mrf.mxu0 }
0x26e3   :  { %9910 = vtanh.f32 %v4404_v11  ;;  %v8531_v26 = vmul.f32 -1.442695, %v4404_v11  ;;  %v12475_v11 = vunpack.c.l.bf16 %v11531_v28  ;;  %v11542_v38 = vld [vmem:[#allocation12 + $0x18] sm:$0xff]  }
0x26e4   :  { %v9320_v52 = vpop.f32.mrf.mxu0  ;;  %v12473_v12 = vunpack.c.l.bf16 %v11542_v38 }
0x26e5   :  { %9912 = vpow2.f32 %v8531_v26 }
0x26f0   :  { %v9911_v44 = vpop.eup %9910 }
0x26f1   :  { %4414 = vrot.lane.b32.xlu1 %v9911_v44, %s10360_s30 }
0x26f2   :  { %v9913_v2 = vpop.eup %9912 }
0x26f3   :  { %v4408_v37 = vadd.f32 1.0, %v9913_v2 }
0x26f5   :  { %9914 = vrcp.f32 %v4408_v37 }
0x2702   :  { %v9915_v47 = vpop.eup %9914 }
0x2703   :  { %v4411_v18 = vmul.f32 %v9915_v47, %v11283_v19  ;;  %v9604_v19 = vld [vmem:[%s12433_s10 + $0x8] sm:$0xff]  }
0x2763   :  { %v4415_v56 = vpop.permute.xlu1 %4414 }
0x2764   :  { %v4417_v20 = vmul.f32 %v9915_v47, %v4415_v56  ;;  %v12470_v56 = vunpack.c.h.bf16 %v11531_v28 }
0x2766   :  { %4419 = vrot.lane.b32.xlu1 %v4417_v20, %s10373_s9 }
0x27d8   :  { %v4420_v40 = vpop.permute.xlu1 %4419 }
0x27d9   :  { %v11489_v7 = vadd.f32 %v4420_v40, %v4411_v18 }
0x27db   :  { %9916 = vtanh.f32 %v11489_v7 }
0x27e8   :  { %v9917_v32 = vpop.eup %9916 }
0x27e9   :  { %4425 = vrot.lane.b32.xlu0 %v9917_v32, %s10360_s30 }
0x285b   :  { %v4426_v42 = vpop.permute.xlu0 %4425 }
0x285c   :  { %v4428_v36 = vmul.f32 %v9915_v47, %v4426_v42 }
0x285e   :  { %v4429_v25 = vpack.c.bf16 %v4428_v36, %v4428_v36 }
0x2860   :  { %4442 = vrot.lane.b32.xlu1 %v4429_v25, %s10373_s9 }
0x28d2   :  { %v4443_v6 = vpop.permute.xlu1 %4442 }
0x28d3   :  { %9334 = vmatmul.mubr.msk.bf16.vlgmr.msra.gmra.mxu0 %vm161_vm0, %v4443_v6 }
0x28d4   :  { %9350 = vmatpush3.bf16.msra.mxu0 %v9604_v19  ;;  %9353 = vmatprep.mubr.msk.bf16.mxu0 %vm10372_vm1, %v12479_v1 }
0x28d5   :  { %9351 = vmatprep.subr.bf16.mxu0 %v12479_v1 }
0x28d8   :  { %9352 = vmatpush3.bf16.msra.mxu0 %v9605_v54 }
0x28d9   :  { %9357 = vmatprep.subr.bf16.mxu0 %v12479_v1 }
0x28db   :  { %9354 = vmatmul.mubr.msk.bf16.vlgmr.msra.gmra.mxu0 %vm161_vm0, %v4443_v6 }
0x28dc   :  { %9358 = vmatpush3.bf16.msra.mxu0 %v9606_v10  ;;  %9361 = vmatprep.mubr.msk.bf16.mxu0 %vm10372_vm1, %v12479_v1 }
0x28dd   :  { %9359 = vmatprep.subr.bf16.mxu0 %v12479_v1 }
0x28e0   :  { %9360 = vmatpush3.bf16.msra.mxu0 %v9607_v17 }
0x28e1   :  { %9373 = vmatprep.subr.bf16.mxu0 %v12479_v1 }
0x28e3   :  { %9362 = vmatmul.mubr.msk.bf16.vlgmr.msra.gmra.mxu0 %vm161_vm0, %v4291_v27 }
0x28e4   :  { %9374 = vmatpush3.bf16.msra.mxu0 %v9608_v4  ;;  %9377 = vmatprep.mubr.msk.bf16.mxu0 %vm10372_vm1, %v12479_v1 }
0x28e5   :  { %9375 = vmatprep.subr.bf16.mxu0 %v12479_v1 }
0x28e8   :  { %9376 = vmatpush3.bf16.msra.mxu0 %v9609_v62 }
0x28e9   :  { %9389 = vmatprep.subr.bf16.mxu0 %v12479_v1 }
0x28eb   :  { %9378 = vmatmul.mubr.msk.bf16.vlgmr.msra.gmra.mxu0 %vm161_vm0, %v4443_v6 }
0x28ec   :  { %9397 = vmatprep.mubr.msk.bf16.mxu0 %vm10372_vm1, %v12479_v1 }
0x2993   :  { %v4493_v61 = vpop.f32.mrf.mxu0 }
0x2994   :  { %v4494_v48 = vadd.f32 %v11523_v30, %v4493_v61  ;;  %v12469_v61 = vunpack.c.h.bf16 %v11542_v38 }
0x2995   :  { %v9335_v8 = vpop.f32.mrf.mxu0 }
0x2996   :  { %v4516_v58 = vcombine.high %v4494_v48, %v4494_v48  ;;  %v4523_v63 = vrot.slane %v4494_v48, %v10567_v53 }
0x2997   :  { %v4496_v14 = vpop.f32.mrf.mxu0 }
0x2998   :  { %v4530_v15 = vrot.slane %v4516_v58, %v10567_v53  ;;  %v4531_v29 = vcombine.high %v4523_v63, %v4523_v63  ;;  %v4539_v59 = vrot.slane %v4523_v63, %v10567_v53 }
0x2999   :  { %v9336_v50 = vpop.f32.mrf.mxu0 }
0x299a   :  { %v4532_v0 = vcombine.high %v4530_v15, %v4530_v15  ;;  %v4546_v27 = vrot.slane %v4530_v15, %v10567_v53  ;;  %v4553_v51 = vrot.slane %v4531_v29, %v10567_v53  ;;  %v4561_v35 = vcombine.high %v4539_v59, %v4539_v59 }
0x299b   :  { %v4568_v52 = vrot.slane %v4539_v59, %v10574_v60  ;;  %v11545_v44 = vpop.f32.mrf.mxu0  ;;  %v11579_v59 = vld [vmem:[%s12430_s7] ss:$0 sm:$0xff] }
0x299c   :  { %v4560_v26 = vrot.slane %v4532_v0, %v10567_v53  ;;  %v4562_v2 = vcombine.high %v4546_v27, %v4546_v27  ;;  %v4563_v37 = vcombine.high %v4553_v51, %v4553_v51  ;;  %v4572_v47 = vrot.slane %v4553_v51, %v10574_v60 }
0x299d   :  { %v4576_v20 = vrot.slane %v4561_v35, %v10574_v60  ;;  %v4584_v18 = vrot.slane %v4546_v27, %v10574_v60  ;;  %v4605_v40 = vadd.f32 %v12478_v9, %v4568_v52  ;;  %v9355_v5 = vpop.f32.mrf.mxu0 }
0x299e   :  { %v4564_v32 = vcombine.high %v4560_v26, %v4560_v26  ;;  %v4580_v42 = vrot.slane %v4563_v37, %v10574_v60  ;;  %v4592_v36 = vrot.slane %v4562_v2, %v10574_v60  ;;  %v4588_v25 = vrot.slane %v4560_v26, %v10574_v60 }
0x299f   :  { %v4606_v19 = vadd.f32 %v12477_v55, %v4572_v47  ;;  %v4607_v6 = vadd.f32 %v12476_v46, %v4576_v20  ;;  %9918 = vtanh.f32 %v4605_v40  ;;  %v5213_v54 = vpop.f32.mrf.mxu0  ;;  %v4609_v17 = vadd.f32 %v12475_v11, %v4584_v18 }
0x29a0   :  { %v4608_v10 = vadd.f32 %v12474_v21, %v4580_v42  ;;  %v4611_v62 = vadd.f32 %v12473_v12, %v4592_v36  ;;  %v4596_v48 = vrot.slane %v4564_v32, %v10574_v60  ;;  %v4610_v8 = vadd.f32 %v12470_v56, %v4588_v25 }
0x29a1   :  { %9920 = vtanh.f32 %v4606_v19  ;;  %v9356_v4 = vpop.f32.mrf.mxu0 }
0x29a2   :  { %9922 = vtanh.f32 %v4607_v6  ;;  %v4612_v14 = vadd.f32 %v12469_v61, %v4596_v48 }
0x29a3   :  { %9924 = vtanh.f32 %v4608_v10  ;;  %v11572_v58 = vpop.f32.mrf.mxu0 }
0x29a4   :  { %9926 = vtanh.f32 %v4609_v17 }
0x29a5   :  { %v9363_v63 = vpop.f32.mrf.mxu0  ;;  %9928 = vtanh.f32 %v4611_v62 }
0x29a6   :  { %9930 = vtanh.f32 %v4610_v8 }
0x29a7   :  { %v5270_v15 = vpop.f32.mrf.mxu0  ;;  %9932 = vtanh.f32 %v4612_v14  ;;  %v11599_v14 = vld [vmem:[#allocation6] ss:$0 sm:$0xff] }
0x29a9   :  { %v9364_v29 = vpop.f32.mrf.mxu0 }
0x29ab   :  { %v11581_v50 = vpop.f32.mrf.mxu0 }
0x29ac   :  { %v9919_v0 = vpop.eup %9918 }
0x29ad   :  { %v9379_v27 = vpop.f32.mrf.mxu0  ;;  %v4628_v51 = vmul.f32 %v9919_v0, %v11579_v59 }
0x29ae   :  { %v9921_v35 = vpop.eup %9920 }
0x29af   :  { %v9923_v52 = vpop.eup %9922  ;;  %v4636_v26 = vsel %vm161_vm0, %v4628_v51, 0.0  ;;  %v5424_v2 = vpop.f32.mrf.mxu0  ;;  %v4629_v37 = vmul.f32 %v9921_v35, %v11579_v59 }
0x29b0   :  { %v9925_v47 = vpop.eup %9924  ;;  %4637 = vadd.xlane.f32.xlu0 %v4636_v26  ;;  %v4630_v20 = vmul.f32 %v9923_v52, %v11579_v59 }
0x29b1   :  { %v9927_v18 = vpop.eup %9926  ;;  %v4639_v40 = vsel %vm161_vm0, %v4629_v37, 0.0  ;;  %v9380_v5 = vpop.f32.mrf.mxu0  ;;  %v4631_v25 = vmul.f32 %v9925_v47, %v11579_v59 }
0x29b2   :  { %4640 = vadd.xlane.f32.xlu1 %v4639_v40  ;;  %v4632_v32 = vmul.f32 %v9927_v18, %v11579_v59  ;;  %v9929_v42 = vpop.eup %9928  ;;  %v4642_v36 = vsel %vm161_vm0, %v4630_v20, 0.0 }
0x29b3   :  { %v9931_v19 = vpop.eup %9930  ;;  %v4634_v54 = vmul.f32 %v9929_v42, %v11579_v59  ;;  %v4645_v10 = vsel %vm161_vm0, %v4631_v25, 0.0 }
0x29b4   :  { %4643 = vadd.xlane.f32.xlu0 %v4642_v36  ;;  %v4648_v6 = vsel %vm161_vm0, %v4632_v32, 0.0  ;;  %v4633_v17 = vmul.f32 %v9931_v19, %v11579_v59  ;;  %v9933_v4 = vpop.eup %9932 }
0x29b5   :  { %v4654_v62 = vsel %vm161_vm0, %v4634_v54, 0.0  ;;  %v4635_v8 = vmul.f32 %v9933_v4, %v11579_v59 }
0x29b6   :  { %4649 = vadd.xlane.f32.xlu1 %v4648_v6  ;;  %v4651_v48 = vsel %vm161_vm0, %v4633_v17, 0.0 }
0x29b7   :  { %v4657_v63 = vsel %vm161_vm0, %v4635_v8, 0.0 }
0x29b8   :  { %4646 = vadd.xlane.f32.xlu0 %v4645_v10 }
0x29ba   :  { %4655 = vadd.xlane.f32.xlu1 %v4654_v62 }
0x29bc   :  { %4652 = vadd.xlane.f32.xlu0 %v4651_v48 }
0x29c0   :  { %4658 = vadd.xlane.f32.xlu0 %v4657_v63 }
0x29cb   :  { %4667 = vperm.xlu1 %9541, %v11599_v14  }
0x2a39   :  { %v4638_v15 = vpop.xlane.xlu0 %4637 }
0x2a3b   :  { %v4641_v29 = vpop.xlane.xlu1 %4640 }
0x2a3d   :  { %v4644_v0 = vpop.xlane.xlu0 %4643 }
0x2a3f   :  { %v4650_v27 = vpop.xlane.xlu1 %4649 }
0x2a41   :  { %v4647_v51 = vpop.xlane.xlu0 %4646 }
0x2a43   :  { %v4656_v35 = vpop.xlane.xlu1 %4655 }
0x2a45   :  { %v4653_v52 = vpop.xlane.xlu0 %4652 }
0x2a47   :  { %v4668_v26 = vpop.permute.xlu1 %4667 }
0x2a48   :  { %v4670_v2 = vadd.f32 %v4668_v26, %v4638_v15  ;;  %v4671_v37 = vadd.f32 %v4668_v26, %v4641_v29  ;;  %v4672_v47 = vadd.f32 %v4668_v26, %v4644_v0  ;;  %v4673_v20 = vadd.f32 %v4668_v26, %v4647_v51 }
0x2a49   :  { %v4659_v18 = vpop.xlane.xlu0 %4658  ;;  %v4674_v40 = vadd.f32 %v4668_v26, %v4650_v27  ;;  %v4675_v5 = vadd.f32 %v4668_v26, %v4653_v52  ;;  %v4676_v25 = vadd.f32 %v4668_v26, %v4656_v35 }
0x2a4a   :  { %v4689_v32 = vrot.slane %v4670_v2, %v10651_v41  ;;  %v4693_v42 = vrot.slane %v4671_v37, %v10651_v41  ;;  %v4697_v36 = vrot.slane %v4672_v47, %v10651_v41  ;;  %v4677_v19 = vadd.f32 %v4668_v26, %v4659_v18 }
0x2a4b   :  { %v4701_v6 = vrot.slane %v4673_v20, %v10651_v41  ;;  %v4705_v10 = vrot.slane %v4674_v40, %v10651_v41  ;;  %v4709_v4 = vrot.slane %v4675_v5, %v10651_v41  ;;  %v4713_v48 = vrot.slane %v4676_v25, %v10651_v41 }
0x2a4c   :  { %v4718_v54 = vsel %vm613_vm2, %v4693_v42, %v4689_v32  ;;  %v4717_v63 = vrot.slane %v4677_v19, %v10651_v41 }
0x2a4d   :  { %v4719_v17 = vsel %vm615_vm3, %v4697_v36, %v4718_v54 }
0x2a4e   :  { %v4720_v62 = vsel %vm617_vm4, %v4701_v6, %v4719_v17 }
0x2a4f   :  { %v4721_v8 = vsel %vm619_vm5, %v4705_v10, %v4720_v62 }
0x2a50   :  { %v4722_v15 = vsel %vm621_vm6, %v4709_v4, %v4721_v8 }
0x2a51   :  { %v4723_v29 = vsel %vm623_vm7, %v4713_v48, %v4722_v15 }
0x2a52   :  { %v4724_v0 = vsel %vm625_vm8, %v4717_v63, %v4723_v29 }
0x2a53   :  { %v4726_v27 = vsel %vm628_vm9, %v4724_v0, -inf }
0x2a54   :  { %4727 = vmax.xlane.f32.xlu0 %v4726_v27 }
0x2add   :  { %v4728_v51 = vpop.xlane.xlu0 %4727 }
0x2ade   :  { %v4733_v35 = vrot.slane %v4728_v51, %v10574_v60  ;;  %v4737_v52 = vrot.slane %v4728_v51, %v10670_v22  ;;  %v4741_v26 = vrot.slane %v4728_v51, %v10676_v24  ;;  %v4749_v18 = vrot.slane %v4728_v51, %v10686_v39 }
0x2adf   :  { %v4757_v32 = vrot.slane %v4728_v51, %v10694_v45  ;;  %v4745_v6 = vrot.slane %v4728_v51, %v10682_v33  ;;  %v4753_v8 = vrot.slane %v4728_v51, %v10690_v49  ;;  %v4761_v0 = vrot.slane %v4728_v51, %v10673_v23 }
0x2ae0   :  { %v4770_v42 = vsub.f32 %v4670_v2, %v4733_v35  ;;  %v4771_v36 = vsub.f32 %v4671_v37, %v4737_v52  ;;  %v4772_v54 = vsub.f32 %v4672_v47, %v4741_v26  ;;  %v4774_v10 = vsub.f32 %v4674_v40, %v4749_v18 }
0x2ae1   :  { %v4776_v62 = vsub.f32 %v4676_v25, %v4757_v32  ;;  %v4773_v63 = vsub.f32 %v4673_v20, %v4745_v6  ;;  %v4775_v2 = vsub.f32 %v4675_v5, %v4753_v8  ;;  %v4777_v47 = vsub.f32 %v4677_v19, %v4761_v0 }
0x2ae2   :  { %v4778_v17 = vmul.f32 1.442695, %v4770_v42  ;;  %v4780_v4 = vmul.f32 1.442695, %v4771_v36  ;;  %v4786_v48 = vmul.f32 1.442695, %v4774_v10 }
0x2ae3   :  { %v4782_v15 = vmul.f32 1.442695, %v4772_v54  ;;  %v4790_v29 = vmul.f32 1.442695, %v4776_v62  ;;  %v4784_v37 = vmul.f32 1.442695, %v4773_v63 }
0x2ae4   :  { %9934 = vpow2.f32 %v4778_v17  ;;  %v4788_v40 = vmul.f32 1.442695, %v4775_v2  ;;  %v4792_v25 = vmul.f32 1.442695, %v4777_v47 }
0x2ae5   :  { %9936 = vpow2.f32 %v4780_v4 }
0x2ae6   :  { %9938 = vpow2.f32 %v4786_v48 }
0x2ae7   :  { %9940 = vpow2.f32 %v4782_v15 }
0x2ae8   :  { %9942 = vpow2.f32 %v4790_v29 }
0x2ae9   :  { %9944 = vpow2.f32 %v4784_v37 }
0x2aea   :  { %9946 = vpow2.f32 %v4788_v40 }
0x2aeb   :  { %9948 = vpow2.f32 %v4792_v25 }
0x2af1   :  { %v9935_v27 = vpop.eup %9934 }
0x2af2   :  { %v9937_v35 = vpop.eup %9936  ;;  %4803 = vperm.xlu0 %9540, %v9935_v27  }
0x2af3   :  { %4806 = vperm.xlu1 %9541, %v9937_v35   ;;  %v11626_v20 = vpop.eup %9938 }
0x2af4   :  { %v9941_v52 = vpop.eup %9940 }
0x2af5   :  { %v11629_v5 = vpop.eup %9942 }
0x2af6   :  { %4815 = vperm.xlu0 %9540, %v11626_v20   ;;  %v9945_v51 = vpop.eup %9944 }
0x2af7   :  { %4809 = vperm.xlu1 %9541, %v9941_v52   ;;  %v9947_v19 = vpop.eup %9946 }
0x2af8   :  { %v11632_v26 = vpop.eup %9948 }
0x2afa   :  { %4821 = vperm.xlu0 %9540, %v11629_v5  }
0x2afb   :  { %4812 = vperm.xlu1 %9541, %v9945_v51  }
0x2aff   :  { %4818 = vperm.xlu1 %9541, %v9947_v19  }
0x2b03   :  { %4824 = vperm.xlu1 %9541, %v11632_v26  }
0x2b6d   :  { %v4804_v32 = vpop.permute.xlu0 %4803 }
0x2b6e   :  { %v4807_v18 = vpop.permute.xlu1 %4806  ;;  %v4829_v6 = vrot.slane %v4804_v32, %v10651_v41 }
0x2b6f   :  { %v4833_v36 = vrot.slane %v4807_v18, %v10651_v41 }
0x2b71   :  { %v4816_v10 = vpop.permute.xlu0 %4815  ;;  %v4858_v4 = vsel %vm613_vm2, %v4833_v36, %v4829_v6 }
0x2b72   :  { %v4810_v42 = vpop.permute.xlu1 %4809  ;;  %v4845_v63 = vrot.slane %v4816_v10, %v10651_v41 }
0x2b73   :  { %v4837_v54 = vrot.slane %v4810_v42, %v10651_v41 }
0x2b75   :  { %v4859_v48 = vsel %vm615_vm3, %v4837_v54, %v4858_v4  ;;  %v4822_v29 = vpop.permute.xlu0 %4821 }
0x2b76   :  { %v4813_v17 = vpop.permute.xlu1 %4812  ;;  %v4853_v47 = vrot.slane %v4822_v29, %v10651_v41 }
0x2b77   :  { %v4841_v62 = vrot.slane %v4813_v17, %v10651_v41 }
0x2b79   :  { %v4860_v8 = vsel %vm617_vm4, %v4841_v62, %v4859_v48 }
0x2b7a   :  { %v4819_v15 = vpop.permute.xlu1 %4818  ;;  %v4861_v2 = vsel %vm619_vm5, %v4845_v63, %v4860_v8 }
0x2b7b   :  { %v4849_v0 = vrot.slane %v4819_v15, %v10651_v41 }
0x2b7d   :  { %v4862_v37 = vsel %vm621_vm6, %v4849_v0, %v4861_v2 }
0x2b7e   :  { %v4825_v40 = vpop.permute.xlu1 %4824  ;;  %v4863_v18 = vsel %vm623_vm7, %v4853_v47, %v4862_v37 }
0x2b7f   :  { %v4857_v25 = vrot.slane %v4825_v40, %v10651_v41 }
0x2b81   :  { %v4864_v32 = vsel %vm625_vm8, %v4857_v25, %v4863_v18 }
0x2b82   :  { %v4866_v42 = vsel %vm628_vm9, %v4864_v32, 0.0 }
0x2b83   :  { %4867 = vadd.xlane.f32.xlu0 %v4866_v42 }
0x2c0c   :  { %v4868_v36 = vpop.xlane.xlu0 %4867 }
0x2c0d   :  { %v4873_v6 = vrot.slane %v4868_v36, %v10574_v60  ;;  %v4877_v54 = vrot.slane %v4868_v36, %v10670_v22  ;;  %v4881_v10 = vrot.slane %v4868_v36, %v10676_v24  ;;  %v4885_v17 = vrot.slane %v4868_v36, %v10682_v33 }
0x2c0e   :  { %v4889_v4 = vrot.slane %v4868_v36, %v10686_v39  ;;  %v4893_v8 = vrot.slane %v4868_v36, %v10690_v49  ;;  %v4897_v29 = vrot.slane %v4868_v36, %v10694_v45  ;;  %v4901_v37 = vrot.slane %v4868_v36, %v10673_v23  ;;  %v9610_v36 = vld [vmem:[#allocation18 + $0x18] sm:$0xff]  }
0x2c0f   :  { %9950 = vrcp.f32 %v4873_v6  ;;  %9338 = vmatpush3.bf16.msra.mxu1 %v9610_v36 }
0x2c10   :  { %9952 = vrcp.f32 %v4877_v54  ;;  %9339 = vmatprep.subr.bf16.mxu1 %v12479_v1  ;;  %v9612_v54 = vld [vmem:[#allocation18 + $0x8] sm:$0xff]  }
0x2c11   :  { %9954 = vrcp.f32 %v4881_v10 }
0x2c12   :  { %9956 = vrcp.f32 %v4885_v17  ;;  %v11670_v17 = vld [vmem:[#allocation10 + $0x8] sm:$0xff]  }
0x2c13   :  { %9958 = vrcp.f32 %v4889_v4 }
0x2c14   :  { %9960 = vrcp.f32 %v4893_v8  ;;  %v12466_v8 = vunpack.c.l.bf16 %v11670_v17 }
0x2c15   :  { %9962 = vrcp.f32 %v4897_v29 }
0x2c16   :  { %9964 = vrcp.f32 %v4901_v37 }
0x2c1c   :  { %v9951_v62 = vpop.eup %9950 }
0x2c1d   :  { %v4911_v48 = vmul.f32 %v9951_v62, %v9935_v27  ;;  %v9953_v63 = vpop.eup %9952 }
0x2c1e   :  { %v4913_v15 = vmul.f32 %v9953_v63, %v9937_v35  ;;  %v9955_v0 = vpop.eup %9954 }
0x2c1f   :  { %4944 = vperm.xlu1 %9541, %v4911_v48   ;;  %v4915_v2 = vmul.f32 %v9955_v0, %v9941_v52  ;;  %v9957_v47 = vpop.eup %9956 }
0x2c20   :  { %v4917_v40 = vmul.f32 %v9957_v47, %v9945_v51  ;;  %v9959_v27 = vpop.eup %9958  ;;  %v9611_v51 = vld [vmem:[#allocation18 + $0x10] sm:$0xff]   ;;  %v11682_v47 = vld [vmem:[#allocation10 + $0x10] sm:$0xff]  }
0x2c21   :  { %v4919_v25 = vmul.f32 %v9959_v27, %v11626_v20  ;;  %v9961_v18 = vpop.eup %9960  ;;  %9340 = vmatpush3.bf16.msra.mxu1 %v9611_v51  ;;  %v9613_v20 = vld [vmem:[#allocation18] sm:$0xff]  }
0x2c22   :  { %v4921_v35 = vmul.f32 %v9961_v18, %v9947_v19  ;;  %v9963_v32 = vpop.eup %9962  ;;  %9341 = vmatprep.subr.bf16.mxu1 %v12479_v1 }
0x2c23   :  { %4949 = vperm.xlu1 %9541, %v4913_v15   ;;  %v4923_v42 = vmul.f32 %v9963_v32, %v11629_v5  ;;  %v9965_v6 = vpop.eup %9964  ;;  %v11666_v5 = vld [vmem:[#allocation10] sm:$0xff]   ;;  %v12464_v32 = vunpack.c.l.bf16 %v11682_v47 }
0x2c24   :  { %v4925_v52 = vmul.f32 %v9965_v6, %v11632_v26  ;;  %v12468_v26 = vunpack.c.l.bf16 %v11666_v5  ;;  %v12467_v10 = vunpack.c.h.bf16 %v11666_v5 }
0x2c25   :  { %9342 = vmatpush3.bf16.msra.mxu1 %v9612_v54 }
0x2c26   :  { %9343 = vmatprep.subr.bf16.mxu1 %v12479_v1 }
0x2c27   :  { %4954 = vperm.xlu1 %9541, %v4915_v2   ;;  %v12465_v2 = vunpack.c.h.bf16 %v11670_v17 }
0x2c29   :  { %9344 = vmatpush3.bf16.msra.mxu1 %v9613_v20 }
0x2c2a   :  { %9365 = vmatprep.subr.bf16.mxu1 %v12479_v1 }
0x2c2b   :  { %4959 = vperm.xlu1 %9541, %v4917_v40  }
0x2c2f   :  { %4964 = vperm.xlu1 %9541, %v4919_v25  }
0x2c33   :  { %4969 = vperm.xlu1 %9541, %v4921_v35  }
0x2c37   :  { %4974 = vperm.xlu1 %9541, %v4923_v42  }
0x2c3b   :  { %4979 = vperm.xlu1 %9541, %v4925_v52  }
0x2c9a   :  { %v4945_v19 = vpop.permute.xlu1 %4944 }
0x2c9b   :  { %v4982_v62 = vmul.f32 %v12468_v26, %v4945_v19  ;;  %v12471_v19 = vunpack.c.h.bf16 %v11682_v47 }
0x2c9d   :  { %v4990_v29 = vsel %vm893_vm10, %v4982_v62, 0.0 }
0x2c9e   :  { %v4950_v4 = vpop.permute.xlu1 %4949  ;;  %v4991_v27 = vrot.slane %v4990_v29, 4 }
0x2c9f   :  { %v4983_v48 = vmul.f32 %v12467_v10, %v4950_v4 }
0x2ca0   :  { %v4992_v36 = vadd.f32 %v4991_v27, %v4990_v29 }
0x2ca1   :  { %v4997_v63 = vsel %vm893_vm10, %v4983_v48, 0.0  ;;  %v11692_v48 = vld [vmem:[#allocation10 + $0x18] sm:$0xff]  }
0x2ca2   :  { %v4955_v15 = vpop.permute.xlu1 %4954  ;;  %v4998_v37 = vrot.slane %v4997_v63, 4  ;;  %v12472_v27 = vunpack.c.l.bf16 %v11692_v48  ;;  %v8800_v26 = vunpack.c.h.bf16 %v11692_v48 }
0x2ca3   :  { %v4984_v0 = vmul.f32 %v12466_v8, %v4955_v15 }
0x2ca4   :  { %v4999_v42 = vadd.f32 %v4998_v37, %v4997_v63 }
0x2ca5   :  { %v5004_v40 = vsel %vm893_vm10, %v4984_v0, 0.0 }
0x2ca6   :  { %v5005_v25 = vrot.slane %v5004_v40, 4  ;;  %v4960_v18 = vpop.permute.xlu1 %4959  ;;  %v5000_v4 = vrot.slane %v4999_v42, 2 }
0x2ca7   :  { %v4985_v35 = vmul.f32 %v12465_v2, %v4960_v18  ;;  %v4993_v18 = vrot.slane %v4992_v36, 2 }
0x2ca8   :  { %v5006_v6 = vadd.f32 %v5005_v25, %v5004_v40  ;;  %v5001_v25 = vadd.f32 %v5000_v4, %v4999_v42 }
0x2ca9   :  { %v5011_v52 = vsel %vm893_vm10, %v4985_v35, 0.0 }
0x2caa   :  { %v5012_v51 = vrot.slane %v5011_v52, 4  ;;  %v4965_v54 = vpop.permute.xlu1 %4964  ;;  %v5007_v15 = vrot.slane %v5006_v6, 2  ;;  %v5002_v61 = vrot.slane %v5001_v25, 1 }
0x2cab   :  { %v4986_v20 = vmul.f32 %v12464_v32, %v4965_v54 }
0x2cac   :  { %v5013_v62 = vadd.f32 %v5012_v51, %v5011_v52  ;;  %v5008_v54 = vadd.f32 %v5007_v15, %v5006_v6  ;;  %v4994_v52 = vadd.f32 %v4993_v18, %v4992_v36 }
0x2cad   :  { %v5018_v0 = vsel %vm893_vm10, %v4986_v20, 0.0 }
0x2cae   :  { %v5014_v63 = vrot.slane %v5013_v62, 2  ;;  %v5019_v37 = vrot.slane %v5018_v0, 4  ;;  %v4970_v40 = vpop.permute.xlu1 %4969  ;;  %v4995_v4 = vrot.slane %v4994_v52, 1 }
0x2caf   :  { %v4987_v29 = vmul.f32 %v12471_v19, %v4970_v40  ;;  %v5009_v40 = vrot.slane %v5008_v54, 1 }
0x2cb0   :  { %v5020_v35 = vadd.f32 %v5019_v37, %v5018_v0  ;;  %v5015_v51 = vadd.f32 %v5014_v63, %v5013_v62  ;;  %v5003_v63 = vadd.f32 %v5002_v61, %v5001_v25 }
0x2cb1   :  { %v5025_v32 = vsel %vm893_vm10, %v4987_v29, 0.0 }
0x2cb2   :  { %v5021_v2 = vrot.slane %v5020_v35, 2  ;;  %v4975_v8 = vpop.permute.xlu1 %4974  ;;  %v5026_v10 = vrot.slane %v5025_v32, 4  ;;  %v5016_v6 = vrot.slane %v5015_v51, 1  ;;  %v5047_v21 = vpack.c.bf16 %v5003_v63, %v5003_v63 }
0x2cb3   :  { %v4988_v20 = vmul.f32 %v12472_v27, %v4975_v8  ;;  %v5010_v8 = vadd.f32 %v5009_v40, %v5008_v54 }
0x2cb4   :  { %v5022_v56 = vadd.f32 %v5021_v2, %v5020_v35  ;;  %v5027_v19 = vadd.f32 %v5026_v10, %v5025_v32  ;;  %v4996_v2 = vadd.f32 %v4995_v4, %v4994_v52  ;;  %v5017_v35 = vadd.f32 %v5016_v6, %v5015_v51 }
0x2cb5   :  { %v5032_v42 = vsel %vm893_vm10, %v4988_v20, 0.0  ;;  %v5048_v55 = vpack.c.bf16 %v5010_v8, %v5010_v8  ;;  %v5078_v54 = vunpack.c.l.b16 %v5047_v21  ;;  %v11719_v8 = vld [vmem:[%s12435_s12] ss:$0 sm:$0xff] }
0x2cb6   :  { %v5033_v15 = vrot.slane %v5032_v42, 4  ;;  %v4980_v0 = vpop.permute.xlu1 %4979  ;;  %v5023_v36 = vrot.slane %v5022_v56, 1  ;;  %v5028_v62 = vrot.slane %v5027_v19, 2  ;;  %v5046_v1 = vpack.c.bf16 %v4996_v2, %v4996_v2 }
0x2cb7   :  { %v4989_v18 = vmul.f32 %v8800_v26, %v4980_v0  ;;  %v5049_v31 = vpack.c.bf16 %v5017_v35, %v5017_v35  ;;  %v5079_v52 = vunpack.c.l.b16 %v5048_v55 }
0x2cb8   :  { %v5034_v37 = vadd.f32 %v5033_v15, %v5032_v42  ;;  %v5029_v29 = vadd.f32 %v5028_v62, %v5027_v19  ;;  %v5024_v20 = vadd.f32 %v5023_v36, %v5022_v56  ;;  %v5077_v51 = vunpack.c.l.b16 %v5046_v1 }
0x2cb9   :  { %v5039_v27 = vsel %vm893_vm10, %v4989_v18, 0.0  ;;  %v5080_v4 = vunpack.c.l.b16 %v5049_v31 }
0x2cba   :  { %v5035_v10 = vrot.slane %v5034_v37, 2  ;;  %v5040_v32 = vrot.slane %v5039_v27, 4  ;;  %v5030_v12 = vrot.slane %v5029_v29, 1  ;;  %v5050_v25 = vpack.c.bf16 %v5024_v20, %v5024_v20 }
0x2cbb   :  { %v5085_v36 = vsel %vm613_vm2, %v5078_v54, %v5077_v51 }
0x2cbc   :  { %v5036_v11 = vadd.f32 %v5035_v10, %v5034_v37  ;;  %v5041_v46 = vadd.f32 %v5040_v32, %v5039_v27  ;;  %v5031_v9 = vadd.f32 %v5030_v12, %v5029_v29  ;;  %v5081_v15 = vunpack.c.l.b16 %v5050_v25 }
0x2cbd   :  { %v5086_v12 = vsel %vm615_vm3, %v5079_v52, %v5085_v36 }
0x2cbe   :  { %v5037_v0 = vrot.slane %v5036_v11, 1  ;;  %v5042_v61 = vrot.slane %v5041_v46, 2  ;;  %v5051_v19 = vpack.c.bf16 %v5031_v9, %v5031_v9  ;;  %v5087_v63 = vsel %vm617_vm4, %v5080_v4, %v5086_v12 }
0x2cbf   :  { %v5088_v9 = vsel %vm619_vm5, %v5081_v15, %v5087_v63 }
0x2cc0   :  { %v5038_v40 = vadd.f32 %v5037_v0, %v5036_v11  ;;  %v5043_v42 = vadd.f32 %v5042_v61, %v5041_v46  ;;  %v5082_v27 = vunpack.c.l.b16 %v5051_v19  ;;  %v12530_v11 = vmov 0.0  }
0x2cc2   :  { %v5052_v6 = vpack.c.bf16 %v5038_v40, %v5038_v40  ;;  %v5044_v56 = vrot.slane %v5043_v42, 1  ;;  %v5089_v46 = vsel %vm621_vm6, %v5082_v27, %v5088_v9 }
0x2cc4   :  { %v5045_v62 = vadd.f32 %v5044_v56, %v5043_v42  ;;  %v5083_v18 = vunpack.c.l.b16 %v5052_v6  ;;  %v9615_v6 = vld [vmem:[#allocation13] sm:$0xff]  }
0x2cc6   :  { %v5053_v37 = vpack.c.bf16 %v5045_v62, %v5045_v62  ;;  %v5090_v1 = vsel %vm623_vm7, %v5083_v18, %v5089_v46  ;;  %v5308_v62 = vld [vmem:[#allocation7 + $0x28] sm:$0xff] }
0x2cc8   :  { %v5084_v55 = vunpack.c.l.b16 %v5053_v37 }
0x2cca   :  { %v5091_v31 = vsel %vm625_vm8, %v5084_v55, %v5090_v1 }
0x2ccb   :  { %v5092_v21 = vpack.c.b16 %v5091_v31, %v5091_v31 }
0x2ccd   :  { %9346 = vmatmul.mubr.msk.bf16.vlgmr.msra.gmra.mxu1 %vm893_vm10, %v5092_v21 }
0x2cce   :  { %9369 = vmatprep.mubr.msk.bf16.mxu1 %vm10372_vm1, %v12530_v11 }
0x2d8d   :  { %v5154_v29 = vpop.f32.mrf.mxu1 }
0x2d8e   :  { %v5155_v2 = vadd.f32 %v11719_v8, %v5154_v29 }
0x2d8f   :  { %v9347_v35 = vpop.f32.mrf.mxu1 }
0x2d90   :  { %v5216_v10 = vadd.f32 %v11545_v44, %v5155_v2 }
0x2d91   :  { %v5157_v32 = vpop.f32.mrf.mxu1 }
0x2d92   :  { %v5273_v20 = vadd.f32 %v11572_v58, %v5216_v10  ;;  %v9614_v58 = vld [vmem:[#allocation13 + $0x8] sm:$0xff]  }
0x2d93   :  { %v9348_v0 = vpop.f32.mrf.mxu1  ;;  %9366 = vmatpush3.bf16.msra.mxu1 %v9614_v58  ;;  %v9623_v58 = vld [vmem:[#allocation15] sm:$0xff]  }
0x2d94   :  { %9966 = vtanh.f32 %v5273_v20  ;;  %v8550_v25 = vmul.f32 -1.442695, %v5273_v20  ;;  %9367 = vmatprep.subr.bf16.mxu1 %v12530_v11  ;;  %v9616_v20 = vld [vmem:[#allocation16 + $0x8] sm:$0xff]   ;;  %v9617_v0 = vld [vmem:[#allocation16] sm:$0xff]  }
0x2d96   :  { %9968 = vpow2.f32 %v8550_v25 }
0x2d97   :  { %9368 = vmatpush3.bf16.msra.mxu1 %v9615_v6 }
0x2d98   :  { %9381 = vmatprep.subr.bf16.mxu1 %v12530_v11 }
0x2da1   :  { %v9967_v61 = vpop.eup %9966 }
0x2da2   :  { %5283 = vrot.lane.b32.xlu0 %v9967_v61, %s10360_s30 }
0x2da3   :  { %v9969_v54 = vpop.eup %9968 }
0x2da4   :  { %v5277_v19 = vadd.f32 1.0, %v9969_v54 }
0x2da6   :  { %9970 = vrcp.f32 %v5277_v19 }
0x2db3   :  { %v9971_v40 = vpop.eup %9970 }
0x2db4   :  { %v5280_v44 = vmul.f32 %v9971_v40, %v11472_v57 }
0x2e14   :  { %v5284_v42 = vpop.permute.xlu0 %5283 }
0x2e15   :  { %v5286_v52 = vmul.f32 %v9971_v40, %v5284_v42  ;;  %v9619_v42 = vld [vmem:[%s12433_s10] sm:$0xff]  }
0x2e17   :  { %5288 = vrot.lane.b32.xlu1 %v5286_v52, %s10373_s9  ;;  %v9620_v52 = vld [vmem:[#allocation19 + $0x8] sm:$0xff]  }
0x2e89   :  { %v5289_v51 = vpop.permute.xlu1 %5288 }
0x2e8a   :  { %v11727_v4 = vadd.f32 %v5289_v51, %v5280_v44  ;;  %v9621_v44 = vld [vmem:[#allocation19] sm:$0xff]   ;;  %v9622_v51 = vld [vmem:[#allocation15 + $0x8] sm:$0xff]  }
0x2e8c   :  { %9972 = vtanh.f32 %v11727_v4 }
0x2e99   :  { %v9973_v56 = vpop.eup %9972 }
0x2e9a   :  { %5294 = vrot.lane.b32.xlu1 %v9973_v56, %s10360_s30 }
0x2f0c   :  { %v5295_v15 = vpop.permute.xlu1 %5294 }
0x2f0d   :  { %v5297_v36 = vmul.f32 %v9971_v40, %v5295_v15 }
0x2f0f   :  { %v11733_v27 = vpack.c.bf16 %v5297_v36, %v5297_v36 }
0x2f11   :  { %5313 = vrot.lane.b32.xlu1 %v11733_v27, %s10373_s9 }
0x2f83   :  { %v5314_v57 = vpop.permute.xlu1 %5313 }
0x2f84   :  { %9370 = vmatmul.mubr.msk.bf16.vlgmr.msra.gmra.mxu1 %vm161_vm0, %v5314_v57 }
0x2f85   :  { %9385 = vmatprep.mubr.msk.bf16.mxu1 %vm10372_vm1, %v12530_v11  ;;  %9382 = vmatpush3.bf16.msra.mxu1 %v9616_v20  ;;  %v12531_v20 = vunpack.c.l.bf16 %v11526_v13 }
0x2f86   :  { %9383 = vmatprep.subr.bf16.mxu1 %v12530_v11 }
0x2f89   :  { %9384 = vmatpush3.bf16.msra.mxu1 %v9617_v0 }
0x2f8a   :  { %9401 = vmatprep.subr.bf16.mxu1 %v12530_v11 }
0x3044   :  { %v5364_v12 = vpop.f32.mrf.mxu1 }
0x3045   :  { %v5370_v18 = vadd.f32 %v5364_v12, %v5308_v62 }
0x3046   :  { %v9371_v63 = vpop.f32.mrf.mxu1 }
0x3047   :  { %v5427_v37 = vadd.f32 %v11581_v50, %v5370_v18 }
0x3048   :  { %v5367_v9 = vpop.f32.mrf.mxu1 }
0x3049   :  { %9974 = vtanh.f32 %v5427_v37  ;;  %v8558_v1 = vmul.f32 -1.442695, %v5427_v37 }
0x304a   :  { %v9372_v46 = vpop.f32.mrf.mxu1 }
0x304b   :  { %9976 = vpow2.f32 %v8558_v1 }
0x3056   :  { %v9975_v55 = vpop.eup %9974 }
0x3057   :  { %5437 = vrot.lane.b32.xlu1 %v9975_v55, %s10360_s30 }
0x3058   :  { %v9977_v31 = vpop.eup %9976 }
0x3059   :  { %v5431_v21 = vadd.f32 1.0, %v9977_v31 }
0x305b   :  { %9978 = vrcp.f32 %v5431_v21 }
0x3068   :  { %v9979_v29 = vpop.eup %9978 }
0x3069   :  { %v5434_v10 = vmul.f32 %v9979_v29, %v11489_v7  ;;  %v9618_v7 = vld [vmem:[%s12433_s10 + $0x8] sm:$0xff]  }
0x30c9   :  { %v5438_v2 = vpop.permute.xlu1 %5437 }
0x30ca   :  { %v5440_v35 = vmul.f32 %v9979_v29, %v5438_v2 }
0x30cc   :  { %5442 = vrot.lane.b32.xlu1 %v5440_v35, %s10373_s9 }
0x313e   :  { %v5443_v32 = vpop.permute.xlu1 %5442 }
0x313f   :  { %v11744_v50 = vadd.f32 %v5443_v32, %v5434_v10 }
0x3141   :  { %9980 = vtanh.f32 %v11744_v50 }
0x314e   :  { %v9981_v61 = vpop.eup %9980 }
0x314f   :  { %5448 = vrot.lane.b32.xlu1 %v9981_v61, %s10360_s30 }
0x31c1   :  { %v5449_v25 = vpop.permute.xlu1 %5448 }
0x31c2   :  { %v5451_v54 = vmul.f32 %v9979_v29, %v5449_v25 }
0x31c4   :  { %v5452_v19 = vpack.c.bf16 %v5451_v54, %v5451_v54 }
0x31c6   :  { %5465 = vrot.lane.b32.xlu0 %v5452_v19, %s10373_s9  ;;  %v12532_v19 = vunpack.c.h.bf16 %v11526_v13 }
0x3238   :  { %v5466_v40 = vpop.permute.xlu0 %5465 }
0x3239   :  { %9386 = vmatmul.mubr.msk.bf16.vlgmr.msra.gmra.mxu1 %vm161_vm0, %v5466_v40 }
0x323a   :  { %9402 = vmatpush3.bf16.msra.mxu1 %v9618_v7  ;;  %9405 = vmatprep.mubr.msk.bf16.mxu1 %vm10372_vm1, %v12530_v11 }
0x323b   :  { %9403 = vmatprep.subr.bf16.mxu1 %v12530_v11 }
0x323e   :  { %9404 = vmatpush3.bf16.msra.mxu1 %v9619_v42 }
0x323f   :  { %9409 = vmatprep.subr.bf16.mxu1 %v12530_v11 }
0x3241   :  { %9406 = vmatmul.mubr.msk.bf16.vlgmr.msra.gmra.mxu1 %vm161_vm0, %v5466_v40 }
0x3242   :  { %9410 = vmatpush3.bf16.msra.mxu1 %v9620_v52  ;;  %9413 = vmatprep.mubr.msk.bf16.mxu1 %vm10372_vm1, %v12530_v11 }
0x3243   :  { %9411 = vmatprep.subr.bf16.mxu1 %v12530_v11 }
0x3246   :  { %9412 = vmatpush3.bf16.msra.mxu1 %v9621_v44  ;;  %v12534_v44 = vunpack.c.l.bf16 %v11531_v28 }
0x3247   :  { %9425 = vmatprep.subr.bf16.mxu1 %v12530_v11 }
0x3249   :  { %9414 = vmatmul.mubr.msk.bf16.vlgmr.msra.gmra.mxu1 %vm161_vm0, %v5314_v57 }
0x324a   :  { %9426 = vmatpush3.bf16.msra.mxu1 %v9622_v51  ;;  %9429 = vmatprep.mubr.msk.bf16.mxu1 %vm10372_vm1, %v12530_v11 }
0x324b   :  { %9427 = vmatprep.subr.bf16.mxu1 %v12530_v11 }
0x324e   :  { %9428 = vmatpush3.bf16.msra.mxu1 %v9623_v58 }
0x324f   :  { %9441 = vmatprep.subr.bf16.mxu1 %v12530_v11 }
0x3251   :  { %9430 = vmatmul.mubr.msk.bf16.vlgmr.msra.gmra.mxu1 %vm161_vm0, %v5466_v40  ;;  %v12533_v40 = vunpack.c.l.bf16 %v11529_v3 }
0x3252   :  { %9449 = vmatprep.mubr.msk.bf16.mxu1 %vm10372_vm1, %v12530_v11 }
0x32f9   :  { %v5516_v6 = vpop.f32.mrf.mxu1 }
0x32fa   :  { %v5517_v56 = vadd.f32 %v11523_v30, %v5516_v6 }
0x32fb   :  { %v9387_v15 = vpop.f32.mrf.mxu1 }
0x32fc   :  { %v5539_v36 = vcombine.high %v5517_v56, %v5517_v56  ;;  %v5546_v57 = vrot.slane %v5517_v56, %v10567_v53  ;;  %v12535_v56 = vunpack.c.h.bf16 %v11529_v3  ;;  %v12538_v3 = vunpack.c.h.bf16 %v11542_v38 }
0x32fd   :  { %v5519_v62 = vpop.f32.mrf.mxu1 }
0x32fe   :  { %v5553_v12 = vrot.slane %v5539_v36, %v10567_v53  ;;  %v5554_v18 = vcombine.high %v5546_v57, %v5546_v57  ;;  %v5562_v63 = vrot.slane %v5546_v57, %v10567_v53  ;;  %v12536_v57 = vunpack.c.l.bf16 %v11542_v38 }
0x32ff   :  { %v9388_v37 = vpop.f32.mrf.mxu1 }
0x3300   :  { %v5555_v9 = vcombine.high %v5553_v12, %v5553_v12  ;;  %v5569_v46 = vrot.slane %v5553_v12, %v10567_v53  ;;  %v5576_v55 = vrot.slane %v5554_v18, %v10567_v53  ;;  %v5584_v1 = vcombine.high %v5562_v63, %v5562_v63 }
0x3301   :  { %v5591_v31 = vrot.slane %v5562_v63, %v10574_v60  ;;  %v11782_v30 = vpop.f32.mrf.mxu1  ;;  %v12537_v18 = vunpack.c.h.bf16 %v11531_v28 }
0x3302   :  { %v5585_v21 = vcombine.high %v5569_v46, %v5569_v46  ;;  %v5586_v29 = vcombine.high %v5576_v55, %v5576_v55  ;;  %v5595_v2 = vrot.slane %v5576_v55, %v10574_v60  ;;  %v5583_v35 = vrot.slane %v5555_v9, %v10567_v53 }
0x3303   :  { %v5599_v10 = vrot.slane %v5584_v1, %v10574_v60  ;;  %v5607_v32 = vrot.slane %v5569_v46, %v10574_v60  ;;  %v5628_v0 = vadd.f32 %v12531_v20, %v5591_v31  ;;  %v9407_v61 = vpop.f32.mrf.mxu1 }
0x3304   :  { %v5603_v25 = vrot.slane %v5586_v29, %v10574_v60  ;;  %v5615_v54 = vrot.slane %v5585_v21, %v10574_v60  ;;  %v5629_v7 = vadd.f32 %v12532_v19, %v5595_v2  ;;  %v5587_v58 = vcombine.high %v5583_v35, %v5583_v35 }
0x3305   :  { %v5630_v42 = vadd.f32 %v12533_v40, %v5599_v10  ;;  %9982 = vtanh.f32 %v5628_v0  ;;  %v6236_v52 = vpop.f32.mrf.mxu1  ;;  %v5632_v51 = vadd.f32 %v12534_v44, %v5607_v32  ;;  %v5611_v6 = vrot.slane %v5583_v35, %v10574_v60 }
0x3306   :  { %v5631_v15 = vadd.f32 %v12535_v56, %v5603_v25  ;;  %9984 = vtanh.f32 %v5629_v7  ;;  %v5634_v13 = vadd.f32 %v12536_v57, %v5615_v54  ;;  %v5619_v12 = vrot.slane %v5587_v58, %v10574_v60 }
0x3307   :  { %v9408_v36 = vpop.f32.mrf.mxu1  ;;  %9986 = vtanh.f32 %v5630_v42  ;;  %v5633_v63 = vadd.f32 %v12537_v18, %v5611_v6 }
0x3308   :  { %9988 = vtanh.f32 %v5632_v51  ;;  %v5635_v46 = vadd.f32 %v12538_v3, %v5619_v12 }
0x3309   :  { %v11803_v62 = vpop.f32.mrf.mxu1  ;;  %9990 = vtanh.f32 %v5631_v15 }
0x330a   :  { %9992 = vtanh.f32 %v5634_v13 }
0x330b   :  { %v9415_v37 = vpop.f32.mrf.mxu1  ;;  %9994 = vtanh.f32 %v5633_v63 }
0x330c   :  { %9996 = vtanh.f32 %v5635_v46 }
0x330d   :  { %v6293_v9 = vpop.f32.mrf.mxu1 }
0x330f   :  { %v9416_v55 = vpop.f32.mrf.mxu1 }
0x3311   :  { %v11810_v1 = vpop.f32.mrf.mxu1 }
0x3312   :  { %v9983_v31 = vpop.eup %9982 }
0x3313   :  { %v9431_v21 = vpop.f32.mrf.mxu1  ;;  %v5651_v29 = vmul.f32 %v9983_v31, %v11579_v59  ;;  %v9985_v2 = vpop.eup %9984 }
0x3314   :  { %v9987_v35 = vpop.eup %9986  ;;  %v5652_v32 = vmul.f32 %v9985_v2, %v11579_v59 }
0x3315   :  { %v5659_v28 = vsel %vm161_vm0, %v5651_v29, 0.0  ;;  %v6447_v10 = vpop.f32.mrf.mxu1  ;;  %v9989_v20 = vpop.eup %9988  ;;  %v5653_v61 = vmul.f32 %v9987_v35, %v11579_v59 }
0x3316   :  { %5660 = vadd.xlane.f32.xlu1 %v5659_v28  ;;  %v5662_v38 = vsel %vm161_vm0, %v5652_v32, 0.0  ;;  %v9991_v25 = vpop.eup %9990  ;;  %v5655_v54 = vmul.f32 %v9989_v20, %v11579_v59 }
0x3317   :  { %v9432_v0 = vpop.f32.mrf.mxu1  ;;  %5663 = vadd.xlane.f32.xlu0 %v5662_v38  ;;  %v9993_v19 = vpop.eup %9992  ;;  %v5665_v42 = vsel %vm161_vm0, %v5653_v61, 0.0  ;;  %v5654_v52 = vmul.f32 %v9991_v25, %v11579_v59 }
0x3318   :  { %v5671_v7 = vsel %vm161_vm0, %v5655_v54, 0.0  ;;  %v5657_v40 = vmul.f32 %v9993_v19, %v11579_v59  ;;  %v9995_v44 = vpop.eup %9994 }
0x3319   :  { %v5668_v58 = vsel %vm161_vm0, %v5654_v52, 0.0  ;;  %v5656_v6 = vmul.f32 %v9995_v44, %v11579_v59  ;;  %v9997_v56 = vpop.eup %9996 }
0x331a   :  { %5672 = vadd.xlane.f32.xlu1 %v5671_v7  ;;  %v5677_v51 = vsel %vm161_vm0, %v5657_v40, 0.0  ;;  %v5658_v36 = vmul.f32 %v9997_v56, %v11579_v59 }
0x331b   :  { %5666 = vadd.xlane.f32.xlu0 %v5665_v42  ;;  %v5674_v15 = vsel %vm161_vm0, %v5656_v6, 0.0 }
0x331c   :  { %v5680_v57 = vsel %vm161_vm0, %v5658_v36, 0.0 }
0x331e   :  { %5678 = vadd.xlane.f32.xlu1 %v5677_v51 }
0x331f   :  { %5669 = vadd.xlane.f32.xlu0 %v5668_v58 }
0x3323   :  { %5675 = vadd.xlane.f32.xlu0 %v5674_v15 }
0x3327   :  { %5681 = vadd.xlane.f32.xlu0 %v5680_v57 }
0x332f   :  { %5690 = vperm.xlu1 %9541, %v11599_v14  }
0x339f   :  { %v5661_v13 = vpop.xlane.xlu1 %5660 }
0x33a0   :  { %v5664_v12 = vpop.xlane.xlu0 %5663 }
0x33a3   :  { %v5673_v18 = vpop.xlane.xlu1 %5672 }
0x33a4   :  { %v5667_v63 = vpop.xlane.xlu0 %5666 }
0x33a7   :  { %v5679_v37 = vpop.xlane.xlu1 %5678 }
0x33a8   :  { %v5670_v9 = vpop.xlane.xlu0 %5669 }
0x33ab   :  { %v5691_v3 = vpop.permute.xlu1 %5690 }
0x33ac   :  { %v5693_v46 = vadd.f32 %v5691_v3, %v5661_v13  ;;  %v5694_v55 = vadd.f32 %v5691_v3, %v5664_v12  ;;  %v5695_v31 = vadd.f32 %v5691_v3, %v5667_v63  ;;  %v5676_v21 = vpop.xlane.xlu0 %5675  ;;  %v5696_v29 = vadd.f32 %v5691_v3, %v5670_v9 }
0x33ad   :  { %v5697_v2 = vadd.f32 %v5691_v3, %v5673_v18  ;;  %v5698_v59 = vadd.f32 %v5691_v3, %v5676_v21  ;;  %v5699_v10 = vadd.f32 %v5691_v3, %v5679_v37 }
0x33ae   :  { %v5712_v35 = vrot.slane %v5693_v46, %v10651_v41  ;;  %v5716_v28 = vrot.slane %v5694_v55, %v10651_v41  ;;  %v5720_v14 = vrot.slane %v5695_v31, %v10651_v41  ;;  %v5724_v20 = vrot.slane %v5696_v29, %v10651_v41 }
0x33af   :  { %v5728_v61 = vrot.slane %v5697_v2, %v10651_v41  ;;  %v5732_v54 = vrot.slane %v5698_v59, %v10651_v41  ;;  %v5736_v40 = vrot.slane %v5699_v10, %v10651_v41 }
0x33b0   :  { %v5682_v32 = vpop.xlane.xlu0 %5681  ;;  %v5741_v38 = vsel %vm613_vm2, %v5716_v28, %v5712_v35 }
0x33b1   :  { %v5700_v0 = vadd.f32 %v5691_v3, %v5682_v32  ;;  %v5742_v25 = vsel %vm615_vm3, %v5720_v14, %v5741_v38 }
0x33b2   :  { %v5743_v19 = vsel %vm617_vm4, %v5724_v20, %v5742_v25 }
0x33b3   :  { %v5740_v7 = vrot.slane %v5700_v0, %v10651_v41  ;;  %v5744_v42 = vsel %vm619_vm5, %v5728_v61, %v5743_v19 }
0x33b4   :  { %v5745_v52 = vsel %vm621_vm6, %v5732_v54, %v5744_v42 }
0x33b5   :  { %v5746_v44 = vsel %vm623_vm7, %v5736_v40, %v5745_v52 }
0x33b6   :  { %v5747_v51 = vsel %vm625_vm8, %v5740_v7, %v5746_v44 }
0x33b7   :  { %v5749_v58 = vsel %vm628_vm9, %v5747_v51, -inf }
0x33b8   :  { %5750 = vmax.xlane.f32.xlu0 %v5749_v58 }
0x3441   :  { %v5751_v6 = vpop.xlane.xlu0 %5750 }
0x3442   :  { %v5756_v56 = vrot.slane %v5751_v6, %v10574_v60  ;;  %v5760_v15 = vrot.slane %v5751_v6, %v10670_v22  ;;  %v5764_v36 = vrot.slane %v5751_v6, %v10676_v24  ;;  %v5776_v57 = vrot.slane %v5751_v6, %v10690_v49 }
0x3443   :  { %v5768_v13 = vrot.slane %v5751_v6, %v10682_v33  ;;  %v5784_v37 = vrot.slane %v5751_v6, %v10673_v23  ;;  %v5772_v14 = vrot.slane %v5751_v6, %v10686_v39  ;;  %v5780_v61 = vrot.slane %v5751_v6, %v10694_v45 }
0x3444   :  { %v5793_v12 = vsub.f32 %v5693_v46, %v5756_v56  ;;  %v5794_v18 = vsub.f32 %v5694_v55, %v5760_v15  ;;  %v5795_v63 = vsub.f32 %v5695_v31, %v5764_v36  ;;  %v5798_v9 = vsub.f32 %v5698_v59, %v5776_v57 }
0x3445   :  { %v5796_v35 = vsub.f32 %v5696_v29, %v5768_v13  ;;  %v5800_v32 = vsub.f32 %v5700_v0, %v5784_v37  ;;  %v5797_v46 = vsub.f32 %v5697_v2, %v5772_v14  ;;  %v5799_v31 = vsub.f32 %v5699_v10, %v5780_v61 }
0x3446   :  { %v5801_v3 = vmul.f32 1.442695, %v5793_v12  ;;  %v5803_v21 = vmul.f32 1.442695, %v5794_v18  ;;  %v5805_v28 = vmul.f32 1.442695, %v5795_v63 }
0x3447   :  { %v5811_v20 = vmul.f32 1.442695, %v5798_v9  ;;  %v5807_v38 = vmul.f32 1.442695, %v5796_v35  ;;  %v5815_v55 = vmul.f32 1.442695, %v5800_v32 }
0x3448   :  { %9998 = vpow2.f32 %v5801_v3  ;;  %v5809_v59 = vmul.f32 1.442695, %v5797_v46  ;;  %v5813_v29 = vmul.f32 1.442695, %v5799_v31 }
0x3449   :  { %10000 = vpow2.f32 %v5803_v21 }
0x344a   :  { %10002 = vpow2.f32 %v5805_v28 }
0x344b   :  { %10004 = vpow2.f32 %v5811_v20 }
0x344c   :  { %10006 = vpow2.f32 %v5807_v38 }
0x344d   :  { %10008 = vpow2.f32 %v5815_v55 }
0x344e   :  { %10010 = vpow2.f32 %v5809_v59 }
0x344f   :  { %10012 = vpow2.f32 %v5813_v29 }
0x3455   :  { %v9999_v25 = vpop.eup %9998 }
0x3456   :  { %v10001_v54 = vpop.eup %10000  ;;  %5826 = vperm.xlu0 %9540, %v9999_v25  }
0x3457   :  { %5829 = vperm.xlu1 %9541, %v10001_v54   ;;  %v10003_v0 = vpop.eup %10002 }
0x3458   :  { %v11853_v19 = vpop.eup %10004 }
0x3459   :  { %v10007_v2 = vpop.eup %10006 }
0x345a   :  { %5841 = vperm.xlu0 %9540, %v11853_v19   ;;  %v11856_v7 = vpop.eup %10008 }
0x345b   :  { %5832 = vperm.xlu1 %9541, %v10003_v0   ;;  %v10011_v10 = vpop.eup %10010 }
0x345c   :  { %v11859_v40 = vpop.eup %10012 }
0x345e   :  { %5847 = vperm.xlu0 %9540, %v11856_v7  }
0x345f   :  { %5835 = vperm.xlu1 %9541, %v10007_v2  }
0x3463   :  { %5838 = vperm.xlu1 %9541, %v10011_v10  }
0x3467   :  { %5844 = vperm.xlu1 %9541, %v11859_v40  }
0x34d1   :  { %v5827_v52 = vpop.permute.xlu0 %5826 }
0x34d2   :  { %v5830_v42 = vpop.permute.xlu1 %5829  ;;  %v5852_v58 = vrot.slane %v5827_v52, %v10651_v41 }
0x34d3   :  { %v5856_v51 = vrot.slane %v5830_v42, %v10651_v41 }
0x34d5   :  { %v5842_v15 = vpop.permute.xlu0 %5841  ;;  %v5881_v57 = vsel %vm613_vm2, %v5856_v51, %v5852_v58 }
0x34d6   :  { %v5833_v44 = vpop.permute.xlu1 %5832  ;;  %v5872_v3 = vrot.slane %v5842_v15, %v10651_v41 }
0x34d7   :  { %v5860_v56 = vrot.slane %v5833_v44, %v10651_v41 }
0x34d9   :  { %v5882_v12 = vsel %vm615_vm3, %v5860_v56, %v5881_v57  ;;  %v5848_v37 = vpop.permute.xlu0 %5847 }
0x34da   :  { %v5836_v6 = vpop.permute.xlu1 %5835  ;;  %v5880_v28 = vrot.slane %v5848_v37, %v10651_v41 }
0x34db   :  { %v5864_v36 = vrot.slane %v5836_v6, %v10651_v41 }
0x34dd   :  { %v5883_v63 = vsel %vm617_vm4, %v5864_v36, %v5882_v12 }
0x34de   :  { %v5839_v13 = vpop.permute.xlu1 %5838 }
0x34df   :  { %v5868_v18 = vrot.slane %v5839_v13, %v10651_v41 }
0x34e1   :  { %v5884_v9 = vsel %vm619_vm5, %v5868_v18, %v5883_v63 }
0x34e2   :  { %v5845_v21 = vpop.permute.xlu1 %5844  ;;  %v5885_v14 = vsel %vm621_vm6, %v5872_v3, %v5884_v9 }
0x34e3   :  { %v5876_v35 = vrot.slane %v5845_v21, %v10651_v41 }
0x34e5   :  { %v5886_v32 = vsel %vm623_vm7, %v5876_v35, %v5885_v14 }
0x34e6   :  { %v5887_v20 = vsel %vm625_vm8, %v5880_v28, %v5886_v32  ;;  %v12540_v28 = vunpack.c.h.bf16 %v11666_v5 }
0x34e7   :  { %v5889_v38 = vsel %vm628_vm9, %v5887_v20, 0.0 }
0x34e8   :  { %5890 = vadd.xlane.f32.xlu1 %v5889_v38 }
0x3571   :  { %v5891_v61 = vpop.xlane.xlu1 %5890 }
0x3572   :  { %v5896_v46 = vrot.slane %v5891_v61, %v10574_v60  ;;  %v5900_v55 = vrot.slane %v5891_v61, %v10670_v22  ;;  %v5904_v31 = vrot.slane %v5891_v61, %v10676_v24  ;;  %v5908_v59 = vrot.slane %v5891_v61, %v10682_v33 }
0x3573   :  { %v5912_v29 = vrot.slane %v5891_v61, %v10686_v39  ;;  %v5916_v52 = vrot.slane %v5891_v61, %v10690_v49  ;;  %v5920_v58 = vrot.slane %v5891_v61, %v10694_v45  ;;  %v5924_v15 = vrot.slane %v5891_v61, %v10673_v23 }
0x3574   :  { %10014 = vrcp.f32 %v5896_v46  ;;  %v12541_v61 = vunpack.c.l.bf16 %v11670_v17 }
0x3575   :  { %10016 = vrcp.f32 %v5900_v55 }
0x3576   :  { %10018 = vrcp.f32 %v5904_v31 }
0x3577   :  { %10020 = vrcp.f32 %v5908_v59 }
0x3578   :  { %10022 = vrcp.f32 %v5912_v29 }
0x3579   :  { %10024 = vrcp.f32 %v5916_v52  ;;  %v12542_v52 = vunpack.c.h.bf16 %v11670_v17 }
0x357a   :  { %10026 = vrcp.f32 %v5920_v58 }
0x357b   :  { %10028 = vrcp.f32 %v5924_v15 }
0x3581   :  { %v10015_v42 = vpop.eup %10014 }
0x3582   :  { %v5934_v44 = vmul.f32 %v10015_v42, %v9999_v25  ;;  %v10017_v51 = vpop.eup %10016 }
0x3583   :  { %v5936_v6 = vmul.f32 %v10017_v51, %v10001_v54  ;;  %v10019_v56 = vpop.eup %10018 }
0x3584   :  { %5967 = vperm.xlu0 %9540, %v5934_v44   ;;  %v5938_v36 = vmul.f32 %v10019_v56, %v10003_v0  ;;  %v10021_v57 = vpop.eup %10020  ;;  %v9624_v0 = vld [vmem:[#allocation18 + $0x18] sm:$0xff]  }
0x3585   :  { %v5940_v13 = vmul.f32 %v10021_v57, %v10007_v2  ;;  %v10023_v12 = vpop.eup %10022  ;;  %9390 = vmatpush3.bf16.msra.mxu0 %v9624_v0  ;;  %v9625_v2 = vld [vmem:[#allocation18 + $0x10] sm:$0xff]  }
0x3586   :  { %v5942_v18 = vmul.f32 %v10023_v12, %v10011_v10  ;;  %v10025_v25 = vpop.eup %10024  ;;  %9391 = vmatprep.subr.bf16.mxu0 %v12530_v11  ;;  %v9626_v10 = vld [vmem:[#allocation18 + $0x8] sm:$0xff]  }
0x3587   :  { %v5944_v63 = vmul.f32 %v10025_v25, %v11853_v19  ;;  %v10027_v37 = vpop.eup %10026  ;;  %v9627_v19 = vld [vmem:[#allocation18] sm:$0xff]  }
0x3588   :  { %5972 = vperm.xlu0 %9540, %v5936_v6   ;;  %v5946_v54 = vmul.f32 %v10027_v37, %v11859_v40  ;;  %v10029_v9 = vpop.eup %10028 }
0x3589   :  { %v5948_v3 = vmul.f32 %v10029_v9, %v11856_v7  ;;  %9392 = vmatpush3.bf16.msra.mxu0 %v9625_v2  ;;  %v12539_v7 = vunpack.c.l.bf16 %v11666_v5  ;;  %v12544_v9 = vunpack.c.h.bf16 %v11682_v47 }
0x358a   :  { %9393 = vmatprep.subr.bf16.mxu0 %v12530_v11 }
0x358c   :  { %5977 = vperm.xlu0 %9540, %v5938_v36   ;;  %v12543_v36 = vunpack.c.l.bf16 %v11682_v47 }
0x358d   :  { %9394 = vmatpush3.bf16.msra.mxu0 %v9626_v10 }
0x358e   :  { %9395 = vmatprep.subr.bf16.mxu0 %v12530_v11 }
0x3590   :  { %5982 = vperm.xlu0 %9540, %v5940_v13  }
0x3591   :  { %9396 = vmatpush3.bf16.msra.mxu0 %v9627_v19 }
0x3592   :  { %9417 = vmatprep.subr.bf16.mxu0 %v12530_v11 }
0x3594   :  { %5987 = vperm.xlu0 %9540, %v5942_v18  }
0x3598   :  { %5992 = vperm.xlu0 %9540, %v5944_v63  }
0x359c   :  { %5997 = vperm.xlu0 %9540, %v5946_v54  }
0x35a0   :  { %6002 = vperm.xlu0 %9540, %v5948_v3  }
0x35ff   :  { %v5968_v40 = vpop.permute.xlu0 %5967 }
0x3600   :  { %v6005_v35 = vmul.f32 %v12539_v7, %v5968_v40 }
0x3602   :  { %v6013_v38 = vsel %vm893_vm10, %v6005_v35, 0.0 }
0x3603   :  { %v5973_v21 = vpop.permute.xlu0 %5972  ;;  %v6014_v59 = vrot.slane %v6013_v38, 4 }
0x3604   :  { %v6006_v14 = vmul.f32 %v12540_v28, %v5973_v21 }
0x3605   :  { %v6015_v6 = vadd.f32 %v6014_v59, %v6013_v38 }
0x3606   :  { %v6020_v32 = vsel %vm893_vm10, %v6006_v14, 0.0  ;;  %v12545_v14 = vunpack.c.l.bf16 %v11692_v48 }
0x3607   :  { %v5978_v20 = vpop.permute.xlu0 %5977  ;;  %v6021_v55 = vrot.slane %v6020_v32, 4  ;;  %v6016_v63 = vrot.slane %v6015_v6, 2 }
0x3608   :  { %v6007_v46 = vmul.f32 %v12541_v61, %v5978_v20 }
0x3609   :  { %v6022_v51 = vadd.f32 %v6021_v55, %v6020_v32  ;;  %v6017_v40 = vadd.f32 %v6016_v63, %v6015_v6 }
0x360a   :  { %v6027_v31 = vsel %vm893_vm10, %v6007_v46, 0.0 }
0x360b   :  { %v6028_v29 = vrot.slane %v6027_v31, 4  ;;  %v5983_v42 = vpop.permute.xlu0 %5982  ;;  %v6023_v13 = vrot.slane %v6022_v51, 2  ;;  %v6018_v55 = vrot.slane %v6017_v40, 1 }
0x360c   :  { %v6008_v44 = vmul.f32 %v12542_v52, %v5983_v42 }
0x360d   :  { %v6029_v5 = vadd.f32 %v6028_v29, %v6027_v31  ;;  %v6024_v0 = vadd.f32 %v6023_v13, %v6022_v51 }
0x360e   :  { %v6034_v58 = vsel %vm893_vm10, %v6008_v44, 0.0 }
0x360f   :  { %v6035_v56 = vrot.slane %v6034_v58, 4  ;;  %v5988_v15 = vpop.permute.xlu0 %5987  ;;  %v6030_v18 = vrot.slane %v6029_v5, 2  ;;  %v6025_v20 = vrot.slane %v6024_v0, 1 }
0x3610   :  { %v6009_v57 = vmul.f32 %v12543_v36, %v5988_v15  ;;  %v6019_v15 = vadd.f32 %v6018_v55, %v6017_v40 }
0x3611   :  { %v6036_v12 = vadd.f32 %v6035_v56, %v6034_v58  ;;  %v6031_v10 = vadd.f32 %v6030_v18, %v6029_v5  ;;  %v6026_v51 = vadd.f32 %v6025_v20, %v6024_v0 }
0x3612   :  { %v6041_v25 = vsel %vm893_vm10, %v6009_v57, 0.0 }
0x3613   :  { %v6037_v37 = vrot.slane %v6036_v12, 2  ;;  %v6042_v54 = vrot.slane %v6041_v25, 4  ;;  %v5993_v17 = vpop.permute.xlu0 %5992  ;;  %v6032_v61 = vrot.slane %v6031_v10, 1 }
0x3614   :  { %v6010_v3 = vmul.f32 %v12544_v9, %v5993_v17  ;;  %v6069_v9 = vpack.c.bf16 %v6019_v15, %v6019_v15 }
0x3615   :  { %v6043_v2 = vadd.f32 %v6042_v54, %v6041_v25  ;;  %v6038_v21 = vadd.f32 %v6037_v37, %v6036_v12  ;;  %v6033_v58 = vadd.f32 %v6032_v61, %v6031_v10  ;;  %v6070_v25 = vpack.c.bf16 %v6026_v51, %v6026_v51 }
0x3616   :  { %v6048_v19 = vsel %vm893_vm10, %v6010_v3, 0.0 }
0x3617   :  { %v6044_v7 = vrot.slane %v6043_v2, 2  ;;  %v5998_v35 = vpop.permute.xlu0 %5997  ;;  %v6049_v28 = vrot.slane %v6048_v19, 4  ;;  %v6039_v31 = vrot.slane %v6038_v21, 1  ;;  %v6071_v54 = vpack.c.bf16 %v6033_v58, %v6033_v58 }
0x3618   :  { %v6011_v32 = vmul.f32 %v12545_v14, %v5998_v35 }
0x3619   :  { %v6045_v38 = vadd.f32 %v6044_v7, %v6043_v2  ;;  %v6050_v46 = vadd.f32 %v6049_v28, %v6048_v19  ;;  %v6040_v36 = vadd.f32 %v6039_v31, %v6038_v21  ;;  %v6101_v2 = vunpack.c.l.b16 %v6070_v25 }
0x361a   :  { %v6055_v47 = vsel %vm893_vm10, %v6011_v32, 0.0  ;;  %v6102_v40 = vunpack.c.l.b16 %v6071_v54  ;;  %v6100_v21 = vunpack.c.l.b16 %v6069_v9  ;;  %v9629_v9 = vld [vmem:[#allocation13] sm:$0xff]  }
0x361b   :  { %v6056_v59 = vrot.slane %v6055_v47, 4  ;;  %v6003_v29 = vpop.permute.xlu0 %6002  ;;  %v6046_v42 = vrot.slane %v6045_v38, 1  ;;  %v6051_v52 = vrot.slane %v6050_v46, 2  ;;  %v6072_v48 = vpack.c.bf16 %v6040_v36, %v6040_v36 }
0x361c   :  { %v6012_v44 = vmul.f32 %v8800_v26, %v6003_v29  ;;  %v6108_v20 = vsel %vm613_vm2, %v6101_v2, %v6100_v21  ;;  %v6331_v2 = vld [vmem:[#allocation7 + $0x30] sm:$0xff] }
0x361d   :  { %v6057_v5 = vadd.f32 %v6056_v59, %v6055_v47  ;;  %v6052_v6 = vadd.f32 %v6051_v52, %v6050_v46  ;;  %v6047_v12 = vadd.f32 %v6046_v42, %v6045_v38  ;;  %v6103_v35 = vunpack.c.l.b16 %v6072_v48 }
0x361e   :  { %v6062_v56 = vsel %vm893_vm10, %v6012_v44, 0.0  ;;  %v6109_v46 = vsel %vm615_vm3, %v6102_v40, %v6108_v20 }
0x361f   :  { %v6058_v57 = vrot.slane %v6057_v5, 2  ;;  %v6063_v13 = vrot.slane %v6062_v56, 4  ;;  %v6053_v18 = vrot.slane %v6052_v6, 1  ;;  %v6073_v0 = vpack.c.bf16 %v6047_v12, %v6047_v12 }
0x3620   :  { %v6110_v55 = vsel %vm617_vm4, %v6103_v35, %v6109_v46 }
0x3621   :  { %v6059_v63 = vadd.f32 %v6058_v57, %v6057_v5  ;;  %v6064_v37 = vadd.f32 %v6063_v13, %v6062_v56  ;;  %v6054_v17 = vadd.f32 %v6053_v18, %v6052_v6  ;;  %v6104_v32 = vunpack.c.l.b16 %v6073_v0 }
0x3623   :  { %v6060_v26 = vrot.slane %v6059_v63, 1  ;;  %v6065_v3 = vrot.slane %v6064_v37, 2  ;;  %v6074_v10 = vpack.c.bf16 %v6054_v17, %v6054_v17  ;;  %v6111_v59 = vsel %vm619_vm5, %v6104_v32, %v6110_v55 }
0x3625   :  { %v6061_v19 = vadd.f32 %v6060_v26, %v6059_v63  ;;  %v6066_v7 = vadd.f32 %v6065_v3, %v6064_v37  ;;  %v6105_v38 = vunpack.c.l.b16 %v6074_v10 }
0x3627   :  { %v6075_v28 = vpack.c.bf16 %v6061_v19, %v6061_v19  ;;  %v6067_v14 = vrot.slane %v6066_v7, 1  ;;  %v6112_v29 = vsel %vm621_vm6, %v6105_v38, %v6111_v59  ;;  %v9631_v59 = vld [vmem:[#allocation16] sm:$0xff]  }
0x3629   :  { %v6068_v61 = vadd.f32 %v6067_v14, %v6066_v7  ;;  %v6106_v47 = vunpack.c.l.b16 %v6075_v28 }
0x362b   :  { %v6076_v31 = vpack.c.bf16 %v6068_v61, %v6068_v61  ;;  %v6113_v52 = vsel %vm623_vm7, %v6106_v47, %v6112_v29 }
0x362d   :  { %v6107_v42 = vunpack.c.l.b16 %v6076_v31  ;;  %v9630_v31 = vld [vmem:[#allocation16 + $0x8] sm:$0xff]  }
0x362f   :  { %v6114_v44 = vsel %vm625_vm8, %v6107_v42, %v6113_v52 }
0x3630   :  { %v6115_v51 = vpack.c.b16 %v6114_v44, %v6114_v44 }
0x3632   :  { %9398 = vmatmul.mubr.msk.bf16.vlgmr.msra.gmra.mxu0 %vm893_vm10, %v6115_v51 }
0x3633   :  { %9421 = vmatprep.mubr.msk.bf16.mxu0 %vm10372_vm1, %v12530_v11 }
0x36f2   :  { %v6177_v5 = vpop.f32.mrf.mxu0 }
0x36f3   :  { %v6178_v58 = vadd.f32 %v11719_v8, %v6177_v5  ;;  %v9633_v5 = vld [vmem:[%s12433_s10] sm:$0xff]  }
0x36f4   :  { %v9399_v6 = vpop.f32.mrf.mxu0 }
0x36f5   :  { %v6239_v56 = vadd.f32 %v11782_v30, %v6178_v58  ;;  %v9634_v58 = vld [vmem:[#allocation19 + $0x8] sm:$0xff]   ;;  %v9635_v6 = vld [vmem:[#allocation19] sm:$0xff]  }
0x36f6   :  { %v6180_v15 = vpop.f32.mrf.mxu0 }
0x36f7   :  { %v6296_v36 = vadd.f32 %v11803_v62, %v6239_v56  ;;  %v9628_v62 = vld [vmem:[#allocation13 + $0x8] sm:$0xff]   ;;  %v9636_v56 = vld [vmem:[#allocation15 + $0x8] sm:$0xff]   ;;  %v9637_v15 = vld [vmem:[#allocation15] sm:$0xff]  }
0x36f8   :  { %v9400_v57 = vpop.f32.mrf.mxu0  ;;  %9418 = vmatpush3.bf16.msra.mxu0 %v9628_v62 }
0x36f9   :  { %10030 = vtanh.f32 %v6296_v36  ;;  %v8577_v12 = vmul.f32 -1.442695, %v6296_v36  ;;  %9419 = vmatprep.subr.bf16.mxu0 %v12530_v11  ;;  %v11984_v36 = vld [vmem:[%s12429_s6] ss:$0 sm:$0xff] }
0x36fb   :  { %10032 = vpow2.f32 %v8577_v12 }
0x36fc   :  { %9420 = vmatpush3.bf16.msra.mxu0 %v9629_v9 }
0x36fd   :  { %9433 = vmatprep.subr.bf16.mxu0 %v12530_v11 }
0x3706   :  { %v10031_v13 = vpop.eup %10030 }
0x3707   :  { %6306 = vrot.lane.b32.xlu0 %v10031_v13, %s10360_s30 }
0x3708   :  { %v10033_v18 = vpop.eup %10032 }
0x3709   :  { %v6300_v25 = vadd.f32 1.0, %v10033_v18  ;;  %v11987_v18 = vld [vmem:[#allocation12] sm:$0xff]  }
0x370b   :  { %10034 = vrcp.f32 %v6300_v25 }
0x3718   :  { %v10035_v63 = vpop.eup %10034 }
0x3719   :  { %v6303_v8 = vmul.f32 %v10035_v63, %v11727_v4 }
0x3779   :  { %v6307_v37 = vpop.permute.xlu0 %6306 }
0x377a   :  { %v6309_v54 = vmul.f32 %v10035_v63, %v6307_v37 }
0x377c   :  { %6311 = vrot.lane.b32.xlu1 %v6309_v54, %s10373_s9  ;;  %v11990_v54 = vld [vmem:[#allocation12 + $0x8] sm:$0xff]  }
0x37ee   :  { %v6312_v30 = vpop.permute.xlu1 %6311 }
0x37ef   :  { %v11933_v17 = vadd.f32 %v6312_v30, %v6303_v8  ;;  %v11992_v8 = vld [vmem:[#allocation12 + $0x10] sm:$0xff]  }
0x37f1   :  { %10036 = vtanh.f32 %v11933_v17 }
0x37fe   :  { %v10037_v48 = vpop.eup %10036 }
0x37ff   :  { %6317 = vrot.lane.b32.xlu0 %v10037_v48, %s10360_s30  ;;  %v12496_v48 = vunpack.c.l.bf16 %v11987_v18 }
0x3871   :  { %v6318_v26 = vpop.permute.xlu0 %6317 }
0x3872   :  { %v6320_v3 = vmul.f32 %v10035_v63, %v6318_v26  ;;  %v12495_v26 = vunpack.c.h.bf16 %v11987_v18 }
0x3874   :  { %v11939_v0 = vpack.c.bf16 %v6320_v3, %v6320_v3 }
0x3876   :  { %12546 = vst [vmem:[#allocation31_spill] sm:$0xff] %v11939_v0  ;;  %6336 = vrot.lane.b32.xlu0 %v11939_v0, %s10373_s9 }
0x38e8   :  { %v6337_v4 = vpop.permute.xlu0 %6336 }
0x38e9   :  { %9422 = vmatmul.mubr.msk.bf16.vlgmr.msra.gmra.mxu0 %vm161_vm0, %v6337_v4 }
0x38ea   :  { %9437 = vmatprep.mubr.msk.bf16.mxu0 %vm10372_vm1, %v12530_v11  ;;  %9434 = vmatpush3.bf16.msra.mxu0 %v9630_v31 }
0x38eb   :  { %9435 = vmatprep.subr.bf16.mxu0 %v12530_v11 }
0x38ee   :  { %9436 = vmatpush3.bf16.msra.mxu0 %v9631_v59 }
0x38ef   :  { %9453 = vmatprep.subr.bf16.mxu0 %v12530_v11 }
0x39a9   :  { %v6387_v10 = vpop.f32.mrf.mxu0 }
0x39aa   :  { %v6393_v19 = vadd.f32 %v6387_v10, %v6331_v2 }
0x39ab   :  { %v9423_v7 = vpop.f32.mrf.mxu0 }
0x39ac   :  { %v6450_v40 = vadd.f32 %v11810_v1, %v6393_v19  ;;  %v12494_v7 = vunpack.c.l.bf16 %v11990_v54 }
0x39ad   :  { %v6390_v21 = vpop.f32.mrf.mxu0 }
0x39ae   :  { %10038 = vtanh.f32 %v6450_v40  ;;  %v8585_v14 = vmul.f32 -1.442695, %v6450_v40  ;;  %v12492_v40 = vunpack.c.h.bf16 %v11990_v54  ;;  %v12493_v21 = vunpack.c.l.bf16 %v11992_v8 }
0x39af   :  { %v9424_v35 = vpop.f32.mrf.mxu0 }
0x39b0   :  { %10040 = vpow2.f32 %v8585_v14  ;;  %v12003_v35 = vld [vmem:[#allocation12 + $0x18] sm:$0xff]  }
0x39bb   :  { %v10039_v28 = vpop.eup %10038 }
0x39bc   :  { %6460 = vrot.lane.b32.xlu0 %v10039_v28, %s10360_s30 }
0x39bd   :  { %v10041_v32 = vpop.eup %10040 }
0x39be   :  { %v6454_v20 = vadd.f32 1.0, %v10041_v32 }
0x39c0   :  { %10042 = vrcp.f32 %v6454_v20 }
0x39cd   :  { %v10043_v38 = vpop.eup %10042 }
0x39ce   :  { %v6457_v47 = vmul.f32 %v10043_v38, %v11744_v50  ;;  %v9632_v50 = vld [vmem:[%s12433_s10 + $0x8] sm:$0xff]  }
0x3a2e   :  { %v6461_v61 = vpop.permute.xlu0 %6460 }
0x3a2f   :  { %v6463_v46 = vmul.f32 %v10043_v38, %v6461_v61 }
0x3a31   :  { %6465 = vrot.lane.b32.xlu0 %v6463_v46, %s10373_s9  ;;  %v12488_v46 = vunpack.c.h.bf16 %v11992_v8 }
0x3aa3   :  { %v6466_v55 = vpop.permute.xlu0 %6465 }
0x3aa4   :  { %v11950_v1 = vadd.f32 %v6466_v55, %v6457_v47 }
0x3aa6   :  { %10044 = vtanh.f32 %v11950_v1 }
0x3ab3   :  { %v10045_v29 = vpop.eup %10044 }
0x3ab4   :  { %6471 = vrot.lane.b32.xlu0 %v10045_v29, %s10360_s30  ;;  %v12489_v29 = vunpack.c.l.bf16 %v12003_v35 }
0x3b26   :  { %v6472_v42 = vpop.permute.xlu0 %6471 }
0x3b27   :  { %v6474_v52 = vmul.f32 %v10043_v38, %v6472_v42 }
0x3b29   :  { %v6475_v44 = vpack.c.bf16 %v6474_v52, %v6474_v52 }
0x3b2b   :  { %6488 = vrot.lane.b32.xlu1 %v6475_v44, %s10373_s9 }
0x3b9d   :  { %v6489_v51 = vpop.permute.xlu1 %6488 }
0x3b9e   :  { %9438 = vmatmul.mubr.msk.bf16.vlgmr.msra.gmra.mxu0 %vm161_vm0, %v6489_v51 }
0x3b9f   :  { %9454 = vmatpush3.bf16.msra.mxu0 %v9632_v50  ;;  %9457 = vmatprep.mubr.msk.bf16.mxu0 %vm10372_vm1, %v12530_v11 }
0x3ba0   :  { %9455 = vmatprep.subr.bf16.mxu0 %v12530_v11 }
0x3ba3   :  { %9456 = vmatpush3.bf16.msra.mxu0 %v9633_v5 }
0x3ba4   :  { %9461 = vmatprep.subr.bf16.mxu0 %v12530_v11 }
0x3ba6   :  { %9458 = vmatmul.mubr.msk.bf16.vlgmr.msra.gmra.mxu0 %vm161_vm0, %v6489_v51 }
0x3ba7   :  { %9462 = vmatpush3.bf16.msra.mxu0 %v9634_v58  ;;  %9465 = vmatprep.mubr.msk.bf16.mxu0 %vm10372_vm1, %v12530_v11 }
0x3ba8   :  { %9463 = vmatprep.subr.bf16.mxu0 %v12530_v11 }
0x3bab   :  { %9464 = vmatpush3.bf16.msra.mxu0 %v9635_v6 }
0x3bac   :  { %9477 = vmatprep.subr.bf16.mxu0 %v12530_v11 }
0x3bae   :  { %9466 = vmatmul.mubr.msk.bf16.vlgmr.msra.gmra.mxu0 %vm161_vm0, %v6337_v4 }
0x3baf   :  { %9478 = vmatpush3.bf16.msra.mxu0 %v9636_v56  ;;  %9481 = vmatprep.mubr.msk.bf16.mxu0 %vm10372_vm1, %v12530_v11 }
0x3bb0   :  { %9479 = vmatprep.subr.bf16.mxu0 %v12530_v11 }
0x3bb3   :  { %9480 = vmatpush3.bf16.msra.mxu0 %v9637_v15 }
0x3bb4   :  { %9493 = vmatprep.subr.bf16.mxu0 %v12530_v11 }
0x3bb6   :  { %9482 = vmatmul.mubr.msk.bf16.vlgmr.msra.gmra.mxu0 %vm161_vm0, %v6489_v51 }
0x3bb7   :  { %9501 = vmatprep.mubr.msk.bf16.mxu0 %vm10372_vm1, %v12530_v11 }
0x3c5e   :  { %v6539_v57 = vpop.f32.mrf.mxu0 }
0x3c5f   :  { %v6540_v13 = vadd.f32 %v11984_v36, %v6539_v57 }
0x3c60   :  { %v9439_v12 = vpop.f32.mrf.mxu0 }
0x3c61   :  { %v6562_v25 = vcombine.high %v6540_v13, %v6540_v13  ;;  %v6569_v63 = vrot.slane %v6540_v13, %v10567_v53  ;;  %v12487_v13 = vunpack.c.h.bf16 %v12003_v35 }
0x3c62   :  { %v6542_v37 = vpop.f32.mrf.mxu0 }
0x3c63   :  { %v6576_v30 = vrot.slane %v6562_v25, %v10567_v53  ;;  %v6577_v62 = vcombine.high %v6569_v63, %v6569_v63  ;;  %v6585_v9 = vrot.slane %v6569_v63, %v10567_v53 }
0x3c64   :  { %v9440_v3 = vpop.f32.mrf.mxu0 }
0x3c65   :  { %v6578_v4 = vcombine.high %v6576_v30, %v6576_v30  ;;  %v6592_v2 = vrot.slane %v6576_v30, %v10567_v53  ;;  %v6599_v10 = vrot.slane %v6577_v62, %v10567_v53  ;;  %v6607_v19 = vcombine.high %v6585_v9, %v6585_v9  ;;  %v12040_v3 = vld [vmem:[%s12430_s7] ss:$0 sm:$0xff] }
0x3c66   :  { %v6614_v28 = vrot.slane %v6585_v9, %v10574_v60  ;;  %v12006_v14 = vpop.f32.mrf.mxu0 }
0x3c67   :  { %v6606_v32 = vrot.slane %v6578_v4, %v10567_v53  ;;  %v6608_v20 = vcombine.high %v6592_v2, %v6592_v2  ;;  %v6609_v38 = vcombine.high %v6599_v10, %v6599_v10  ;;  %v6618_v61 = vrot.slane %v6599_v10, %v10574_v60 }
0x3c68   :  { %v6622_v47 = vrot.slane %v6607_v19, %v10574_v60  ;;  %v6630_v55 = vrot.slane %v6592_v2, %v10574_v60  ;;  %v6651_v31 = vadd.f32 %v12496_v48, %v6614_v28  ;;  %v9459_v59 = vpop.f32.mrf.mxu0 }
0x3c69   :  { %v6610_v42 = vcombine.high %v6606_v32, %v6606_v32  ;;  %v6626_v52 = vrot.slane %v6609_v38, %v10574_v60  ;;  %v6638_v44 = vrot.slane %v6608_v20, %v10574_v60  ;;  %v6634_v50 = vrot.slane %v6606_v32, %v10574_v60 }
0x3c6a   :  { %v6652_v51 = vadd.f32 %v12495_v26, %v6618_v61  ;;  %v6653_v5 = vadd.f32 %v12494_v7, %v6622_v47  ;;  %10046 = vtanh.f32 %v6651_v31  ;;  %v7259_v58 = vpop.f32.mrf.mxu0  ;;  %v6655_v56 = vadd.f32 %v12493_v21, %v6630_v55 }
0x3c6b   :  { %v6654_v6 = vadd.f32 %v12492_v40, %v6626_v52  ;;  %v6657_v57 = vadd.f32 %v12489_v29, %v6638_v44  ;;  %v6642_v12 = vrot.slane %v6610_v42, %v10574_v60  ;;  %v6656_v25 = vadd.f32 %v12488_v46, %v6634_v50 }
0x3c6c   :  { %10048 = vtanh.f32 %v6652_v51  ;;  %v9460_v15 = vpop.f32.mrf.mxu0 }
0x3c6d   :  { %10050 = vtanh.f32 %v6653_v5  ;;  %v6658_v30 = vadd.f32 %v12487_v13, %v6642_v12 }
0x3c6e   :  { %10052 = vtanh.f32 %v6654_v6  ;;  %v12033_v63 = vpop.f32.mrf.mxu0 }
0x3c6f   :  { %10054 = vtanh.f32 %v6655_v56 }
0x3c70   :  { %v9467_v37 = vpop.f32.mrf.mxu0  ;;  %10056 = vtanh.f32 %v6657_v57 }
0x3c71   :  { %10058 = vtanh.f32 %v6656_v25 }
0x3c72   :  { %v7316_v62 = vpop.f32.mrf.mxu0  ;;  %10060 = vtanh.f32 %v6658_v30 }
0x3c73   :  { %v12060_v62 = vld [vmem:[#allocation6] ss:$0 sm:$0xff] }
0x3c74   :  { %v9468_v9 = vpop.f32.mrf.mxu0 }
0x3c76   :  { %v12042_v4 = vpop.f32.mrf.mxu0 }
0x3c77   :  { %v10047_v2 = vpop.eup %10046 }
0x3c78   :  { %v9483_v10 = vpop.f32.mrf.mxu0  ;;  %v6674_v19 = vmul.f32 %v10047_v2, %v12040_v3 }
0x3c79   :  { %v10049_v28 = vpop.eup %10048 }
0x3c7a   :  { %v10051_v32 = vpop.eup %10050  ;;  %v6682_v20 = vsel %vm161_vm0, %v6674_v19, 0.0  ;;  %v7470_v38 = vpop.f32.mrf.mxu0  ;;  %v6675_v61 = vmul.f32 %v10049_v28, %v12040_v3 }
0x3c7b   :  { %v10053_v47 = vpop.eup %10052  ;;  %6683 = vadd.xlane.f32.xlu0 %v6682_v20  ;;  %v6676_v55 = vmul.f32 %v10051_v32, %v12040_v3 }
0x3c7c   :  { %v10055_v31 = vpop.eup %10054  ;;  %v6685_v59 = vsel %vm161_vm0, %v6675_v61, 0.0  ;;  %v9484_v42 = vpop.f32.mrf.mxu0  ;;  %v6677_v51 = vmul.f32 %v10053_v47, %v12040_v3 }
0x3c7d   :  { %6686 = vadd.xlane.f32.xlu1 %v6685_v59  ;;  %v6678_v52 = vmul.f32 %v10055_v31, %v12040_v3  ;;  %v10057_v44 = vpop.eup %10056  ;;  %v6688_v50 = vsel %vm161_vm0, %v6676_v55, 0.0 }
0x3c7e   :  { %v10059_v5 = vpop.eup %10058  ;;  %v6680_v6 = vmul.f32 %v10057_v44, %v12040_v3  ;;  %v6691_v56 = vsel %vm161_vm0, %v6677_v51, 0.0 }
0x3c7f   :  { %6689 = vadd.xlane.f32.xlu0 %v6688_v50  ;;  %v6694_v58 = vsel %vm161_vm0, %v6678_v52, 0.0  ;;  %v6679_v15 = vmul.f32 %v10059_v5, %v12040_v3  ;;  %v10061_v57 = vpop.eup %10060 }
0x3c80   :  { %v6700_v12 = vsel %vm161_vm0, %v6680_v6, 0.0  ;;  %v6681_v37 = vmul.f32 %v10061_v57, %v12040_v3 }
0x3c81   :  { %6695 = vadd.xlane.f32.xlu1 %v6694_v58  ;;  %v6697_v25 = vsel %vm161_vm0, %v6679_v15, 0.0 }
0x3c82   :  { %v6703_v30 = vsel %vm161_vm0, %v6681_v37, 0.0 }
0x3c83   :  { %6692 = vadd.xlane.f32.xlu0 %v6691_v56 }
0x3c85   :  { %6701 = vadd.xlane.f32.xlu1 %v6700_v12 }
0x3c87   :  { %6698 = vadd.xlane.f32.xlu0 %v6697_v25 }
0x3c8b   :  { %6704 = vadd.xlane.f32.xlu0 %v6703_v30 }
0x3c96   :  { %6713 = vperm.xlu1 %9541, %v12060_v62  }
0x3d04   :  { %v6684_v9 = vpop.xlane.xlu0 %6683 }
0x3d06   :  { %v6687_v2 = vpop.xlane.xlu1 %6686 }
0x3d08   :  { %v6690_v10 = vpop.xlane.xlu0 %6689 }
0x3d0a   :  { %v6696_v19 = vpop.xlane.xlu1 %6695 }
0x3d0c   :  { %v6693_v28 = vpop.xlane.xlu0 %6692 }
0x3d0e   :  { %v6702_v32 = vpop.xlane.xlu1 %6701 }
0x3d10   :  { %v6699_v20 = vpop.xlane.xlu0 %6698 }
0x3d12   :  { %v6714_v38 = vpop.permute.xlu1 %6713 }
0x3d13   :  { %v6716_v61 = vadd.f32 %v6714_v38, %v6684_v9  ;;  %v6717_v47 = vadd.f32 %v6714_v38, %v6687_v2  ;;  %v6718_v55 = vadd.f32 %v6714_v38, %v6690_v10  ;;  %v6719_v31 = vadd.f32 %v6714_v38, %v6693_v28 }
0x3d14   :  { %v6705_v59 = vpop.xlane.xlu0 %6704  ;;  %v6720_v42 = vadd.f32 %v6714_v38, %v6696_v19  ;;  %v6721_v52 = vadd.f32 %v6714_v38, %v6699_v20  ;;  %v6722_v5 = vadd.f32 %v6714_v38, %v6702_v32 }
0x3d15   :  { %v6735_v44 = vrot.slane %v6716_v61, %v10651_v41  ;;  %v6739_v50 = vrot.slane %v6717_v47, %v10651_v41  ;;  %v6743_v51 = vrot.slane %v6718_v55, %v10651_v41  ;;  %v6723_v58 = vadd.f32 %v6714_v38, %v6705_v59 }
0x3d16   :  { %v6747_v6 = vrot.slane %v6719_v31, %v10651_v41  ;;  %v6751_v15 = vrot.slane %v6720_v42, %v10651_v41  ;;  %v6755_v12 = vrot.slane %v6721_v52, %v10651_v41  ;;  %v6759_v37 = vrot.slane %v6722_v5, %v10651_v41 }
0x3d17   :  { %v6764_v56 = vsel %vm613_vm2, %v6739_v50, %v6735_v44  ;;  %v6763_v9 = vrot.slane %v6723_v58, %v10651_v41 }
0x3d18   :  { %v6765_v57 = vsel %vm615_vm3, %v6743_v51, %v6764_v56 }
0x3d19   :  { %v6766_v25 = vsel %vm617_vm4, %v6747_v6, %v6765_v57 }
0x3d1a   :  { %v6767_v30 = vsel %vm619_vm5, %v6751_v15, %v6766_v25 }
0x3d1b   :  { %v6768_v2 = vsel %vm621_vm6, %v6755_v12, %v6767_v30 }
0x3d1c   :  { %v6769_v10 = vsel %vm623_vm7, %v6759_v37, %v6768_v2 }
0x3d1d   :  { %v6770_v19 = vsel %vm625_vm8, %v6763_v9, %v6769_v10 }
0x3d1e   :  { %v6772_v28 = vsel %vm628_vm9, %v6770_v19, -inf }
0x3d1f   :  { %6773 = vmax.xlane.f32.xlu0 %v6772_v28 }
0x3da8   :  { %v6774_v32 = vpop.xlane.xlu0 %6773 }
0x3da9   :  { %v6779_v20 = vrot.slane %v6774_v32, %v10574_v60  ;;  %v6783_v38 = vrot.slane %v6774_v32, %v10670_v22  ;;  %v6787_v59 = vrot.slane %v6774_v32, %v10676_v24  ;;  %v6795_v44 = vrot.slane %v6774_v32, %v10686_v39 }
0x3daa   :  { %v6803_v50 = vrot.slane %v6774_v32, %v10694_v45  ;;  %v6791_v56 = vrot.slane %v6774_v32, %v10682_v33  ;;  %v6799_v9 = vrot.slane %v6774_v32, %v10690_v49  ;;  %v6807_v28 = vrot.slane %v6774_v32, %v10673_v23 }
0x3dab   :  { %v6816_v51 = vsub.f32 %v6716_v61, %v6779_v20  ;;  %v6817_v6 = vsub.f32 %v6717_v47, %v6783_v38  ;;  %v6818_v15 = vsub.f32 %v6718_v55, %v6787_v59  ;;  %v6820_v57 = vsub.f32 %v6720_v42, %v6795_v44 }
0x3dac   :  { %v6822_v37 = vsub.f32 %v6722_v5, %v6803_v50  ;;  %v6819_v2 = vsub.f32 %v6719_v31, %v6791_v56  ;;  %v6821_v61 = vsub.f32 %v6721_v52, %v6799_v9  ;;  %v6823_v55 = vsub.f32 %v6723_v58, %v6807_v28 }
0x3dad   :  { %v6824_v12 = vmul.f32 1.442695, %v6816_v51  ;;  %v6826_v25 = vmul.f32 1.442695, %v6817_v6  ;;  %v6832_v30 = vmul.f32 1.442695, %v6820_v57 }
0x3dae   :  { %v6828_v10 = vmul.f32 1.442695, %v6818_v15  ;;  %v6836_v19 = vmul.f32 1.442695, %v6822_v37  ;;  %v6830_v47 = vmul.f32 1.442695, %v6819_v2 }
0x3daf   :  { %10062 = vpow2.f32 %v6824_v12  ;;  %v6834_v42 = vmul.f32 1.442695, %v6821_v61  ;;  %v6838_v5 = vmul.f32 1.442695, %v6823_v55 }
0x3db0   :  { %10064 = vpow2.f32 %v6826_v25 }
0x3db1   :  { %10066 = vpow2.f32 %v6832_v30 }
0x3db2   :  { %10068 = vpow2.f32 %v6828_v10 }
0x3db3   :  { %10070 = vpow2.f32 %v6836_v19 }
0x3db4   :  { %10072 = vpow2.f32 %v6830_v47 }
0x3db5   :  { %10074 = vpow2.f32 %v6834_v42 }
0x3db6   :  { %10076 = vpow2.f32 %v6838_v5 }
0x3dbc   :  { %v10063_v20 = vpop.eup %10062 }
0x3dbd   :  { %v10065_v38 = vpop.eup %10064  ;;  %6849 = vperm.xlu0 %9540, %v10063_v20  }
0x3dbe   :  { %6852 = vperm.xlu1 %9541, %v10065_v38   ;;  %v12087_v31 = vpop.eup %10066 }
0x3dbf   :  { %v10069_v59 = vpop.eup %10068 }
0x3dc0   :  { %v12090_v52 = vpop.eup %10070 }
0x3dc1   :  { %6861 = vperm.xlu0 %9540, %v12087_v31   ;;  %v10073_v32 = vpop.eup %10072 }
0x3dc2   :  { %6855 = vperm.xlu1 %9541, %v10069_v59   ;;  %v10075_v58 = vpop.eup %10074 }
0x3dc3   :  { %v12093_v44 = vpop.eup %10076 }
0x3dc5   :  { %6867 = vperm.xlu0 %9540, %v12090_v52  }
0x3dc6   :  { %6858 = vperm.xlu1 %9541, %v10073_v32  }
0x3dca   :  { %6864 = vperm.xlu1 %9541, %v10075_v58  }
0x3dce   :  { %6870 = vperm.xlu1 %9541, %v12093_v44  }
0x3e38   :  { %v6850_v51 = vpop.permute.xlu0 %6849 }
0x3e39   :  { %v6853_v50 = vpop.permute.xlu1 %6852  ;;  %v6875_v15 = vrot.slane %v6850_v51, %v10651_v41 }
0x3e3a   :  { %v6879_v56 = vrot.slane %v6853_v50, %v10651_v41 }
0x3e3c   :  { %v6862_v12 = vpop.permute.xlu0 %6861  ;;  %v6904_v37 = vsel %vm613_vm2, %v6879_v56, %v6875_v15 }
0x3e3d   :  { %v6856_v6 = vpop.permute.xlu1 %6855  ;;  %v6891_v10 = vrot.slane %v6862_v12, %v10651_v41 }
0x3e3e   :  { %v6883_v57 = vrot.slane %v6856_v6, %v10651_v41 }
0x3e40   :  { %v6905_v9 = vsel %vm615_vm3, %v6883_v57, %v6904_v37  ;;  %v6868_v28 = vpop.permute.xlu0 %6867 }
0x3e41   :  { %v6859_v25 = vpop.permute.xlu1 %6858  ;;  %v6899_v42 = vrot.slane %v6868_v28, %v10651_v41 }
0x3e42   :  { %v6887_v30 = vrot.slane %v6859_v25, %v10651_v41 }
0x3e44   :  { %v6906_v2 = vsel %vm617_vm4, %v6887_v30, %v6905_v9 }
0x3e45   :  { %v6865_v19 = vpop.permute.xlu1 %6864  ;;  %v6907_v47 = vsel %vm619_vm5, %v6891_v10, %v6906_v2 }
0x3e46   :  { %v6895_v61 = vrot.slane %v6865_v19, %v10651_v41 }
0x3e48   :  { %v6908_v55 = vsel %vm621_vm6, %v6895_v61, %v6907_v47 }
0x3e49   :  { %v6871_v5 = vpop.permute.xlu1 %6870  ;;  %v6909_v51 = vsel %vm623_vm7, %v6899_v42, %v6908_v55 }
0x3e4a   :  { %v6903_v50 = vrot.slane %v6871_v5, %v10651_v41 }
0x3e4c   :  { %v6910_v6 = vsel %vm625_vm8, %v6903_v50, %v6909_v51 }
0x3e4d   :  { %v6912_v56 = vsel %vm628_vm9, %v6910_v6, 0.0 }
0x3e4e   :  { %6913 = vadd.xlane.f32.xlu0 %v6912_v56 }
0x3ed7   :  { %v6914_v15 = vpop.xlane.xlu0 %6913 }
0x3ed8   :  { %v6919_v57 = vrot.slane %v6914_v15, %v10574_v60  ;;  %v6923_v12 = vrot.slane %v6914_v15, %v10670_v22  ;;  %v6927_v25 = vrot.slane %v6914_v15, %v10676_v24  ;;  %v6931_v37 = vrot.slane %v6914_v15, %v10682_v33 }
0x3ed9   :  { %v6935_v30 = vrot.slane %v6914_v15, %v10686_v39  ;;  %v6939_v2 = vrot.slane %v6914_v15, %v10690_v49  ;;  %v6943_v28 = vrot.slane %v6914_v15, %v10694_v45  ;;  %v6947_v55 = vrot.slane %v6914_v15, %v10673_v23 }
0x3eda   :  { %10078 = vrcp.f32 %v6919_v57 }
0x3edb   :  { %10080 = vrcp.f32 %v6923_v12 }
0x3edc   :  { %10082 = vrcp.f32 %v6927_v25  ;;  %v9640_v25 = vld [vmem:[#allocation18 + $0x8] sm:$0xff]  }
0x3edd   :  { %10084 = vrcp.f32 %v6931_v37 }
0x3ede   :  { %10086 = vrcp.f32 %v6935_v30  ;;  %v12131_v30 = vld [vmem:[#allocation10 + $0x8] sm:$0xff]  }
0x3edf   :  { %10088 = vrcp.f32 %v6939_v2 }
0x3ee0   :  { %10090 = vrcp.f32 %v6943_v28 }
0x3ee1   :  { %10092 = vrcp.f32 %v6947_v55 }
0x3ee7   :  { %v10079_v9 = vpop.eup %10078 }
0x3ee8   :  { %v6957_v10 = vmul.f32 %v10079_v9, %v10063_v20  ;;  %v10081_v19 = vpop.eup %10080 }
0x3ee9   :  { %v6959_v61 = vmul.f32 %v10081_v19, %v10065_v38  ;;  %v10083_v47 = vpop.eup %10082  ;;  %v12484_v19 = vunpack.c.l.bf16 %v12131_v30 }
0x3eea   :  { %6990 = vperm.xlu1 %9541, %v6957_v10   ;;  %v6961_v42 = vmul.f32 %v10083_v47, %v10069_v59  ;;  %v10085_v5 = vpop.eup %10084  ;;  %v9638_v59 = vld [vmem:[#allocation18 + $0x18] sm:$0xff]  }
0x3eeb   :  { %v6963_v50 = vmul.f32 %v10085_v5, %v10073_v32  ;;  %v10087_v51 = vpop.eup %10086  ;;  %9442 = vmatpush3.bf16.msra.mxu1 %v9638_v59  ;;  %v9639_v32 = vld [vmem:[#allocation18 + $0x10] sm:$0xff]  }
0x3eec   :  { %v6965_v20 = vmul.f32 %v10087_v51, %v12087_v31  ;;  %v10089_v6 = vpop.eup %10088  ;;  %9443 = vmatprep.subr.bf16.mxu1 %v12530_v11  ;;  %v9641_v31 = vld [vmem:[#allocation18] sm:$0xff]  }
0x3eed   :  { %v6967_v56 = vmul.f32 %v10089_v6, %v10075_v58  ;;  %v10091_v57 = vpop.eup %10090 }
0x3eee   :  { %6995 = vperm.xlu1 %9541, %v6959_v61   ;;  %v6969_v38 = vmul.f32 %v10091_v57, %v12090_v52  ;;  %v10093_v12 = vpop.eup %10092  ;;  %v12127_v52 = vld [vmem:[#allocation10] sm:$0xff]  }
0x3eef   :  { %v6971_v15 = vmul.f32 %v10093_v12, %v12093_v44  ;;  %9444 = vmatpush3.bf16.msra.mxu1 %v9639_v32  ;;  %v12486_v44 = vunpack.c.l.bf16 %v12127_v52  ;;  %v12485_v37 = vunpack.c.h.bf16 %v12127_v52 }
0x3ef0   :  { %9445 = vmatprep.subr.bf16.mxu1 %v12530_v11 }
0x3ef2   :  { %7000 = vperm.xlu1 %9541, %v6961_v42   ;;  %v12482_v42 = vunpack.c.h.bf16 %v12131_v30 }
0x3ef3   :  { %9446 = vmatpush3.bf16.msra.mxu1 %v9640_v25 }
0x3ef4   :  { %9447 = vmatprep.subr.bf16.mxu1 %v12530_v11 }
0x3ef6   :  { %7005 = vperm.xlu1 %9541, %v6963_v50   ;;  %v12143_v50 = vld [vmem:[#allocation10 + $0x10] sm:$0xff]  }
0x3ef7   :  { %9448 = vmatpush3.bf16.msra.mxu1 %v9641_v31 }
0x3ef8   :  { %9469 = vmatprep.subr.bf16.mxu1 %v12530_v11 }
0x3efa   :  { %7010 = vperm.xlu1 %9541, %v6965_v20  }
0x3efe   :  { %7015 = vperm.xlu1 %9541, %v6967_v56  }
0x3f02   :  { %7020 = vperm.xlu1 %9541, %v6969_v38   ;;  %v12483_v38 = vunpack.c.l.bf16 %v12143_v50 }
0x3f06   :  { %7025 = vperm.xlu1 %9541, %v6971_v15  }
0x3f65   :  { %v6991_v58 = vpop.permute.xlu1 %6990 }
0x3f66   :  { %v7028_v2 = vmul.f32 %v12486_v44, %v6991_v58 }
0x3f68   :  { %v7036_v47 = vsel %vm893_vm10, %v7028_v2, 0.0 }
0x3f69   :  { %v6996_v9 = vpop.permute.xlu1 %6995  ;;  %v7037_v20 = vrot.slane %v7036_v47, 4 }
0x3f6a   :  { %v7029_v10 = vmul.f32 %v12485_v37, %v6996_v9  ;;  %v12490_v9 = vunpack.c.h.bf16 %v12143_v50 }
0x3f6b   :  { %v7038_v32 = vadd.f32 %v7037_v20, %v7036_v47 }
0x3f6c   :  { %v7043_v28 = vsel %vm893_vm10, %v7029_v10, 0.0 }
0x3f6d   :  { %v7001_v61 = vpop.permute.xlu1 %7000  ;;  %v7044_v5 = vrot.slane %v7043_v28, 4 }
0x3f6e   :  { %v7030_v55 = vmul.f32 %v12484_v19, %v7001_v61  ;;  %v12153_v61 = vld [vmem:[#allocation10 + $0x18] sm:$0xff]  }
0x3f6f   :  { %v7045_v12 = vadd.f32 %v7044_v5, %v7043_v28  ;;  %v12491_v20 = vunpack.c.l.bf16 %v12153_v61  ;;  %v8864_v13 = vunpack.c.h.bf16 %v12153_v61 }
0x3f70   :  { %v7050_v51 = vsel %vm893_vm10, %v7030_v55, 0.0 }
0x3f71   :  { %v7051_v6 = vrot.slane %v7050_v51, 4  ;;  %v7006_v56 = vpop.permute.xlu1 %7005  ;;  %v7046_v2 = vrot.slane %v7045_v12, 2 }
0x3f72   :  { %v7031_v57 = vmul.f32 %v12482_v42, %v7006_v56  ;;  %v7039_v42 = vrot.slane %v7038_v32, 2 }
0x3f73   :  { %v7052_v15 = vadd.f32 %v7051_v6, %v7050_v51  ;;  %v7047_v6 = vadd.f32 %v7046_v2, %v7045_v12 }
0x3f74   :  { %v7057_v59 = vsel %vm893_vm10, %v7031_v57, 0.0 }
0x3f75   :  { %v7058_v25 = vrot.slane %v7057_v59, 4  ;;  %v7011_v31 = vpop.permute.xlu1 %7010  ;;  %v7053_v55 = vrot.slane %v7052_v15, 2  ;;  %v7048_v46 = vrot.slane %v7047_v6, 1 }
0x3f76   :  { %v7032_v58 = vmul.f32 %v12483_v38, %v7011_v31 }
0x3f77   :  { %v7059_v10 = vadd.f32 %v7058_v25, %v7057_v59  ;;  %v7054_v31 = vadd.f32 %v7053_v55, %v7052_v15  ;;  %v7040_v59 = vadd.f32 %v7039_v42, %v7038_v32 }
0x3f78   :  { %v7064_v56 = vsel %vm893_vm10, %v7032_v58, 0.0 }
0x3f79   :  { %v7060_v28 = vrot.slane %v7059_v10, 2  ;;  %v7065_v5 = vrot.slane %v7064_v56, 4  ;;  %v7016_v51 = vpop.permute.xlu1 %7015  ;;  %v7041_v2 = vrot.slane %v7040_v59, 1 }
0x3f7a   :  { %v7033_v47 = vmul.f32 %v12490_v9, %v7016_v51  ;;  %v7055_v51 = vrot.slane %v7054_v31, 1 }
0x3f7b   :  { %v7066_v57 = vadd.f32 %v7065_v5, %v7064_v56  ;;  %v7061_v25 = vadd.f32 %v7060_v28, %v7059_v10  ;;  %v7049_v28 = vadd.f32 %v7048_v46, %v7047_v6 }
0x3f7c   :  { %v7071_v38 = vsel %vm893_vm10, %v7033_v47, 0.0 }
0x3f7d   :  { %v7067_v19 = vrot.slane %v7066_v57, 2  ;;  %v7021_v37 = vpop.permute.xlu1 %7020  ;;  %v7072_v44 = vrot.slane %v7071_v38, 4  ;;  %v7062_v15 = vrot.slane %v7061_v25, 1  ;;  %v7093_v21 = vpack.c.bf16 %v7049_v28, %v7049_v28 }
0x3f7e   :  { %v7034_v58 = vmul.f32 %v12491_v20, %v7021_v37  ;;  %v7056_v37 = vadd.f32 %v7055_v51, %v7054_v31 }
0x3f7f   :  { %v7068_v29 = vadd.f32 %v7067_v19, %v7066_v57  ;;  %v7073_v9 = vadd.f32 %v7072_v44, %v7071_v38  ;;  %v7042_v19 = vadd.f32 %v7041_v2, %v7040_v59  ;;  %v7063_v57 = vadd.f32 %v7062_v15, %v7061_v25 }
0x3f80   :  { %v7078_v12 = vsel %vm893_vm10, %v7034_v58, 0.0  ;;  %v7094_v48 = vpack.c.bf16 %v7056_v37, %v7056_v37  ;;  %v7124_v31 = vunpack.c.l.b16 %v7093_v21  ;;  %v12180_v21 = vld [vmem:[%s12435_s12] ss:$0 sm:$0xff] }
0x3f81   :  { %v7079_v55 = vrot.slane %v7078_v12, 4  ;;  %v7026_v56 = vpop.permute.xlu1 %7025  ;;  %v7069_v42 = vrot.slane %v7068_v29, 1  ;;  %v7074_v32 = vrot.slane %v7073_v9, 2  ;;  %v7092_v16 = vpack.c.bf16 %v7042_v19, %v7042_v19 }
0x3f82   :  { %v7035_v10 = vmul.f32 %v8864_v13, %v7026_v56  ;;  %v7095_v43 = vpack.c.bf16 %v7063_v57, %v7063_v57  ;;  %v7125_v59 = vunpack.c.l.b16 %v7094_v48 }
0x3f83   :  { %v7080_v5 = vadd.f32 %v7079_v55, %v7078_v12  ;;  %v7075_v47 = vadd.f32 %v7074_v32, %v7073_v9  ;;  %v7070_v58 = vadd.f32 %v7069_v42, %v7068_v29  ;;  %v7123_v25 = vunpack.c.l.b16 %v7092_v16 }
0x3f84   :  { %v7085_v20 = vsel %vm893_vm10, %v7035_v10, 0.0  ;;  %v7126_v2 = vunpack.c.l.b16 %v7095_v43 }
0x3f85   :  { %v7081_v44 = vrot.slane %v7080_v5, 2  ;;  %v7086_v38 = vrot.slane %v7085_v20, 4  ;;  %v7076_v40 = vrot.slane %v7075_v47, 1  ;;  %v7096_v6 = vpack.c.bf16 %v7070_v58, %v7070_v58 }
0x3f86   :  { %v7131_v42 = vsel %vm613_vm2, %v7124_v31, %v7123_v25 }
0x3f87   :  { %v7082_v7 = vadd.f32 %v7081_v44, %v7080_v5  ;;  %v7087_v26 = vadd.f32 %v7086_v38, %v7085_v20  ;;  %v7077_v0 = vadd.f32 %v7076_v40, %v7075_v47  ;;  %v7127_v55 = vunpack.c.l.b16 %v7096_v6 }
0x3f88   :  { %v7132_v40 = vsel %vm615_vm3, %v7125_v59, %v7131_v42 }
0x3f89   :  { %v7083_v56 = vrot.slane %v7082_v7, 1  ;;  %v7088_v46 = vrot.slane %v7087_v26, 2  ;;  %v7097_v9 = vpack.c.bf16 %v7077_v0, %v7077_v0  ;;  %v7133_v28 = vsel %vm617_vm4, %v7126_v2, %v7132_v40  ;;  %v9643_v2 = vld [vmem:[#allocation13] sm:$0xff]  }
0x3f8a   :  { %v7134_v0 = vsel %vm619_vm5, %v7127_v55, %v7133_v28 }
0x3f8b   :  { %v7084_v51 = vadd.f32 %v7083_v56, %v7082_v7  ;;  %v7089_v12 = vadd.f32 %v7088_v46, %v7087_v26  ;;  %v7128_v20 = vunpack.c.l.b16 %v7097_v9 }
0x3f8d   :  { %v7098_v15 = vpack.c.bf16 %v7084_v51, %v7084_v51  ;;  %v7090_v29 = vrot.slane %v7089_v12, 1  ;;  %v7135_v26 = vsel %vm621_vm6, %v7128_v20, %v7134_v0  ;;  %v7354_v20 = vld [vmem:[#allocation7 + $0x38] sm:$0xff] }
0x3f8f   :  { %v7091_v32 = vadd.f32 %v7090_v29, %v7089_v12  ;;  %v7129_v10 = vunpack.c.l.b16 %v7098_v15 }
0x3f91   :  { %v7099_v5 = vpack.c.bf16 %v7091_v32, %v7091_v32  ;;  %v7136_v43 = vsel %vm623_vm7, %v7129_v10, %v7135_v26 }
0x3f93   :  { %v7130_v48 = vunpack.c.l.b16 %v7099_v5 }
0x3f95   :  { %v7137_v16 = vsel %vm625_vm8, %v7130_v48, %v7136_v43 }
0x3f96   :  { %v7138_v7 = vpack.c.b16 %v7137_v16, %v7137_v16 }
0x3f98   :  { %9450 = vmatmul.mubr.msk.bf16.vlgmr.msra.gmra.mxu1 %vm893_vm10, %v7138_v7 }
0x3f99   :  { %9473 = vmatprep.mubr.msk.bf16.mxu1 %vm10372_vm1, %v12530_v11 }
0x4058   :  { %v7200_v37 = vpop.f32.mrf.mxu1 }
0x4059   :  { %v7201_v47 = vadd.f32 %v12180_v21, %v7200_v37 }
0x405a   :  { %v9451_v19 = vpop.f32.mrf.mxu1 }
0x405b   :  { %v7262_v57 = vadd.f32 %v12006_v14, %v7201_v47 }
0x405c   :  { %v7203_v44 = vpop.f32.mrf.mxu1 }
0x405d   :  { %v7319_v38 = vadd.f32 %v12033_v63, %v7262_v57  ;;  %v9642_v63 = vld [vmem:[#allocation13 + $0x8] sm:$0xff]  }
0x405e   :  { %v9452_v58 = vpop.f32.mrf.mxu1  ;;  %9470 = vmatpush3.bf16.msra.mxu1 %v9642_v63  ;;  %v9644_v44 = vld [vmem:[#allocation16 + $0x8] sm:$0xff]  }
0x405f   :  { %10094 = vtanh.f32 %v7319_v38  ;;  %v8604_v46 = vmul.f32 -1.442695, %v7319_v38  ;;  %9471 = vmatprep.subr.bf16.mxu1 %v12530_v11  ;;  %v9645_v38 = vld [vmem:[#allocation16] sm:$0xff]  }
0x4061   :  { %10096 = vpow2.f32 %v8604_v46 }
0x4062   :  { %9472 = vmatpush3.bf16.msra.mxu1 %v9643_v2 }
0x4063   :  { %9485 = vmatprep.subr.bf16.mxu1 %v12530_v11 }
0x406c   :  { %v10095_v56 = vpop.eup %10094 }
0x406d   :  { %7329 = vrot.lane.b32.xlu0 %v10095_v56, %s10360_s30 }
0x406e   :  { %v10097_v6 = vpop.eup %10096 }
0x406f   :  { %v7323_v31 = vadd.f32 1.0, %v10097_v6  ;;  %v9646_v6 = vld [vmem:[%s12433_s10 + $0x8] sm:$0xff]  }
0x4071   :  { %10098 = vrcp.f32 %v7323_v31 }
0x407e   :  { %v10099_v9 = vpop.eup %10098 }
0x407f   :  { %v7326_v14 = vmul.f32 %v10099_v9, %v11933_v17 }
0x40df   :  { %v7330_v51 = vpop.permute.xlu0 %7329 }
0x40e0   :  { %v7332_v12 = vmul.f32 %v10099_v9, %v7330_v51  ;;  %v9648_v51 = vld [vmem:[#allocation19 + $0x8] sm:$0xff]  }
0x40e2   :  { %7334 = vrot.lane.b32.xlu1 %v7332_v12, %s10373_s9  ;;  %v9649_v12 = vld [vmem:[#allocation19] sm:$0xff]  }
0x4154   :  { %v7335_v59 = vpop.permute.xlu1 %7334 }
0x4155   :  { %v12188_v25 = vadd.f32 %v7335_v59, %v7326_v14 }
0x4157   :  { %10100 = vtanh.f32 %v12188_v25 }
0x4164   :  { %v10101_v15 = vpop.eup %10100 }
0x4165   :  { %7340 = vrot.lane.b32.xlu1 %v10101_v15, %s10360_s30 }
0x41d7   :  { %v7341_v29 = vpop.permute.xlu1 %7340 }
0x41d8   :  { %v7343_v55 = vmul.f32 %v10099_v9, %v7341_v29  ;;  %v9647_v9 = vld [vmem:[%s12433_s10] sm:$0xff]   ;;  %s10376_s10 = smov 96  }
0x41da   :  { %v12194_v42 = vpack.c.bf16 %v7343_v55, %v7343_v55 }
0x41dc   :  { %7359 = vrot.lane.b32.xlu1 %v12194_v42, %s10373_s9 }
0x424e   :  { %v7360_v17 = vpop.permute.xlu1 %7359 }
0x424f   :  { %9474 = vmatmul.mubr.msk.bf16.vlgmr.msra.gmra.mxu1 %vm161_vm0, %v7360_v17 }
0x4250   :  { %9489 = vmatprep.mubr.msk.bf16.mxu1 %vm10372_vm1, %v12530_v11  ;;  %9486 = vmatpush3.bf16.msra.mxu1 %v9644_v44 }
0x4251   :  { %9487 = vmatprep.subr.bf16.mxu1 %v12530_v11 }
0x4254   :  { %9488 = vmatpush3.bf16.msra.mxu1 %v9645_v38 }
0x4255   :  { %9505 = vmatprep.subr.bf16.mxu1 %v12530_v11 }
0x430f   :  { %v7410_v32 = vpop.f32.mrf.mxu1 }
0x4310   :  { %v7416_v40 = vadd.f32 %v7410_v32, %v7354_v20 }
0x4311   :  { %v9475_v10 = vpop.f32.mrf.mxu1 }
0x4312   :  { %v7473_v28 = vadd.f32 %v12042_v4, %v7416_v40 }
0x4313   :  { %v7413_v5 = vpop.f32.mrf.mxu1 }
0x4314   :  { %10102 = vtanh.f32 %v7473_v28  ;;  %v8612_v48 = vmul.f32 -1.442695, %v7473_v28 }
0x4315   :  { %v9476_v0 = vpop.f32.mrf.mxu1 }
0x4316   :  { %10104 = vpow2.f32 %v8612_v48 }
0x4321   :  { %v10103_v26 = vpop.eup %10102 }
0x4322   :  { %7483 = vrot.lane.b32.xlu1 %v10103_v26, %s10360_s30 }
0x4323   :  { %v10105_v43 = vpop.eup %10104 }
0x4324   :  { %v7477_v16 = vadd.f32 1.0, %v10105_v43 }
0x4326   :  { %10106 = vrcp.f32 %v7477_v16 }
0x4333   :  { %v10107_v7 = vpop.eup %10106 }
0x4334   :  { %v7480_v19 = vmul.f32 %v10107_v7, %v11950_v1 }
0x4394   :  { %v7484_v37 = vpop.permute.xlu1 %7483 }
0x4395   :  { %v7486_v47 = vmul.f32 %v10107_v7, %v7484_v37 }
0x4397   :  { %7488 = vrot.lane.b32.xlu1 %v7486_v47, %s10373_s9  ;;  %v12547_v47 = vunpack.c.l.bf16 %v11987_v18 }
0x4409   :  { %v7489_v57 = vpop.permute.xlu1 %7488 }
0x440a   :  { %v12205_v4 = vadd.f32 %v7489_v57, %v7480_v19 }
0x440c   :  { %10108 = vtanh.f32 %v12205_v4 }
0x4419   :  { %v10109_v58 = vpop.eup %10108 }
0x441a   :  { %7494 = vrot.lane.b32.xlu1 %v10109_v58, %s10360_s30  ;;  %v12548_v58 = vunpack.c.h.bf16 %v11987_v18 }
0x448c   :  { %v7495_v56 = vpop.permute.xlu1 %7494 }
0x448d   :  { %v12211_v46 = vmul.f32 %v10107_v7, %v7495_v56 }
0x448f   :  { %v7498_v1 = vpack.c.bf16 %v12211_v46, %v12211_v46 }
0x4491   :  { %7511 = vrot.lane.b32.xlu0 %v7498_v1, %s10373_s9  ;;  %v12549_v1 = vunpack.c.l.bf16 %v11990_v54 }
0x4503   :  { %v7512_v31 = vpop.permute.xlu0 %7511 }
0x4504   :  { %9490 = vmatmul.mubr.msk.bf16.vlgmr.msra.gmra.mxu1 %vm161_vm0, %v7512_v31 }
0x4505   :  { %9506 = vmatpush3.bf16.msra.mxu1 %v9646_v6  ;;  %9509 = vmatprep.mubr.msk.bf16.mxu1 %vm10372_vm1, %v12530_v11 }
0x4506   :  { %9507 = vmatprep.subr.bf16.mxu1 %v12530_v11 }
0x4509   :  { %9508 = vmatpush3.bf16.msra.mxu1 %v9647_v9 }
0x450a   :  { %9513 = vmatprep.subr.bf16.mxu1 %v12530_v11 }
0x450c   :  { %9510 = vmatmul.mubr.msk.bf16.vlgmr.msra.gmra.mxu1 %vm161_vm0, %v7512_v31  ;;  %v12550_v31 = vunpack.c.l.bf16 %v11992_v8 }
0x450d   :  { %9514 = vmatpush3.bf16.msra.mxu1 %v9648_v51  ;;  %9517 = vmatprep.mubr.msk.bf16.mxu1 %vm10372_vm1, %v12530_v11 }
0x450e   :  { %9515 = vmatprep.subr.bf16.mxu1 %v12530_v11 }
0x4511   :  { %9516 = vmatpush3.bf16.msra.mxu1 %v9649_v12 }
0x4514   :  { %9518 = vmatmul.mubr.msk.bf16.vlgmr.msra.gmra.mxu1 %vm161_vm0, %v7360_v17 }
0x45c4   :  { %v7562_v14 = vpop.f32.mrf.mxu1 }
0x45c5   :  { %v7563_v59 = vadd.f32 %v11984_v36, %v7562_v14  ;;  %v12551_v14 = vunpack.c.h.bf16 %v11990_v54  ;;  %v12554_v54 = vunpack.c.h.bf16 %v12003_v35 }
0x45c6   :  { %v9491_v63 = vpop.f32.mrf.mxu1 }
0x45c7   :  { %v7585_v2 = vcombine.high %v7563_v59, %v7563_v59  ;;  %v7592_v15 = vrot.slane %v7563_v59, %v10567_v53 }
0x45c8   :  { %v7565_v29 = vpop.f32.mrf.mxu1 }
0x45c9   :  { %v7599_v55 = vrot.slane %v7585_v2, %v10567_v53  ;;  %v7600_v20 = vcombine.high %v7592_v15, %v7592_v15  ;;  %v7608_v32 = vrot.slane %v7592_v15, %v10567_v53  ;;  %v12552_v2 = vunpack.c.l.bf16 %v12003_v35 }
0x45ca   :  { %v9492_v40 = vpop.f32.mrf.mxu1 }
0x45cb   :  { %v7601_v10 = vcombine.high %v7599_v55, %v7599_v55  ;;  %v7615_v28 = vrot.slane %v7599_v55, %v10567_v53  ;;  %v7622_v5 = vrot.slane %v7600_v20, %v10567_v53  ;;  %v7630_v17 = vcombine.high %v7608_v32, %v7608_v32 }
0x45cc   :  { %v7637_v0 = vrot.slane %v7608_v32, %v10574_v60  ;;  %v12239_v36 = vpop.f32.mrf.mxu1  ;;  %v12553_v55 = vunpack.c.h.bf16 %v11992_v8 }
0x45cd   :  { %v7631_v26 = vcombine.high %v7615_v28, %v7615_v28  ;;  %v7632_v48 = vcombine.high %v7622_v5, %v7622_v5  ;;  %v7641_v43 = vrot.slane %v7622_v5, %v10574_v60  ;;  %v7629_v16 = vrot.slane %v7601_v10, %v10567_v53 }
0x45ce   :  { %v7645_v7 = vrot.slane %v7630_v17, %v10574_v60  ;;  %v7653_v37 = vrot.slane %v7615_v28, %v10574_v60  ;;  %v7674_v19 = vadd.f32 %v12547_v47, %v7637_v0  ;;  %v9511_v57 = vpop.f32.mrf.mxu1 }
0x45cf   :  { %v7649_v44 = vrot.slane %v7632_v48, %v10574_v60  ;;  %v7661_v38 = vrot.slane %v7631_v26, %v10574_v60  ;;  %v7675_v56 = vadd.f32 %v12548_v58, %v7641_v43  ;;  %v7633_v51 = vcombine.high %v7629_v16, %v7629_v16 }
0x45d0   :  { %v7676_v6 = vadd.f32 %v12549_v1, %v7645_v7  ;;  %10110 = vtanh.f32 %v7674_v19  ;;  %v8282_v53 = vpop.f32.mrf.mxu1  ;;  %v7678_v9 = vadd.f32 %v12550_v31, %v7653_v37  ;;  %v7657_v12 = vrot.slane %v7629_v16, %v10574_v60 }
0x45d1   :  { %v7677_v59 = vadd.f32 %v12551_v14, %v7649_v44  ;;  %10112 = vtanh.f32 %v7675_v56  ;;  %v7680_v18 = vadd.f32 %v12552_v2, %v7661_v38  ;;  %v7665_v29 = vrot.slane %v7633_v51, %v10574_v60 }
0x45d2   :  { %v9512_v63 = vpop.f32.mrf.mxu1  ;;  %10114 = vtanh.f32 %v7676_v6  ;;  %v7679_v20 = vadd.f32 %v12553_v55, %v7657_v12 }
0x45d3   :  { %10116 = vtanh.f32 %v7678_v9  ;;  %v7681_v10 = vadd.f32 %v12554_v54, %v7665_v29 }
0x45d4   :  { %v12260_v15 = vpop.f32.mrf.mxu1  ;;  %10118 = vtanh.f32 %v7677_v59 }
0x45d5   :  { %10120 = vtanh.f32 %v7680_v18 }
0x45d6   :  { %v9519_v32 = vpop.f32.mrf.mxu1  ;;  %10122 = vtanh.f32 %v7679_v20 }
0x45d7   :  { %10124 = vtanh.f32 %v7681_v10 }
0x45d8   :  { %v8339_v40 = vpop.f32.mrf.mxu1 }
0x45da   :  { %v9520_v28 = vpop.f32.mrf.mxu1 }
0x45dd   :  { %v10111_v5 = vpop.eup %10110 }
0x45de   :  { %v7697_v17 = vmul.f32 %v10111_v5, %v12040_v3  ;;  %v10113_v0 = vpop.eup %10112 }
0x45df   :  { %v10115_v26 = vpop.eup %10114  ;;  %v7698_v8 = vmul.f32 %v10113_v0, %v12040_v3 }
0x45e0   :  { %v7705_v48 = vsel %vm161_vm0, %v7697_v17, 0.0  ;;  %v10117_v43 = vpop.eup %10116  ;;  %v7699_v7 = vmul.f32 %v10115_v26, %v12040_v3 }
0x45e1   :  { %7706 = vadd.xlane.f32.xlu1 %v7705_v48  ;;  %v7708_v16 = vsel %vm161_vm0, %v7698_v8, 0.0  ;;  %v10119_v35 = vpop.eup %10118  ;;  %v7701_v37 = vmul.f32 %v10117_v43, %v12040_v3 }
0x45e2   :  { %7709 = vadd.xlane.f32.xlu0 %v7708_v16  ;;  %v10121_v47 = vpop.eup %10120  ;;  %v7711_v44 = vsel %vm161_vm0, %v7699_v7, 0.0  ;;  %v7700_v38 = vmul.f32 %v10119_v35, %v12040_v3 }
0x45e3   :  { %v7717_v19 = vsel %vm161_vm0, %v7701_v37, 0.0  ;;  %v7703_v57 = vmul.f32 %v10121_v47, %v12040_v3  ;;  %v10123_v58 = vpop.eup %10122 }
0x45e4   :  { %v7714_v1 = vsel %vm161_vm0, %v7700_v38, 0.0  ;;  %v7702_v6 = vmul.f32 %v10123_v58, %v12040_v3  ;;  %v10125_v53 = vpop.eup %10124 }
0x45e5   :  { %7718 = vadd.xlane.f32.xlu1 %v7717_v19  ;;  %v7723_v56 = vsel %vm161_vm0, %v7703_v57, 0.0  ;;  %v7704_v9 = vmul.f32 %v10125_v53, %v12040_v3 }
0x45e6   :  { %7712 = vadd.xlane.f32.xlu0 %v7711_v44  ;;  %v7720_v31 = vsel %vm161_vm0, %v7702_v6, 0.0 }
0x45e7   :  { %v7726_v51 = vsel %vm161_vm0, %v7704_v9, 0.0 }
0x45e9   :  { %7724 = vadd.xlane.f32.xlu1 %v7723_v56 }
0x45ea   :  { %7715 = vadd.xlane.f32.xlu0 %v7714_v1 }
0x45ee   :  { %7721 = vadd.xlane.f32.xlu0 %v7720_v31 }
0x45f2   :  { %7727 = vadd.xlane.f32.xlu0 %v7726_v51 }
0x45fa   :  { %7736 = vperm.xlu1 %9541, %v12060_v62  }
0x466a   :  { %v7707_v12 = vpop.xlane.xlu1 %7706 }
0x466b   :  { %v7710_v14 = vpop.xlane.xlu0 %7709 }
0x466e   :  { %v7719_v59 = vpop.xlane.xlu1 %7718 }
0x466f   :  { %v7713_v63 = vpop.xlane.xlu0 %7712 }
0x4672   :  { %v7725_v2 = vpop.xlane.xlu1 %7724 }
0x4673   :  { %v7716_v18 = vpop.xlane.xlu0 %7715 }
0x4676   :  { %v7737_v29 = vpop.permute.xlu1 %7736 }
0x4677   :  { %v7739_v55 = vadd.f32 %v7737_v29, %v7707_v12  ;;  %v7740_v20 = vadd.f32 %v7737_v29, %v7710_v14  ;;  %v7741_v32 = vadd.f32 %v7737_v29, %v7713_v63  ;;  %v7742_v40 = vadd.f32 %v7737_v29, %v7716_v18  ;;  %v7722_v54 = vpop.xlane.xlu0 %7721 }
0x4678   :  { %v7743_v10 = vadd.f32 %v7737_v29, %v7719_v59  ;;  %v7744_v62 = vadd.f32 %v7737_v29, %v7722_v54  ;;  %v7745_v17 = vadd.f32 %v7737_v29, %v7725_v2 }
0x4679   :  { %v7758_v3 = vrot.slane %v7739_v55, %v10651_v41  ;;  %v7762_v28 = vrot.slane %v7740_v20, %v10651_v41  ;;  %v7766_v5 = vrot.slane %v7741_v32, %v10651_v41  ;;  %v7770_v0 = vrot.slane %v7742_v40, %v10651_v41 }
0x467a   :  { %v7774_v8 = vrot.slane %v7743_v10, %v10651_v41  ;;  %v7778_v35 = vrot.slane %v7744_v62, %v10651_v41  ;;  %v7782_v19 = vrot.slane %v7745_v17, %v10651_v41 }
0x467b   :  { %v7787_v26 = vsel %vm613_vm2, %v7762_v28, %v7758_v3  ;;  %v7728_v48 = vpop.xlane.xlu0 %7727 }
0x467c   :  { %v7788_v43 = vsel %vm615_vm3, %v7766_v5, %v7787_v26  ;;  %v7746_v16 = vadd.f32 %v7737_v29, %v7728_v48 }
0x467d   :  { %v7789_v7 = vsel %vm617_vm4, %v7770_v0, %v7788_v43 }
0x467e   :  { %v7790_v37 = vsel %vm619_vm5, %v7774_v8, %v7789_v7  ;;  %v7786_v47 = vrot.slane %v7746_v16, %v10651_v41 }
0x467f   :  { %v7791_v57 = vsel %vm621_vm6, %v7778_v35, %v7790_v37 }
0x4680   :  { %v7792_v44 = vsel %vm623_vm7, %v7782_v19, %v7791_v57 }
0x4681   :  { %v7793_v38 = vsel %vm625_vm8, %v7786_v47, %v7792_v44 }
0x4682   :  { %v7795_v58 = vsel %vm628_vm9, %v7793_v38, -inf }
0x4683   :  { %7796 = vmax.xlane.f32.xlu0 %v7795_v58 }
0x470c   :  { %v7797_v56 = vpop.xlane.xlu0 %7796 }
0x470d   :  { %v7802_v1 = vrot.slane %v7797_v56, %v10574_v60  ;;  %v7806_v6 = vrot.slane %v7797_v56, %v10670_v22  ;;  %v7810_v53 = vrot.slane %v7797_v56, %v10676_v24  ;;  %v7822_v31 = vrot.slane %v7797_v56, %v10690_v49 }
0x470e   :  { %v7814_v9 = vrot.slane %v7797_v56, %v10682_v33  ;;  %v7830_v59 = vrot.slane %v7797_v56, %v10673_v23  ;;  %v7818_v3 = vrot.slane %v7797_v56, %v10686_v39  ;;  %v7826_v26 = vrot.slane %v7797_v56, %v10694_v45 }
0x470f   :  { %v7839_v51 = vsub.f32 %v7739_v55, %v7802_v1  ;;  %v7840_v12 = vsub.f32 %v7740_v20, %v7806_v6  ;;  %v7841_v14 = vsub.f32 %v7741_v32, %v7810_v53  ;;  %v7844_v63 = vsub.f32 %v7744_v62, %v7822_v31 }
0x4710   :  { %v7842_v29 = vsub.f32 %v7742_v40, %v7814_v9  ;;  %v7846_v28 = vsub.f32 %v7746_v16, %v7830_v59  ;;  %v7843_v55 = vsub.f32 %v7743_v10, %v7818_v3  ;;  %v7845_v32 = vsub.f32 %v7745_v17, %v7826_v26 }
0x4711   :  { %v7847_v2 = vmul.f32 1.442695, %v7839_v51  ;;  %v7849_v18 = vmul.f32 1.442695, %v7840_v12  ;;  %v7851_v54 = vmul.f32 1.442695, %v7841_v14 }
0x4712   :  { %v7857_v5 = vmul.f32 1.442695, %v7844_v63  ;;  %v7853_v0 = vmul.f32 1.442695, %v7842_v29  ;;  %v7861_v20 = vmul.f32 1.442695, %v7846_v28 }
0x4713   :  { %10126 = vpow2.f32 %v7847_v2  ;;  %v7855_v62 = vmul.f32 1.442695, %v7843_v55  ;;  %v7859_v40 = vmul.f32 1.442695, %v7845_v32 }
0x4714   :  { %10128 = vpow2.f32 %v7849_v18 }
0x4715   :  { %10130 = vpow2.f32 %v7851_v54 }
0x4716   :  { %10132 = vpow2.f32 %v7857_v5 }
0x4717   :  { %10134 = vpow2.f32 %v7853_v0 }
0x4718   :  { %10136 = vpow2.f32 %v7861_v20 }
0x4719   :  { %10138 = vpow2.f32 %v7855_v62 }
0x471a   :  { %10140 = vpow2.f32 %v7859_v40 }
0x4720   :  { %v10127_v48 = vpop.eup %10126 }
0x4721   :  { %v10129_v8 = vpop.eup %10128  ;;  %7872 = vperm.xlu0 %9540, %v10127_v48  }
0x4722   :  { %7875 = vperm.xlu1 %9541, %v10129_v8   ;;  %v10131_v43 = vpop.eup %10130 }
0x4723   :  { %v12308_v16 = vpop.eup %10132 }
0x4724   :  { %v10135_v10 = vpop.eup %10134 }
0x4725   :  { %7887 = vperm.xlu0 %9540, %v12308_v16   ;;  %v12311_v7 = vpop.eup %10136 }
0x4726   :  { %7878 = vperm.xlu1 %9541, %v10131_v43   ;;  %v10139_v17 = vpop.eup %10138 }
0x4727   :  { %v12314_v35 = vpop.eup %10140 }
0x4729   :  { %7893 = vperm.xlu0 %9540, %v12311_v7  }
0x472a   :  { %7881 = vperm.xlu1 %9541, %v10135_v10  }
0x472e   :  { %7884 = vperm.xlu1 %9541, %v10139_v17  }
0x4732   :  { %7890 = vperm.xlu1 %9541, %v12314_v35  }
0x479c   :  { %v7873_v47 = vpop.permute.xlu0 %7872 }
0x479d   :  { %v7876_v37 = vpop.permute.xlu1 %7875  ;;  %v7898_v44 = vrot.slane %v7873_v47, %v10651_v41 }
0x479e   :  { %v7902_v57 = vrot.slane %v7876_v37, %v10651_v41 }
0x47a0   :  { %v7888_v56 = vpop.permute.xlu0 %7887  ;;  %v7927_v6 = vsel %vm613_vm2, %v7902_v57, %v7898_v44 }
0x47a1   :  { %v7879_v19 = vpop.permute.xlu1 %7878  ;;  %v7918_v59 = vrot.slane %v7888_v56, %v10651_v41  ;;  %v12555_v56 = vunpack.c.l.bf16 %v12127_v52 }
0x47a2   :  { %v7906_v58 = vrot.slane %v7879_v19, %v10651_v41 }
0x47a4   :  { %v7928_v31 = vsel %vm615_vm3, %v7906_v58, %v7927_v6  ;;  %v7894_v12 = vpop.permute.xlu0 %7893 }
0x47a5   :  { %v7882_v38 = vpop.permute.xlu1 %7881  ;;  %v7926_v18 = vrot.slane %v7894_v12, %v10651_v41 }
0x47a6   :  { %v7910_v1 = vrot.slane %v7882_v38, %v10651_v41 }
0x47a8   :  { %v7929_v51 = vsel %vm617_vm4, %v7910_v1, %v7928_v31  ;;  %v12556_v1 = vunpack.c.h.bf16 %v12127_v52 }
0x47a9   :  { %v7885_v53 = vpop.permute.xlu1 %7884 }
0x47aa   :  { %v7914_v9 = vrot.slane %v7885_v53, %v10651_v41 }
0x47ac   :  { %v7930_v14 = vsel %vm619_vm5, %v7914_v9, %v7929_v51  ;;  %v12557_v51 = vunpack.c.l.bf16 %v12131_v30 }
0x47ad   :  { %v7891_v63 = vpop.permute.xlu1 %7890  ;;  %v7931_v29 = vsel %vm621_vm6, %v7918_v59, %v7930_v14 }
0x47ae   :  { %v7922_v2 = vrot.slane %v7891_v63, %v10651_v41 }
0x47b0   :  { %v7932_v54 = vsel %vm623_vm7, %v7922_v2, %v7931_v29 }
0x47b1   :  { %v7933_v3 = vsel %vm625_vm8, %v7926_v18, %v7932_v54  ;;  %v12558_v18 = vunpack.c.h.bf16 %v12131_v30 }
0x47b2   :  { %v7935_v28 = vsel %vm628_vm9, %v7933_v3, 0.0 }
0x47b3   :  { %7936 = vadd.xlane.f32.xlu1 %v7935_v28 }
0x483c   :  { %v7937_v5 = vpop.xlane.xlu1 %7936 }
0x483d   :  { %v7942_v0 = vrot.slane %v7937_v5, %v10574_v60  ;;  %v7946_v26 = vrot.slane %v7937_v5, %v10670_v22  ;;  %v7950_v55 = vrot.slane %v7937_v5, %v10676_v24  ;;  %v7954_v41 = vrot.slane %v7937_v5, %v10682_v33 }
0x483e   :  { %v7958_v20 = vrot.slane %v7937_v5, %v10686_v39  ;;  %v7962_v62 = vrot.slane %v7937_v5, %v10690_v49  ;;  %v7966_v60 = vrot.slane %v7937_v5, %v10694_v45  ;;  %v7970_v24 = vrot.slane %v7937_v5, %v10673_v23 }
0x483f   :  { %10142 = vrcp.f32 %v7942_v0 }
0x4840   :  { %10144 = vrcp.f32 %v7946_v26  ;;  %v12559_v26 = vunpack.c.l.bf16 %v12143_v50 }
0x4841   :  { %10146 = vrcp.f32 %v7950_v55 }
0x4842   :  { %10148 = vrcp.f32 %v7954_v41 }
0x4843   :  { %10150 = vrcp.f32 %v7958_v20 }
0x4844   :  { %10152 = vrcp.f32 %v7962_v62 }
0x4845   :  { %10154 = vrcp.f32 %v7966_v60 }
0x4846   :  { %10156 = vrcp.f32 %v7970_v24 }
0x484c   :  { %v10143_v32 = vpop.eup %10142 }
0x484d   :  { %v7980_v40 = vmul.f32 %v10143_v32, %v10127_v48  ;;  %v10145_v37 = vpop.eup %10144 }
0x484e   :  { %v7982_v22 = vmul.f32 %v10145_v37, %v10129_v8  ;;  %v10147_v47 = vpop.eup %10146 }
0x484f   :  { %8013 = vperm.xlu0 %9540, %v7980_v40   ;;  %v7984_v33 = vmul.f32 %v10147_v47, %v10131_v43  ;;  %v10149_v19 = vpop.eup %10148  ;;  %v9650_v43 = vld [vmem:[#allocation18 + $0x18] sm:$0xff]  }
0x4850   :  { %v7986_v39 = vmul.f32 %v10149_v19, %v10135_v10  ;;  %v10151_v57 = vpop.eup %10150  ;;  %9494 = vmatpush3.bf16.msra.mxu0 %v9650_v43  ;;  %v9651_v10 = vld [vmem:[#allocation18 + $0x10] sm:$0xff]  }
0x4851   :  { %v7988_v49 = vmul.f32 %v10151_v57, %v10139_v17  ;;  %v10153_v48 = vpop.eup %10152  ;;  %9495 = vmatprep.subr.bf16.mxu0 %v12530_v11  ;;  %v9652_v17 = vld [vmem:[#allocation18 + $0x8] sm:$0xff]  }
0x4852   :  { %v7990_v44 = vmul.f32 %v10153_v48, %v12308_v16  ;;  %v10155_v45 = vpop.eup %10154  ;;  %v9653_v16 = vld [vmem:[#allocation18] sm:$0xff]  }
0x4853   :  { %8018 = vperm.xlu0 %9540, %v7982_v22   ;;  %v7992_v8 = vmul.f32 %v10155_v45, %v12314_v35  ;;  %v10157_v38 = vpop.eup %10156  ;;  %v12560_v22 = vunpack.c.h.bf16 %v12143_v50 }
0x4854   :  { %v7994_v23 = vmul.f32 %v10157_v38, %v12311_v7  ;;  %9496 = vmatpush3.bf16.msra.mxu0 %v9651_v10 }
0x4855   :  { %9497 = vmatprep.subr.bf16.mxu0 %v12530_v11 }
0x4857   :  { %8023 = vperm.xlu0 %9540, %v7984_v33  }
0x4858   :  { %9498 = vmatpush3.bf16.msra.mxu0 %v9652_v17 }
0x4859   :  { %9499 = vmatprep.subr.bf16.mxu0 %v12530_v11 }
0x485b   :  { %8028 = vperm.xlu0 %9540, %v7986_v39  }
0x485c   :  { %9500 = vmatpush3.bf16.msra.mxu0 %v9653_v16 }
0x485f   :  { %8033 = vperm.xlu0 %9540, %v7988_v49  }
0x4863   :  { %8038 = vperm.xlu0 %9540, %v7990_v44  }
0x4867   :  { %8043 = vperm.xlu0 %9540, %v7992_v8   ;;  %v12561_v8 = vunpack.c.l.bf16 %v12153_v61 }
0x486b   :  { %8048 = vperm.xlu0 %9540, %v7994_v23  }
0x48ca   :  { %v8014_v35 = vpop.permute.xlu0 %8013 }
0x48cb   :  { %v8051_v7 = vmul.f32 %v12555_v56, %v8014_v35 }
0x48cd   :  { %v8059_v9 = vsel %vm893_vm10, %v8051_v7, 0.0 }
0x48ce   :  { %v8019_v58 = vpop.permute.xlu0 %8018  ;;  %v8060_v59 = vrot.slane %v8059_v9, 4 }
0x48cf   :  { %v8052_v6 = vmul.f32 %v12556_v1, %v8019_v58 }
0x48d0   :  { %v8061_v28 = vadd.f32 %v8060_v59, %v8059_v9 }
0x48d1   :  { %v8066_v53 = vsel %vm893_vm10, %v8052_v6, 0.0 }
0x48d2   :  { %v8024_v31 = vpop.permute.xlu0 %8023  ;;  %v8067_v14 = vrot.slane %v8066_v53, 4  ;;  %v8062_v40 = vrot.slane %v8061_v28, 2 }
0x48d3   :  { %v8053_v12 = vmul.f32 %v12557_v51, %v8024_v31 }
0x48d4   :  { %v8068_v54 = vadd.f32 %v8067_v14, %v8066_v53  ;;  %v8063_v57 = vadd.f32 %v8062_v40, %v8061_v28 }
0x48d5   :  { %v8073_v11 = vsel %vm893_vm10, %v8053_v12, 0.0 }
0x48d6   :  { %v8074_v63 = vrot.slane %v8073_v11, 4  ;;  %v8029_v2 = vpop.permute.xlu0 %8028  ;;  %v8069_v41 = vrot.slane %v8068_v54, 2  ;;  %v8064_v16 = vrot.slane %v8063_v57, 1 }
0x48d7   :  { %v8054_v29 = vmul.f32 %v12558_v18, %v8029_v2 }
0x48d8   :  { %v8075_v52 = vadd.f32 %v8074_v63, %v8073_v11  ;;  %v8070_v24 = vadd.f32 %v8069_v41, %v8068_v54  ;;  %v8065_v14 = vadd.f32 %v8064_v16, %v8063_v57 }
0x48d9   :  { %v8080_v3 = vsel %vm893_vm10, %v8054_v29, 0.0 }
0x48da   :  { %v8081_v5 = vrot.slane %v8080_v3, 4  ;;  %v8034_v0 = vpop.permute.xlu0 %8033  ;;  %v8076_v32 = vrot.slane %v8075_v52, 2  ;;  %v8071_v23 = vrot.slane %v8070_v24, 1 }
0x48db   :  { %v8055_v55 = vmul.f32 %v12559_v26, %v8034_v0 }
0x48dc   :  { %v8082_v20 = vadd.f32 %v8081_v5, %v8080_v3  ;;  %v8077_v19 = vadd.f32 %v8076_v32, %v8075_v52  ;;  %v8072_v53 = vadd.f32 %v8071_v23, %v8070_v24  ;;  %v8115_v5 = vpack.c.bf16 %v8065_v14, %v8065_v14 }
0x48dd   :  { %v8087_v62 = vsel %vm893_vm10, %v8055_v55, 0.0 }
0x48de   :  { %v8083_v37 = vrot.slane %v8082_v20, 2  ;;  %v8088_v60 = vrot.slane %v8087_v62, 4  ;;  %v8039_v30 = vpop.permute.xlu0 %8038  ;;  %v8078_v10 = vrot.slane %v8077_v19, 1  ;;  %v8116_v29 = vpack.c.bf16 %v8072_v53, %v8072_v53 }
0x48df   :  { %v8056_v47 = vmul.f32 %v12560_v22, %v8039_v30  ;;  %v8146_v40 = vunpack.c.l.b16 %v8115_v5 }
0x48e0   :  { %v8089_v33 = vadd.f32 %v8088_v60, %v8087_v62  ;;  %v8084_v49 = vadd.f32 %v8083_v37, %v8082_v20  ;;  %v8079_v9 = vadd.f32 %v8078_v10, %v8077_v19  ;;  %v8147_v55 = vunpack.c.l.b16 %v8116_v29 }
0x48e1   :  { %v8094_v39 = vsel %vm893_vm10, %v8056_v47, 0.0 }
0x48e2   :  { %v8090_v48 = vrot.slane %v8089_v33, 2  ;;  %v8044_v44 = vpop.permute.xlu0 %8043  ;;  %v8095_v45 = vrot.slane %v8094_v39, 4  ;;  %v8085_v35 = vrot.slane %v8084_v49, 1  ;;  %v8117_v3 = vpack.c.bf16 %v8079_v9, %v8079_v9 }
0x48e3   :  { %v8057_v38 = vmul.f32 %v12561_v8, %v8044_v44  ;;  %v8154_v47 = vsel %vm613_vm2, %v8147_v55, %v8146_v40 }
0x48e4   :  { %v8091_v43 = vadd.f32 %v8090_v48, %v8089_v33  ;;  %v8096_v17 = vadd.f32 %v8095_v45, %v8094_v39  ;;  %v8086_v11 = vadd.f32 %v8085_v35, %v8084_v49  ;;  %v8148_v62 = vunpack.c.l.b16 %v8117_v3 }
0x48e5   :  { %v8101_v50 = vsel %vm893_vm10, %v8057_v38, 0.0 }
0x48e6   :  { %v8102_v58 = vrot.slane %v8101_v50, 4  ;;  %v8049_v56 = vpop.permute.xlu0 %8048  ;;  %v8092_v7 = vrot.slane %v8091_v43, 1  ;;  %v8097_v1 = vrot.slane %v8096_v17, 2  ;;  %v8118_v61 = vpack.c.bf16 %v8086_v11, %v8086_v11  ;;  %v12565_v11 = vld [vmem:[#allocation31_spill] sm:$0xff] }
0x48e7   :  { %v8058_v6 = vmul.f32 %v8864_v13, %v8049_v56  ;;  %v8155_v19 = vsel %vm615_vm3, %v8148_v62, %v8154_v47 }
0x48e8   :  { %v8103_v31 = vadd.f32 %v8102_v58, %v8101_v50  ;;  %v8098_v51 = vadd.f32 %v8097_v1, %v8096_v17  ;;  %v8093_v2 = vadd.f32 %v8092_v7, %v8091_v43  ;;  %v8149_v37 = vunpack.c.l.b16 %v8118_v61 }
0x48e9   :  { %v8108_v12 = vsel %vm893_vm10, %v8058_v6, 0.0 }
0x48ea   :  { %v8104_v59 = vrot.slane %v8103_v31, 2  ;;  %v8109_v63 = vrot.slane %v8108_v12, 4  ;;  %v8099_v18 = vrot.slane %v8098_v51, 1  ;;  %v8119_v26 = vpack.c.bf16 %v8093_v2, %v8093_v2 }
0x48eb   :  { %v8156_v57 = vsel %vm617_vm4, %v8149_v37, %v8155_v19 }
0x48ec   :  { %v8105_v54 = vadd.f32 %v8104_v59, %v8103_v31  ;;  %v8110_v52 = vadd.f32 %v8109_v63, %v8108_v12  ;;  %v8100_v28 = vadd.f32 %v8099_v18, %v8098_v51  ;;  %v8150_v22 = vunpack.c.l.b16 %v8119_v26 }
0x48ee   :  { %v8106_v13 = vrot.slane %v8105_v54, 1  ;;  %v8111_v0 = vrot.slane %v8110_v52, 2  ;;  %v8120_v41 = vpack.c.bf16 %v8100_v28, %v8100_v28  ;;  %v8157_v48 = vsel %vm619_vm5, %v8150_v22, %v8156_v57 }
0x48f0   :  { %v8107_v20 = vadd.f32 %v8106_v13, %v8105_v54  ;;  %v8112_v32 = vadd.f32 %v8111_v0, %v8110_v52  ;;  %v8151_v24 = vunpack.c.l.b16 %v8120_v41 }
0x48f2   :  { %v8121_v60 = vpack.c.bf16 %v8107_v20, %v8107_v20  ;;  %v8113_v30 = vrot.slane %v8112_v32, 1  ;;  %v8158_v44 = vsel %vm621_vm6, %v8151_v24, %v8157_v48 }
0x48f4   :  { %v8114_v33 = vadd.f32 %v8113_v30, %v8112_v32  ;;  %v8152_v39 = vunpack.c.l.b16 %v8121_v60 }
0x48f6   :  { %v8122_v49 = vpack.c.bf16 %v8114_v33, %v8114_v33  ;;  %v8159_v8 = vsel %vm623_vm7, %v8152_v39, %v8158_v44 }
0x48f8   :  { %v8153_v45 = vunpack.c.l.b16 %v8122_v49 }
0x48fa   :  { %v8160_v38 = vsel %vm625_vm8, %v8153_v45, %v8159_v8 }
0x48fb   :  { %v8161_v23 = vpack.c.b16 %v8160_v38, %v8160_v38 }
0x48fd   :  { %9502 = vmatmul.mubr.msk.bf16.vlgmr.msra.gmra.mxu0 %vm893_vm10, %v8161_v23 }
0x49bd   :  { %v8223_v43 = vpop.f32.mrf.mxu0 }
0x49be   :  { %v8224_v10 = vadd.f32 %v12180_v21, %v8223_v43 }
0x49bf   :  { %v9503_v17 = vpop.f32.mrf.mxu0 }
0x49c0   :  { %v8285_v50 = vadd.f32 %v12239_v36, %v8224_v10 }
0x49c1   :  { %v8226_v16 = vpop.f32.mrf.mxu0 }
0x49c2   :  { %v8342_v35 = vadd.f32 %v12260_v15, %v8285_v50 }
0x49c3   :  { %v9504_v58 = vpop.f32.mrf.mxu0 }
0x49c4   :  { %10158 = vtanh.f32 %v8342_v35  ;;  %v8631_v7 = vmul.f32 -1.442695, %v8342_v35 }
0x49c6   :  { %10160 = vpow2.f32 %v8631_v7 }
0x49d1   :  { %v10159_v56 = vpop.eup %10158 }
0x49d2   :  { %8352 = vrot.lane.b32.xlu0 %v10159_v56, %s10360_s30 }
0x49d3   :  { %v10161_v1 = vpop.eup %10160 }
0x49d4   :  { %v8346_v6 = vadd.f32 1.0, %v10161_v1 }
0x49d6   :  { %10162 = vrcp.f32 %v8346_v6 }
0x49e3   :  { %v10163_v53 = vpop.eup %10162 }
0x49e4   :  { %v8349_v21 = vmul.f32 %v10163_v53, %v12188_v25  ;;  %v12562_v25 = vld [vmem:[#allocation28_spill] sm:$0xff] }
0x4a44   :  { %v8353_v31 = vpop.permute.xlu0 %8352 }
0x4a45   :  { %v8355_v9 = vmul.f32 %v10163_v53, %v8353_v31 }
0x4a47   :  { %8357 = vrot.lane.b32.xlu1 %v8355_v9, %s10373_s9 }
0x4a4b   :  { %5302 = vrot.lane.b32.xlu1 %v11733_v27, %s10373_s9 }
0x4a4f   :  { %7348 = vrot.lane.b32.xlu1 %v12194_v42, %s10373_s9  ;;  %v12563_v42 = vld [vmem:[#allocation29_spill] sm:$0xff] }
0x4a53   :  { %8377 = vrot.lane.b32.xlu1 %v12211_v46, %s10373_s9  ;;  %v12564_v46 = vld [vmem:[#allocation30_spill] sm:$0xff] }
0x4ab9   :  { %v8358_v36 = vpop.permute.xlu1 %8357 }
0x4aba   :  { %v8360_v15 = vadd.f32 %v8358_v36, %v8349_v21 }
0x4abc   :  { %10164 = vtanh.f32 %v8360_v15 }
0x4abd   :  { %v5303_v51 = vpop.permute.xlu1 %5302 }
0x4abe   :  { %5306 = vst.msk [vmem:[#allocation21 + $0x10] sm:$0xf] %vm1213_vm11, %v5303_v51 }
0x4ac1   :  { %v7349_v12 = vpop.permute.xlu1 %7348 }
0x4ac2   :  { %7352 = vst.msk [vmem:[#allocation21 + $0x18] sm:$0xf] %vm1213_vm11, %v7349_v12 }
0x4ac5   :  { %v8378_v14 = vpop.permute.xlu1 %8377 }
0x4ac6   :  { %8380 = vst.msk [vmem:[#allocation2] sm:$0xff] %vm161_vm0, %v8378_v14 }
0x4ac9   :  { %v10165_v27 = vpop.eup %10164 }
0x4aca   :  { %8363 = vrot.lane.b32.xlu0 %v10165_v27, %s10360_s30 }
0x4ace   :  { %1210 = vrot.lane.b32.xlu0 %v10801_v34, %s10373_s9 }
0x4ad2   :  { %2233 = vrot.lane.b32.xlu0 %v12562_v25, %s10373_s9 }
0x4ad6   :  { %3256 = vrot.lane.b32.xlu0 %v12563_v42, %s10373_s9 }
0x4ada   :  { %4279 = vrot.lane.b32.xlu0 %v12564_v46, %s10373_s9 }
0x4ade   :  { %6325 = vrot.lane.b32.xlu0 %v12565_v11, %s10373_s9 }
0x4ae2   :  { %8382 = vrot.lane.b32.xlu0 %v12205_v4, %s10376_s10 }
0x4b3c   :  { %v8364_v59 = vpop.permute.xlu0 %8363 }
0x4b3d   :  { %v8366_v63 = vmul.f32 %v10163_v53, %v8364_v59 }
0x4b3f   :  { %v8640_v2 = vpack.c.bf16 %v8366_v63, %v8366_v63  ;;  %8387 = vrot.lane.b32.xlu1 %v8366_v63, %s10373_s9 }
0x4b40   :  { %v1211_v34 = vpop.permute.xlu0 %1210 }
0x4b41   :  { %1214 = vst.msk [vmem:[#allocation21] sm:$0xf] %vm1213_vm11, %v1211_v34  ;;  %8371 = vrot.lane.b32.xlu0 %v8640_v2, %s10373_s9  ;;  %s10327_s9 = scalar_lea.vmem %s8402_s0, 512 }
0x4b42   :  { %p10328_p12 = scmp.ne.s32.totalorder %s8402_s0, %s10327_s9  ;;  %p10333_p0 = scmp.lt.s32.totalorder %s10327_s9, %s10327_s9 }
0x4b44   :  { %v2234_v18 = vpop.permute.xlu0 %2233  ;;  %p10334_p1 = por %p10333_p0, %p10332_p13 }
0x4b45   :  { %2237 = vst.msk [vmem:[#allocation21 + $0x4] sm:$0xf] %vm1213_vm11, %v2234_v18  ;;  %8392 = vrot.lane.b32.xlu0 %v8360_v15, %s10376_s10 }
0x4b46   :  { %p10335_p2 = pnand %p10334_p1, %p10328_p12 }
0x4b48   :  { %v3257_v29 = vpop.permute.xlu0 %3256 }
0x4b49   :  { %3260 = vst.msk [vmem:[#allocation21 + $0x8] sm:$0xf] %vm1213_vm11, %v3257_v29 }
0x4b4c   :  { %v4280_v54 = vpop.permute.xlu0 %4279 }
0x4b4d   :  { %4283 = vst.msk [vmem:[#allocation21 + $0xc] sm:$0xf] %vm1213_vm11, %v4280_v54 }
0x4b50   :  { %v6326_v4 = vpop.permute.xlu0 %6325 }
0x4b51   :  { %6329 = vst.msk [vmem:[#allocation21 + $0x14] sm:$0xf] %vm1213_vm11, %v6326_v4 }
0x4b54   :  { %v8383_v52 = vpop.permute.xlu0 %8382 }
0x4b55   :  { %8385 = vst.msk [vmem:[#allocation3] sm:$0xff] %vm161_vm0, %v8383_v52 }
0x4bb1   :  { %v8388_v3 = vpop.permute.xlu1 %8387 }
0x4bb2   :  { %8390 = vst.msk [vmem:[#allocation4] sm:$0xff] %vm161_vm0, %v8388_v3 }
0x4bb3   :  { %v8372_v28 = vpop.permute.xlu0 %8371 }
0x4bb4   :  { %8375 = vst.msk [vmem:[#allocation21 + $0x1c] sm:$0xf] %vm1213_vm11, %v8372_v28 }
0x4bb5   :  { %10338 = shalt.err (!%p10335_p2)
}
0x4bb6   :  { %8407 = dma.vmem_to_hbm [thread:$0]  %s8402_s0, 512, %s12436_s13, [#allocation9], %s10360_s30, %s10360_s30, %s10361_s14  }
0x4bb7   :  { %v8393_v5 = vpop.permute.xlu0 %8392 }
0x4bb8   :  { %8395 = vst.msk [vmem:[#allocation5] sm:$0xff] %vm161_vm0, %v8393_v5 }
0x4bb9   :  { %10357 = dma.done.wait [#allocation9], 512  }
0x4bba   :  { %10358 = vsyncadd [#allocation9], 4294966784 }
0x4bbb   :  { %8411 = vsyncpa [#allocation8], 1 }
0x4bbc   :  { %8412 = vsyncpa [#allocation11], 1 }
0x4bbd   :  { %8413 = vsyncpa [#allocation14], 1 }
0x4bbe   :  { %8414 = vsyncpa [#allocation17], 1 }
0x4bbf   :  { %8415 = vsyncpa [#allocation20], 1 }
0x4bc0   :  { %8416 = vsyncpa [#allocation9], 1 }

</bundles_post_ra>
